<compile_context>
chip_gen: v6e
topology: v6e:2x2x1
jax: 0.10.0
libtpu: 0.0.40
codegen_flags: <defaults>
</compile_context>

<pallas_src>
import numpy as np
import jax
import jax.numpy as jnp
from jax import lax
from jax.experimental import pallas as pl
from jax.experimental.pallas import tpu as pltpu


# --------------------------------------------------------------------------
# One-time host-side weight packing
# --------------------------------------------------------------------------
def _toeplitz_conv(w_hwio, w_in_size, k_order):
    """Fold kw taps + channel contraction + w zero-padding of a 3x3 'SAME' conv
    into per-kh block-Toeplitz matrices.

    Returns T of shape (3, Cin*W, 2*(W//2)*Cout) with
      row index k = c*W + w_in   (k_order == 'cw')   or   w_in*Cin + c  ('wc')
      col index j = dw*(W//2)*Cout + wo*Cout + co    (conv output w = 2*wo + dw)
    so that  y[h, 2*wo+dw, co] = sum_kh  x_row(h+kh-1) @ T[kh]  (rows off the
    image contribute via an explicit zero halo row in the kernel).
    """
    KH, KW, Cin, Cout = w_hwio.shape
    Wo = w_in_size // 2
    T = np.zeros((KH, Cin * w_in_size, 2 * Wo * Cout), np.float32)
    w = np.asarray(w_hwio, np.float32)
    for kh in range(KH):
        for dw in range(2):
            for wo in range(Wo):
                col = (dw * Wo + wo) * Cout
                for kw in range(KW):
                    wi = 2 * wo + dw + kw - 1          # 'SAME' padding in w
                    if wi < 0 or wi >= w_in_size:
                        continue                       # zero pad -> drop tap
                    for c in range(Cin):
                        row = (c * w_in_size + wi) if k_order == "cw" else (wi * Cin + c)
                        T[kh, row, col:col + Cout] = w[kh, kw, c, :]
    return T


def pack_params(params):
    """One-time (outside the per-call path) weight re-layout for the kernel."""
    (w1, b1, w2, b2, fw1, fb1, fw2, fb2) = params
    w1 = np.asarray(w1); b1 = np.asarray(b1)
    w2 = np.asarray(w2); b2 = np.asarray(b2)
    fw1 = np.asarray(fw1); fb1 = np.asarray(fb1)
    fw2 = np.asarray(fw2); fb2 = np.asarray(fb2)

    # conv1: input lanes are (c, w) channel-major (matches the NCHW channel concat)
    t1 = _toeplitz_conv(w1, 32, "cw")                  # (3, Cin*32, 512)
    # conv2: input lanes are (w, c) w-major (matches the pooled conv1 output layout)
    t2 = _toeplitz_conv(w2, 16, "wc")                  # (3, 256, 512)
    b1t = np.tile(b1, 32).reshape(1, 512)              # cols (dw, wo, co): co = j % 16
    b2t = np.tile(b2, 16).reshape(1, 512)              # cols (dw, wo, co): co = j % 32

    # Fold torch's NCHW .view(-1, 32*8*8) into fc1:
    #   old row c*64 + h*8 + w  ->  fw1r[h, w*32 + c, :]
    fw1r = fw1.reshape(32, 8, 8, 96).transpose(1, 2, 0, 3).reshape(8, 256, 96)

    return tuple(jnp.asarray(a) for a in (
        t1, b1t, t2, b2t, fw1r, fb1.reshape(1, 96), fw2, fb2.reshape(1, 10)))


# --------------------------------------------------------------------------
# Fused kernel
# --------------------------------------------------------------------------
def _conv_net_kernel(x_ref, w1t_ref, b1_ref, w2t_ref, b2_ref,
                     fw1_ref, fb1_ref, fw2_ref, fb2_ref, o_ref,
                     p1_ref, p2_ref):
    f32 = jnp.float32
    NB, Cin = x_ref.shape[0], x_ref.shape[1]
    K1 = Cin * 32
    NF1 = fw1_ref.shape[2]

    # ---- stage conv1 input: rows 8..39 hold the image, rows 7/40 are the zero
    # halo.  Halo rows are zeroed unconditionally EVERY step so that "parallel"
    # grid sharding across v7x TensorCores stays correct.
    p1_ref[:, 7:8, :] = jnp.zeros((NB, 1, K1), f32)
    p1_ref[:, 40:41, :] = jnp.zeros((NB, 1, K1), f32)
    x_cw = jnp.concatenate([x_ref[:, c, :, :] for c in range(Cin)], axis=-1)  # (NB,32,Cin*32)
    p1_ref[:, 8:40, :] = x_cw                                                 # aligned store

    # ---- conv1 + bias + ReLU: 3 accumulated block-Toeplitz matmuls ----
    acc1 = jnp.zeros((NB * 32, 512), f32)
    for kh in range(3):
        a = p1_ref[:, 7 + kh:39 + kh, :].reshape(NB * 32, K1)
        acc1 = acc1 + jnp.dot(a, w1t_ref[kh], preferred_element_type=f32)
    y1 = jnp.maximum(acc1 + b1_ref[...], 0.0)            # (NB*32, 512), cols (dw, wo, co)

    # ---- 2x2/2 max-pool 1: w via aligned lane halves, h via row pairs ----
    wp1 = jnp.maximum(y1[:, :256], y1[:, 256:]).reshape(NB, 16, 2, 256)
    pool1 = jnp.maximum(wp1[:, :, 0, :], wp1[:, :, 1, :])  # (NB, 16, 256), lanes (w, c)

    # ---- stage conv2 input (rows 8..23, zero halo rows 7/24) ----
    p2_ref[:, 7:8, :] = jnp.zeros((NB, 1, 256), f32)
    p2_ref[:, 24:25, :] = jnp.zeros((NB, 1, 256), f32)
    p2_ref[:, 8:24, :] = pool1                             # aligned store

    # ---- conv2 + bias + ReLU ----
    acc2 = jnp.zeros((NB * 16, 512), f32)
    for kh in range(3):
        a2 = p2_ref[:, 7 + kh:23 + kh, :].reshape(NB * 16, 256)
        acc2 = acc2 + jnp.dot(a2, w2t_ref[kh], preferred_element_type=f32)
    y2 = jnp.maximum(acc2 + b2_ref[...], 0.0)            # (NB*16, 512), cols (dw, wo, co)

    # ---- max-pool 2 ----
    wp2 = jnp.maximum(y2[:, :256], y2[:, 256:]).reshape(NB, 8, 2, 256)
    pool2 = jnp.maximum(wp2[:, :, 0, :], wp2[:, :, 1, :])  # (NB, 8, 256), lanes (w, c)

    # ---- fused MLP head: fc1 as 8 accumulated matmuls over pooled rows
    # (avoids a sublane->lane flatten relayout), ReLU, fc2 ----
    acc3 = jnp.zeros((NB, NF1), f32)
    for ho in range(8):
        acc3 = acc3 + jnp.dot(pool2[:, ho, :], fw1_ref[ho], preferred_element_type=f32)
    h1 = jnp.maximum(acc3 + fb1_ref[...], 0.0)
    o_ref[0] = jnp.dot(h1, fw2_ref[...], preferred_element_type=f32) + fb2_ref[...]


def _pick_nb(batch):
    # Biggest per-step batch that divides B while keeping grid >= 2 (feeds both
    # v7x TensorCores); falls back to 1 image/step for B == 1.
    for nb in (8, 4, 2):
        if batch % nb == 0 and batch // nb >= 2:
            return nb
    return 1


def conv_net_forward(x_nchw, packed):
    (w1t, b1t, w2t, b2t, fw1r, fb1r, fw2, fb2r) = packed
    B, Cin, H, W = x_nchw.shape
    assert (H, W) == (32, 32), "Linear layer hard-codes 32*8*8 -> spatial must be 32x32"
    nb = _pick_nb(B)
    G = B // nb
    K1 = Cin * 32

    out = pl.pallas_call(
        _conv_net_kernel,
        out_shape=jax.ShapeDtypeStruct((G, nb, 10), jnp.float32),
        grid=(G,),
        in_specs=[
            pl.BlockSpec((nb, Cin, 32, 32), lambda g: (g, 0, 0, 0)),   # NCHW input, NB imgs/step
            pl.BlockSpec((3, K1, 512), lambda g: (0, 0, 0)),           # conv1 Toeplitz (resident)
            pl.BlockSpec((1, 512), lambda g: (0, 0)),
            pl.BlockSpec((3, 256, 512), lambda g: (0, 0, 0)),          # conv2 Toeplitz (resident)
            pl.BlockSpec((1, 512), lambda g: (0, 0)),
            pl.BlockSpec((8, 256, 96), lambda g: (0, 0, 0)),           # fc1 (permuted, resident)
            pl.BlockSpec((1, 96), lambda g: (0, 0)),
            pl.BlockSpec((96, 10), lambda g: (0, 0)),
            pl.BlockSpec((1, 10), lambda g: (0, 0)),
        ],
        out_specs=pl.BlockSpec((1, nb, 10), lambda g: (g, 0, 0)),
        scratch_shapes=[
            pltpu.VMEM((nb, 48, K1), jnp.float32),    # conv1 padded input (halo rows 7/40)
            pltpu.VMEM((nb, 32, 256), jnp.float32),   # conv2 padded input (halo rows 7/24)
        ],
        compiler_params=pltpu.CompilerParams(
            dimension_semantics=("parallel",),
            vmem_limit_bytes=32 * 1024 * 1024),
    )(x_nchw, w1t, b1t, w2t, b2t, fw1r, fb1r, fw2, fb2r)
    return out.reshape(B, 10)


# --------------------------------------------------------------------------
# Params / pure-JAX reference
# --------------------------------------------------------------------------
def init_params(key, in_channel=3):
    ks = jax.random.split(key, 8)
    w1 = jax.random.normal(ks[0], (3, 3, in_channel, 16), jnp.float32) * 0.10
    b1 = jax.random.normal(ks[1], (16,), jnp.float32) * 0.10
    w2 = jax.random.normal(ks[2], (3, 3, 16, 32), jnp.float32) * 0.05
    b2 = jax.random.normal(ks[3], (32,), jnp.float32) * 0.05
    fw1 = jax.random.normal(ks[4], (32 * 8 * 8, 96), jnp.float32) * 0.02
    fb1 = jax.random.normal(ks[5], (96,), jnp.float32) * 0.02
    fw2 = jax.random.normal(ks[6], (96, 10), jnp.float32) * 0.05
    fb2 = jax.random.normal(ks[7], (10,), jnp.float32) * 0.05
    return (w1, b1, w2, b2, fw1, fb1, fw2, fb2)


def ref_forward(x_nchw, params):
    (w1, b1, w2, b2, fw1, fb1, fw2, fb2) = params
    dn = ('NHWC', 'HWIO', 'NHWC')
    x = jnp.transpose(x_nchw, (0, 2, 3, 1))
    y = lax.conv_general_dilated(x, w1, (1, 1), 'SAME', dimension_numbers=dn) + b1
    y = jnp.maximum(y, 0.0)
    y = lax.reduce_window(y, -jnp.inf, lax.max, (1, 2, 2, 1), (1, 2, 2, 1), 'VALID')
    y = lax.conv_general_dilated(y, w2, (1, 1), 'SAME', dimension_numbers=dn) + b2
    y = jnp.maximum(y, 0.0)
    y = lax.reduce_window(y, -jnp.inf, lax.max, (1, 2, 2, 1), (1, 2, 2, 1), 'VALID')
    B = y.shape[0]
    flat = jnp.transpose(y, (0, 3, 1, 2)).reshape(B, -1)       # torch NCHW flatten order
    h = jnp.maximum(flat @ fw1 + fb1, 0.0)
    return h @ fw2 + fb2


if __name__ == "__main__":
    key = jax.random.PRNGKey(0)
    pkey, xkey = jax.random.split(key)
    params = init_params(pkey, in_channel=3)
    packed = pack_params(params)

    # NCHW input like the PyTorch module; B=8 -> NB=4 images per grid step, grid=2.
    x = jax.random.normal(xkey, (8, 3, 32, 32), jnp.float32)

    fwd = jax.jit(conv_net_forward)
    out = jax.block_until_ready(fwd(x, packed))
    ref = jax.block_until_ready(ref_forward(x, params))

    assert out.shape == (8, 10), out.shape
    np.testing.assert_allclose(np.asarray(out), np.asarray(ref), rtol=2e-3, atol=2e-3)
    print("KERNEL_OK")
</pallas_src>

<mosaic_0001>
module attributes {stable_mosaic.version = 11 : i64} {
  func.func @_conv_net_kernel(%arg0: i32, %arg1: memref<4x3x32x32xf32, #tpu.memory_space<vmem>>, %arg2: memref<3x96x512xf32, #tpu.memory_space<vmem>>, %arg3: memref<1x512xf32, #tpu.memory_space<vmem>>, %arg4: memref<3x256x512xf32, #tpu.memory_space<vmem>>, %arg5: memref<1x512xf32, #tpu.memory_space<vmem>>, %arg6: memref<8x256x96xf32, #tpu.memory_space<vmem>>, %arg7: memref<1x96xf32, #tpu.memory_space<vmem>>, %arg8: memref<96x10xf32, #tpu.memory_space<vmem>>, %arg9: memref<1x10xf32, #tpu.memory_space<vmem>>, %arg10: memref<1x4x10xf32, #tpu.memory_space<vmem>>, %arg11: memref<4x48x96xf32, #tpu.memory_space<vmem>>, %arg12: memref<4x32x256xf32, #tpu.memory_space<vmem>>) attributes {dimension_semantics = [#tpu.dimension_semantics<parallel>], iteration_bounds = array<i64: 2>, scalar_prefetch = 0 : i64, scratch_operands = 2 : i64, tpu.core_type = #tpu.core_type<tc>, window_params = [{transform_indices = @transform_0, window_bounds = array<i64: 4, 3, 32, 32>}, {pipeline_mode = #tpu.pipeline_mode<synchronous>, transform_indices = @transform_1, window_bounds = array<i64: 3, 96, 512>}, {pipeline_mode = #tpu.pipeline_mode<synchronous>, transform_indices = @transform_2, window_bounds = array<i64: 1, 512>}, {pipeline_mode = #tpu.pipeline_mode<synchronous>, transform_indices = @transform_3, window_bounds = array<i64: 3, 256, 512>}, {pipeline_mode = #tpu.pipeline_mode<synchronous>, transform_indices = @transform_4, window_bounds = array<i64: 1, 512>}, {pipeline_mode = #tpu.pipeline_mode<synchronous>, transform_indices = @transform_5, window_bounds = array<i64: 8, 256, 96>}, {pipeline_mode = #tpu.pipeline_mode<synchronous>, transform_indices = @transform_6, window_bounds = array<i64: 1, 96>}, {pipeline_mode = #tpu.pipeline_mode<synchronous>, transform_indices = @transform_7, window_bounds = array<i64: 96, 10>}, {pipeline_mode = #tpu.pipeline_mode<synchronous>, transform_indices = @transform_8, window_bounds = array<i64: 1, 10>}, {transform_indices = @transform_9, window_bounds = array<i64: 1, 4, 10>}]} {
    %cst = arith.constant 0.000000e+00 : f32
    %0 = vector.broadcast %cst : f32 to vector<4x1x96xf32>
    %c0 = arith.constant 0 : index
    %c7 = arith.constant 7 : index
    %c0_0 = arith.constant 0 : index
    %1 = vector.load %arg11[%c0, %c7, %c0_0] : memref<4x48x96xf32, #tpu.memory_space<vmem>>, vector<4x1x96xf32>
    tpu.vector_store %arg11[%c0, %c7, %c0_0], %0 {strides = array<i32>} : memref<4x48x96xf32, #tpu.memory_space<vmem>>, vector<4x1x96xf32>,
    %cst_1 = arith.constant 0.000000e+00 : f32
    %2 = vector.broadcast %cst_1 : f32 to vector<4x1x96xf32>
    %c0_2 = arith.constant 0 : index
    %c40 = arith.constant 40 : index
    %c0_3 = arith.constant 0 : index
    %3 = vector.load %arg11[%c0_2, %c40, %c0_3] : memref<4x48x96xf32, #tpu.memory_space<vmem>>, vector<4x1x96xf32>
    tpu.vector_store %arg11[%c0_2, %c40, %c0_3], %2 {strides = array<i32>} : memref<4x48x96xf32, #tpu.memory_space<vmem>>, vector<4x1x96xf32>,
    %c0_4 = arith.constant 0 : index
    %c0_5 = arith.constant 0 : index
    %c0_6 = arith.constant 0 : index
    %c0_7 = arith.constant 0 : index
    %4 = vector.load %arg1[%c0_4, %c0_5, %c0_6, %c0_7] : memref<4x3x32x32xf32, #tpu.memory_space<vmem>>, vector<4x1x32x32xf32>
    %5 = vector.shape_cast %4 : vector<4x1x32x32xf32> to vector<4x32x32xf32>
    %c0_8 = arith.constant 0 : index
    %c1 = arith.constant 1 : index
    %c0_9 = arith.constant 0 : index
    %c0_10 = arith.constant 0 : index
    %6 = vector.load %arg1[%c0_8, %c1, %c0_9, %c0_10] : memref<4x3x32x32xf32, #tpu.memory_space<vmem>>, vector<4x1x32x32xf32>
    %7 = vector.shape_cast %6 : vector<4x1x32x32xf32> to vector<4x32x32xf32>
    %c0_11 = arith.constant 0 : index
    %c2 = arith.constant 2 : index
    %c0_12 = arith.constant 0 : index
    %c0_13 = arith.constant 0 : index
    %8 = vector.load %arg1[%c0_11, %c2, %c0_12, %c0_13] : memref<4x3x32x32xf32, #tpu.memory_space<vmem>>, vector<4x1x32x32xf32>
    %9 = vector.shape_cast %8 : vector<4x1x32x32xf32> to vector<4x32x32xf32>
    %10 = tpu.concatenate %5, %7, %9 in 2 : vector<4x32x32xf32>, vector<4x32x32xf32>, vector<4x32x32xf32> -> vector<4x32x96xf32>
    %c0_14 = arith.constant 0 : index
    %c8 = arith.constant 8 : index
    %c0_15 = arith.constant 0 : index
    %11 = vector.load %arg11[%c0_14, %c8, %c0_15] : memref<4x48x96xf32, #tpu.memory_space<vmem>>, vector<4x32x96xf32>
    tpu.vector_store %arg11[%c0_14, %c8, %c0_15], %10 {strides = array<i32>} : memref<4x48x96xf32, #tpu.memory_space<vmem>>, vector<4x32x96xf32>,
    %cst_16 = arith.constant 0.000000e+00 : f32
    %12 = vector.broadcast %cst_16 : f32 to vector<128x512xf32>
    %c0_17 = arith.constant 0 : index
    %c7_18 = arith.constant 7 : index
    %c0_19 = arith.constant 0 : index
    %13 = vector.load %arg11[%c0_17, %c7_18, %c0_19] : memref<4x48x96xf32, #tpu.memory_space<vmem>>, vector<4x32x96xf32>
    %14 = vector.shape_cast %13 : vector<4x32x96xf32> to vector<128x96xf32>
    %c0_20 = arith.constant 0 : index
    %c0_21 = arith.constant 0 : index
    %c0_22 = arith.constant 0 : index
    %15 = vector.load %arg2[%c0_20, %c0_21, %c0_22] : memref<3x96x512xf32, #tpu.memory_space<vmem>>, vector<1x96x512xf32>
    %16 = vector.shape_cast %15 : vector<1x96x512xf32> to vector<96x512xf32>
    %cst_23 = arith.constant dense<0.000000e+00> : vector<128x512xf32>
    %17 = tpu.matmul %14, %16, %cst_23 {dimension_numbers = #tpu.dot_dimension_numbers<[1], [0], [0], [1], [0, 0, 1, 1], [], []>} : vector<128x96xf32>, vector<96x512xf32>, vector<128x512xf32> -> vector<128x512xf32>
    %18 = arith.addf %12, %17 : vector<128x512xf32>
    %c0_24 = arith.constant 0 : index
    %c8_25 = arith.constant 8 : index
    %c0_26 = arith.constant 0 : index
    %19 = vector.load %arg11[%c0_24, %c8_25, %c0_26] : memref<4x48x96xf32, #tpu.memory_space<vmem>>, vector<4x32x96xf32>
    %20 = vector.shape_cast %19 : vector<4x32x96xf32> to vector<128x96xf32>
    %c1_27 = arith.constant 1 : index
    %c0_28 = arith.constant 0 : index
    %c0_29 = arith.constant 0 : index
    %21 = vector.load %arg2[%c1_27, %c0_28, %c0_29] : memref<3x96x512xf32, #tpu.memory_space<vmem>>, vector<1x96x512xf32>
    %22 = vector.shape_cast %21 : vector<1x96x512xf32> to vector<96x512xf32>
    %cst_30 = arith.constant dense<0.000000e+00> : vector<128x512xf32>
    %23 = tpu.matmul %20, %22, %cst_30 {dimension_numbers = #tpu.dot_dimension_numbers<[1], [0], [0], [1], [0, 0, 1, 1], [], []>} : vector<128x96xf32>, vector<96x512xf32>, vector<128x512xf32> -> vector<128x512xf32>
    %24 = arith.addf %18, %23 : vector<128x512xf32>
    %c0_31 = arith.constant 0 : index
    %c9 = arith.constant 9 : index
    %c0_32 = arith.constant 0 : index
    %25 = vector.load %arg11[%c0_31, %c9, %c0_32] : memref<4x48x96xf32, #tpu.memory_space<vmem>>, vector<4x32x96xf32>
    %26 = vector.shape_cast %25 : vector<4x32x96xf32> to vector<128x96xf32>
    %c2_33 = arith.constant 2 : index
    %c0_34 = arith.constant 0 : index
    %c0_35 = arith.constant 0 : index
    %27 = vector.load %arg2[%c2_33, %c0_34, %c0_35] : memref<3x96x512xf32, #tpu.memory_space<vmem>>, vector<1x96x512xf32>
    %28 = vector.shape_cast %27 : vector<1x96x512xf32> to vector<96x512xf32>
    %cst_36 = arith.constant dense<0.000000e+00> : vector<128x512xf32>
    %29 = tpu.matmul %26, %28, %cst_36 {dimension_numbers = #tpu.dot_dimension_numbers<[1], [0], [0], [1], [0, 0, 1, 1], [], []>} : vector<128x96xf32>, vector<96x512xf32>, vector<128x512xf32> -> vector<128x512xf32>
    %30 = arith.addf %24, %29 : vector<128x512xf32>
    %c0_37 = arith.constant 0 : index
    %c0_38 = arith.constant 0 : index
    %31 = vector.load %arg3[%c0_37, %c0_38] : memref<1x512xf32, #tpu.memory_space<vmem>>, vector<1x512xf32>
    %32 = vector.broadcast %31 : vector<1x512xf32> to vector<128x512xf32>
    %33 = arith.addf %30, %32 : vector<128x512xf32>
    %cst_39 = arith.constant 0.000000e+00 : f32
    %34 = vector.broadcast %cst_39 : f32 to vector<128x512xf32>
    %35 = arith.maximumf %33, %34 : vector<128x512xf32>
    %36 = vector.extract_strided_slice %35 {offsets = [0, 0], sizes = [128, 256], strides = [1, 1]} : vector<128x512xf32> to vector<128x256xf32>
    %37 = vector.extract_strided_slice %35 {offsets = [0, 256], sizes = [128, 256], strides = [1, 1]} : vector<128x512xf32> to vector<128x256xf32>
    %38 = arith.maximumf %36, %37 : vector<128x256xf32>
    %39 = vector.shape_cast %38 : vector<128x256xf32> to vector<4x16x2x256xf32>
    %40 = vector.extract_strided_slice %39 {offsets = [0, 0, 0, 0], sizes = [4, 16, 1, 256], strides = [1, 1, 1, 1]} : vector<4x16x2x256xf32> to vector<4x16x1x256xf32>
    %41 = vector.shape_cast %40 : vector<4x16x1x256xf32> to vector<4x16x256xf32>
    %42 = vector.extract_strided_slice %39 {offsets = [0, 0, 1, 0], sizes = [4, 16, 1, 256], strides = [1, 1, 1, 1]} : vector<4x16x2x256xf32> to vector<4x16x1x256xf32>
    %43 = vector.shape_cast %42 : vector<4x16x1x256xf32> to vector<4x16x256xf32>
    %44 = arith.maximumf %41, %43 : vector<4x16x256xf32>
    %cst_40 = arith.constant 0.000000e+00 : f32
    %45 = vector.broadcast %cst_40 : f32 to vector<4x1x256xf32>
    %c0_41 = arith.constant 0 : index
    %c7_42 = arith.constant 7 : index
    %c0_43 = arith.constant 0 : index
    %46 = vector.load %arg12[%c0_41, %c7_42, %c0_43] : memref<4x32x256xf32, #tpu.memory_space<vmem>>, vector<4x1x256xf32>
    tpu.vector_store %arg12[%c0_41, %c7_42, %c0_43], %45 {strides = array<i32>} : memref<4x32x256xf32, #tpu.memory_space<vmem>>, vector<4x1x256xf32>,
    %cst_44 = arith.constant 0.000000e+00 : f32
    %47 = vector.broadcast %cst_44 : f32 to vector<4x1x256xf32>
    %c0_45 = arith.constant 0 : index
    %c24 = arith.constant 24 : index
    %c0_46 = arith.constant 0 : index
    %48 = vector.load %arg12[%c0_45, %c24, %c0_46] : memref<4x32x256xf32, #tpu.memory_space<vmem>>, vector<4x1x256xf32>
    tpu.vector_store %arg12[%c0_45, %c24, %c0_46], %47 {strides = array<i32>} : memref<4x32x256xf32, #tpu.memory_space<vmem>>, vector<4x1x256xf32>,
    %c0_47 = arith.constant 0 : index
    %c8_48 = arith.constant 8 : index
    %c0_49 = arith.constant 0 : index
    %49 = vector.load %arg12[%c0_47, %c8_48, %c0_49] : memref<4x32x256xf32, #tpu.memory_space<vmem>>, vector<4x16x256xf32>
    tpu.vector_store %arg12[%c0_47, %c8_48, %c0_49], %44 {strides = array<i32>} : memref<4x32x256xf32, #tpu.memory_space<vmem>>, vector<4x16x256xf32>,
    %cst_50 = arith.constant 0.000000e+00 : f32
    %50 = vector.broadcast %cst_50 : f32 to vector<64x512xf32>
    %c0_51 = arith.constant 0 : index
    %c7_52 = arith.constant 7 : index
    %c0_53 = arith.constant 0 : index
    %51 = vector.load %arg12[%c0_51, %c7_52, %c0_53] : memref<4x32x256xf32, #tpu.memory_space<vmem>>, vector<4x16x256xf32>
    %52 = vector.shape_cast %51 : vector<4x16x256xf32> to vector<64x256xf32>
    %c0_54 = arith.constant 0 : index
    %c0_55 = arith.constant 0 : index
    %c0_56 = arith.constant 0 : index
    %53 = vector.load %arg4[%c0_54, %c0_55, %c0_56] : memref<3x256x512xf32, #tpu.memory_space<vmem>>, vector<1x256x512xf32>
    %54 = vector.shape_cast %53 : vector<1x256x512xf32> to vector<256x512xf32>
    %cst_57 = arith.constant dense<0.000000e+00> : vector<64x512xf32>
    %55 = tpu.matmul %52, %54, %cst_57 {dimension_numbers = #tpu.dot_dimension_numbers<[1], [0], [0], [1], [0, 0, 1, 1], [], []>} : vector<64x256xf32>, vector<256x512xf32>, vector<64x512xf32> -> vector<64x512xf32>
    %56 = arith.addf %50, %55 : vector<64x512xf32>
    %c0_58 = arith.constant 0 : index
    %c8_59 = arith.constant 8 : index
    %c0_60 = arith.constant 0 : index
    %57 = vector.load %arg12[%c0_58, %c8_59, %c0_60] : memref<4x32x256xf32, #tpu.memory_space<vmem>>, vector<4x16x256xf32>
    %58 = vector.shape_cast %57 : vector<4x16x256xf32> to vector<64x256xf32>
    %c1_61 = arith.constant 1 : index
    %c0_62 = arith.constant 0 : index
    %c0_63 = arith.constant 0 : index
    %59 = vector.load %arg4[%c1_61, %c0_62, %c0_63] : memref<3x256x512xf32, #tpu.memory_space<vmem>>, vector<1x256x512xf32>
    %60 = vector.shape_cast %59 : vector<1x256x512xf32> to vector<256x512xf32>
    %cst_64 = arith.constant dense<0.000000e+00> : vector<64x512xf32>
    %61 = tpu.matmul %58, %60, %cst_64 {dimension_numbers = #tpu.dot_dimension_numbers<[1], [0], [0], [1], [0, 0, 1, 1], [], []>} : vector<64x256xf32>, vector<256x512xf32>, vector<64x512xf32> -> vector<64x512xf32>
    %62 = arith.addf %56, %61 : vector<64x512xf32>
    %c0_65 = arith.constant 0 : index
    %c9_66 = arith.constant 9 : index
    %c0_67 = arith.constant 0 : index
    %63 = vector.load %arg12[%c0_65, %c9_66, %c0_67] : memref<4x32x256xf32, #tpu.memory_space<vmem>>, vector<4x16x256xf32>
    %64 = vector.shape_cast %63 : vector<4x16x256xf32> to vector<64x256xf32>
    %c2_68 = arith.constant 2 : index
    %c0_69 = arith.constant 0 : index
    %c0_70 = arith.constant 0 : index
    %65 = vector.load %arg4[%c2_68, %c0_69, %c0_70] : memref<3x256x512xf32, #tpu.memory_space<vmem>>, vector<1x256x512xf32>
    %66 = vector.shape_cast %65 : vector<1x256x512xf32> to vector<256x512xf32>
    %cst_71 = arith.constant dense<0.000000e+00> : vector<64x512xf32>
    %67 = tpu.matmul %64, %66, %cst_71 {dimension_numbers = #tpu.dot_dimension_numbers<[1], [0], [0], [1], [0, 0, 1, 1], [], []>} : vector<64x256xf32>, vector<256x512xf32>, vector<64x512xf32> -> vector<64x512xf32>
    %68 = arith.addf %62, %67 : vector<64x512xf32>
    %c0_72 = arith.constant 0 : index
    %c0_73 = arith.constant 0 : index
    %69 = vector.load %arg5[%c0_72, %c0_73] : memref<1x512xf32, #tpu.memory_space<vmem>>, vector<1x512xf32>
    %70 = vector.broadcast %69 : vector<1x512xf32> to vector<64x512xf32>
    %71 = arith.addf %68, %70 : vector<64x512xf32>
    %cst_74 = arith.constant 0.000000e+00 : f32
    %72 = vector.broadcast %cst_74 : f32 to vector<64x512xf32>
    %73 = arith.maximumf %71, %72 : vector<64x512xf32>
    %74 = vector.extract_strided_slice %73 {offsets = [0, 0], sizes = [64, 256], strides = [1, 1]} : vector<64x512xf32> to vector<64x256xf32>
    %75 = vector.extract_strided_slice %73 {offsets = [0, 256], sizes = [64, 256], strides = [1, 1]} : vector<64x512xf32> to vector<64x256xf32>
    %76 = arith.maximumf %74, %75 : vector<64x256xf32>
    %77 = vector.shape_cast %76 : vector<64x256xf32> to vector<4x8x2x256xf32>
    %78 = vector.extract_strided_slice %77 {offsets = [0, 0, 0, 0], sizes = [4, 8, 1, 256], strides = [1, 1, 1, 1]} : vector<4x8x2x256xf32> to vector<4x8x1x256xf32>
    %79 = vector.shape_cast %78 : vector<4x8x1x256xf32> to vector<4x8x256xf32>
    %80 = vector.extract_strided_slice %77 {offsets = [0, 0, 1, 0], sizes = [4, 8, 1, 256], strides = [1, 1, 1, 1]} : vector<4x8x2x256xf32> to vector<4x8x1x256xf32>
    %81 = vector.shape_cast %80 : vector<4x8x1x256xf32> to vector<4x8x256xf32>
    %82 = arith.maximumf %79, %81 : vector<4x8x256xf32>
    %cst_75 = arith.constant 0.000000e+00 : f32
    %83 = vector.broadcast %cst_75 : f32 to vector<4x96xf32>
    %84 = vector.extract_strided_slice %82 {offsets = [0, 0, 0], sizes = [4, 1, 256], strides = [1, 1, 1]} : vector<4x8x256xf32> to vector<4x1x256xf32>
    %85 = vector.shape_cast %84 : vector<4x1x256xf32> to vector<4x256xf32>
    %c0_76 = arith.constant 0 : index
    %c0_77 = arith.constant 0 : index
    %c0_78 = arith.constant 0 : index
    %86 = vector.load %arg6[%c0_76, %c0_77, %c0_78] : memref<8x256x96xf32, #tpu.memory_space<vmem>>, vector<1x256x96xf32>
    %87 = vector.shape_cast %86 : vector<1x256x96xf32> to vector<256x96xf32>
    %cst_79 = arith.constant dense<0.000000e+00> : vector<4x96xf32>
    %88 = tpu.matmul %85, %87, %cst_79 {dimension_numbers = #tpu.dot_dimension_numbers<[1], [0], [0], [1], [0, 0, 1, 1], [], []>} : vector<4x256xf32>, vector<256x96xf32>, vector<4x96xf32> -> vector<4x96xf32>
    %89 = arith.addf %83, %88 : vector<4x96xf32>
    %90 = vector.extract_strided_slice %82 {offsets = [0, 1, 0], sizes = [4, 1, 256], strides = [1, 1, 1]} : vector<4x8x256xf32> to vector<4x1x256xf32>
    %91 = vector.shape_cast %90 : vector<4x1x256xf32> to vector<4x256xf32>
    %c1_80 = arith.constant 1 : index
    %c0_81 = arith.constant 0 : index
    %c0_82 = arith.constant 0 : index
    %92 = vector.load %arg6[%c1_80, %c0_81, %c0_82] : memref<8x256x96xf32, #tpu.memory_space<vmem>>, vector<1x256x96xf32>
    %93 = vector.shape_cast %92 : vector<1x256x96xf32> to vector<256x96xf32>
    %cst_83 = arith.constant dense<0.000000e+00> : vector<4x96xf32>
    %94 = tpu.matmul %91, %93, %cst_83 {dimension_numbers = #tpu.dot_dimension_numbers<[1], [0], [0], [1], [0, 0, 1, 1], [], []>} : vector<4x256xf32>, vector<256x96xf32>, vector<4x96xf32> -> vector<4x96xf32>
    %95 = arith.addf %89, %94 : vector<4x96xf32>
    %96 = vector.extract_strided_slice %82 {offsets = [0, 2, 0], sizes = [4, 1, 256], strides = [1, 1, 1]} : vector<4x8x256xf32> to vector<4x1x256xf32>
    %97 = vector.shape_cast %96 : vector<4x1x256xf32> to vector<4x256xf32>
    %c2_84 = arith.constant 2 : index
    %c0_85 = arith.constant 0 : index
    %c0_86 = arith.constant 0 : index
    %98 = vector.load %arg6[%c2_84, %c0_85, %c0_86] : memref<8x256x96xf32, #tpu.memory_space<vmem>>, vector<1x256x96xf32>
    %99 = vector.shape_cast %98 : vector<1x256x96xf32> to vector<256x96xf32>
    %cst_87 = arith.constant dense<0.000000e+00> : vector<4x96xf32>
    %100 = tpu.matmul %97, %99, %cst_87 {dimension_numbers = #tpu.dot_dimension_numbers<[1], [0], [0], [1], [0, 0, 1, 1], [], []>} : vector<4x256xf32>, vector<256x96xf32>, vector<4x96xf32> -> vector<4x96xf32>
    %101 = arith.addf %95, %100 : vector<4x96xf32>
    %102 = vector.extract_strided_slice %82 {offsets = [0, 3, 0], sizes = [4, 1, 256], strides = [1, 1, 1]} : vector<4x8x256xf32> to vector<4x1x256xf32>
    %103 = vector.shape_cast %102 : vector<4x1x256xf32> to vector<4x256xf32>
    %c3 = arith.constant 3 : index
    %c0_88 = arith.constant 0 : index
    %c0_89 = arith.constant 0 : index
    %104 = vector.load %arg6[%c3, %c0_88, %c0_89] : memref<8x256x96xf32, #tpu.memory_space<vmem>>, vector<1x256x96xf32>
    %105 = vector.shape_cast %104 : vector<1x256x96xf32> to vector<256x96xf32>
    %cst_90 = arith.constant dense<0.000000e+00> : vector<4x96xf32>
    %106 = tpu.matmul %103, %105, %cst_90 {dimension_numbers = #tpu.dot_dimension_numbers<[1], [0], [0], [1], [0, 0, 1, 1], [], []>} : vector<4x256xf32>, vector<256x96xf32>, vector<4x96xf32> -> vector<4x96xf32>
    %107 = arith.addf %101, %106 : vector<4x96xf32>
    %108 = vector.extract_strided_slice %82 {offsets = [0, 4, 0], sizes = [4, 1, 256], strides = [1, 1, 1]} : vector<4x8x256xf32> to vector<4x1x256xf32>
    %109 = vector.shape_cast %108 : vector<4x1x256xf32> to vector<4x256xf32>
    %c4 = arith.constant 4 : index
    %c0_91 = arith.constant 0 : index
    %c0_92 = arith.constant 0 : index
    %110 = vector.load %arg6[%c4, %c0_91, %c0_92] : memref<8x256x96xf32, #tpu.memory_space<vmem>>, vector<1x256x96xf32>
    %111 = vector.shape_cast %110 : vector<1x256x96xf32> to vector<256x96xf32>
    %cst_93 = arith.constant dense<0.000000e+00> : vector<4x96xf32>
    %112 = tpu.matmul %109, %111, %cst_93 {dimension_numbers = #tpu.dot_dimension_numbers<[1], [0], [0], [1], [0, 0, 1, 1], [], []>} : vector<4x256xf32>, vector<256x96xf32>, vector<4x96xf32> -> vector<4x96xf32>
    %113 = arith.addf %107, %112 : vector<4x96xf32>
    %114 = vector.extract_strided_slice %82 {offsets = [0, 5, 0], sizes = [4, 1, 256], strides = [1, 1, 1]} : vector<4x8x256xf32> to vector<4x1x256xf32>
    %115 = vector.shape_cast %114 : vector<4x1x256xf32> to vector<4x256xf32>
    %c5 = arith.constant 5 : index
    %c0_94 = arith.constant 0 : index
    %c0_95 = arith.constant 0 : index
    %116 = vector.load %arg6[%c5, %c0_94, %c0_95] : memref<8x256x96xf32, #tpu.memory_space<vmem>>, vector<1x256x96xf32>
    %117 = vector.shape_cast %116 : vector<1x256x96xf32> to vector<256x96xf32>
    %cst_96 = arith.constant dense<0.000000e+00> : vector<4x96xf32>
    %118 = tpu.matmul %115, %117, %cst_96 {dimension_numbers = #tpu.dot_dimension_numbers<[1], [0], [0], [1], [0, 0, 1, 1], [], []>} : vector<4x256xf32>, vector<256x96xf32>, vector<4x96xf32> -> vector<4x96xf32>
    %119 = arith.addf %113, %118 : vector<4x96xf32>
    %120 = vector.extract_strided_slice %82 {offsets = [0, 6, 0], sizes = [4, 1, 256], strides = [1, 1, 1]} : vector<4x8x256xf32> to vector<4x1x256xf32>
    %121 = vector.shape_cast %120 : vector<4x1x256xf32> to vector<4x256xf32>
    %c6 = arith.constant 6 : index
    %c0_97 = arith.constant 0 : index
    %c0_98 = arith.constant 0 : index
    %122 = vector.load %arg6[%c6, %c0_97, %c0_98] : memref<8x256x96xf32, #tpu.memory_space<vmem>>, vector<1x256x96xf32>
    %123 = vector.shape_cast %122 : vector<1x256x96xf32> to vector<256x96xf32>
    %cst_99 = arith.constant dense<0.000000e+00> : vector<4x96xf32>
    %124 = tpu.matmul %121, %123, %cst_99 {dimension_numbers = #tpu.dot_dimension_numbers<[1], [0], [0], [1], [0, 0, 1, 1], [], []>} : vector<4x256xf32>, vector<256x96xf32>, vector<4x96xf32> -> vector<4x96xf32>
    %125 = arith.addf %119, %124 : vector<4x96xf32>
    %126 = vector.extract_strided_slice %82 {offsets = [0, 7, 0], sizes = [4, 1, 256], strides = [1, 1, 1]} : vector<4x8x256xf32> to vector<4x1x256xf32>
    %127 = vector.shape_cast %126 : vector<4x1x256xf32> to vector<4x256xf32>
    %c7_100 = arith.constant 7 : index
    %c0_101 = arith.constant 0 : index
    %c0_102 = arith.constant 0 : index
    %128 = vector.load %arg6[%c7_100, %c0_101, %c0_102] : memref<8x256x96xf32, #tpu.memory_space<vmem>>, vector<1x256x96xf32>
    %129 = vector.shape_cast %128 : vector<1x256x96xf32> to vector<256x96xf32>
    %cst_103 = arith.constant dense<0.000000e+00> : vector<4x96xf32>
    %130 = tpu.matmul %127, %129, %cst_103 {dimension_numbers = #tpu.dot_dimension_numbers<[1], [0], [0], [1], [0, 0, 1, 1], [], []>} : vector<4x256xf32>, vector<256x96xf32>, vector<4x96xf32> -> vector<4x96xf32>
    %131 = arith.addf %125, %130 : vector<4x96xf32>
    %c0_104 = arith.constant 0 : index
    %c0_105 = arith.constant 0 : index
    %132 = vector.load %arg7[%c0_104, %c0_105] : memref<1x96xf32, #tpu.memory_space<vmem>>, vector<1x96xf32>
    %133 = vector.broadcast %132 : vector<1x96xf32> to vector<4x96xf32>
    %134 = arith.addf %131, %133 : vector<4x96xf32>
    %cst_106 = arith.constant 0.000000e+00 : f32
    %135 = vector.broadcast %cst_106 : f32 to vector<4x96xf32>
    %136 = arith.maximumf %134, %135 : vector<4x96xf32>
    %c0_107 = arith.constant 0 : index
    %c0_108 = arith.constant 0 : index
    %137 = vector.load %arg8[%c0_107, %c0_108] : memref<96x10xf32, #tpu.memory_space<vmem>>, vector<96x10xf32>
    %cst_109 = arith.constant dense<0.000000e+00> : vector<4x10xf32>
    %138 = tpu.matmul %136, %137, %cst_109 {dimension_numbers = #tpu.dot_dimension_numbers<[1], [0], [0], [1], [0, 0, 1, 1], [], []>} : vector<4x96xf32>, vector<96x10xf32>, vector<4x10xf32> -> vector<4x10xf32>
    %c0_110 = arith.constant 0 : index
    %c0_111 = arith.constant 0 : index
    %139 = vector.load %arg9[%c0_110, %c0_111] : memref<1x10xf32, #tpu.memory_space<vmem>>, vector<1x10xf32>
    %140 = vector.broadcast %139 : vector<1x10xf32> to vector<4x10xf32>
    %141 = arith.addf %138, %140 : vector<4x10xf32>
    %c0_112 = arith.constant 0 : index
    %c0_113 = arith.constant 0 : index
    %c0_114 = arith.constant 0 : index
    %142 = vector.load %arg10[%c0_112, %c0_113, %c0_114] : memref<1x4x10xf32, #tpu.memory_space<vmem>>, vector<1x4x10xf32>
    %143 = vector.shape_cast %142 : vector<1x4x10xf32> to vector<4x10xf32>
    %144 = vector.shape_cast %141 : vector<4x10xf32> to vector<1x4x10xf32>
    tpu.vector_store %arg10[%c0_112, %c0_113, %c0_114], %144 {strides = array<i32>} : memref<1x4x10xf32, #tpu.memory_space<vmem>>, vector<1x4x10xf32>,
    return
  }
  func.func @transform_0(%arg0: i32) -> (i32, i32, i32, i32) {
    %c0_i32 = arith.constant 0 : i32
    %c0_i32_0 = arith.constant 0 : i32
    %c0_i32_1 = arith.constant 0 : i32
    %c0_i32_2 = arith.constant 0 : i32
    return %arg0, %c0_i32, %c0_i32_0, %c0_i32_1 : i32, i32, i32, i32
  }
  func.func @transform_1(%arg0: i32) -> (i32, i32, i32) {
    %c0_i32 = arith.constant 0 : i32
    %c0_i32_0 = arith.constant 0 : i32
    %c0_i32_1 = arith.constant 0 : i32
    %c0_i32_2 = arith.constant 0 : i32
    return %c0_i32, %c0_i32_0, %c0_i32_1 : i32, i32, i32
  }
  func.func @transform_2(%arg0: i32) -> (i32, i32) {
    %c0_i32 = arith.constant 0 : i32
    %c0_i32_0 = arith.constant 0 : i32
    %c0_i32_1 = arith.constant 0 : i32
    return %c0_i32, %c0_i32_0 : i32, i32
  }
  func.func @transform_3(%arg0: i32) -> (i32, i32, i32) {
    %c0_i32 = arith.constant 0 : i32
    %c0_i32_0 = arith.constant 0 : i32
    %c0_i32_1 = arith.constant 0 : i32
    %c0_i32_2 = arith.constant 0 : i32
    return %c0_i32, %c0_i32_0, %c0_i32_1 : i32, i32, i32
  }
  func.func @transform_4(%arg0: i32) -> (i32, i32) {
    %c0_i32 = arith.constant 0 : i32
    %c0_i32_0 = arith.constant 0 : i32
    %c0_i32_1 = arith.constant 0 : i32
    return %c0_i32, %c0_i32_0 : i32, i32
  }
  func.func @transform_5(%arg0: i32) -> (i32, i32, i32) {
    %c0_i32 = arith.constant 0 : i32
    %c0_i32_0 = arith.constant 0 : i32
    %c0_i32_1 = arith.constant 0 : i32
    %c0_i32_2 = arith.constant 0 : i32
    return %c0_i32, %c0_i32_0, %c0_i32_1 : i32, i32, i32
  }
  func.func @transform_6(%arg0: i32) -> (i32, i32) {
    %c0_i32 = arith.constant 0 : i32
    %c0_i32_0 = arith.constant 0 : i32
    %c0_i32_1 = arith.constant 0 : i32
    return %c0_i32, %c0_i32_0 : i32, i32
  }
  func.func @transform_7(%arg0: i32) -> (i32, i32) {
    %c0_i32 = arith.constant 0 : i32
    %c0_i32_0 = arith.constant 0 : i32
    %c0_i32_1 = arith.constant 0 : i32
    return %c0_i32, %c0_i32_0 : i32, i32
  }
  func.func @transform_8(%arg0: i32) -> (i32, i32) {
    %c0_i32 = arith.constant 0 : i32
    %c0_i32_0 = arith.constant 0 : i32
    %c0_i32_1 = arith.constant 0 : i32
    return %c0_i32, %c0_i32_0 : i32, i32
  }
  func.func @transform_9(%arg0: i32) -> (i32, i32, i32) {
    %c0_i32 = arith.constant 0 : i32
    %c0_i32_0 = arith.constant 0 : i32
    %c0_i32_1 = arith.constant 0 : i32
    return %arg0, %c0_i32, %c0_i32_0 : i32, i32, i32
  }
}

</mosaic_0001>

<bundles_post_ra>
// kernel: conv_net_forward.1
= control target key start
LH: loop header
LB: loop body
LE: loop exit
PB: predicated region body
PF: predicated region fallthrough
CT: control target
= control target key end

     0   :  { %s12047_s0 = inlined_call_operand.hbm [shape: f32[8,3,32,32], index: 0, kind: input, shape index: {}]   ;;  %s12048_s1 = inlined_call_operand.hbm [shape: f32[3,96,512], index: 1, kind: input, shape index: {}]   ;;  %s12049_s2 = inlined_call_operand.vmem [shape: f32[1,512], index: 2, kind: input, shape index: {}]   ;;  %s12050_s3 = inlined_call_operand.vmem [shape: f32[3,256,512], index: 3, kind: input, shape index: {}]   ;;  %s12051_s4 = inlined_call_operand.vmem [shape: f32[1,512], index: 4, kind: input, shape index: {}]   ;;  %s12052_s5 = inlined_call_operand.vmem [shape: f32[8,256,96], index: 5, kind: input, shape index: {}]   ;;  %s12053_s6 = inlined_call_operand.vmem [shape: f32[1,96], index: 6, kind: input, shape index: {}]   ;;  %s12054_s7 = inlined_call_operand.vmem [shape: f32[96,10], index: 7, kind: input, shape index: {}]   ;;  %s12055_s8 = inlined_call_operand.vmem [shape: f32[1,10], index: 8, kind: input, shape index: {}]   ;;  %s12056_s9 = inlined_call_operand.hbm [shape: f32[2,4,10], index: 9, kind: output, shape index: {}]  }
   0x1   :  { %12076 = sst [smem:[#allocation70_spill]] %s12048_s1 }
   0x2   :  { %14 = vsyncpa [#allocation5], 0 }
   0x3   :  { %16 = vsyncpa [#allocation5 + $0x1], 0 }
   0x4   :  { %17 = vsyncpa [#allocation8], 0 }
   0x5   :  { %18 = vsyncpa [#allocation6], 0 }
   0x6   :  { %20 = vsyncpa [#allocation6 + $0x1], 0  ;;  %s7965_s30 = smov 0   ;;  %s7967_s10 = smov 0  }
   0x7   :  { %s7969_s11 = smov 0   ;;  %s7971_s12 = smov 0  }
   0x8 LB: > { %s7986_s13 = sadd.s32 4294967295, %s7901_s12   ;;  %s6665_s14 = sadd.s32 4294967294, %s7901_s12   ;;  %s7901_s12 = sphi %s7971_s12, %s12228_s12   ;;  %s7897_s11 = sphi %s7969_s11, %s12231_s11   ;;  %s7893_s10 = sphi %s7967_s10, %s12230_s10   ;;  %s7889_s30 = sphi %s7965_s30, %s12229_s30  }
   0x9   : > { %p46_p0 = scmp.ne.s32.totalorder %s7893_s10, %s7889_s30  ;;  %p12060_p1 = scmp.eq.s32.totalorder %s7986_s13, 0 }
   0xa   : > { %p244_p3 = scmp.eq.s32.totalorder %s6665_s14, 1  ;;  %p6666_p5 = scmp.ge.s32.totalorder %s7901_s12, 1 }
   0xb   : > { %p7995_p4 = por %p12060_p1, %p46_p0  ;;  %p251_p7 = scmp.lt.s32.totalorder %s7901_s12, 3 }
   0xc   : > { %p8000_p6 = por %p244_p3, %p46_p0  ;;  %s7903_s18 = smov [#allocation7]  }
   0xd   : > { %s12077_s15 = scalar_select %p7995_p4, 1, 0 }
   0xe   : > { %s12078_s16 = scalar_select %p8000_p6, 1, 0 }
   0xf   : > { %p8005_p8 = pnand %p6666_p5, %p251_p7  ;;  %s263_s19 = sshll.u32 %s7903_s18, 4  ;;  %s264_s19 = int_to_ptr.vmem [resolvable:$true] %s263_s19 }
  0x10   : > { %12079 = sst [smem:[#allocation13_spill]] %s12078_s16  ;;  %s8019_s21 = sadd.s32 1, %s7901_s12  }
  0x11   : > { %s12080_s17 = scalar_select %p8005_p8, 1, 0 }
  0x12   : > { %p7717_p9 = pneg %p8005_p8  ;;  %12082 = sst [smem:[#allocation14_spill]] %s8019_s21 }
  0x13   : > { %s33_s22 = sadd.s32 1, %s7897_s11  ;;  %s30_s23 = ssub.s32 %s7901_s12, %s8019_s21 }
  0x14   : > { %p8014_p11 = pnand %p7717_p9, %p12060_p1  ;;  %s7790_s24 = scalar_lea.vmem %s264_s19, 18432 }
  0x15   : > { %p7791_p13 = scmp.ne.s32.totalorder %s264_s19, %s7790_s24  ;;  %p7798_p5 = scmp.lt.s32.totalorder %s264_s19, %s264_s19 }
  0x16   : > { %p7781_p12 = pneg %p8014_p11  ;;  %p7799_p7 = scmp.lt.s32.totalorder %s7790_s24, %s7790_s24 }
  0x18   : > { %p7793_p0 = pnand %p7791_p13, %p7781_p12  ;;  %p7800_p10 = por %p7799_p7, %p7798_p5 }
  0x1a   : > { %p7794_p3 = pneg %p7793_p0 }
  0x1c   : > { %p7801_p2 = pnand %p7800_p10, %p7794_p3 }
  0x1e   : > { %7804 = shalt.err (!%p7801_p2)
}
  0x1f   : > { %s7904_s25 = smov 512   ;;  %s7905_s26 = smov 32  }
  0x20   : > { %s12083_s1 = sld [smem:[#allocation70_spill]]  ;;  %p31_p9 = scmp.eq.s32.totalorder %s30_s23, 0 }
  0x21   : > { %p40_p12 = scmp.ne.s32.totalorder %s7897_s11, %s7893_s10  ;;  %p41_p10 = scmp.eq.s32.totalorder %s7901_s12, 0 }
  0x22   : > { %p7730_p2 = scmp.lt.s32.totalorder %s7901_s12, 2  ;;  %p12084_p0 = scmp.eq.s32.totalorder %s7986_s13, 1 }
  0x23   : > { %s8036_s29 = scalar_select %p31_p9, %s7897_s11, %s33_s22  }
  0x24   : > { %p42_p13 = por %p41_p10, %p40_p12  ;;  %p8040_p3 = por %p12084_p0, %p40_p12 }
  0x25   : > { %s298_s18 = sand.u32 1, %s7897_s11   ;;  %s7707_s24 = smul.u32 6144, %s7901_s12 }
  0x26   : > { %7720 = dma.hbm_to_vmem [thread:$0]  (!%p8014_p11), %s12083_s1, 18432, %s264_s19, [#allocation8], %s7904_s25, %s7904_s25, %s7905_s26  }
  0x27   : > { %s12085_s14 = scalar_select %p8040_p3, 1, 0 }
  0x28   : > { %s7706_s21 = smul.u32 384, %s298_s18  ;;  %s8049_s27 = scalar_lea.hbm %s12047_s0, %s7707_s24 }
  0x29   : > { %p8051_p11 = pnand %p7730_p2, %p42_p13  ;;  %s8057_s25 = scalar_lea.sflag [#allocation5], %s298_s18 }
  0x2a   : > { %s302_s22 = scalar_lea.vmem [#allocation4], %s7706_s21  ;;  %s7805_s26 = scalar_lea.hbm %s8049_s27, 6144 }
  0x2b   : > { %s310_s23 = sshll.u32 %s302_s22, 4  ;;  %p7806_p5 = scmp.ne.s32.totalorder %s8049_s27, %s7805_s26  ;;  %s8055_s23 = int_to_ptr.vmem [resolvable:$true] %s310_s23 }
  0x2c   : > { %p7807_p7 = pneg %p8051_p11  ;;  %s7810_s24 = scalar_lea.hbm %s12047_s0, 12288 }
  0x2d   : > { %p7811_p10 = scmp.lt.s32.totalorder %s8049_s27, %s12047_s0  ;;  %p7812_p2 = scmp.lt.s32.totalorder %s7810_s24, %s7805_s26 }
  0x2e   : > { %p7808_p9 = pnand %p7807_p7, %p7806_p5 }
  0x2f   : > { %p7813_p13 = por %p7812_p2, %p7811_p10 }
  0x30   : > { %p7809_p12 = pneg %p7808_p9 }
  0x32   : > { %p7814_p0 = pnand %p7813_p13, %p7809_p12 }
  0x34   : > { %7817 = shalt.err (!%p7814_p0)
}
  0x35   : > { %s7818_s21 = scalar_lea.vmem %s8055_s23, 6144  ;;  %s7906_s18 = smov [#allocation4]  }
  0x36   : > { %p7819_p1 = scmp.ne.s32.totalorder %s8055_s23, %s7818_s21  ;;  %s7823_s22 = sshll.u32 %s7906_s18, 4  ;;  %s7824_s22 = int_to_ptr.vmem [resolvable:$false] %s7823_s22 }
  0x37   : > { %s7825_s16 = scalar_lea.vmem %s7824_s22, 12288  ;;  %p7826_p9 = scmp.lt.s32.totalorder %s8055_s23, %s7824_s22 }
  0x38   : > { %p7821_p6 = pnand %p7819_p1, %p7807_p7  ;;  %p7827_p3 = scmp.lt.s32.totalorder %s7825_s16, %s7818_s21 }
  0x3a   : > { %p7822_p5 = pneg %p7821_p6  ;;  %p7828_p4 = por %p7827_p3, %p7826_p9 }
  0x3c   : > { %p7829_p8 = pnand %p7828_p4, %p7822_p5 }
  0x3e   : > { %7832 = shalt.err (!%p7829_p8)
}
  0x3f   : > { %s7907_s1 = smov 128   ;;  %s7908_s26 = smov 8  }
  0x40   : > { %7724 = dma.hbm_to_vmem [thread:$0]  (!%p8051_p11), %s8049_s27, 6144, %s8055_s23, %s8057_s25, %s7907_s1, %s7907_s1, %s7908_s26  }
  0x41   : > { %p12087_p1 = scmp.ne.s32.totalorder %s12080_s17, 0 }
  0x43   : > { %322 = sbr.rel (%p12087_p1) target bundleno = 1568 (0x620), region = 56 }
  0x48   : > { %s8081_s28 = sand.u32 1, %s7893_s10   ;;  %p12088_p4 = scmp.ne.s32.totalorder %s12077_s15, 0 }
  0x49   : > { %s7708_s24 = smul.u32 384, %s8081_s28  ;;  %s325_s20 = scalar_lea.sflag [#allocation5], %s8081_s28 }
  0x4b   : > { %s8085_s21 = scalar_lea.vmem [#allocation4], %s7708_s24 }
  0x4c   : > { %7876 = dma.done.wait (%p12088_p4), %s325_s20, 6144  }
  0x4d   : > { %7878 = vsyncadd (%p12088_p4), %s325_s20, 4294961152  ;;  %p12089_p6 = scmp.eq.s32.totalorder %s7986_s13, 0 }
  0x4f   : > { %7880 = dma.done.wait (%p12089_p6), [#allocation8], 18432   ;;  %p12090_p8 = pmov %p12089_p6 }
  0x50   : > { %vm368_vm0 = vcmask 778240   ;;  %v12064_v0 = vmov 0.0   ;;  %v6676_v1 = vld [vmem:[%s8085_s21 + $0x28] sm:$0xff]  ;;  %v6675_v2 = vld [vmem:[%s8085_s21 + $0x20] sm:$0xff]  ;;  %s7910_s15 = smov 32   ;;  %s7911_s17 = smov 64  }
  0x51   : > { %7882 = vsyncadd (%p12090_p8), [#allocation8], 4294948864  ;;  %847 = vmatprep.mubr.f32.mxu0 %v12064_v0  ;;  %1008 = vmatprep.mubr.f32.mxu1 %v12064_v0  ;;  %369 = vst.msk [vmem:[#allocation2 + $0x7] sm:$0x1] %vm368_vm0, %v12064_v0  ;;  %v732_v3 = vld [vmem:[#allocation7 + $0x2e8] sm:$0xff]  ;;  %v6691_v5 = vld [vmem:[%s8085_s21 + $0x40] sm:$0xff] }
  0x52   : > { %370 = vst.msk [vmem:[#allocation2 + $0x37] sm:$0x1] %vm368_vm0, %v12064_v0  ;;  %371 = vst.msk [vmem:[#allocation2 + $0x67] sm:$0x1] %vm368_vm0, %v12064_v0  ;;  %445 = vrot.lane.b32.xlu1 %v6676_v1, %s7910_s15  ;;  %443 = vrot.lane.b32.xlu0 %v6675_v2, %s7910_s15  ;;  %v6692_v4 = vld [vmem:[%s8085_s21 + $0x48] sm:$0xff]  ;;  %v734_v6 = vld [vmem:[#allocation7 + $0x2f8] sm:$0xff] }
  0x53   : > { %372 = vst.msk [vmem:[#allocation2 + $0x97] sm:$0x1] %vm368_vm0, %v12064_v0  ;;  %373 = vst.msk [vmem:[#allocation2 + $0x28] sm:$0x1] %vm368_vm0, %v12064_v0  ;;  %791 = vmatprep.subr.mxu0 %v732_v3  ;;  %v6677_v7 = vld [vmem:[%s8085_s21 + $0x30] sm:$0xff]  ;;  %952 = vmatprep.subr.mxu1 %v734_v6  ;;  %v731_v9 = vld [vmem:[#allocation7 + $0x2e0] sm:$0xff] }
  0x54   : > { %374 = vst.msk [vmem:[#allocation2 + $0x58] sm:$0x1] %vm368_vm0, %v12064_v0  ;;  %375 = vst.msk [vmem:[#allocation2 + $0x88] sm:$0x1] %vm368_vm0, %v12064_v0  ;;  %v6693_v8 = vld [vmem:[%s8085_s21 + $0x50] sm:$0xff]  ;;  %v6678_v10 = vld [vmem:[%s8085_s21 + $0x38] sm:$0xff]  ;;  %792 = vmatpush1.msra.mxu0 %v731_v9 }
  0x55   : > { %376 = vst.msk [vmem:[#allocation2 + $0xb8] sm:$0x1] %vm368_vm0, %v12064_v0  ;;  %v6694_v11 = vld [vmem:[%s8085_s21 + $0x58] sm:$0xff]  ;;  %v733_v12 = vld [vmem:[#allocation7 + $0x2f0] sm:$0xff]  ;;  %v728_v13 = vld [vmem:[#allocation7 + $0x2c8] sm:$0xff]  ;;  %vm555_vm1 = vcmask 261120  }
  0x56   : > { %509 = vrot.lane.b32.xlu1 %v6692_v4, %s7911_s17  ;;  %507 = vrot.lane.b32.xlu0 %v6691_v5, %s7911_s17  ;;  %v730_v14 = vld [vmem:[#allocation7 + $0x2d8] sm:$0xff]  ;;  %v727_v15 = vld [vmem:[#allocation7 + $0x2c0] sm:$0xff]  ;;  %v729_v16 = vld [vmem:[#allocation7 + $0x2d0] sm:$0xff]  ;;  %vm572_vm2 = vcmask 523264   ;;  %vm589_vm3 = vcmask 785408   ;;  %vm3400_vm5 = vcmask 1041409  }
  0x57   : > { %953 = vmatpush1.msra.mxu1 %v733_v12  ;;  %v724_v17 = vld [vmem:[#allocation7 + $0x2a8] sm:$0xff]  ;;  %v726_v18 = vld [vmem:[#allocation7 + $0x2b8] sm:$0xff]  ;;  %v6679_v19 = vld [vmem:[%s8085_s21 + $0x80] sm:$0xff]  ;;  %793 = vmatprep.subr.mxu0 %v728_v13  ;;  %vm3402_vm6 = vcmask 1042434   ;;  %vm3404_vm7 = vcmask 1043459   ;;  %vm3406_vm8 = vcmask 1044484  }
  0x58   : > { %v6695_v20 = vld [vmem:[%s8085_s21 + $0xa0] sm:$0xff]  ;;  %954 = vmatprep.subr.mxu1 %v730_v14  ;;  %794 = vmatpush1.msra.mxu0 %v727_v15  ;;  %v725_v22 = vld [vmem:[#allocation7 + $0x2b0] sm:$0xff]  ;;  %v720_v23 = vld [vmem:[#allocation7 + $0x288] sm:$0xff]  ;;  %vm3408_vm9 = vcmask 1045509   ;;  %vm3410_vm10 = vcmask 1046534   ;;  %vm3412_vm11 = vcmask 1047559  }
  0x59   : > { %955 = vmatpush1.msra.mxu1 %v729_v16  ;;  %v723_v21 = vld [vmem:[#allocation7 + $0x2a0] sm:$0xff]  ;;  %795 = vmatprep.subr.mxu0 %v724_v17  ;;  %v722_v24 = vld [vmem:[#allocation7 + $0x298] sm:$0xff]  ;;  %v721_v26 = vld [vmem:[#allocation7 + $0x290] sm:$0xff]  ;;  %vm3599_vm12 = vcmask 1040384   ;;  %vm4421_vm13 = vcmask 1046528   ;;  %vm7913_vm14 = vmmov 0  }
  0x5a   : > { %447 = vrot.lane.b32.xlu0 %v6677_v7, %s7910_s15  ;;  %511 = vrot.lane.b32.xlu1 %v6693_v8, %s7911_s17  ;;  %v719_v25 = vld [vmem:[#allocation7 + $0x280] sm:$0xff]  ;;  %v6680_v27 = vld [vmem:[%s8085_s21 + $0x88] sm:$0xff]  ;;  %v718_v30 = vld [vmem:[#allocation7 + $0x278] sm:$0xff]  ;;  %s6674_s26 = sshll.u32 %s8081_s28, 2  ;;  %vm6569_vm15 = vcmask 76800   ;;  %s6572_s25 = scalar_lea.sflag [#allocation6], %s8081_s28 }
  0x5b   : > { %956 = vmatprep.subr.mxu1 %v726_v18  ;;  %v6696_v28 = vld [vmem:[%s8085_s21 + $0xa8] sm:$0xff]  ;;  %796 = vmatpush1.msra.mxu0 %v723_v21  ;;  %v715_v31 = vld [vmem:[#allocation7 + $0x260] sm:$0xff]  ;;  %v717_v32 = vld [vmem:[#allocation7 + $0x270] sm:$0xff]  ;;  %p12224_p11 = scmp.ne.s32.totalorder %s12085_s14, 0 }
  0x5c   : > { %957 = vmatpush1.msra.mxu1 %v725_v22  ;;  %797 = vmatprep.subr.mxu0 %v720_v23  ;;  %v716_v29 = vld [vmem:[#allocation7 + $0x268] sm:$0xff]  ;;  %v714_v34 = vld [vmem:[#allocation7 + $0x258] sm:$0xff]  ;;  %v6681_v35 = vld [vmem:[%s8085_s21 + $0x90] sm:$0xff] }
  0x5d   : > { %958 = vmatprep.subr.mxu1 %v722_v24  ;;  %798 = vmatpush1.msra.mxu0 %v719_v25  ;;  %v712_v33 = vld [vmem:[#allocation7 + $0x248] sm:$0xff]  ;;  %v6697_v36 = vld [vmem:[%s8085_s21 + $0xb0] sm:$0xff]  ;;  %v711_v37 = vld [vmem:[#allocation7 + $0x240] sm:$0xff] }
  0x5e   : > { %449 = vrot.lane.b32.xlu0 %v6678_v10, %s7910_s15  ;;  %513 = vrot.lane.b32.xlu1 %v6694_v11, %s7911_s17  ;;  %v713_v38 = vld [vmem:[#allocation7 + $0x250] sm:$0xff]  ;;  %v708_v39 = vld [vmem:[#allocation7 + $0x228] sm:$0xff]  ;;  %v710_v40 = vld [vmem:[#allocation7 + $0x238] sm:$0xff] }
  0x5f   : > { %959 = vmatpush1.msra.mxu1 %v721_v26  ;;  %799 = vmatprep.subr.mxu0 %v716_v29  ;;  %v707_v41 = vld [vmem:[#allocation7 + $0x220] sm:$0xff]  ;;  %v709_v42 = vld [vmem:[#allocation7 + $0x230] sm:$0xff]  ;;  %v6682_v43 = vld [vmem:[%s8085_s21 + $0x98] sm:$0xff] }
  0x60   : > { %960 = vmatprep.subr.mxu1 %v718_v30  ;;  %800 = vmatpush1.msra.mxu0 %v715_v31  ;;  %v6698_v44 = vld [vmem:[%s8085_s21 + $0xb8] sm:$0xff]  ;;  %v704_v45 = vld [vmem:[#allocation7 + $0x208] sm:$0xff]  ;;  %v703_v47 = vld [vmem:[#allocation7 + $0x200] sm:$0xff] }
  0x61   : > { %961 = vmatpush1.msra.mxu1 %v717_v32  ;;  %801 = vmatprep.subr.mxu0 %v712_v33  ;;  %v706_v46 = vld [vmem:[#allocation7 + $0x218] sm:$0xff]  ;;  %v705_v48 = vld [vmem:[#allocation7 + $0x210] sm:$0xff]  ;;  %v700_v49 = vld [vmem:[#allocation7 + $0x1e8] sm:$0xff] }
  0x62   : > { %451 = vrot.lane.b32.xlu0 %v6679_v19, %s7910_s15  ;;  %515 = vrot.lane.b32.xlu1 %v6695_v20, %s7911_s17  ;;  %v702_v50 = vld [vmem:[#allocation7 + $0x1f8] sm:$0xff]  ;;  %v6683_v51 = vld [vmem:[%s8085_s21 + $0xe0] sm:$0xff]  ;;  %v701_v54 = vld [vmem:[#allocation7 + $0x1f0] sm:$0xff] }
  0x63   : > { %962 = vmatprep.subr.mxu1 %v714_v34  ;;  %802 = vmatpush1.msra.mxu0 %v711_v37  ;;  %v6699_v52 = vld [vmem:[%s8085_s21 + $0x100] sm:$0xff]  ;;  %v696_v55 = vld [vmem:[#allocation7 + $0x1c8] sm:$0xff]  ;;  %v698_v56 = vld [vmem:[#allocation7 + $0x1d8] sm:$0xff] }
  0x64   : > { %963 = vmatpush1.msra.mxu1 %v713_v38  ;;  %803 = vmatprep.subr.mxu0 %v708_v39  ;;  %v699_v53 = vld [vmem:[#allocation7 + $0x1e0] sm:$0xff]  ;;  %v697_v58 = vld [vmem:[#allocation7 + $0x1d0] sm:$0xff]  ;;  %v6684_v59 = vld [vmem:[%s8085_s21 + $0xe8] sm:$0xff] }
  0x65   : > { %964 = vmatprep.subr.mxu1 %v710_v40  ;;  %804 = vmatpush1.msra.mxu0 %v707_v41  ;;  %v695_v57 = vld [vmem:[#allocation7 + $0x1c0] sm:$0xff]  ;;  %v6700_v60 = vld [vmem:[%s8085_s21 + $0x108] sm:$0xff]  ;;  %v694_v62 = vld [vmem:[#allocation7 + $0x1b8] sm:$0xff] }
  0x66   : > { %453 = vrot.lane.b32.xlu0 %v6680_v27, %s7910_s15  ;;  %517 = vrot.lane.b32.xlu1 %v6696_v28, %s7911_s17  ;;  %v692_v61 = vld [vmem:[#allocation7 + $0x1a8] sm:$0xff]  ;;  %v691_v63 = vld [vmem:[#allocation7 + $0x1a0] sm:$0xff]  ;;  %v693_v1 = vld [vmem:[#allocation7 + $0x1b0] sm:$0xff] }
  0x67   : > { %965 = vmatpush1.msra.mxu1 %v709_v42  ;;  %805 = vmatprep.subr.mxu0 %v704_v45  ;;  %v688_v2 = vld [vmem:[#allocation7 + $0x188] sm:$0xff]  ;;  %v690_v3 = vld [vmem:[#allocation7 + $0x198] sm:$0xff]  ;;  %v6685_v4 = vld [vmem:[%s8085_s21 + $0xf0] sm:$0xff] }
  0x68   : > { %966 = vmatprep.subr.mxu1 %v706_v46  ;;  %806 = vmatpush1.msra.mxu0 %v703_v47  ;;  %v6701_v5 = vld [vmem:[%s8085_s21 + $0x110] sm:$0xff]  ;;  %v687_v6 = vld [vmem:[#allocation7 + $0x180] sm:$0xff]  ;;  %v667_v8 = vld [vmem:[#allocation7 + $0x168] sm:$0xff] }
  0x69   : > { %967 = vmatpush1.msra.mxu1 %v705_v48  ;;  %807 = vmatprep.subr.mxu0 %v700_v49  ;;  %v689_v7 = vld [vmem:[#allocation7 + $0x190] sm:$0xff]  ;;  %v669_v9 = vld [vmem:[#allocation7 + $0x178] sm:$0xff]  ;;  %v6687_v12 = vld [vmem:[%s8085_s21 + $0x140] sm:$0xff] }
  0x6a   : > { %455 = vrot.lane.b32.xlu0 %v6681_v35, %s7910_s15  ;;  %519 = vrot.lane.b32.xlu1 %v6697_v36, %s7911_s17  ;;  %v6686_v10 = vld [vmem:[%s8085_s21 + $0xf8] sm:$0xff]  ;;  %v6703_v13 = vld [vmem:[%s8085_s21 + $0x160] sm:$0xff]  ;;  %v668_v39 = vld [vmem:[#allocation7 + $0x170] sm:$0xff] }
  0x6b   : > { %968 = vmatprep.subr.mxu1 %v702_v50  ;;  %808 = vmatpush1.msra.mxu0 %v699_v53  ;;  %v6702_v11 = vld [vmem:[%s8085_s21 + $0x118] sm:$0xff]  ;;  %v6688_v14 = vld [vmem:[%s8085_s21 + $0x148] sm:$0xff]  ;;  %v6689_v16 = vld [vmem:[%s8085_s21 + $0x150] sm:$0xff] }
  0x6c   : > { %969 = vmatpush1.msra.mxu1 %v701_v54  ;;  %809 = vmatprep.subr.mxu0 %v696_v55  ;;  %v6704_v15 = vld [vmem:[%s8085_s21 + $0x168] sm:$0xff]  ;;  %v6705_v17 = vld [vmem:[%s8085_s21 + $0x170] sm:$0xff]  ;;  %v6690_v18 = vld [vmem:[%s8085_s21 + $0x158] sm:$0xff] }
  0x6d   : > { %970 = vmatprep.subr.mxu1 %v698_v56  ;;  %810 = vmatpush1.msra.mxu0 %v695_v57  ;;  %v6706_v19 = vld [vmem:[%s8085_s21 + $0x178] sm:$0xff]  ;;  %v378_v20 = vld [vmem:[%s8085_s21 + $0x8] sm:$0xff]  ;;  %v377_v23 = vld [vmem:[%s8085_s21] sm:$0xff] }
  0x6e   : > { %457 = vrot.lane.b32.xlu0 %v6682_v43, %s7910_s15  ;;  %521 = vrot.lane.b32.xlu1 %v6698_v44, %s7911_s17  ;;  %v379_v30 = vld [vmem:[%s8085_s21 + $0x10] sm:$0xff]  ;;  %v380_v35 = vld [vmem:[%s8085_s21 + $0x18] sm:$0xff]  ;;  %v666_v38 = vld [vmem:[#allocation7 + $0x160] sm:$0xff] }
  0x6f   : > { %971 = vmatpush1.msra.mxu1 %v697_v58  ;;  %811 = vmatprep.subr.mxu0 %v692_v61  ;;  %v381_v43 = vld [vmem:[%s8085_s21 + $0x60] sm:$0xff]  ;;  %v663_v44 = vld [vmem:[#allocation7 + $0x148] sm:$0xff]  ;;  %v665_v45 = vld [vmem:[#allocation7 + $0x158] sm:$0xff] }
  0x70   : > { %972 = vmatprep.subr.mxu1 %v694_v62  ;;  %812 = vmatpush1.msra.mxu0 %v691_v63  ;;  %v662_v48 = vld [vmem:[#allocation7 + $0x140] sm:$0xff]  ;;  %v664_v49 = vld [vmem:[#allocation7 + $0x150] sm:$0xff]  ;;  %v382_v53 = vld [vmem:[%s8085_s21 + $0x68] sm:$0xff] }
  0x71   : > { %973 = vmatpush1.msra.mxu1 %v693_v1  ;;  %813 = vmatprep.subr.mxu0 %v688_v2  ;;  %v659_v54 = vld [vmem:[#allocation7 + $0x128] sm:$0xff]  ;;  %v661_v55 = vld [vmem:[#allocation7 + $0x138] sm:$0xff]  ;;  %v660_v61 = vld [vmem:[#allocation7 + $0x130] sm:$0xff] }
  0x72   : > { %459 = vrot.lane.b32.xlu0 %v6683_v51, %s7910_s15  ;;  %523 = vrot.lane.b32.xlu1 %v6699_v52, %s7911_s17  ;;  %v383_v63 = vld [vmem:[%s8085_s21 + $0x70] sm:$0xff]  ;;  %v655_v1 = vld [vmem:[#allocation7 + $0x108] sm:$0xff]  ;;  %v657_v2 = vld [vmem:[#allocation7 + $0x118] sm:$0xff] }
  0x73   : > { %974 = vmatprep.subr.mxu1 %v690_v3  ;;  %814 = vmatpush1.msra.mxu0 %v687_v6 }
  0x74   : > { %975 = vmatpush1.msra.mxu1 %v689_v7  ;;  %1161 = vmatprep.subr.mxu0 %v667_v8  ;;  %v654_v7 = vld [vmem:[#allocation7 + $0x100] sm:$0xff]  ;;  %v656_v8 = vld [vmem:[#allocation7 + $0x110] sm:$0xff] }
  0x75   : > { %1322 = vmatprep.subr.mxu1 %v669_v9 }
  0x76   : > { %461 = vrot.lane.b32.xlu0 %v6684_v59, %s7910_s15  ;;  %525 = vrot.lane.b32.xlu1 %v6700_v60, %s7911_s17  ;;  %v658_v60 = vld [vmem:[#allocation7 + $0x120] sm:$0xff] }
  0x7a   : > { %463 = vrot.lane.b32.xlu0 %v6685_v4, %s7910_s15  ;;  %527 = vrot.lane.b32.xlu1 %v6701_v5, %s7911_s17 }
  0x7e   : > { %465 = vrot.lane.b32.xlu0 %v6686_v10, %s7910_s15  ;;  %529 = vrot.lane.b32.xlu1 %v6702_v11, %s7911_s17  ;;  %v384_v10 = vld [vmem:[%s8085_s21 + $0x78] sm:$0xff]  ;;  %v651_v11 = vld [vmem:[#allocation7 + $0xe8] sm:$0xff] }
  0x82   : > { %467 = vrot.lane.b32.xlu0 %v6687_v12, %s7910_s15  ;;  %531 = vrot.lane.b32.xlu1 %v6703_v13, %s7911_s17  ;;  %v653_v12 = vld [vmem:[#allocation7 + $0xf8] sm:$0xff] }
  0x86   : > { %469 = vrot.lane.b32.xlu0 %v6688_v14, %s7910_s15  ;;  %533 = vrot.lane.b32.xlu1 %v6704_v15, %s7911_s17 }
  0x8a   : > { %471 = vrot.lane.b32.xlu0 %v6689_v16, %s7910_s15  ;;  %535 = vrot.lane.b32.xlu1 %v6705_v17, %s7911_s17  ;;  %v650_v17 = vld [vmem:[#allocation7 + $0xe0] sm:$0xff] }
  0x8e   : > { %473 = vrot.lane.b32.xlu0 %v6690_v18, %s7910_s15  ;;  %537 = vrot.lane.b32.xlu1 %v6706_v19, %s7911_s17  ;;  %v652_v18 = vld [vmem:[#allocation7 + $0xf0] sm:$0xff]  ;;  %s366_s15 = scalar_lea.vmem [#allocation9], %s6674_s26 }
  0x8f   : > { %s6585_s17 = sshll.u32 %s366_s15, 4  ;;  %s6586_s17 = int_to_ptr.vmem [resolvable:$true] %s6585_s17 }
  0x90   : > { %s7833_s18 = scalar_lea.vmem %s6586_s17, 64 }
  0x91   : > { %p7834_p3 = scmp.ne.s32.totalorder %s6586_s17, %s7833_s18 }
  0x93   : > { %p7835_p7 = pnand %p7834_p3, %p12224_p11 }
  0x95   : > { %p7836_p12 = pneg %p7835_p7 }
  0xc4   : > { %v446_v21 = vpop.permute.xlu1 %445  ;;  %v444_v22 = vpop.permute.xlu0 %443 }
  0xc5   : > { %v557_v24 = vsel %vm555_vm1, %v378_v20, %v446_v21  ;;  %v556_v25 = vsel %vm555_vm1, %v377_v23, %v444_v22  ;;  %v385_v20 = vld [vmem:[%s8085_s21 + $0xc0] sm:$0xff]  ;;  %v647_v21 = vld [vmem:[#allocation7 + $0xc8] sm:$0xff]  ;;  %v649_v22 = vld [vmem:[#allocation7 + $0xd8] sm:$0xff] }
  0xc8   : > { %v510_v26 = vpop.permute.xlu1 %509  ;;  %v508_v27 = vpop.permute.xlu0 %507 }
  0xc9   : > { %v574_v28 = vsel %vm572_vm2, %v557_v24, %v510_v26  ;;  %v573_v29 = vsel %vm572_vm2, %v556_v25, %v508_v27  ;;  %v646_v27 = vld [vmem:[#allocation7 + $0xc0] sm:$0xff] }
  0xca   : > { %591 = vst.msk [vmem:[#allocation2 + $0x10] sm:$0xff] %vm589_vm3, %v574_v28  ;;  %590 = vst.msk [vmem:[#allocation2 + $0x8] sm:$0xff] %vm589_vm3, %v573_v29  ;;  %v648_v28 = vld [vmem:[#allocation7 + $0xd0] sm:$0xff] }
  0xcc   : > { %v448_v31 = vpop.permute.xlu0 %447  ;;  %v512_v32 = vpop.permute.xlu1 %511 }
  0xcd   : > { %v558_v33 = vsel %vm555_vm1, %v379_v30, %v448_v31  ;;  %v386_v30 = vld [vmem:[%s8085_s21 + $0xc8] sm:$0xff] }
  0xce   : > { %v575_v34 = vsel %vm572_vm2, %v558_v33, %v512_v32  ;;  %v643_v31 = vld [vmem:[#allocation7 + $0xa8] sm:$0xff]  ;;  %v645_v32 = vld [vmem:[#allocation7 + $0xb8] sm:$0xff] }
  0xcf   : > { %592 = vst.msk [vmem:[#allocation2 + $0x18] sm:$0xff] %vm589_vm3, %v575_v34 }
  0xd0   : > { %v450_v36 = vpop.permute.xlu0 %449  ;;  %v514_v37 = vpop.permute.xlu1 %513 }
  0xd1   : > { %v559_v40 = vsel %vm555_vm1, %v380_v35, %v450_v36  ;;  %v670_v41 = vld [vmem:[#allocation2 + $0x8] sm:$0xff]  ;;  %v671_v51 = vld [vmem:[#allocation2 + $0x10] sm:$0xff] }
  0xd2   : > { %v576_v42 = vsel %vm572_vm2, %v559_v40, %v514_v37  ;;  %6707 = vmatmul.mubr.msk.f32.vlgmr.msra.gmra.mxu0 %vm589_vm3, %v670_v41  ;;  %6723 = vmatmul.mubr.msk.f32.vlgmr.msra.gmra.mxu1 %vm589_vm3, %v670_v41  ;;  %v642_v37 = vld [vmem:[#allocation7 + $0xa0] sm:$0xff]  ;;  %v387_v40 = vld [vmem:[%s8085_s21 + $0xd0] sm:$0xff]  ;;  %v639_v41 = vld [vmem:[#allocation7 + $0x88] sm:$0xff] }
  0xd3   : > { %593 = vst.msk [vmem:[#allocation2 + $0x20] sm:$0xff] %vm589_vm3, %v576_v42  ;;  %1162 = vmatpush1.msra.mxu0 %v666_v38  ;;  %1323 = vmatpush1.msra.mxu1 %v668_v39  ;;  %v644_v38 = vld [vmem:[#allocation7 + $0xb0] sm:$0xff]  ;;  %v641_v42 = vld [vmem:[#allocation7 + $0x98] sm:$0xff] }
  0xd4   : > { %v452_v46 = vpop.permute.xlu0 %451  ;;  %v516_v47 = vpop.permute.xlu1 %515  ;;  %853 = vmatprep.mubr.f32.mxu0 %v12064_v0  ;;  %1014 = vmatprep.mubr.f32.mxu1 %v12064_v0 }
  0xd5   : > { %v560_v50 = vsel %vm555_vm1, %v381_v43, %v452_v46  ;;  %1163 = vmatprep.subr.mxu0 %v663_v44  ;;  %1324 = vmatprep.subr.mxu1 %v665_v45 }
  0xd6   : > { %v577_v52 = vsel %vm572_vm2, %v560_v50, %v516_v47  ;;  %6708 = vmatmul.mubr.msk.f32.gmra.mxu0 %vm589_vm3, %v671_v51  ;;  %6724 = vmatmul.mubr.msk.f32.gmra.mxu1 %vm589_vm3, %v671_v51  ;;  %v672_v56 = vld [vmem:[#allocation2 + $0x18] sm:$0xff]  ;;  %v638_v47 = vld [vmem:[#allocation7 + $0x80] sm:$0xff]  ;;  %v635_v51 = vld [vmem:[#allocation7 + $0x68] sm:$0xff] }
  0xd7   : > { %594 = vst.msk [vmem:[#allocation2 + $0x38] sm:$0xff] %vm589_vm3, %v577_v52  ;;  %1164 = vmatpush1.msra.mxu0 %v662_v48  ;;  %1325 = vmatpush1.msra.mxu1 %v664_v49  ;;  %v640_v48 = vld [vmem:[#allocation7 + $0x90] sm:$0xff]  ;;  %v388_v50 = vld [vmem:[%s8085_s21 + $0xd8] sm:$0xff] }
  0xd8   : > { %v454_v57 = vpop.permute.xlu0 %453  ;;  %v518_v58 = vpop.permute.xlu1 %517  ;;  %859 = vmatprep.mubr.f32.mxu0 %v12064_v0  ;;  %1020 = vmatprep.mubr.f32.mxu1 %v12064_v0  ;;  %v637_v52 = vld [vmem:[#allocation7 + $0x78] sm:$0xff] }
  0xd9   : > { %v561_v59 = vsel %vm555_vm1, %v382_v53, %v454_v57  ;;  %1165 = vmatprep.subr.mxu0 %v659_v54  ;;  %1326 = vmatprep.subr.mxu1 %v661_v55  ;;  %v634_v57 = vld [vmem:[#allocation7 + $0x60] sm:$0xff] }
  0xda   : > { %v578_v62 = vsel %vm572_vm2, %v561_v59, %v518_v58  ;;  %6709 = vmatmul.mubr.msk.f32.gmra.mxu0 %vm589_vm3, %v672_v56  ;;  %6725 = vmatmul.mubr.msk.f32.gmra.mxu1 %vm589_vm3, %v672_v56  ;;  %v673_v3 = vld [vmem:[#allocation2 + $0x20] sm:$0xff]  ;;  %v636_v58 = vld [vmem:[#allocation7 + $0x70] sm:$0xff] }
  0xdb   : > { %595 = vst.msk [vmem:[#allocation2 + $0x40] sm:$0xff] %vm589_vm3, %v578_v62  ;;  %865 = vmatprep.mubr.f32.mxu0 %v12064_v0  ;;  %1026 = vmatprep.mubr.f32.mxu1 %v12064_v0  ;;  %v633_v62 = vld [vmem:[#allocation7 + $0x58] sm:$0xff] }
  0xdc   : > { %v456_v4 = vpop.permute.xlu0 %455  ;;  %v520_v5 = vpop.permute.xlu1 %519  ;;  %1166 = vmatpush1.msra.mxu0 %v658_v60  ;;  %1327 = vmatpush1.msra.mxu1 %v660_v61  ;;  %v389_v60 = vld [vmem:[%s8085_s21 + $0x120] sm:$0xff]  ;;  %v631_v61 = vld [vmem:[#allocation7 + $0x48] sm:$0xff] }
  0xdd   : > { %v562_v6 = vsel %vm555_vm1, %v383_v63, %v456_v4  ;;  %1167 = vmatprep.subr.mxu0 %v655_v1  ;;  %1328 = vmatprep.subr.mxu1 %v657_v2  ;;  %v630_v4 = vld [vmem:[#allocation7 + $0x40] sm:$0xff] }
  0xde   : > { %v579_v9 = vsel %vm572_vm2, %v562_v6, %v520_v5  ;;  %6710 = vmatmul.mubr.msk.f32.gmra.mxu0 %vm589_vm3, %v673_v3  ;;  %6726 = vmatmul.mubr.msk.f32.gmra.mxu1 %vm589_vm3, %v673_v3  ;;  %v674_v13 = vld [vmem:[#allocation2 + $0x38] sm:$0xff]  ;;  %v632_v5 = vld [vmem:[#allocation7 + $0x50] sm:$0xff] }
  0xdf   : > { %596 = vst.msk [vmem:[#allocation2 + $0x48] sm:$0xff] %vm589_vm3, %v579_v9  ;;  %871 = vmatprep.mubr.f32.mxu0 %v12064_v0  ;;  %1032 = vmatprep.mubr.f32.mxu1 %v12064_v0  ;;  %v629_v9 = vld [vmem:[#allocation7 + $0x38] sm:$0xff] }
  0xe0   : > { %v458_v14 = vpop.permute.xlu0 %457  ;;  %v522_v15 = vpop.permute.xlu1 %521  ;;  %1168 = vmatpush1.msra.mxu0 %v654_v7  ;;  %1329 = vmatpush1.msra.mxu1 %v656_v8  ;;  %v390_v7 = vld [vmem:[%s8085_s21 + $0x128] sm:$0xff] }
  0xe1   : > { %v563_v16 = vsel %vm555_vm1, %v384_v10, %v458_v14  ;;  %1169 = vmatprep.subr.mxu0 %v651_v11  ;;  %1330 = vmatprep.subr.mxu1 %v653_v12  ;;  %v627_v8 = vld [vmem:[#allocation7 + $0x28] sm:$0xff]  ;;  %v626_v14 = vld [vmem:[#allocation7 + $0x20] sm:$0xff] }
  0xe2   : > { %v580_v19 = vsel %vm572_vm2, %v563_v16, %v522_v15  ;;  %6711 = vmatmul.mubr.msk.f32.gmra.mxu0 %vm589_vm3, %v674_v13  ;;  %6727 = vmatmul.mubr.msk.f32.gmra.mxu1 %vm589_vm3, %v674_v13  ;;  %v675_v23 = vld [vmem:[#allocation2 + $0x40] sm:$0xff]  ;;  %v628_v15 = vld [vmem:[#allocation7 + $0x30] sm:$0xff] }
  0xe3   : > { %597 = vst.msk [vmem:[#allocation2 + $0x50] sm:$0xff] %vm589_vm3, %v580_v19  ;;  %877 = vmatprep.mubr.f32.mxu0 %v12064_v0  ;;  %1038 = vmatprep.mubr.f32.mxu1 %v12064_v0  ;;  %v625_v19 = vld [vmem:[#allocation7 + $0x18] sm:$0xff] }
  0xe4   : > { %v460_v24 = vpop.permute.xlu0 %459  ;;  %v524_v25 = vpop.permute.xlu1 %523  ;;  %1170 = vmatpush1.msra.mxu0 %v650_v17  ;;  %1331 = vmatpush1.msra.mxu1 %v652_v18  ;;  %v391_v17 = vld [vmem:[%s8085_s21 + $0x130] sm:$0xff]  ;;  %v623_v18 = vld [vmem:[#allocation7 + $0x8] sm:$0xff] }
  0xe5   : > { %v564_v26 = vsel %vm555_vm1, %v385_v20, %v460_v24  ;;  %1171 = vmatprep.subr.mxu0 %v647_v21  ;;  %1332 = vmatprep.subr.mxu1 %v649_v22  ;;  %v622_v24 = vld [vmem:[#allocation7] sm:$0xff] }
  0xe6   : > { %v581_v29 = vsel %vm572_vm2, %v564_v26, %v524_v25  ;;  %6712 = vmatmul.mubr.msk.f32.gmra.mxu0 %vm589_vm3, %v675_v23  ;;  %6728 = vmatmul.mubr.msk.f32.gmra.mxu1 %vm589_vm3, %v675_v23  ;;  %v676_v33 = vld [vmem:[#allocation2 + $0x48] sm:$0xff]  ;;  %v624_v25 = vld [vmem:[#allocation7 + $0x10] sm:$0xff] }
  0xe7   : > { %598 = vst.msk [vmem:[#allocation2 + $0x68] sm:$0xff] %vm589_vm3, %v581_v29  ;;  %883 = vmatprep.mubr.f32.mxu0 %v12064_v0  ;;  %1044 = vmatprep.mubr.f32.mxu1 %v12064_v0  ;;  %v1539_v29 = vld [vmem:[#allocation7 + $0x478] sm:$0xff] }
  0xe8   : > { %v462_v34 = vpop.permute.xlu0 %461  ;;  %v526_v35 = vpop.permute.xlu1 %525  ;;  %1172 = vmatpush1.msra.mxu0 %v646_v27  ;;  %1333 = vmatpush1.msra.mxu1 %v648_v28  ;;  %v392_v27 = vld [vmem:[%s8085_s21 + $0x138] sm:$0xff]  ;;  %v1537_v28 = vld [vmem:[#allocation7 + $0x468] sm:$0xff]  ;;  %s7383_s21 = sshll.u32 %s7986_s13, 6  ;;  %s7914_s13 = smov [#allocation9]  }
  0xe9   : > { %v565_v36 = vsel %vm555_vm1, %v386_v30, %v462_v34  ;;  %1173 = vmatprep.subr.mxu0 %v643_v31  ;;  %1334 = vmatprep.subr.mxu1 %v645_v32  ;;  %s12010_s23 = scalar_lea.hbm %s12056_s9, %s7383_s21  ;;  %s7837_s22 = sshll.u32 %s7914_s13, 4  ;;  %s7838_s22 = int_to_ptr.vmem [resolvable:$false] %s7837_s22 }
  0xea   : > { %v582_v39 = vsel %vm572_vm2, %v565_v36, %v526_v35  ;;  %6713 = vmatmul.mubr.msk.f32.gmra.mxu0 %vm589_vm3, %v676_v33  ;;  %6729 = vmatmul.mubr.msk.f32.gmra.mxu1 %vm589_vm3, %v676_v33  ;;  %v677_v43 = vld [vmem:[#allocation2 + $0x50] sm:$0xff]  ;;  %s7839_s16 = scalar_lea.vmem %s7838_s22, 128  ;;  %p7840_p10 = scmp.lt.s32.totalorder %s6586_s17, %s7838_s22 }
  0xeb   : > { %599 = vst.msk [vmem:[#allocation2 + $0x70] sm:$0xff] %vm589_vm3, %v582_v39  ;;  %889 = vmatprep.mubr.f32.mxu0 %v12064_v0  ;;  %1050 = vmatprep.mubr.f32.mxu1 %v12064_v0  ;;  %v1538_v39 = vld [vmem:[#allocation7 + $0x470] sm:$0xff]  ;;  %p7841_p2 = scmp.lt.s32.totalorder %s7839_s16, %s7833_s18 }
  0xec   : > { %v464_v44 = vpop.permute.xlu0 %463  ;;  %v528_v45 = vpop.permute.xlu1 %527  ;;  %1174 = vmatpush1.msra.mxu0 %v642_v37  ;;  %1335 = vmatpush1.msra.mxu1 %v644_v38  ;;  %v1536_v38 = vld [vmem:[#allocation7 + $0x460] sm:$0xff] }
  0xed   : > { %v566_v46 = vsel %vm555_vm1, %v387_v40, %v464_v44  ;;  %1175 = vmatprep.subr.mxu0 %v639_v41  ;;  %1336 = vmatprep.subr.mxu1 %v641_v42  ;;  %v606_v40 = vld [vmem:[#allocation2 + $0x7] sm:$0xff]  ;;  %v1535_v42 = vld [vmem:[#allocation7 + $0x458] sm:$0xff]  ;;  %v1534_v44 = vld [vmem:[#allocation7 + $0x450] sm:$0xff]  ;;  %p7842_p13 = por %p7841_p2, %p7840_p10 }
  0xee   : > { %v583_v49 = vsel %vm572_vm2, %v566_v46, %v528_v45  ;;  %6714 = vmatmul.mubr.msk.f32.gmra.mxu0 %vm589_vm3, %v677_v43  ;;  %6730 = vmatmul.mubr.msk.f32.gmra.mxu1 %vm589_vm3, %v677_v43  ;;  %v678_v53 = vld [vmem:[#allocation2 + $0x68] sm:$0xff]  ;;  %v1532_v43 = vld [vmem:[#allocation7 + $0x440] sm:$0xff] }
  0xef   : > { %600 = vst.msk [vmem:[#allocation2 + $0x78] sm:$0xff] %vm589_vm3, %v583_v49  ;;  %895 = vmatprep.mubr.f32.mxu0 %v12064_v0  ;;  %1056 = vmatprep.mubr.f32.mxu1 %v12064_v0  ;;  %v1533_v41 = vld [vmem:[#allocation7 + $0x448] sm:$0xff]  ;;  %v1528_v49 = vld [vmem:[#allocation7 + $0x420] sm:$0xff]  ;;  %p7843_p0 = pnand %p7842_p13, %p7836_p12 }
  0xf0   : > { %v466_v54 = vpop.permute.xlu0 %465  ;;  %v530_v55 = vpop.permute.xlu1 %529  ;;  %1176 = vmatpush1.msra.mxu0 %v638_v47  ;;  %1337 = vmatpush1.msra.mxu1 %v640_v48  ;;  %v607_v45 = vld [vmem:[#allocation2 + $0xf] sm:$0xff]  ;;  %v1531_v47 = vld [vmem:[#allocation7 + $0x438] sm:$0xff] }
  0xf1   : > { %v567_v56 = vsel %vm555_vm1, %v388_v50, %v466_v54  ;;  %1177 = vmatprep.subr.mxu0 %v635_v51  ;;  %1338 = vmatprep.subr.mxu1 %v637_v52  ;;  %v1529_v46 = vld [vmem:[#allocation7 + $0x428] sm:$0xff]  ;;  %v608_v48 = vld [vmem:[#allocation2 + $0x17] sm:$0xff]  ;;  %v1524_v54 = vld [vmem:[#allocation7 + $0x400] sm:$0xff] }
  0xf2   : > { %v584_v59 = vsel %vm572_vm2, %v567_v56, %v530_v55  ;;  %6715 = vmatmul.mubr.msk.f32.gmra.mxu0 %vm589_vm3, %v678_v53  ;;  %6731 = vmatmul.mubr.msk.f32.gmra.mxu1 %vm589_vm3, %v678_v53  ;;  %v679_v63 = vld [vmem:[#allocation2 + $0x70] sm:$0xff]  ;;  %v1525_v51 = vld [vmem:[#allocation7 + $0x408] sm:$0xff]  ;;  %v1527_v52 = vld [vmem:[#allocation7 + $0x418] sm:$0xff] }
  0xf3   : > { %601 = vst.msk [vmem:[#allocation2 + $0x80] sm:$0xff] %vm589_vm3, %v584_v59  ;;  %901 = vmatprep.mubr.f32.mxu0 %v12064_v0  ;;  %1062 = vmatprep.mubr.f32.mxu1 %v12064_v0  ;;  %v1530_v50 = vld [vmem:[#allocation7 + $0x430] sm:$0xff]  ;;  %v609_v53 = vld [vmem:[#allocation2 + $0x1f] sm:$0xff]  ;;  %v1521_v56 = vld [vmem:[#allocation7 + $0x3e8] sm:$0xff] }
  0xf4   : > { %v468_v1 = vpop.permute.xlu0 %467  ;;  %v532_v2 = vpop.permute.xlu1 %531  ;;  %1178 = vmatpush1.msra.mxu0 %v634_v57  ;;  %1339 = vmatpush1.msra.mxu1 %v636_v58  ;;  %v1526_v55 = vld [vmem:[#allocation7 + $0x410] sm:$0xff]  ;;  %v1523_v57 = vld [vmem:[#allocation7 + $0x3f8] sm:$0xff]  ;;  %v1520_v59 = vld [vmem:[#allocation7 + $0x3e0] sm:$0xff] }
  0xf5   : > { %v568_v3 = vsel %vm555_vm1, %v389_v60, %v468_v1  ;;  %1179 = vmatprep.subr.mxu0 %v631_v61  ;;  %1340 = vmatprep.subr.mxu1 %v633_v62  ;;  %v610_v58 = vld [vmem:[#allocation2 + $0x37] sm:$0xff]  ;;  %v1517_v61 = vld [vmem:[#allocation7 + $0x3c8] sm:$0xff]  ;;  %v1516_v1 = vld [vmem:[#allocation7 + $0x3c0] sm:$0xff] }
  0xf6   : > { %v585_v6 = vsel %vm572_vm2, %v568_v3, %v532_v2  ;;  %6716 = vmatmul.mubr.msk.f32.gmra.mxu0 %vm589_vm3, %v679_v63  ;;  %6732 = vmatmul.mubr.msk.f32.gmra.mxu1 %vm589_vm3, %v679_v63  ;;  %v680_v10 = vld [vmem:[#allocation2 + $0x78] sm:$0xff]  ;;  %v1522_v60 = vld [vmem:[#allocation7 + $0x3f0] sm:$0xff]  ;;  %v1513_v3 = vld [vmem:[#allocation7 + $0x3a8] sm:$0xff] }
  0xf7   : > { %602 = vst.msk [vmem:[#allocation2 + $0x98] sm:$0xff] %vm589_vm3, %v585_v6  ;;  %907 = vmatprep.mubr.f32.mxu0 %v12064_v0  ;;  %1068 = vmatprep.mubr.f32.mxu1 %v12064_v0  ;;  %v1519_v62 = vld [vmem:[#allocation7 + $0x3d8] sm:$0xff]  ;;  %v1518_v2 = vld [vmem:[#allocation7 + $0x3d0] sm:$0xff]  ;;  %v1512_v6 = vld [vmem:[#allocation7 + $0x3a0] sm:$0xff] }
  0xf8   : > { %v470_v11 = vpop.permute.xlu0 %469  ;;  %v534_v12 = vpop.permute.xlu1 %533  ;;  %1180 = vmatpush1.msra.mxu0 %v630_v4  ;;  %1341 = vmatpush1.msra.mxu1 %v632_v5  ;;  %v611_v63 = vld [vmem:[#allocation2 + $0x3f] sm:$0xff]  ;;  %v612_v5 = vld [vmem:[#allocation2 + $0x47] sm:$0xff] }
  0xf9   : > { %v569_v13 = vsel %vm555_vm1, %v390_v7, %v470_v11  ;;  %1181 = vmatprep.subr.mxu0 %v627_v8  ;;  %1342 = vmatprep.subr.mxu1 %v629_v9  ;;  %v1515_v4 = vld [vmem:[#allocation7 + $0x3b8] sm:$0xff]  ;;  %v1514_v7 = vld [vmem:[#allocation7 + $0x3b0] sm:$0xff]  ;;  %v1509_v8 = vld [vmem:[#allocation7 + $0x388] sm:$0xff] }
  0xfa   : > { %v586_v16 = vsel %vm572_vm2, %v569_v13, %v534_v12  ;;  %6717 = vmatmul.mubr.msk.f32.gmra.mxu0 %vm589_vm3, %v680_v10  ;;  %6733 = vmatmul.mubr.msk.f32.gmra.mxu1 %vm589_vm3, %v680_v10  ;;  %v681_v20 = vld [vmem:[#allocation2 + $0x80] sm:$0xff]  ;;  %v1511_v9 = vld [vmem:[#allocation7 + $0x398] sm:$0xff]  ;;  %v613_v10 = vld [vmem:[#allocation2 + $0x4f] sm:$0xff] }
  0xfb   : > { %603 = vst.msk [vmem:[#allocation2 + $0xa0] sm:$0xff] %vm589_vm3, %v586_v16  ;;  %913 = vmatprep.mubr.f32.mxu0 %v12064_v0  ;;  %1074 = vmatprep.mubr.f32.mxu1 %v12064_v0  ;;  %v1508_v11 = vld [vmem:[#allocation7 + $0x380] sm:$0xff]  ;;  %v1510_v12 = vld [vmem:[#allocation7 + $0x390] sm:$0xff]  ;;  %v1505_v13 = vld [vmem:[#allocation7 + $0x368] sm:$0xff] }
  0xfc   : > { %v472_v21 = vpop.permute.xlu0 %471  ;;  %v536_v22 = vpop.permute.xlu1 %535  ;;  %1182 = vmatpush1.msra.mxu0 %v626_v14  ;;  %1343 = vmatpush1.msra.mxu1 %v628_v15  ;;  %v1507_v14 = vld [vmem:[#allocation7 + $0x378] sm:$0xff]  ;;  %v614_v15 = vld [vmem:[#allocation2 + $0x67] sm:$0xff] }
  0xfd   : > { %v570_v23 = vsel %vm555_vm1, %v391_v17, %v472_v21  ;;  %1183 = vmatprep.subr.mxu0 %v623_v18  ;;  %1344 = vmatprep.subr.mxu1 %v625_v19  ;;  %v1504_v16 = vld [vmem:[#allocation7 + $0x360] sm:$0xff]  ;;  %v1506_v17 = vld [vmem:[#allocation7 + $0x370] sm:$0xff]  ;;  %v1501_v18 = vld [vmem:[#allocation7 + $0x348] sm:$0xff] }
  0xfe   : > { %v587_v26 = vsel %vm572_vm2, %v570_v23, %v536_v22  ;;  %6718 = vmatmul.mubr.msk.f32.gmra.mxu0 %vm589_vm3, %v681_v20  ;;  %6734 = vmatmul.mubr.msk.f32.gmra.mxu1 %vm589_vm3, %v681_v20  ;;  %v682_v30 = vld [vmem:[#allocation2 + $0x98] sm:$0xff]  ;;  %v615_v20 = vld [vmem:[#allocation2 + $0x6f] sm:$0xff]  ;;  %v1500_v21 = vld [vmem:[#allocation7 + $0x340] sm:$0xff] }
  0xff   : > { %604 = vst.msk [vmem:[#allocation2 + $0xa8] sm:$0xff] %vm589_vm3, %v587_v26  ;;  %919 = vmatprep.mubr.f32.mxu0 %v12064_v0  ;;  %1080 = vmatprep.mubr.f32.mxu1 %v12064_v0  ;;  %v1503_v19 = vld [vmem:[#allocation7 + $0x358] sm:$0xff]  ;;  %v1502_v22 = vld [vmem:[#allocation7 + $0x350] sm:$0xff]  ;;  %v1497_v23 = vld [vmem:[#allocation7 + $0x328] sm:$0xff] }
 0x100   : > { %v474_v31 = vpop.permute.xlu0 %473  ;;  %v538_v32 = vpop.permute.xlu1 %537  ;;  %1184 = vmatpush1.msra.mxu0 %v622_v24  ;;  %1345 = vmatpush1.msra.mxu1 %v624_v25  ;;  %v1499_v24 = vld [vmem:[#allocation7 + $0x338] sm:$0xff]  ;;  %v1496_v26 = vld [vmem:[#allocation7 + $0x320] sm:$0xff] }
 0x101   : > { %v571_v33 = vsel %vm555_vm1, %v392_v27, %v474_v31  ;;  %1596 = vmatprep.subr.mxu0 %v1537_v28  ;;  %1757 = vmatprep.subr.mxu1 %v1539_v29  ;;  %v616_v25 = vld [vmem:[#allocation2 + $0x77] sm:$0xff]  ;;  %v1493_v28 = vld [vmem:[#allocation7 + $0x308] sm:$0xff]  ;;  %v1492_v31 = vld [vmem:[#allocation7 + $0x300] sm:$0xff] }
 0x102   : > { %v588_v34 = vsel %vm572_vm2, %v571_v33, %v538_v32  ;;  %6719 = vmatmul.mubr.msk.f32.gmra.mxu0 %vm589_vm3, %v682_v30  ;;  %6735 = vmatmul.mubr.msk.f32.gmra.mxu1 %vm589_vm3, %v682_v30  ;;  %v683_v35 = vld [vmem:[#allocation2 + $0xa0] sm:$0xff]  ;;  %v1498_v27 = vld [vmem:[#allocation7 + $0x330] sm:$0xff]  ;;  %v1495_v29 = vld [vmem:[#allocation7 + $0x318] sm:$0xff] }
 0x103   : > { %605 = vst.msk [vmem:[#allocation2 + $0xb0] sm:$0xff] %vm589_vm3, %v588_v34  ;;  %925 = vmatprep.mubr.f32.mxu0 %v12064_v0  ;;  %1086 = vmatprep.mubr.f32.mxu1 %v12064_v0  ;;  %v617_v30 = vld [vmem:[#allocation2 + $0x7f] sm:$0xff]  ;;  %v1494_v32 = vld [vmem:[#allocation7 + $0x310] sm:$0xff] }
 0x104   : > { %v618_v33 = vld [vmem:[#allocation2 + $0x97] sm:$0xff]  ;;  %v619_v34 = vld [vmem:[#allocation2 + $0x9f] sm:$0xff] }
 0x106   : > { %6720 = vmatmul.mubr.msk.f32.gmra.mxu0 %vm589_vm3, %v683_v35  ;;  %6736 = vmatmul.mubr.msk.f32.gmra.mxu1 %vm589_vm3, %v683_v35  ;;  %v684_v36 = vld [vmem:[#allocation2 + $0xa8] sm:$0xff] }
 0x107   : > { %931 = vmatprep.mubr.f32.mxu0 %v12064_v0  ;;  %1092 = vmatprep.mubr.f32.mxu1 %v12064_v0  ;;  %v620_v35 = vld [vmem:[#allocation2 + $0xa7] sm:$0xff] }
 0x10a   : > { %6721 = vmatmul.mubr.msk.f32.gmra.mxu0 %vm589_vm3, %v684_v36  ;;  %6737 = vmatmul.mubr.msk.f32.gmra.mxu1 %vm589_vm3, %v684_v36  ;;  %v685_v37 = vld [vmem:[#allocation2 + $0xb0] sm:$0xff] }
 0x10b   : > { %937 = vmatprep.mubr.f32.mxu0 %v12064_v0  ;;  %1098 = vmatprep.mubr.f32.mxu1 %v12064_v0  ;;  %v621_v36 = vld [vmem:[#allocation2 + $0xaf] sm:$0xff] }
 0x10e   : > { %6722 = vmatmul.mubr.msk.f32.gmra.mxu0 %vm589_vm3, %v685_v37  ;;  %6738 = vmatmul.mubr.msk.f32.gmra.mxu1 %vm589_vm3, %v685_v37  ;;  %v1475_v37 = vld [vmem:[#allocation2 + $0x9] sm:$0xff] }
 0x10f   : > { %1217 = vmatprep.mubr.f32.mxu0 %v12064_v0  ;;  %1378 = vmatprep.mubr.f32.mxu1 %v12064_v0 }
 0x112   : > { %6739 = vmatmul.mubr.msk.f32.vlgmr.msra.gmra.mxu0 %vm589_vm3, %v606_v40  ;;  %6755 = vmatmul.mubr.msk.f32.vlgmr.msra.gmra.mxu1 %vm589_vm3, %v606_v40  ;;  %v1478_v40 = vld [vmem:[#allocation2 + $0x21] sm:$0xff] }
 0x113   : > { %1597 = vmatpush1.msra.mxu0 %v1536_v38  ;;  %1758 = vmatpush1.msra.mxu1 %v1538_v39  ;;  %v1476_v38 = vld [vmem:[#allocation2 + $0x11] sm:$0xff]  ;;  %v1477_v39 = vld [vmem:[#allocation2 + $0x19] sm:$0xff] }
 0x114   : > { %1223 = vmatprep.mubr.f32.mxu0 %v12064_v0  ;;  %1384 = vmatprep.mubr.f32.mxu1 %v12064_v0 }
 0x115   : > { %1598 = vmatprep.subr.mxu0 %v1533_v41  ;;  %1759 = vmatprep.subr.mxu1 %v1535_v42  ;;  %v1479_v41 = vld [vmem:[#allocation2 + $0x39] sm:$0xff]  ;;  %v1480_v42 = vld [vmem:[#allocation2 + $0x41] sm:$0xff] }
 0x116   : > { %6740 = vmatmul.mubr.msk.f32.gmra.mxu0 %vm589_vm3, %v607_v45  ;;  %6756 = vmatmul.mubr.msk.f32.gmra.mxu1 %vm589_vm3, %v607_v45  ;;  %v1483_v45 = vld [vmem:[#allocation2 + $0x69] sm:$0xff] }
 0x117   : > { %1599 = vmatpush1.msra.mxu0 %v1532_v43  ;;  %1760 = vmatpush1.msra.mxu1 %v1534_v44  ;;  %v1481_v43 = vld [vmem:[#allocation2 + $0x49] sm:$0xff]  ;;  %v1482_v44 = vld [vmem:[#allocation2 + $0x51] sm:$0xff] }
 0x118   : > { %1229 = vmatprep.mubr.f32.mxu0 %v12064_v0  ;;  %1390 = vmatprep.mubr.f32.mxu1 %v12064_v0 }
 0x119   : > { %1600 = vmatprep.subr.mxu0 %v1529_v46  ;;  %1761 = vmatprep.subr.mxu1 %v1531_v47  ;;  %v1484_v46 = vld [vmem:[#allocation2 + $0x71] sm:$0xff]  ;;  %v6928_v47 = vld [vmem:[%s12050_s3 + $0x5e8] sm:$0xff] }
 0x11a   : > { %6741 = vmatmul.mubr.msk.f32.gmra.mxu0 %vm589_vm3, %v608_v48  ;;  %6757 = vmatmul.mubr.msk.f32.gmra.mxu1 %vm589_vm3, %v608_v48  ;;  %v6930_v48 = vld [vmem:[%s12050_s3 + $0x5f8] sm:$0xff] }
 0x11b   : > { %1235 = vmatprep.mubr.f32.mxu0 %v12064_v0  ;;  %1396 = vmatprep.mubr.f32.mxu1 %v12064_v0 }
 0x11c   : > { %1601 = vmatpush1.msra.mxu0 %v1528_v49  ;;  %1762 = vmatpush1.msra.mxu1 %v1530_v50  ;;  %v1485_v49 = vld [vmem:[#allocation2 + $0x79] sm:$0xff] }
 0x11d   : > { %1602 = vmatprep.subr.mxu0 %v1525_v51  ;;  %1763 = vmatprep.subr.mxu1 %v1527_v52  ;;  %v6927_v50 = vld [vmem:[%s12050_s3 + $0x5e0] sm:$0xff]  ;;  %v6929_v51 = vld [vmem:[%s12050_s3 + $0x5f0] sm:$0xff]  ;;  %v6924_v52 = vld [vmem:[%s12050_s3 + $0x5c8] sm:$0xff] }
 0x11e   : > { %6742 = vmatmul.mubr.msk.f32.gmra.mxu0 %vm589_vm3, %v609_v53  ;;  %6758 = vmatmul.mubr.msk.f32.gmra.mxu1 %vm589_vm3, %v609_v53  ;;  %v6926_v53 = vld [vmem:[%s12050_s3 + $0x5d8] sm:$0xff] }
 0x11f   : > { %1241 = vmatprep.mubr.f32.mxu0 %v12064_v0  ;;  %1402 = vmatprep.mubr.f32.mxu1 %v12064_v0 }
 0x120   : > { %1603 = vmatpush1.msra.mxu0 %v1524_v54  ;;  %1764 = vmatpush1.msra.mxu1 %v1526_v55  ;;  %v1486_v54 = vld [vmem:[#allocation2 + $0x81] sm:$0xff] }
 0x121   : > { %1604 = vmatprep.subr.mxu0 %v1521_v56  ;;  %1765 = vmatprep.subr.mxu1 %v1523_v57  ;;  %v6923_v55 = vld [vmem:[%s12050_s3 + $0x5c0] sm:$0xff]  ;;  %v6925_v56 = vld [vmem:[%s12050_s3 + $0x5d0] sm:$0xff]  ;;  %v6920_v57 = vld [vmem:[%s12050_s3 + $0x5a8] sm:$0xff] }
 0x122   : > { %6743 = vmatmul.mubr.msk.f32.gmra.mxu0 %vm589_vm3, %v610_v58  ;;  %6759 = vmatmul.mubr.msk.f32.gmra.mxu1 %vm589_vm3, %v610_v58  ;;  %v6922_v58 = vld [vmem:[%s12050_s3 + $0x5b8] sm:$0xff] }
 0x123   : > { %1247 = vmatprep.mubr.f32.mxu0 %v12064_v0  ;;  %1408 = vmatprep.mubr.f32.mxu1 %v12064_v0 }
 0x124   : > { %1605 = vmatpush1.msra.mxu0 %v1520_v59  ;;  %1766 = vmatpush1.msra.mxu1 %v1522_v60  ;;  %v1487_v59 = vld [vmem:[#allocation2 + $0x99] sm:$0xff] }
 0x125   : > { %1606 = vmatprep.subr.mxu0 %v1517_v61  ;;  %1767 = vmatprep.subr.mxu1 %v1519_v62  ;;  %v6919_v60 = vld [vmem:[%s12050_s3 + $0x5a0] sm:$0xff]  ;;  %v6921_v61 = vld [vmem:[%s12050_s3 + $0x5b0] sm:$0xff]  ;;  %v6916_v62 = vld [vmem:[%s12050_s3 + $0x588] sm:$0xff] }
 0x126   : > { %6744 = vmatmul.mubr.msk.f32.gmra.mxu0 %vm589_vm3, %v611_v63  ;;  %6760 = vmatmul.mubr.msk.f32.gmra.mxu1 %vm589_vm3, %v611_v63  ;;  %v6918_v63 = vld [vmem:[%s12050_s3 + $0x598] sm:$0xff] }
 0x127   : > { %1253 = vmatprep.mubr.f32.mxu0 %v12064_v0  ;;  %1414 = vmatprep.mubr.f32.mxu1 %v12064_v0 }
 0x128   : > { %1607 = vmatpush1.msra.mxu0 %v1516_v1  ;;  %1768 = vmatpush1.msra.mxu1 %v1518_v2  ;;  %v1488_v1 = vld [vmem:[#allocation2 + $0xa1] sm:$0xff] }
 0x129   : > { %1608 = vmatprep.subr.mxu0 %v1513_v3  ;;  %1769 = vmatprep.subr.mxu1 %v1515_v4  ;;  %v6915_v2 = vld [vmem:[%s12050_s3 + $0x580] sm:$0xff]  ;;  %v6917_v3 = vld [vmem:[%s12050_s3 + $0x590] sm:$0xff]  ;;  %v6912_v4 = vld [vmem:[%s12050_s3 + $0x568] sm:$0xff] }
 0x12a   : > { %6745 = vmatmul.mubr.msk.f32.gmra.mxu0 %vm589_vm3, %v612_v5  ;;  %6761 = vmatmul.mubr.msk.f32.gmra.mxu1 %vm589_vm3, %v612_v5  ;;  %v6914_v5 = vld [vmem:[%s12050_s3 + $0x578] sm:$0xff] }
 0x12b   : > { %1259 = vmatprep.mubr.f32.mxu0 %v12064_v0  ;;  %1420 = vmatprep.mubr.f32.mxu1 %v12064_v0 }
 0x12c   : > { %1609 = vmatpush1.msra.mxu0 %v1512_v6  ;;  %1770 = vmatpush1.msra.mxu1 %v1514_v7  ;;  %v1489_v6 = vld [vmem:[#allocation2 + $0xa9] sm:$0xff]  ;;  %v6911_v7 = vld [vmem:[%s12050_s3 + $0x560] sm:$0xff] }
 0x12d   : > { %1610 = vmatprep.subr.mxu0 %v1509_v8  ;;  %1771 = vmatprep.subr.mxu1 %v1511_v9  ;;  %v6913_v8 = vld [vmem:[%s12050_s3 + $0x570] sm:$0xff]  ;;  %v6908_v9 = vld [vmem:[%s12050_s3 + $0x548] sm:$0xff] }
 0x12e   : > { %6746 = vmatmul.mubr.msk.f32.gmra.mxu0 %vm589_vm3, %v613_v10  ;;  %6762 = vmatmul.mubr.msk.f32.gmra.mxu1 %vm589_vm3, %v613_v10  ;;  %v6910_v10 = vld [vmem:[%s12050_s3 + $0x558] sm:$0xff] }
 0x12f   : > { %1265 = vmatprep.mubr.f32.mxu0 %v12064_v0  ;;  %1426 = vmatprep.mubr.f32.mxu1 %v12064_v0 }
 0x130   : > { %1611 = vmatpush1.msra.mxu0 %v1508_v11  ;;  %1772 = vmatpush1.msra.mxu1 %v1510_v12  ;;  %v6907_v11 = vld [vmem:[%s12050_s3 + $0x540] sm:$0xff]  ;;  %v6909_v12 = vld [vmem:[%s12050_s3 + $0x550] sm:$0xff] }
 0x131   : > { %1612 = vmatprep.subr.mxu0 %v1505_v13  ;;  %1773 = vmatprep.subr.mxu1 %v1507_v14  ;;  %v1490_v13 = vld [vmem:[#allocation2 + $0xb1] sm:$0xff]  ;;  %v6904_v14 = vld [vmem:[%s12050_s3 + $0x528] sm:$0xff] }
 0x132   : > { %6747 = vmatmul.mubr.msk.f32.gmra.mxu0 %vm589_vm3, %v614_v15  ;;  %6763 = vmatmul.mubr.msk.f32.gmra.mxu1 %vm589_vm3, %v614_v15  ;;  %v6906_v15 = vld [vmem:[%s12050_s3 + $0x538] sm:$0xff] }
 0x133   : > { %1271 = vmatprep.mubr.f32.mxu0 %v12064_v0  ;;  %1432 = vmatprep.mubr.f32.mxu1 %v12064_v0 }
 0x134   : > { %1613 = vmatpush1.msra.mxu0 %v1504_v16  ;;  %1774 = vmatpush1.msra.mxu1 %v1506_v17  ;;  %v6903_v16 = vld [vmem:[%s12050_s3 + $0x520] sm:$0xff]  ;;  %v6905_v17 = vld [vmem:[%s12050_s3 + $0x530] sm:$0xff] }
 0x135   : > { %1614 = vmatprep.subr.mxu0 %v1501_v18  ;;  %1775 = vmatprep.subr.mxu1 %v1503_v19  ;;  %v6900_v18 = vld [vmem:[%s12050_s3 + $0x508] sm:$0xff]  ;;  %v6902_v19 = vld [vmem:[%s12050_s3 + $0x518] sm:$0xff] }
 0x136   : > { %6748 = vmatmul.mubr.msk.f32.gmra.mxu0 %vm589_vm3, %v615_v20  ;;  %6764 = vmatmul.mubr.msk.f32.gmra.mxu1 %vm589_vm3, %v615_v20  ;;  %v6899_v20 = vld [vmem:[%s12050_s3 + $0x500] sm:$0xff] }
 0x137   : > { %1277 = vmatprep.mubr.f32.mxu0 %v12064_v0  ;;  %1438 = vmatprep.mubr.f32.mxu1 %v12064_v0 }
 0x138   : > { %1615 = vmatpush1.msra.mxu0 %v1500_v21  ;;  %1776 = vmatpush1.msra.mxu1 %v1502_v22  ;;  %v6901_v21 = vld [vmem:[%s12050_s3 + $0x510] sm:$0xff]  ;;  %v6896_v22 = vld [vmem:[%s12050_s3 + $0x4e8] sm:$0xff] }
 0x139   : > { %1616 = vmatprep.subr.mxu0 %v1497_v23  ;;  %1777 = vmatprep.subr.mxu1 %v1499_v24  ;;  %v6898_v23 = vld [vmem:[%s12050_s3 + $0x4f8] sm:$0xff] }
 0x13a   : > { %6749 = vmatmul.mubr.msk.f32.gmra.mxu0 %vm589_vm3, %v616_v25  ;;  %6765 = vmatmul.mubr.msk.f32.gmra.mxu1 %vm589_vm3, %v616_v25 }
 0x13b   : > { %1283 = vmatprep.mubr.f32.mxu0 %v12064_v0  ;;  %1444 = vmatprep.mubr.f32.mxu1 %v12064_v0 }
 0x13c   : > { %1617 = vmatpush1.msra.mxu0 %v1496_v26  ;;  %1778 = vmatpush1.msra.mxu1 %v1498_v27  ;;  %v6895_v26 = vld [vmem:[%s12050_s3 + $0x4e0] sm:$0xff]  ;;  %v6897_v27 = vld [vmem:[%s12050_s3 + $0x4f0] sm:$0xff] }
 0x13d   : > { %1618 = vmatprep.subr.mxu0 %v1493_v28  ;;  %1779 = vmatprep.subr.mxu1 %v1495_v29  ;;  %v6892_v28 = vld [vmem:[%s12050_s3 + $0x4c8] sm:$0xff]  ;;  %v6894_v29 = vld [vmem:[%s12050_s3 + $0x4d8] sm:$0xff] }
 0x13e   : > { %6750 = vmatmul.mubr.msk.f32.gmra.mxu0 %vm589_vm3, %v617_v30  ;;  %6766 = vmatmul.mubr.msk.f32.gmra.mxu1 %vm589_vm3, %v617_v30 }
 0x13f   : > { %1289 = vmatprep.mubr.f32.mxu0 %v12064_v0  ;;  %1450 = vmatprep.mubr.f32.mxu1 %v12064_v0 }
 0x140   : > { %1619 = vmatpush1.msra.mxu0 %v1492_v31  ;;  %1780 = vmatpush1.msra.mxu1 %v1494_v32  ;;  %v6891_v32 = vld [vmem:[%s12050_s3 + $0x4c0] sm:$0xff] }
 0x141   : > { %3921 = vmatprep.subr.mxu0 %v6928_v47  ;;  %4034 = vmatprep.subr.mxu1 %v6930_v48  ;;  %v6882_v47 = vld [vmem:[%s12050_s3 + $0x478] sm:$0xff] }
 0x142   : > { %6751 = vmatmul.mubr.msk.f32.gmra.mxu0 %vm589_vm3, %v618_v33  ;;  %6767 = vmatmul.mubr.msk.f32.gmra.mxu1 %vm589_vm3, %v618_v33  ;;  %v6893_v33 = vld [vmem:[%s12050_s3 + $0x4d0] sm:$0xff] }
 0x143   : > { %1295 = vmatprep.mubr.f32.mxu0 %v12064_v0  ;;  %1456 = vmatprep.mubr.f32.mxu1 %v12064_v0 }
 0x146   : > { %6752 = vmatmul.mubr.msk.f32.gmra.mxu0 %vm589_vm3, %v619_v34  ;;  %6768 = vmatmul.mubr.msk.f32.gmra.mxu1 %vm589_vm3, %v619_v34  ;;  %v6888_v34 = vld [vmem:[%s12050_s3 + $0x4a8] sm:$0xff] }
 0x147   : > { %1301 = vmatprep.mubr.f32.mxu0 %v12064_v0  ;;  %1462 = vmatprep.mubr.f32.mxu1 %v12064_v0 }
 0x14a   : > { %6753 = vmatmul.mubr.msk.f32.gmra.mxu0 %vm589_vm3, %v620_v35  ;;  %6769 = vmatmul.mubr.msk.f32.gmra.mxu1 %vm589_vm3, %v620_v35  ;;  %v6890_v35 = vld [vmem:[%s12050_s3 + $0x4b8] sm:$0xff] }
 0x14b   : > { %1307 = vmatprep.mubr.f32.mxu0 %v12064_v0  ;;  %1468 = vmatprep.mubr.f32.mxu1 %v12064_v0 }
 0x14e   : > { %6754 = vmatmul.mubr.msk.f32.gmra.mxu0 %vm589_vm3, %v621_v36  ;;  %6770 = vmatmul.mubr.msk.f32.gmra.mxu1 %vm589_vm3, %v621_v36 }
 0x14f   : > { %1652 = vmatprep.mubr.f32.mxu0 %v12064_v0  ;;  %1813 = vmatprep.mubr.f32.mxu1 %v12064_v0 }
 0x152   : > { %6771 = vmatmul.mubr.msk.f32.vlgmr.msra.gmra.mxu0 %vm589_vm3, %v1475_v37  ;;  %6787 = vmatmul.mubr.msk.f32.vlgmr.msra.gmra.mxu1 %vm589_vm3, %v1475_v37 }
 0x153   : > { %1658 = vmatprep.mubr.f32.mxu0 %v12064_v0  ;;  %1819 = vmatprep.mubr.f32.mxu1 %v12064_v0 }
 0x154   : > { %3922 = vmatpush1.msra.mxu0 %v6927_v50  ;;  %4035 = vmatpush1.msra.mxu1 %v6929_v51  ;;  %v6879_v50 = vld [vmem:[%s12050_s3 + $0x460] sm:$0xff]  ;;  %v6881_v51 = vld [vmem:[%s12050_s3 + $0x470] sm:$0xff] }
 0x155   : > { %3923 = vmatprep.subr.mxu0 %v6924_v52  ;;  %4036 = vmatprep.subr.mxu1 %v6926_v53  ;;  %v6876_v52 = vld [vmem:[%s12050_s3 + $0x448] sm:$0xff]  ;;  %v6878_v53 = vld [vmem:[%s12050_s3 + $0x458] sm:$0xff] }
 0x156   : > { %6772 = vmatmul.mubr.msk.f32.gmra.mxu0 %vm589_vm3, %v1476_v38  ;;  %6788 = vmatmul.mubr.msk.f32.gmra.mxu1 %vm589_vm3, %v1476_v38  ;;  %v6887_v38 = vld [vmem:[%s12050_s3 + $0x4a0] sm:$0xff] }
 0x157   : > { %1664 = vmatprep.mubr.f32.mxu0 %v12064_v0  ;;  %1825 = vmatprep.mubr.f32.mxu1 %v12064_v0 }
 0x158   : > { %3924 = vmatpush1.msra.mxu0 %v6923_v55  ;;  %4037 = vmatpush1.msra.mxu1 %v6925_v56  ;;  %v6875_v56 = vld [vmem:[%s12050_s3 + $0x440] sm:$0xff] }
 0x159   : > { %3925 = vmatprep.subr.mxu0 %v6920_v57  ;;  %4038 = vmatprep.subr.mxu1 %v6922_v58  ;;  %v6877_v57 = vld [vmem:[%s12050_s3 + $0x450] sm:$0xff]  ;;  %v6872_v58 = vld [vmem:[%s12050_s3 + $0x428] sm:$0xff] }
 0x15a   : > { %6773 = vmatmul.mubr.msk.f32.gmra.mxu0 %vm589_vm3, %v1477_v39  ;;  %6789 = vmatmul.mubr.msk.f32.gmra.mxu1 %vm589_vm3, %v1477_v39  ;;  %v6889_v39 = vld [vmem:[%s12050_s3 + $0x4b0] sm:$0xff] }
 0x15b   : > { %1670 = vmatprep.mubr.f32.mxu0 %v12064_v0  ;;  %1831 = vmatprep.mubr.f32.mxu1 %v12064_v0 }
 0x15c   : > { %3926 = vmatpush1.msra.mxu0 %v6919_v60  ;;  %4039 = vmatpush1.msra.mxu1 %v6921_v61 }
 0x15d   : > { %3927 = vmatprep.subr.mxu0 %v6916_v62  ;;  %4040 = vmatprep.subr.mxu1 %v6918_v63  ;;  %v6871_v62 = vld [vmem:[%s12050_s3 + $0x420] sm:$0xff]  ;;  %v6873_v63 = vld [vmem:[%s12050_s3 + $0x430] sm:$0xff] }
 0x15e   : > { %6774 = vmatmul.mubr.msk.f32.gmra.mxu0 %vm589_vm3, %v1478_v40  ;;  %6790 = vmatmul.mubr.msk.f32.gmra.mxu1 %vm589_vm3, %v1478_v40  ;;  %v6884_v40 = vld [vmem:[%s12050_s3 + $0x488] sm:$0xff] }
 0x15f   : > { %1676 = vmatprep.mubr.f32.mxu0 %v12064_v0  ;;  %1837 = vmatprep.mubr.f32.mxu1 %v12064_v0 }
 0x160   : > { %3928 = vmatpush1.msra.mxu0 %v6915_v2  ;;  %4041 = vmatpush1.msra.mxu1 %v6917_v3  ;;  %v6870_v2 = vld [vmem:[%s12050_s3 + $0x418] sm:$0xff] }
 0x161   : > { %3929 = vmatprep.subr.mxu0 %v6912_v4  ;;  %4042 = vmatprep.subr.mxu1 %v6914_v5  ;;  %v6867_v5 = vld [vmem:[%s12050_s3 + $0x400] sm:$0xff] }
 0x162   : > { %6775 = vmatmul.mubr.msk.f32.gmra.mxu0 %vm589_vm3, %v1479_v41  ;;  %6791 = vmatmul.mubr.msk.f32.gmra.mxu1 %vm589_vm3, %v1479_v41  ;;  %v6886_v41 = vld [vmem:[%s12050_s3 + $0x498] sm:$0xff] }
 0x163   : > { %1682 = vmatprep.mubr.f32.mxu0 %v12064_v0  ;;  %1843 = vmatprep.mubr.f32.mxu1 %v12064_v0 }
 0x164   : > { %3930 = vmatpush1.msra.mxu0 %v6911_v7  ;;  %4043 = vmatpush1.msra.mxu1 %v6913_v8  ;;  %v6992_v7 = vld [vmem:[%s12050_s3 + $0x7e8] sm:$0xff]  ;;  %v6994_v8 = vld [vmem:[%s12050_s3 + $0x7f8] sm:$0xff] }
 0x165   : > { %3931 = vmatprep.subr.mxu0 %v6908_v9  ;;  %4044 = vmatprep.subr.mxu1 %v6910_v10 }
 0x166   : > { %6776 = vmatmul.mubr.msk.f32.gmra.mxu0 %vm589_vm3, %v1480_v42  ;;  %6792 = vmatmul.mubr.msk.f32.gmra.mxu1 %vm589_vm3, %v1480_v42 }
 0x167   : > { %1688 = vmatprep.mubr.f32.mxu0 %v12064_v0  ;;  %1849 = vmatprep.mubr.f32.mxu1 %v12064_v0 }
 0x168   : > { %3932 = vmatpush1.msra.mxu0 %v6907_v11  ;;  %4045 = vmatpush1.msra.mxu1 %v6909_v12  ;;  %v6991_v11 = vld [vmem:[%s12050_s3 + $0x7e0] sm:$0xff]  ;;  %v6993_v12 = vld [vmem:[%s12050_s3 + $0x7f0] sm:$0xff] }
 0x169   : > { %3933 = vmatprep.subr.mxu0 %v6904_v14  ;;  %4046 = vmatprep.subr.mxu1 %v6906_v15  ;;  %v6990_v14 = vld [vmem:[%s12050_s3 + $0x7d8] sm:$0xff] }
 0x16a   : > { %6777 = vmatmul.mubr.msk.f32.gmra.mxu0 %vm589_vm3, %v1481_v43  ;;  %6793 = vmatmul.mubr.msk.f32.gmra.mxu1 %vm589_vm3, %v1481_v43 }
 0x16b   : > { %1694 = vmatprep.mubr.f32.mxu0 %v12064_v0  ;;  %1855 = vmatprep.mubr.f32.mxu1 %v12064_v0 }
 0x16c   : > { %3934 = vmatpush1.msra.mxu0 %v6903_v16  ;;  %4047 = vmatpush1.msra.mxu1 %v6905_v17  ;;  %v6987_v17 = vld [vmem:[%s12050_s3 + $0x7c0] sm:$0xff] }
 0x16d   : > { %3935 = vmatprep.subr.mxu0 %v6900_v18  ;;  %4048 = vmatprep.subr.mxu1 %v6902_v19  ;;  %v6989_v18 = vld [vmem:[%s12050_s3 + $0x7d0] sm:$0xff] }
 0x16e   : > { %6778 = vmatmul.mubr.msk.f32.gmra.mxu0 %vm589_vm3, %v1482_v44  ;;  %6794 = vmatmul.mubr.msk.f32.gmra.mxu1 %vm589_vm3, %v1482_v44  ;;  %v6883_v44 = vld [vmem:[%s12050_s3 + $0x480] sm:$0xff] }
 0x16f   : > { %1700 = vmatprep.mubr.f32.mxu0 %v12064_v0  ;;  %1861 = vmatprep.mubr.f32.mxu1 %v12064_v0 }
 0x170   : > { %3936 = vmatpush1.msra.mxu0 %v6899_v20  ;;  %4049 = vmatpush1.msra.mxu1 %v6901_v21  ;;  %v6984_v21 = vld [vmem:[%s12050_s3 + $0x7a8] sm:$0xff] }
 0x171   : > { %3937 = vmatprep.subr.mxu0 %v6896_v22  ;;  %4050 = vmatprep.subr.mxu1 %v6898_v23  ;;  %v6986_v22 = vld [vmem:[%s12050_s3 + $0x7b8] sm:$0xff] }
 0x172   : > { %6779 = vmatmul.mubr.msk.f32.gmra.mxu0 %vm589_vm3, %v1483_v45  ;;  %6795 = vmatmul.mubr.msk.f32.gmra.mxu1 %vm589_vm3, %v1483_v45  ;;  %v6885_v45 = vld [vmem:[%s12050_s3 + $0x490] sm:$0xff] }
 0x173   : > { %1706 = vmatprep.mubr.f32.mxu0 %v12064_v0  ;;  %1867 = vmatprep.mubr.f32.mxu1 %v12064_v0 }
 0x174   : > { %3938 = vmatpush1.msra.mxu0 %v6895_v26  ;;  %4051 = vmatpush1.msra.mxu1 %v6897_v27  ;;  %v6983_v27 = vld [vmem:[%s12050_s3 + $0x7a0] sm:$0xff] }
 0x175   : > { %3939 = vmatprep.subr.mxu0 %v6892_v28  ;;  %4052 = vmatprep.subr.mxu1 %v6894_v29  ;;  %v6985_v28 = vld [vmem:[%s12050_s3 + $0x7b0] sm:$0xff] }
 0x176   : > { %6780 = vmatmul.mubr.msk.f32.gmra.mxu0 %vm589_vm3, %v1484_v46  ;;  %6796 = vmatmul.mubr.msk.f32.gmra.mxu1 %vm589_vm3, %v1484_v46  ;;  %v6880_v46 = vld [vmem:[%s12050_s3 + $0x468] sm:$0xff] }
 0x177   : > { %1712 = vmatprep.mubr.f32.mxu0 %v12064_v0  ;;  %1873 = vmatprep.mubr.f32.mxu1 %v12064_v0 }
 0x178   : > { %3940 = vmatpush1.msra.mxu0 %v6891_v32  ;;  %4053 = vmatpush1.msra.mxu1 %v6893_v33 }
 0x179   : > { %3941 = vmatprep.subr.mxu0 %v6888_v34  ;;  %4054 = vmatprep.subr.mxu1 %v6890_v35  ;;  %v6980_v35 = vld [vmem:[%s12050_s3 + $0x788] sm:$0xff] }
 0x17a   : > { %6781 = vmatmul.mubr.msk.f32.gmra.mxu0 %vm589_vm3, %v1485_v49  ;;  %6797 = vmatmul.mubr.msk.f32.gmra.mxu1 %vm589_vm3, %v1485_v49 }
 0x17b   : > { %1718 = vmatprep.mubr.f32.mxu0 %v12064_v0  ;;  %1879 = vmatprep.mubr.f32.mxu1 %v12064_v0 }
 0x17c   : > { %3942 = vmatpush1.msra.mxu0 %v6887_v38  ;;  %4055 = vmatpush1.msra.mxu1 %v6889_v39  ;;  %v6982_v38 = vld [vmem:[%s12050_s3 + $0x798] sm:$0xff] }
 0x17d   : > { %3943 = vmatprep.subr.mxu0 %v6884_v40  ;;  %4056 = vmatprep.subr.mxu1 %v6886_v41  ;;  %v6979_v41 = vld [vmem:[%s12050_s3 + $0x780] sm:$0xff] }
 0x17e   : > { %6782 = vmatmul.mubr.msk.f32.gmra.mxu0 %vm589_vm3, %v1486_v54  ;;  %6798 = vmatmul.mubr.msk.f32.gmra.mxu1 %vm589_vm3, %v1486_v54 }
 0x17f   : > { %1724 = vmatprep.mubr.f32.mxu0 %v12064_v0  ;;  %1885 = vmatprep.mubr.f32.mxu1 %v12064_v0 }
 0x180   : > { %3944 = vmatpush1.msra.mxu0 %v6883_v44  ;;  %4057 = vmatpush1.msra.mxu1 %v6885_v45  ;;  %v6981_v44 = vld [vmem:[%s12050_s3 + $0x790] sm:$0xff] }
 0x181   : > { %3945 = vmatprep.subr.mxu0 %v6880_v46  ;;  %4058 = vmatprep.subr.mxu1 %v6882_v47  ;;  %v6976_v47 = vld [vmem:[%s12050_s3 + $0x768] sm:$0xff] }
 0x182   : > { %6783 = vmatmul.mubr.msk.f32.gmra.mxu0 %vm589_vm3, %v1487_v59  ;;  %6799 = vmatmul.mubr.msk.f32.gmra.mxu1 %vm589_vm3, %v1487_v59  ;;  %v6874_v59 = vld [vmem:[%s12050_s3 + $0x438] sm:$0xff] }
 0x183   : > { %1730 = vmatprep.mubr.f32.mxu0 %v12064_v0  ;;  %1891 = vmatprep.mubr.f32.mxu1 %v12064_v0 }
 0x184   : > { %3946 = vmatpush1.msra.mxu0 %v6879_v50  ;;  %4059 = vmatpush1.msra.mxu1 %v6881_v51  ;;  %v6978_v50 = vld [vmem:[%s12050_s3 + $0x778] sm:$0xff]  ;;  %v6975_v51 = vld [vmem:[%s12050_s3 + $0x760] sm:$0xff] }
 0x185   : > { %3947 = vmatprep.subr.mxu0 %v6876_v52  ;;  %4060 = vmatprep.subr.mxu1 %v6878_v53  ;;  %v6977_v52 = vld [vmem:[%s12050_s3 + $0x770] sm:$0xff] }
 0x186   : > { %6784 = vmatmul.mubr.msk.f32.gmra.mxu0 %vm589_vm3, %v1488_v1  ;;  %6800 = vmatmul.mubr.msk.f32.gmra.mxu1 %vm589_vm3, %v1488_v1  ;;  %v6868_v1 = vld [vmem:[%s12050_s3 + $0x408] sm:$0xff] }
 0x187   : > { %1736 = vmatprep.mubr.f32.mxu0 %v12064_v0  ;;  %1897 = vmatprep.mubr.f32.mxu1 %v12064_v0 }
 0x188   : > { %3948 = vmatpush1.msra.mxu0 %v6875_v56  ;;  %4061 = vmatpush1.msra.mxu1 %v6877_v57  ;;  %v6972_v57 = vld [vmem:[%s12050_s3 + $0x748] sm:$0xff] }
 0x189   : > { %3949 = vmatprep.subr.mxu0 %v6872_v58  ;;  %4062 = vmatprep.subr.mxu1 %v6874_v59  ;;  %v6974_v58 = vld [vmem:[%s12050_s3 + $0x758] sm:$0xff] }
 0x18a   : > { %6785 = vmatmul.mubr.msk.f32.gmra.mxu0 %vm589_vm3, %v1489_v6  ;;  %6801 = vmatmul.mubr.msk.f32.gmra.mxu1 %vm589_vm3, %v1489_v6  ;;  %v6869_v6 = vld [vmem:[%s12050_s3 + $0x410] sm:$0xff] }
 0x18b   : > { %1742 = vmatprep.mubr.f32.mxu0 %v12064_v0  ;;  %1903 = vmatprep.mubr.f32.mxu1 %v12064_v0 }
 0x18c   : > { %3950 = vmatpush1.msra.mxu0 %v6871_v62  ;;  %4063 = vmatpush1.msra.mxu1 %v6873_v63  ;;  %v6971_v63 = vld [vmem:[%s12050_s3 + $0x740] sm:$0xff] }
 0x18d   : > { %3951 = vmatprep.subr.mxu0 %v6868_v1  ;;  %4064 = vmatprep.subr.mxu1 %v6870_v2  ;;  %v6973_v1 = vld [vmem:[%s12050_s3 + $0x750] sm:$0xff] }
 0x18e   : > { %6786 = vmatmul.mubr.msk.f32.gmra.mxu0 %vm589_vm3, %v1490_v13  ;;  %6802 = vmatmul.mubr.msk.f32.gmra.mxu1 %vm589_vm3, %v1490_v13  ;;  %v6988_v13 = vld [vmem:[%s12050_s3 + $0x7c8] sm:$0xff] }
 0x18f   : > { %3952 = vmatpush1.msra.mxu0 %v6867_v5  ;;  %4065 = vmatpush1.msra.mxu1 %v6869_v6 }
 0x190   : > { %3953 = vmatprep.subr.mxu0 %v6992_v7  ;;  %4066 = vmatprep.subr.mxu1 %v6994_v8 }
 0x191   : > { %3954 = vmatpush2.msra.mxu0 %v6991_v11  ;;  %4067 = vmatpush2.msra.mxu1 %v6993_v12 }
 0x192   : > { %v8525_v24 = vpop.f32.mrf.mxu0  ;;  %v8527_v25 = vpop.f32.mrf.mxu1  ;;  %3955 = vmatprep.subr.mxu0 %v6988_v13  ;;  %4068 = vmatprep.subr.mxu1 %v6990_v14  ;;  %v6968_v14 = vld [vmem:[%s12050_s3 + $0x728] sm:$0xff] }
 0x193   : > { %3956 = vmatpush2.msra.mxu0 %v6987_v17  ;;  %4069 = vmatpush2.msra.mxu1 %v6989_v18  ;;  %v6970_v17 = vld [vmem:[%s12050_s3 + $0x738] sm:$0xff] }
 0x194   : > { %v8541_v30 = vpop.f32.mrf.mxu0  ;;  %v8543_v31 = vpop.f32.mrf.mxu1  ;;  %3957 = vmatprep.subr.mxu0 %v6984_v21  ;;  %4070 = vmatprep.subr.mxu1 %v6986_v22  ;;  %v6967_v22 = vld [vmem:[%s12050_s3 + $0x720] sm:$0xff] }
 0x195   : > { %3958 = vmatpush2.msra.mxu0 %v6983_v27  ;;  %4071 = vmatpush2.msra.mxu1 %v6985_v28  ;;  %v6969_v27 = vld [vmem:[%s12050_s3 + $0x730] sm:$0xff] }
 0x196   : > { %v8557_v36 = vpop.f32.mrf.mxu0  ;;  %v8559_v37 = vpop.f32.mrf.mxu1  ;;  %3959 = vmatprep.subr.mxu0 %v6980_v35  ;;  %4072 = vmatprep.subr.mxu1 %v6982_v38  ;;  %v6964_v38 = vld [vmem:[%s12050_s3 + $0x708] sm:$0xff] }
 0x197   : > { %3960 = vmatpush2.msra.mxu0 %v6979_v41  ;;  %4073 = vmatpush2.msra.mxu1 %v6981_v44  ;;  %v6966_v41 = vld [vmem:[%s12050_s3 + $0x718] sm:$0xff] }
 0x198   : > { %v8573_v42 = vpop.f32.mrf.mxu0  ;;  %v8575_v43 = vpop.f32.mrf.mxu1  ;;  %3961 = vmatprep.subr.mxu0 %v6976_v47  ;;  %4074 = vmatprep.subr.mxu1 %v6978_v50  ;;  %v6963_v50 = vld [vmem:[%s12050_s3 + $0x700] sm:$0xff] }
 0x199   : > { %3962 = vmatpush2.msra.mxu0 %v6975_v51  ;;  %4075 = vmatpush2.msra.mxu1 %v6977_v52  ;;  %v6965_v51 = vld [vmem:[%s12050_s3 + $0x710] sm:$0xff] }
 0x19a   : > { %v8589_v48 = vpop.f32.mrf.mxu0  ;;  %v8591_v49 = vpop.f32.mrf.mxu1  ;;  %3963 = vmatprep.subr.mxu0 %v6972_v57  ;;  %4076 = vmatprep.subr.mxu1 %v6974_v58 }
 0x19b   : > { %3964 = vmatpush2.msra.mxu0 %v6971_v63  ;;  %4077 = vmatpush2.msra.mxu1 %v6973_v1  ;;  %v6960_v1 = vld [vmem:[%s12050_s3 + $0x6e8] sm:$0xff] }
 0x19c   : > { %v8605_v54 = vpop.f32.mrf.mxu0  ;;  %v8607_v55 = vpop.f32.mrf.mxu1  ;;  %3965 = vmatprep.subr.mxu0 %v6968_v14  ;;  %4078 = vmatprep.subr.mxu1 %v6970_v17  ;;  %v6962_v14 = vld [vmem:[%s12050_s3 + $0x6f8] sm:$0xff]  ;;  %v6959_v17 = vld [vmem:[%s12050_s3 + $0x6e0] sm:$0xff] }
 0x19d   : > { %3966 = vmatpush2.msra.mxu0 %v6967_v22  ;;  %4079 = vmatpush2.msra.mxu1 %v6969_v27  ;;  %v6961_v22 = vld [vmem:[%s12050_s3 + $0x6f0] sm:$0xff] }
 0x19e   : > { %v8621_v60 = vpop.f32.mrf.mxu0  ;;  %v8623_v61 = vpop.f32.mrf.mxu1  ;;  %3967 = vmatprep.subr.mxu0 %v6964_v38  ;;  %4080 = vmatprep.subr.mxu1 %v6966_v41  ;;  %v6956_v41 = vld [vmem:[%s12050_s3 + $0x6c8] sm:$0xff] }
 0x19f   : > { %3968 = vmatpush2.msra.mxu0 %v6963_v50  ;;  %4081 = vmatpush2.msra.mxu1 %v6965_v51  ;;  %v6958_v50 = vld [vmem:[%s12050_s3 + $0x6d8] sm:$0xff] }
 0x1a0   : > { %v8637_v3 = vpop.f32.mrf.mxu0  ;;  %v8639_v4 = vpop.f32.mrf.mxu1  ;;  %3969 = vmatprep.subr.mxu0 %v6960_v1  ;;  %4082 = vmatprep.subr.mxu1 %v6962_v14  ;;  %v6955_v14 = vld [vmem:[%s12050_s3 + $0x6c0] sm:$0xff] }
 0x1a1   : > { %3970 = vmatpush2.msra.mxu0 %v6959_v17  ;;  %4083 = vmatpush2.msra.mxu1 %v6961_v22  ;;  %v6957_v17 = vld [vmem:[%s12050_s3 + $0x6d0] sm:$0xff] }
 0x1a2   : > { %v8653_v9 = vpop.f32.mrf.mxu0  ;;  %v8655_v10 = vpop.f32.mrf.mxu1  ;;  %3971 = vmatprep.subr.mxu0 %v6956_v41  ;;  %4084 = vmatprep.subr.mxu1 %v6958_v50 }
 0x1a3   : > { %3972 = vmatpush2.msra.mxu0 %v6955_v14  ;;  %4085 = vmatpush2.msra.mxu1 %v6957_v17  ;;  %v6954_v14 = vld [vmem:[%s12050_s3 + $0x6b8] sm:$0xff] }
 0x1a4   : > { %v8669_v15 = vpop.f32.mrf.mxu0  ;;  %v8671_v16 = vpop.f32.mrf.mxu1  ;;  %4086 = vmatprep.subr.mxu1 %v6954_v14  ;;  %v6948_v14 = vld [vmem:[%s12050_s3 + $0x688] sm:$0xff] }
 0x1a6   : > { %v8679_v19 = vpop.f32.mrf.mxu0  ;;  %v8681_v20 = vpop.f32.mrf.mxu1 }
 0x1a8   : > { %v8689_v23 = vpop.f32.mrf.mxu0  ;;  %v8691_v26 = vpop.f32.mrf.mxu1 }
 0x1aa   : > { %v8699_v29 = vpop.f32.mrf.mxu0  ;;  %v8701_v32 = vpop.f32.mrf.mxu1 }
 0x1ac   : > { %v8703_v33 = vpop.f32.mrf.mxu0  ;;  %v8705_v34 = vpop.f32.mrf.mxu1 }
 0x1ae   : > { %v8713_v39 = vpop.f32.mrf.mxu0  ;;  %v8715_v40 = vpop.f32.mrf.mxu1 }
 0x1b0   : > { %v8723_v45 = vpop.f32.mrf.mxu0  ;;  %v8725_v46 = vpop.f32.mrf.mxu1 }
 0x1b2   : > { %v8739_v53 = vpop.f32.mrf.mxu0  ;;  %v8741_v56 = vpop.f32.mrf.mxu1 }
 0x1b4   : > { %v8749_v59 = vpop.f32.mrf.mxu0  ;;  %v8751_v62 = vpop.f32.mrf.mxu1 }
 0x1b5   : > { %12091 = vst [vmem:[#allocation15_spill] sm:$0xff] %v8751_v62 }
 0x1b6   : > { %v8759_v2 = vpop.f32.mrf.mxu0  ;;  %v8761_v5 = vpop.f32.mrf.mxu1 }
 0x1b8   : > { %v8763_v6 = vpop.f32.mrf.mxu0  ;;  %v8765_v7 = vpop.f32.mrf.mxu1 }
 0x1b9   : > { %12092 = vst [vmem:[#allocation16_spill] sm:$0xff] %v8763_v6  ;;  %12093 = vst [vmem:[#allocation17_spill] sm:$0xff] %v8765_v7 }
 0x1ba   : > { %v8767_v8 = vpop.f32.mrf.mxu0  ;;  %v8769_v11 = vpop.f32.mrf.mxu1 }
 0x1bc   : > { %v8771_v12 = vpop.f32.mrf.mxu0  ;;  %v8773_v13 = vpop.f32.mrf.mxu1 }
 0x1bd   : > { %12094 = vst [vmem:[#allocation18_spill] sm:$0xff] %v8771_v12  ;;  %12095 = vst [vmem:[#allocation19_spill] sm:$0xff] %v8773_v13 }
 0x1be   : > { %v8781_v18 = vpop.f32.mrf.mxu0  ;;  %v8783_v21 = vpop.f32.mrf.mxu1 }
 0x1c0   : > { %v8791_v28 = vpop.f32.mrf.mxu0  ;;  %v8793_v35 = vpop.f32.mrf.mxu1 }
 0x1c1   : > { %12096 = vst [vmem:[#allocation20_spill] sm:$0xff] %v8791_v28  ;;  %12097 = vst [vmem:[#allocation21_spill] sm:$0xff] %v8793_v35  ;;  %v6950_v28 = vld [vmem:[%s12050_s3 + $0x698] sm:$0xff] }
 0x1c2   : > { %v8801_v44 = vpop.f32.mrf.mxu0  ;;  %v8803_v47 = vpop.f32.mrf.mxu1 }
 0x1c4   : > { %v8811_v52 = vpop.f32.mrf.mxu0  ;;  %v8813_v57 = vpop.f32.mrf.mxu1 }
 0x1c5   : > { %12098 = vst [vmem:[#allocation22_spill] sm:$0xff] %v8811_v52  ;;  %12099 = vst [vmem:[#allocation23_spill] sm:$0xff] %v8813_v57  ;;  %v6952_v57 = vld [vmem:[%s12050_s3 + $0x6a8] sm:$0xff] }
 0x1c6   : > { %v8815_v58 = vpop.f32.mrf.mxu0  ;;  %v8817_v63 = vpop.f32.mrf.mxu1  ;;  %3973 = vmatprep.subr.mxu0 %v6952_v57 }
 0x1c8   : > { %v8831_v27 = vpop.f32.mrf.mxu0  ;;  %v8833_v38 = vpop.f32.mrf.mxu1 }
 0x1c9   : > { %12100 = vst [vmem:[#allocation24_spill] sm:$0xff] %v8831_v27  ;;  %12101 = vst [vmem:[#allocation25_spill] sm:$0xff] %v8833_v38 }
 0x1ca   : > { %v8841_v51 = vpop.f32.mrf.mxu0  ;;  %v8843_v1 = vpop.f32.mrf.mxu1 }
 0x1cc   : > { %v8851_v22 = vpop.f32.mrf.mxu0  ;;  %v8853_v0 = vpop.f32.mrf.mxu1 }
 0x1cd   : > { %12102 = vst [vmem:[#allocation26_spill] sm:$0xff] %v8851_v22  ;;  %12103 = vst [vmem:[#allocation27_spill] sm:$0xff] %v8853_v0  ;;  %v6951_v0 = vld [vmem:[%s12050_s3 + $0x6a0] sm:$0xff] }
 0x1ce   : > { %v8855_v38 = vpop.f32.mrf.mxu0  ;;  %v8857_v27 = vpop.f32.mrf.mxu1  ;;  %3974 = vmatpush2.msra.mxu0 %v6951_v0  ;;  %v6947_v0 = vld [vmem:[%s12050_s3 + $0x680] sm:$0xff] }
 0x1cf   : > { %3975 = vmatprep.subr.mxu0 %v6948_v14 }
 0x1d0   : > { %v8859_v41 = vpop.f32.mrf.mxu0  ;;  %v8861_v50 = vpop.f32.mrf.mxu1  ;;  %3976 = vmatpush2.msra.mxu0 %v6947_v0  ;;  %v6946_v0 = vld [vmem:[%s12050_s3 + $0x678] sm:$0xff] }
 0x1d1   : > { %12104 = vst [vmem:[#allocation28_spill] sm:$0xff] %v8859_v41  ;;  %12105 = vst [vmem:[#allocation29_spill] sm:$0xff] %v8861_v50  ;;  %v6953_v50 = vld [vmem:[%s12050_s3 + $0x6b0] sm:$0xff] }
 0x1d2   : > { %v1219_v17 = vpop.f32.mrf.mxu0  ;;  %v1380_v22 = vpop.f32.mrf.mxu1  ;;  %4087 = vmatpush2.msra.mxu1 %v6953_v50 }
 0x1d3   : > { %v8876_v41 = vadd.f32 %v1219_v17, %v8525_v24  ;;  %v8879_v52 = vadd.f32 %v1380_v22, %v8527_v25  ;;  %4088 = vmatprep.subr.mxu1 %v6950_v28  ;;  %v6949_v25 = vld [vmem:[%s12050_s3 + $0x690] sm:$0xff] }
 0x1d4   : > { %v8881_v35 = vpop.f32.mrf.mxu0  ;;  %v8883_v57 = vpop.f32.mrf.mxu1  ;;  %4089 = vmatpush2.msra.mxu1 %v6949_v25  ;;  %v6945_v25 = vld [vmem:[%s12050_s3 + $0x670] sm:$0xff] }
 0x1d5   : > { %4090 = vmatprep.subr.mxu1 %v6946_v0 }
 0x1d6   : > { %v1225_v13 = vpop.f32.mrf.mxu0  ;;  %v1386_v24 = vpop.f32.mrf.mxu1  ;;  %4091 = vmatpush2.msra.mxu1 %v6945_v25 }
 0x1d7   : > { %v8898_v22 = vadd.f32 %v1225_v13, %v8557_v36  ;;  %v8901_v50 = vadd.f32 %v1386_v24, %v8559_v37  ;;  %v6944_v24 = vld [vmem:[%s12050_s3 + $0x668] sm:$0xff] }
 0x1d8   : > { %v8903_v17 = vpop.f32.mrf.mxu0  ;;  %v8905_v14 = vpop.f32.mrf.mxu1  ;;  %3977 = vmatprep.subr.mxu0 %v6944_v24 }
 0x1d9   : > { %12106 = vst [vmem:[#allocation30_spill] sm:$0xff] %v8898_v22  ;;  %12107 = vst [vmem:[#allocation31_spill] sm:$0xff] %v8901_v50 }
 0x1da   : > { %v1231_v28 = vpop.f32.mrf.mxu0  ;;  %v1392_v12 = vpop.f32.mrf.mxu1 }
 0x1db   : > { %v8908_v7 = vadd.f32 %v1231_v28, %v8589_v48  ;;  %v8911_v6 = vadd.f32 %v1392_v12, %v8591_v49  ;;  %v6943_v12 = vld [vmem:[%s12050_s3 + $0x660] sm:$0xff] }
 0x1dc   : > { %v8913_v62 = vpop.f32.mrf.mxu0  ;;  %v8915_v36 = vpop.f32.mrf.mxu1  ;;  %3978 = vmatpush2.msra.mxu0 %v6943_v12 }
 0x1dd   : > { %12108 = vst [vmem:[#allocation32_spill] sm:$0xff] %v8908_v7  ;;  %12109 = vst [vmem:[#allocation33_spill] sm:$0xff] %v8911_v6 }
 0x1de   : > { %v1237_v37 = vpop.f32.mrf.mxu0  ;;  %v1398_v13 = vpop.f32.mrf.mxu1 }
 0x1df   : > { %v8924_v48 = vadd.f32 %v1237_v37, %v8621_v60  ;;  %v8927_v49 = vadd.f32 %v1398_v13, %v8623_v61  ;;  %v6940_v60 = vld [vmem:[%s12050_s3 + $0x648] sm:$0xff]  ;;  %v6942_v61 = vld [vmem:[%s12050_s3 + $0x658] sm:$0xff]  ;;  %v6939_v37 = vld [vmem:[%s12050_s3 + $0x640] sm:$0xff] }
 0x1e0   : > { %v8935_v28 = vpop.f32.mrf.mxu0  ;;  %v8937_v6 = vpop.f32.mrf.mxu1  ;;  %3979 = vmatprep.subr.mxu0 %v6940_v60  ;;  %4092 = vmatprep.subr.mxu1 %v6942_v61  ;;  %v6941_v13 = vld [vmem:[%s12050_s3 + $0x650] sm:$0xff] }
 0x1e1   : > { %12110 = vst [vmem:[#allocation34_spill] sm:$0xff] %v8924_v48  ;;  %12111 = vst [vmem:[#allocation35_spill] sm:$0xff] %v8927_v49  ;;  %3980 = vmatpush2.msra.mxu0 %v6939_v37  ;;  %4093 = vmatpush2.msra.mxu1 %v6941_v13  ;;  %v6936_v49 = vld [vmem:[%s12050_s3 + $0x628] sm:$0xff]  ;;  %v6938_v48 = vld [vmem:[%s12050_s3 + $0x638] sm:$0xff] }
 0x1e2   : > { %v1243_v24 = vpop.f32.mrf.mxu0  ;;  %v1404_v0 = vpop.f32.mrf.mxu1  ;;  %3981 = vmatprep.subr.mxu0 %v6936_v49  ;;  %4094 = vmatprep.subr.mxu1 %v6938_v48  ;;  %v6932_v48 = vld [vmem:[%s12050_s3 + $0x608] sm:$0xff]  ;;  %v6934_v49 = vld [vmem:[%s12050_s3 + $0x618] sm:$0xff] }
 0x1e3   : > { %v8952_v12 = vadd.f32 %v1243_v24, %v8653_v9  ;;  %v8955_v25 = vadd.f32 %v1404_v0, %v8655_v10  ;;  %v6935_v9 = vld [vmem:[%s12050_s3 + $0x620] sm:$0xff]  ;;  %v6937_v10 = vld [vmem:[%s12050_s3 + $0x630] sm:$0xff] }
 0x1e4   : > { %v8957_v60 = vpop.f32.mrf.mxu0  ;;  %v8959_v61 = vpop.f32.mrf.mxu1  ;;  %3982 = vmatpush2.msra.mxu0 %v6935_v9  ;;  %4095 = vmatpush2.msra.mxu1 %v6937_v10 }
 0x1e5   : > { %12112 = vst [vmem:[#allocation36_spill] sm:$0xff] %v8952_v12  ;;  %12113 = vst [vmem:[#allocation37_spill] sm:$0xff] %v8955_v25  ;;  %3983 = vmatprep.subr.mxu0 %v6932_v48  ;;  %4096 = vmatprep.subr.mxu1 %v6934_v49 }
 0x1e6   : > { %v1249_v37 = vpop.f32.mrf.mxu0  ;;  %v1410_v13 = vpop.f32.mrf.mxu1 }
 0x1e7   : > { %v8974_v24 = vadd.f32 %v1249_v37, %v8679_v19  ;;  %v8977_v0 = vadd.f32 %v1410_v13, %v8681_v20  ;;  %v6931_v19 = vld [vmem:[%s12050_s3 + $0x600] sm:$0xff]  ;;  %v6933_v20 = vld [vmem:[%s12050_s3 + $0x610] sm:$0xff] }
 0x1e8   : > { %v8985_v25 = vpop.f32.mrf.mxu0  ;;  %v8987_v12 = vpop.f32.mrf.mxu1  ;;  %3984 = vmatpush2.msra.mxu0 %v6931_v19  ;;  %4097 = vmatpush2.msra.mxu1 %v6933_v20 }
 0x1e9   : > { %12114 = vst [vmem:[#allocation38_spill] sm:$0xff] %v8974_v24  ;;  %12115 = vst [vmem:[#allocation39_spill] sm:$0xff] %v8977_v0 }
 0x1ea   : > { %v1255_v37 = vpop.f32.mrf.mxu0  ;;  %v1416_v13 = vpop.f32.mrf.mxu1 }
 0x1eb   : > { %v8996_v9 = vadd.f32 %v1255_v37, %v8699_v29  ;;  %v8999_v10 = vadd.f32 %v1416_v13, %v8701_v32 }
 0x1ec   : > { %v9001_v48 = vpop.f32.mrf.mxu0  ;;  %v9003_v49 = vpop.f32.mrf.mxu1 }
 0x1ed   : > { %12116 = vst [vmem:[#allocation40_spill] sm:$0xff] %v8996_v9  ;;  %12117 = vst [vmem:[#allocation41_spill] sm:$0xff] %v8999_v10 }
 0x1ee   : > { %v1261_v0 = vpop.f32.mrf.mxu0  ;;  %v1422_v24 = vpop.f32.mrf.mxu1 }
 0x1ef   : > { %v9006_v7 = vadd.f32 %v1261_v0, %v8713_v39  ;;  %v9009_v19 = vadd.f32 %v1422_v24, %v8715_v40  ;;  %v3717_v39 = vld [vmem:[%s12050_s3 + $0x1e8] sm:$0xff]  ;;  %v3719_v40 = vld [vmem:[%s12050_s3 + $0x1f8] sm:$0xff] }
 0x1f0   : > { %v9011_v20 = vpop.f32.mrf.mxu0  ;;  %v9013_v50 = vpop.f32.mrf.mxu1  ;;  %4147 = vmatprep.subr.mxu0 %v3717_v39  ;;  %4260 = vmatprep.subr.mxu1 %v3719_v40 }
 0x1f1   : > { %12118 = vst [vmem:[#allocation42_spill] sm:$0xff] %v9006_v7  ;;  %12119 = vst [vmem:[#allocation43_spill] sm:$0xff] %v9009_v19 }
 0x1f2   : > { %v1267_v29 = vpop.f32.mrf.mxu0  ;;  %v1428_v37 = vpop.f32.mrf.mxu1 }
 0x1f3   : > { %v9016_v32 = vadd.f32 %v1267_v29, %v8739_v53  ;;  %v9019_v13 = vadd.f32 %v1428_v37, %v8741_v56 }
 0x1f4   : > { %v9021_v10 = vpop.f32.mrf.mxu0  ;;  %v9023_v9 = vpop.f32.mrf.mxu1 }
 0x1f5   : > { %12120 = vst [vmem:[#allocation44_spill] sm:$0xff] %v9016_v32  ;;  %12121 = vst [vmem:[#allocation45_spill] sm:$0xff] %v9019_v13 }
 0x1f6   : > { %v1273_v24 = vpop.f32.mrf.mxu0  ;;  %v1434_v53 = vpop.f32.mrf.mxu1 }
 0x1f7   : > { %v9032_v0 = vadd.f32 %v1273_v24, %v8759_v2  ;;  %v9035_v56 = vadd.f32 %v1434_v53, %v8761_v5 }
 0x1f8   : > { %v9037_v29 = vpop.f32.mrf.mxu0  ;;  %v9039_v37 = vpop.f32.mrf.mxu1 }
 0x1f9   : > { %12122 = vst [vmem:[#allocation46_spill] sm:$0xff] %v9032_v0  ;;  %12123 = vst [vmem:[#allocation47_spill] sm:$0xff] %v9035_v56 }
 0x1fa   : > { %v1279_v13 = vpop.f32.mrf.mxu0  ;;  %v1440_v32 = vpop.f32.mrf.mxu1 }
 0x1fb   : > { %v9042_v19 = vadd.f32 %v1279_v13, %v8767_v8  ;;  %v9045_v39 = vadd.f32 %v1440_v32, %v8769_v11  ;;  %v12066_v8 = vlaneseq }
 0x1fc   : > { %v9047_v40 = vpop.f32.mrf.mxu0  ;;  %v9049_v7 = vpop.f32.mrf.mxu1 }
 0x1fd   : > { %12124 = vst [vmem:[#allocation48_spill] sm:$0xff] %v9042_v19  ;;  %12125 = vst [vmem:[#allocation49_spill] sm:$0xff] %v9045_v39 }
 0x1fe   : > { %v1285_v2 = vpop.f32.mrf.mxu0  ;;  %v1446_v24 = vpop.f32.mrf.mxu1 }
 0x1ff   : > { %v9052_v5 = vadd.f32 %v1285_v2, %v8781_v18  ;;  %v9055_v53 = vadd.f32 %v1446_v24, %v8783_v21  ;;  %v9072_v21 = vshrl.u32 %v12066_v8, 7 }
 0x200   : > { %v9057_v56 = vpop.f32.mrf.mxu0  ;;  %v9059_v0 = vpop.f32.mrf.mxu1 }
 0x201   : > { %12126 = vst [vmem:[#allocation50_spill] sm:$0xff] %v9052_v5  ;;  %12127 = vst [vmem:[#allocation51_spill] sm:$0xff] %v9055_v53  ;;  %v7912_v53 = vmov 1983009808   ;;  %v9088_v8 = vsub.s32 2, %v9072_v21 }
 0x202   : > { %v1291_v13 = vpop.f32.mrf.mxu0  ;;  %v1452_v11 = vpop.f32.mrf.mxu1  ;;  %12131 = vst [vmem:[#allocation55_spill] sm:$0xff] %v9072_v21  ;;  %v2191_v5 = vunpack.c.l.s4 %v7912_v53 }
 0x203   : > { %v9062_v32 = vadd.f32 %v1291_v13, %v8801_v44  ;;  %v9065_v39 = vadd.f32 %v1452_v11, %v8803_v47  ;;  %v9085_v11 = vsub.s32 0, %v9072_v21  ;;  %12137 = vst [vmem:[#allocation61_spill] sm:$0xff] %v9088_v8 }
 0x204   : > { %v9067_v19 = vpop.f32.mrf.mxu0  ;;  %v9069_v18 = vpop.f32.mrf.mxu1 }
 0x205   : > { %12128 = vst [vmem:[#allocation52_spill] sm:$0xff] %v9062_v32  ;;  %12129 = vst [vmem:[#allocation53_spill] sm:$0xff] %v9065_v39 }
 0x206   : > { %12130 = vst [vmem:[#allocation54_spill] sm:$0xff] %v9069_v18  ;;  %v1297_v2 = vpop.f32.mrf.mxu0  ;;  %v1458_v24 = vpop.f32.mrf.mxu1  ;;  %12136 = vst [vmem:[#allocation60_spill] sm:$0xff] %v9085_v11 }
 0x207   : > { %v9075_v22 = vadd.f32 %v1297_v2, %v8815_v58  ;;  %v9078_v44 = vadd.f32 %v1458_v24, %v8817_v63  ;;  %v1974_v58 = vld [vmem:[%s12049_s2] sm:$0xf]  ;;  %v2192_v2 = vunpack.c.0.s8 %v2191_v5  ;;  %v1222_v63 = vadd.f32 %v8881_v35, %v8541_v30 }
 0x208   : > { %v9080_v13 = vpop.f32.mrf.mxu0  ;;  %v9082_v47 = vpop.f32.mrf.mxu1  ;;  %v9109_v18 = vrot.slane %v1974_v58, %v9088_v8 }
 0x209   : > { %12132 = vst [vmem:[#allocation56_spill] sm:$0xff] %v9075_v22  ;;  %12133 = vst [vmem:[#allocation57_spill] sm:$0xff] %v9078_v44 }
 0x20a   : > { %12134 = vst [vmem:[#allocation58_spill] sm:$0xff] %v9080_v13  ;;  %12135 = vst [vmem:[#allocation59_spill] sm:$0xff] %v9082_v47  ;;  %v1303_v39 = vpop.f32.mrf.mxu0  ;;  %v1464_v32 = vpop.f32.mrf.mxu1  ;;  %v9106_v13 = vrot.slane %v1974_v58, %v9085_v11 }
 0x20b   : > { %v9096_v24 = vadd.f32 %v1303_v39, %v8841_v51  ;;  %v9099_v44 = vadd.f32 %v1464_v32, %v8843_v1  ;;  %v12141_v51 = vsub.s32 1, %v9072_v21  ;;  %v12142_v1 = vsub.s32 3, %v9072_v21 }
 0x20c   : > { %v9101_v22 = vpop.f32.mrf.mxu0  ;;  %v9103_v47 = vpop.f32.mrf.mxu1 }
 0x20d   : > { %12138 = vst [vmem:[#allocation62_spill] sm:$0xff] %v9096_v24  ;;  %12139 = vst [vmem:[#allocation63_spill] sm:$0xff] %v9099_v44  ;;  %v9115_v39 = vrot.slane %v1974_v58, %v12141_v51  ;;  %v9119_v32 = vrot.slane %v1974_v58, %v12142_v1  ;;  %v9122_v44 = vsub.s32 %v2192_v2, %v9072_v21  ;;  %v12158_v1 = vld [vmem:[#allocation23_spill] sm:$0xff] }
 0x20e   : > { %12140 = vst [vmem:[#allocation64_spill] sm:$0xff] %v9103_v47  ;;  %v1309_v5 = vpop.f32.mrf.mxu0  ;;  %v1470_v53 = vpop.f32.mrf.mxu1  ;;  %v1383_v24 = vadd.f32 %v8883_v57, %v8543_v31  ;;  %v1228_v47 = vadd.f32 %v8903_v17, %v8573_v42  ;;  %v1389_v51 = vadd.f32 %v8905_v14, %v8575_v43  ;;  %v9138_v58 = vadd.f32 %v8913_v62, %v8605_v54 }
 0x20f   : > { %12143 = vst [vmem:[#allocation65_spill] sm:$0xff] %v9122_v44  ;;  %v9129_v30 = vadd.f32 %v1309_v5, %v8855_v38  ;;  %v9132_v35 = vadd.f32 %v1470_v53, %v8857_v27  ;;  %v9142_v2 = vadd.f32 %v8915_v36, %v8607_v55  ;;  %v9146_v31 = vadd.f32 %v8935_v28, %v8637_v3  ;;  %v12150_v36 = vld [vmem:[#allocation17_spill] sm:$0xff] }
 0x210   : > { %v9148_v42 = vpop.f32.mrf.mxu0  ;;  %v9150_v38 = vpop.f32.mrf.mxu1  ;;  %v9154_v27 = vadd.f32 %v8937_v6, %v8639_v4  ;;  %v9158_v43 = vadd.f32 %v8957_v60, %v8669_v15  ;;  %v9162_v54 = vadd.f32 %v8959_v61, %v8671_v16  ;;  %v9166_v55 = vadd.f32 %v8985_v25, %v8689_v23  ;;  %v12152_v61 = vld [vmem:[#allocation19_spill] sm:$0xff] }
 0x211   : > { %12144 = vst [vmem:[#allocation66_spill] sm:$0xff] %v9129_v30  ;;  %12145 = vst [vmem:[#allocation67_spill] sm:$0xff] %v9132_v35  ;;  %v9170_v3 = vadd.f32 %v8987_v12, %v8691_v26  ;;  %v9174_v4 = vadd.f32 %v9001_v48, %v8703_v33  ;;  %v9178_v15 = vadd.f32 %v9003_v49, %v8705_v34  ;;  %v12148_v34 = vld [vmem:[#allocation15_spill] sm:$0xff]  ;;  %v12154_v49 = vld [vmem:[#allocation21_spill] sm:$0xff] }
 0x212   : > { %12146 = vst [vmem:[#allocation68_spill] sm:$0xff] %v9148_v42  ;;  %12147 = vst [vmem:[#allocation69_spill] sm:$0xff] %v9150_v38  ;;  %v9182_v16 = vadd.f32 %v9011_v20, %v8723_v45  ;;  %v1654_v62 = vpop.f32.mrf.mxu0  ;;  %v1815_v6 = vpop.f32.mrf.mxu1  ;;  %v9186_v23 = vadd.f32 %v9013_v50, %v8725_v46  ;;  %v9190_v26 = vadd.f32 %v9021_v10, %v8749_v59  ;;  %v12149_v45 = vld [vmem:[#allocation16_spill] sm:$0xff]  ;;  %v12151_v50 = vld [vmem:[#allocation18_spill] sm:$0xff] }
 0x213   : > { %v1910_v33 = vadd.f32 %v1654_v62, %v8876_v41  ;;  %v1912_v57 = vadd.f32 %v1815_v6, %v8879_v52  ;;  %v9196_v17 = vadd.f32 %v9023_v9, %v12148_v34  ;;  %v9200_v14 = vadd.f32 %v9037_v29, %v12149_v45  ;;  %v12153_v10 = vld [vmem:[#allocation20_spill] sm:$0xff]  ;;  %v12159_v62 = vld [vmem:[#allocation54_spill] sm:$0xff]  ;;  %v12161_v34 = vld [vmem:[#allocation31_spill] sm:$0xff] }
 0x214   : > { %v9204_v46 = vadd.f32 %v9039_v37, %v12150_v36  ;;  %v9208_v59 = vadd.f32 %v9047_v40, %v12151_v50  ;;  %v1656_v28 = vpop.f32.mrf.mxu0  ;;  %v1817_v41 = vpop.f32.mrf.mxu1  ;;  %v9214_v9 = vadd.f32 %v9049_v7, %v12152_v61  ;;  %v9218_v48 = vadd.f32 %v9057_v56, %v12153_v10 }
 0x215   : > { %v1996_v52 = vadd.f32 %v9106_v13, %v1910_v33  ;;  %v1998_v12 = vadd.f32 %v9109_v18, %v1912_v57  ;;  %v1911_v25 = vadd.f32 %v1656_v28, %v1222_v63  ;;  %v1913_v60 = vadd.f32 %v1817_v41, %v1383_v24  ;;  %v12160_v33 = vld [vmem:[#allocation30_spill] sm:$0xff] }
 0x216   : > { %v9222_v20 = vadd.f32 %v9059_v0, %v12154_v49  ;;  %v1660_v29 = vpop.f32.mrf.mxu0  ;;  %v1821_v37 = vpop.f32.mrf.mxu1  ;;  %v12155_v40 = vlaneseq  ;;  %v12156_v7 = vmov 0.0   ;;  %v12157_v0 = vld [vmem:[#allocation22_spill] sm:$0xff]  ;;  %v9241_v6 = vadd.f32 %v12159_v62, %v12158_v1  ;;  %v12164_v1 = vld [vmem:[#allocation32_spill] sm:$0xff] }
 0x217   : > { %v2060_v53 = vmax.f32 %v1996_v52, 0.0  ;;  %v2062_v5 = vmax.f32 %v1998_v12, 0.0  ;;  %v1997_v63 = vadd.f32 %v9115_v39, %v1911_v25  ;;  %v1999_v24 = vadd.f32 %v9119_v32, %v1913_v60  ;;  %v12162_v25 = vld [vmem:[#allocation24_spill] sm:$0xff]  ;;  %v12163_v60 = vld [vmem:[#allocation58_spill] sm:$0xff] }
 0x218   : > { %vm2798_vm4 = vcmp.lt.s32.totalorder %v12155_v40, 256  ;;  %v9237_v56 = vadd.f32 %v9067_v19, %v12157_v0  ;;  %v1914_v57 = vadd.f32 %v1660_v29, %v12160_v33  ;;  %v1916_v45 = vadd.f32 %v1821_v37, %v12161_v34  ;;  %v1662_v36 = vpop.f32.mrf.mxu0  ;;  %v1823_v50 = vpop.f32.mrf.mxu1 }
 0x219   : > { %2801 = vst.msk [vmem:[#allocation3 + $0x7] ss:$8 sm:$0x3] %vm2798_vm4, %v12156_v7  ;;  %2804 = vst.msk [vmem:[#allocation3 + $0x47] ss:$8 sm:$0x3] %vm2798_vm4, %v12156_v7  ;;  %v2124_v28 = vmax.f32 %v2060_v53, %v2062_v5  ;;  %v1915_v12 = vadd.f32 %v1662_v36, %v1228_v47  ;;  %v9247_v61 = vadd.f32 %v12163_v60, %v12162_v25 }
 0x21a   : > { %2807 = vst.msk [vmem:[#allocation3 + $0x87] ss:$8 sm:$0x3] %vm2798_vm4, %v12156_v7  ;;  %2810 = vst.msk [vmem:[#allocation3 + $0xc7] ss:$8 sm:$0x3] %vm2798_vm4, %v12156_v7  ;;  %v2000_v19 = vadd.f32 %v9106_v13, %v1914_v57  ;;  %v2002_v10 = vadd.f32 %v9109_v18, %v1916_v45  ;;  %v1917_v49 = vadd.f32 %v1823_v50, %v1389_v51  ;;  %v1666_v40 = vpop.f32.mrf.mxu0  ;;  %v1827_v0 = vpop.f32.mrf.mxu1 }
 0x21b   : > { %2813 = vst.msk [vmem:[#allocation3 + $0x30] ss:$8 sm:$0x3] %vm2798_vm4, %v12156_v7  ;;  %2816 = vst.msk [vmem:[#allocation3 + $0x70] ss:$8 sm:$0x3] %vm2798_vm4, %v12156_v7  ;;  %v2001_v37 = vadd.f32 %v9115_v39, %v1915_v12  ;;  %v1918_v62 = vadd.f32 %v1666_v40, %v12164_v1 }
 0x21c   : > { %2819 = vst.msk [vmem:[#allocation3 + $0xb0] ss:$8 sm:$0x3] %vm2798_vm4, %v12156_v7  ;;  %2822 = vst.msk [vmem:[#allocation3 + $0xf0] ss:$8 sm:$0x3] %vm2798_vm4, %v12156_v7  ;;  %v2003_v57 = vadd.f32 %v9119_v32, %v1917_v49  ;;  %v1668_v36 = vpop.f32.mrf.mxu0  ;;  %v1829_v45 = vpop.f32.mrf.mxu1 }
 0x21d   : > { %v2061_v41 = vmax.f32 %v1997_v63, 0.0  ;;  %v2063_v52 = vmax.f32 %v1999_v24, 0.0  ;;  %v12165_v53 = vld [vmem:[#allocation33_spill] sm:$0xff]  ;;  %v12167_v47 = vld [vmem:[#allocation59_spill] sm:$0xff]  ;;  %v2064_v33 = vmax.f32 %v2000_v19, 0.0  ;;  %v2066_v34 = vmax.f32 %v2002_v10, 0.0 }
 0x21e   : > { %v1920_v5 = vadd.f32 %v1827_v0, %v12165_v53  ;;  %v12166_v63 = vld [vmem:[#allocation25_spill] sm:$0xff]  ;;  %v2065_v25 = vmax.f32 %v2001_v37, 0.0  ;;  %v2067_v12 = vmax.f32 %v2003_v57, 0.0  ;;  %v1919_v40 = vadd.f32 %v1668_v36, %v9138_v58  ;;  %v1672_v0 = vpop.f32.mrf.mxu0 }
 0x21f   : > { %v2125_v29 = vmax.f32 %v2061_v41, %v2063_v52  ;;  %v9256_v24 = vadd.f32 %v12167_v47, %v12166_v63  ;;  %v2004_v41 = vadd.f32 %v9106_v13, %v1918_v62  ;;  %v2126_v52 = vmax.f32 %v2064_v33, %v2066_v34  ;;  %v12169_v62 = vld [vmem:[#allocation34_spill] sm:$0xff] }
 0x220   : > { %v2006_v60 = vadd.f32 %v9109_v18, %v1920_v5  ;;  %v1921_v1 = vadd.f32 %v1829_v45, %v9142_v2  ;;  %v9266_v37 = vadd.f32 %v9115_v39, %v1919_v40  ;;  %v1922_v53 = vadd.f32 %v1672_v0, %v12169_v62 }
 0x221   : > { %12168 = vst [vmem:[#allocation15_spill] sm:$0xff] %v9256_v24  ;;  %v2188_v51 = vcombine.low %v2124_v28, %v2125_v29  ;;  %v2189_v50 = vcombine.high %v2124_v28, %v2125_v29  ;;  %v2068_v49 = vmax.f32 %v2004_v41, 0.0  ;;  %v2127_v28 = vmax.f32 %v2065_v25, %v2067_v12 }
 0x222   : > { %v2070_v29 = vmax.f32 %v2006_v60, 0.0  ;;  %v2069_v36 = vmax.f32 %v9266_v37, 0.0  ;;  %v2007_v12 = vadd.f32 %v9119_v32, %v1921_v1  ;;  %v9276_v60 = vadd.f32 %v9106_v13, %v1922_v53 }
 0x223   : > { %v2196_v19 = vrot.slane %v2188_v51, %v9122_v44  ;;  %v2203_v10 = vrot.slane %v2189_v50, %v9122_v44  ;;  %v2206_v33 = vcombine.low %v2126_v52, %v2127_v28  ;;  %v2207_v34 = vcombine.high %v2126_v52, %v2127_v28 }
 0x224   : > { %v9269_v57 = vmax.f32 %v2068_v49, %v2070_v29 }
 0x225   : > { %v2204_v5 = vcombine.high %v2196_v19, %v2196_v19  ;;  %v2205_v63 = vcombine.high %v2203_v10, %v2203_v10  ;;  %v6803_v58 = vrot.slane %v2196_v19, 9  ;;  %v6805_v47 = vrot.slane %v2203_v10, 9 }
 0x226   : > { %v2214_v25 = vrot.slane %v2206_v33, %v9122_v44  ;;  %v2221_v41 = vrot.slane %v2207_v34, %v9122_v44  ;;  %v1833_v33 = vpop.f32.mrf.mxu1  ;;  %v1674_v34 = vpop.f32.mrf.mxu0 }
 0x227   : > { %v6804_v51 = vrot.slane %v2204_v5, 9  ;;  %v6806_v2 = vrot.slane %v2205_v63, 9  ;;  %v2732_v45 = vmax.f32 %v2196_v19, %v6803_v58  ;;  %v2734_v50 = vmax.f32 %v2203_v10, %v6805_v47 }
 0x228   : > { %v2222_v28 = vcombine.high %v2214_v25, %v2214_v25  ;;  %v2223_v29 = vcombine.high %v2221_v41, %v2221_v41  ;;  %v6809_v58 = vrot.slane %v2221_v41, 9 }
 0x229   : > { %v2733_v52 = vmax.f32 %v2204_v5, %v6804_v51  ;;  %v2735_v40 = vmax.f32 %v2205_v63, %v6806_v2  ;;  %v2891_v0 = vrot.slane %v2732_v45, %v9085_v11  ;;  %v2895_v49 = vrot.slane %v2732_v45, %v9088_v8 }
 0x22a   : > { %v2907_v19 = vrot.slane %v2734_v50, %v9085_v11  ;;  %v2911_v10 = vrot.slane %v2734_v50, %v9088_v8  ;;  %v6807_v5 = vrot.slane %v2214_v25, 9  ;;  %v6808_v63 = vrot.slane %v2222_v28, 9 }
 0x22b   : > { %v2899_v37 = vrot.slane %v2733_v52, %v9085_v11  ;;  %v2903_v1 = vrot.slane %v2733_v52, %v9088_v8  ;;  %v2915_v62 = vrot.slane %v2735_v40, %v9085_v11  ;;  %v2919_v53 = vrot.slane %v2735_v40, %v9088_v8 }
 0x22c   : > { %v6810_v47 = vrot.slane %v2223_v29, 9  ;;  %v2071_v45 = vmax.f32 %v2007_v12, 0.0  ;;  %v2072_v50 = vmax.f32 %v9276_v60, 0.0  ;;  %v2736_v21 = vmax.f32 %v2214_v25, %v6807_v5 }
 0x22d   : > { %v3401_v51 = vsel %vm3400_vm5, %v2899_v37, %v2891_v0  ;;  %v3414_v2 = vsel %vm3400_vm5, %v2903_v1, %v2895_v49  ;;  %v2737_v38 = vmax.f32 %v2222_v28, %v6808_v63  ;;  %v2738_v30 = vmax.f32 %v2221_v41, %v6809_v58  ;;  %v1835_v49 = vpop.f32.mrf.mxu1 }
 0x22e   : > { %v3403_v7 = vsel %vm3402_vm6, %v2907_v19, %v3401_v51  ;;  %v3415_v52 = vsel %vm3402_vm6, %v2911_v10, %v3414_v2  ;;  %v2739_v42 = vmax.f32 %v2223_v29, %v6810_v47  ;;  %v2923_v24 = vrot.slane %v2736_v21, %v9085_v11  ;;  %v1678_v19 = vpop.f32.mrf.mxu0  ;;  %v12171_v2 = vld [vmem:[#allocation36_spill] sm:$0xff] }
 0x22f   : > { %v3405_v40 = vsel %vm3404_vm7, %v2915_v62, %v3403_v7  ;;  %v3416_v35 = vsel %vm3404_vm7, %v2919_v53, %v3415_v52  ;;  %v2927_v0 = vrot.slane %v2736_v21, %v9088_v8  ;;  %v2931_v12 = vrot.slane %v2737_v38, %v9085_v11  ;;  %v12170_v21 = vld [vmem:[#allocation35_spill] sm:$0xff] }
 0x230   : > { %v2935_v60 = vrot.slane %v2737_v38, %v9088_v8  ;;  %v2939_v10 = vrot.slane %v2738_v30, %v9085_v11  ;;  %v2943_v25 = vrot.slane %v2738_v30, %v9088_v8  ;;  %v2947_v7 = vrot.slane %v2739_v42, %v9085_v11 }
 0x231   : > { %v2951_v28 = vrot.slane %v2739_v42, %v9088_v8  ;;  %v3407_v41 = vsel %vm3406_vm8, %v2923_v24, %v3405_v40  ;;  %v3417_v29 = vsel %vm3406_vm8, %v2927_v0, %v3416_v35  ;;  %v2129_v37 = vmax.f32 %v2069_v36, %v2071_v45  ;;  %v1839_v35 = vpop.f32.mrf.mxu1  ;;  %v1680_v36 = vpop.f32.mrf.mxu0  ;;  %v12172_v40 = vld [vmem:[#allocation37_spill] sm:$0xff] }
 0x232   : > { %v1924_v1 = vadd.f32 %v1833_v33, %v12170_v21  ;;  %v3409_v62 = vsel %vm3408_vm9, %v2931_v12, %v3407_v41  ;;  %v3418_v38 = vsel %vm3408_vm9, %v2935_v60, %v3417_v29  ;;  %v1923_v53 = vadd.f32 %v1674_v34, %v9146_v31 }
 0x233   : > { %v1925_v5 = vadd.f32 %v1835_v49, %v9154_v27  ;;  %v3411_v30 = vsel %vm3410_vm10, %v2939_v10, %v3409_v62  ;;  %v3419_v63 = vsel %vm3410_vm10, %v2943_v25, %v3418_v38  ;;  %v2224_v42 = vcombine.low %v9269_v57, %v2129_v37  ;;  %v1841_v62 = vpop.f32.mrf.mxu1 }
 0x234   : > { %v2225_v24 = vcombine.high %v9269_v57, %v2129_v37  ;;  %v3413_v58 = vsel %vm3412_vm11, %v2947_v7, %v3411_v30  ;;  %v3420_v47 = vsel %vm3412_vm11, %v2951_v28, %v3419_v63  ;;  %v2010_v33 = vadd.f32 %v9109_v18, %v1924_v1 }
 0x235   : > { %v2009_v31 = vadd.f32 %v9115_v39, %v1923_v53  ;;  %3535 = vst [vmem:[#allocation3 + $0x10] sm:$0xff] %v3413_v58  ;;  %3536 = vst [vmem:[#allocation3 + $0x18] sm:$0xff] %v3420_v47  ;;  %v2232_v27 = vrot.slane %v2224_v42, %v9122_v44  ;;  %v2011_v51 = vadd.f32 %v9119_v32, %v1925_v5  ;;  %v1684_v47 = vpop.f32.mrf.mxu0 }
 0x236   : > { %v2239_v34 = vrot.slane %v2225_v24, %v9122_v44  ;;  %v1926_v57 = vadd.f32 %v1678_v19, %v12171_v2  ;;  %v2074_v45 = vmax.f32 %v2010_v33, 0.0  ;;  %v1928_v0 = vadd.f32 %v1839_v35, %v12172_v40 }
 0x237   : > { %v2073_v52 = vmax.f32 %v2009_v31, 0.0  ;;  %v1927_v12 = vadd.f32 %v1680_v36, %v9158_v43  ;;  %v2240_v60 = vcombine.high %v2232_v27, %v2232_v27  ;;  %v6811_v10 = vrot.slane %v2232_v27, 9 }
 0x238   : > { %v2241_v49 = vcombine.high %v2239_v34, %v2239_v34  ;;  %v6813_v25 = vrot.slane %v2239_v34, 9  ;;  %v2130_v7 = vmax.f32 %v2072_v50, %v2074_v45  ;;  %v2075_v28 = vmax.f32 %v2011_v51, 0.0  ;;  %v3716_v45 = vld [vmem:[%s12050_s3 + $0x1e0] sm:$0xff] }
 0x239   : > { %v2012_v41 = vadd.f32 %v9106_v13, %v1926_v57  ;;  %v2014_v29 = vadd.f32 %v9109_v18, %v1928_v0  ;;  %v6812_v37 = vrot.slane %v2240_v60, 9  ;;  %v2740_v1 = vmax.f32 %v2232_v27, %v6811_v10  ;;  %v1845_v57 = vpop.f32.mrf.mxu1 }
 0x23a   : > { %v6814_v21 = vrot.slane %v2241_v49, 9  ;;  %v2742_v19 = vmax.f32 %v2239_v34, %v6813_v25  ;;  %v2131_v38 = vmax.f32 %v2073_v52, %v2075_v28  ;;  %v9325_v43 = vadd.f32 %v9115_v39, %v1927_v12  ;;  %v12173_v28 = vld [vmem:[#allocation38_spill] sm:$0xff] }
 0x23b   : > { %v2076_v53 = vmax.f32 %v2012_v41, 0.0  ;;  %v2078_v5 = vmax.f32 %v2014_v29, 0.0  ;;  %v2741_v30 = vmax.f32 %v2240_v60, %v6812_v37  ;;  %v2955_v50 = vrot.slane %v2740_v1, %v9085_v11  ;;  %v3718_v60 = vld [vmem:[%s12050_s3 + $0x1f0] sm:$0xff]  ;;  %v3715_v29 = vld [vmem:[%s12050_s3 + $0x1d8] sm:$0xff]  ;;  %v3712_v37 = vld [vmem:[%s12050_s3 + $0x1c0] sm:$0xff] }
 0x23c   : > { %v2743_v63 = vmax.f32 %v2241_v49, %v6814_v21  ;;  %v2959_v42 = vrot.slane %v2740_v1, %v9088_v8  ;;  %v2971_v24 = vrot.slane %v2742_v19, %v9085_v11  ;;  %v2975_v35 = vrot.slane %v2742_v19, %v9088_v8  ;;  %v3554_v33 = vld [vmem:[#allocation3 + $0x18] sm:$0xff]  ;;  %v3553_v31 = vld [vmem:[#allocation3 + $0x10] sm:$0xff]  ;;  %v3713_v49 = vld [vmem:[%s12050_s3 + $0x1c8] sm:$0xff] }
 0x23d   : > { %v2242_v36 = vcombine.low %v2130_v7, %v2131_v38  ;;  %v2243_v58 = vcombine.high %v2130_v7, %v2131_v38  ;;  %v2963_v27 = vrot.slane %v2741_v30, %v9085_v11  ;;  %v2967_v34 = vrot.slane %v2741_v30, %v9088_v8  ;;  %3985 = vmatprep.mubr.f32.mxu0 %v3554_v33 }
 0x23e   : > { %v2979_v51 = vrot.slane %v2743_v63, %v9085_v11  ;;  %v2983_v2 = vrot.slane %v2743_v63, %v9088_v8  ;;  %v9340_v0 = vmax.f32 %v2076_v53, %v2078_v5  ;;  %v2077_v12 = vmax.f32 %v9325_v43, 0.0  ;;  %4098 = vmatprep.mubr.f32.mxu1 %v3554_v33  ;;  %3986 = vmatmul.mubr.f32.vlgmr.msra.gmra.mxu0 %v3553_v31  ;;  %v1686_v53 = vpop.f32.mrf.mxu0  ;;  %v3708_v33 = vld [vmem:[%s12050_s3 + $0x1a0] sm:$0xff] }
 0x23f   : > { %v2250_v52 = vrot.slane %v2242_v36, %v9122_v44  ;;  %v2257_v40 = vrot.slane %v2243_v58, %v9122_v44  ;;  %v3421_v10 = vsel %vm3400_vm5, %v2963_v27, %v2955_v50  ;;  %v3428_v25 = vsel %vm3400_vm5, %v2967_v34, %v2959_v42  ;;  %4099 = vmatmul.mubr.f32.vlgmr.msra.gmra.mxu1 %v3553_v31  ;;  %v1847_v50 = vpop.f32.mrf.mxu1  ;;  %v3709_v42 = vld [vmem:[%s12050_s3 + $0x1a8] sm:$0xff] }
 0x240   : > { %v1929_v7 = vadd.f32 %v1841_v62, %v9162_v54  ;;  %v1930_v41 = vadd.f32 %v1684_v47, %v12173_v28  ;;  %v3422_v21 = vsel %vm3402_vm6, %v2971_v24, %v3421_v10  ;;  %v3429_v1 = vsel %vm3402_vm6, %v2975_v35, %v3428_v25  ;;  %4148 = vmatpush1.msra.mxu0 %v3716_v45  ;;  %v3714_v54 = vld [vmem:[%s12050_s3 + $0x1d0] sm:$0xff]  ;;  %v3711_v24 = vld [vmem:[%s12050_s3 + $0x1b8] sm:$0xff]  ;;  %v12174_v34 = vld [vmem:[#allocation39_spill] sm:$0xff]  ;;  %v1690_v28 = vpop.f32.mrf.mxu0 }
 0x241   : > { %v2258_v19 = vcombine.high %v2250_v52, %v2250_v52  ;;  %v2259_v38 = vcombine.high %v2257_v40, %v2257_v40  ;;  %v3423_v62 = vsel %vm3404_vm7, %v2979_v51, %v3422_v21  ;;  %v3430_v5 = vsel %vm3404_vm7, %v2983_v2, %v3429_v1  ;;  %4261 = vmatpush1.msra.mxu1 %v3718_v60  ;;  %v3710_v45 = vld [vmem:[%s12050_s3 + $0x1b0] sm:$0xff] }
 0x242   : > { %v6815_v30 = vrot.slane %v2250_v52, 9  ;;  %v6817_v63 = vrot.slane %v2257_v40, 9  ;;  %4149 = vmatprep.subr.mxu0 %v3713_v49  ;;  %v2015_v58 = vadd.f32 %v9119_v32, %v1929_v7  ;;  %v9374_v47 = vadd.f32 %v9106_v13, %v1930_v41  ;;  %4262 = vmatprep.subr.mxu1 %v3715_v29  ;;  %v1851_v41 = vpop.f32.mrf.mxu1  ;;  %v3707_v29 = vld [vmem:[%s12050_s3 + $0x198] sm:$0xff] }
 0x243   : > { %v6816_v35 = vrot.slane %v2258_v19, 9  ;;  %v6818_v36 = vrot.slane %v2259_v38, 9  ;;  %4150 = vmatpush1.msra.mxu0 %v3712_v37  ;;  %v1932_v51 = vadd.f32 %v1845_v57, %v12174_v34  ;;  %v1931_v2 = vadd.f32 %v1686_v53, %v9166_v55  ;;  %4263 = vmatpush1.msra.mxu1 %v3714_v54 }
 0x244   : > { %v2744_v31 = vmax.f32 %v2250_v52, %v6815_v30  ;;  %v2746_v27 = vmax.f32 %v2257_v40, %v6817_v63  ;;  %v2079_v10 = vmax.f32 %v2015_v58, 0.0  ;;  %v2080_v25 = vmax.f32 %v9374_v47, 0.0  ;;  %4151 = vmatprep.subr.mxu0 %v3709_v42  ;;  %4264 = vmatprep.subr.mxu1 %v3711_v24  ;;  %v3705_v52 = vld [vmem:[%s12050_s3 + $0x188] sm:$0xff]  ;;  %v3706_v42 = vld [vmem:[%s12050_s3 + $0x190] sm:$0xff] }
 0x245   : > { %v2745_v60 = vmax.f32 %v2258_v19, %v6816_v35  ;;  %v2747_v49 = vmax.f32 %v2259_v38, %v6818_v36  ;;  %4152 = vmatpush1.msra.mxu0 %v3708_v33  ;;  %4265 = vmatpush1.msra.mxu1 %v3710_v45  ;;  %v3704_v38 = vld [vmem:[%s12050_s3 + $0x180] sm:$0xff]  ;;  %v2018_v63 = vadd.f32 %v9109_v18, %v1932_v51  ;;  %v3701_v24 = vld [vmem:[%s12050_s3 + $0x168] sm:$0xff]  ;;  %v3702_v45 = vld [vmem:[%s12050_s3 + $0x170] sm:$0xff] }
 0x246   : > { %v2987_v57 = vrot.slane %v2744_v31, %v9085_v11  ;;  %v2991_v55 = vrot.slane %v2744_v31, %v9088_v8  ;;  %v3003_v40 = vrot.slane %v2746_v27, %v9085_v11  ;;  %v3007_v7 = vrot.slane %v2746_v27, %v9088_v8  ;;  %4153 = vmatprep.subr.mxu0 %v3705_v52  ;;  %v1692_v31 = vpop.f32.mrf.mxu0  ;;  %v1853_v27 = vpop.f32.mrf.mxu1  ;;  %v12175_v52 = vld [vmem:[#allocation40_spill] sm:$0xff] }
 0x247   : > { %v2995_v37 = vrot.slane %v2745_v60, %v9085_v11  ;;  %v2999_v21 = vrot.slane %v2745_v60, %v9088_v8  ;;  %v3011_v1 = vrot.slane %v2747_v49, %v9085_v11  ;;  %v3015_v19 = vrot.slane %v2747_v49, %v9088_v8  ;;  %4266 = vmatprep.subr.mxu1 %v3707_v29  ;;  %v12176_v29 = vld [vmem:[#allocation41_spill] sm:$0xff] }
 0x248   : > { %v3424_v53 = vsel %vm3406_vm8, %v2987_v57, %v3423_v62  ;;  %v3431_v54 = vsel %vm3406_vm8, %v2991_v55, %v3430_v5  ;;  %v2133_v30 = vmax.f32 %v2077_v12, %v2079_v10  ;;  %v2017_v5 = vadd.f32 %v9115_v39, %v1931_v2  ;;  %v3703_v12 = vld [vmem:[%s12050_s3 + $0x178] sm:$0xff]  ;;  %4154 = vmatpush1.msra.mxu0 %v3704_v38 }
 0x249   : > { %v3425_v35 = vsel %vm3408_vm9, %v2995_v37, %v3424_v53  ;;  %v3432_v62 = vsel %vm3408_vm9, %v2999_v21, %v3431_v54  ;;  %v1933_v43 = vadd.f32 %v1847_v50, %v9170_v3  ;;  %v3700_v3 = vld [vmem:[%s12050_s3 + $0x160] sm:$0xff]  ;;  %v2082_v51 = vmax.f32 %v2018_v63, 0.0  ;;  %4267 = vmatpush1.msra.mxu1 %v3706_v42  ;;  %4155 = vmatprep.subr.mxu0 %v3701_v24  ;;  %v3699_v55 = vld [vmem:[%s12050_s3 + $0x158] sm:$0xff]  ;;  %v3694_v24 = vld [vmem:[%s12050_s3 + $0x130] sm:$0xff] }
 0x24a   : > { %v3426_v36 = vsel %vm3410_vm10, %v3003_v40, %v3425_v35  ;;  %v3433_v58 = vsel %vm3410_vm10, %v3007_v7, %v3432_v62  ;;  %v2260_v47 = vcombine.low %v9340_v0, %v2133_v30  ;;  %v2261_v33 = vcombine.high %v9340_v0, %v2133_v30  ;;  %v3697_v0 = vld [vmem:[%s12050_s3 + $0x148] sm:$0xff]  ;;  %4268 = vmatprep.subr.mxu1 %v3703_v12  ;;  %v3696_v40 = vld [vmem:[%s12050_s3 + $0x140] sm:$0xff] }
 0x24b   : > { %v3427_v50 = vsel %vm3412_vm11, %v3011_v1, %v3426_v36  ;;  %v3434_v34 = vsel %vm3412_vm11, %v3015_v19, %v3433_v58  ;;  %v2081_v2 = vmax.f32 %v2017_v5, 0.0  ;;  %v2019_v10 = vadd.f32 %v9119_v32, %v1933_v43  ;;  %4156 = vmatpush1.msra.mxu0 %v3700_v3  ;;  %v3693_v19 = vld [vmem:[%s12050_s3 + $0x128] sm:$0xff]  ;;  %4269 = vmatpush1.msra.mxu1 %v3702_v45 }
 0x24c   : > { %3537 = vst [vmem:[#allocation3 + $0x20] sm:$0xff] %v3427_v50  ;;  %3538 = vst [vmem:[#allocation3 + $0x28] sm:$0xff] %v3434_v34  ;;  %v2268_v60 = vrot.slane %v2260_v47, %v9122_v44  ;;  %v2275_v49 = vrot.slane %v2261_v33, %v9122_v44  ;;  %v1934_v57 = vadd.f32 %v1690_v28, %v12175_v52  ;;  %v3698_v28 = vld [vmem:[%s12050_s3 + $0x150] sm:$0xff]  ;;  %4157 = vmatprep.subr.mxu0 %v3697_v0  ;;  %v3689_v12 = vld [vmem:[%s12050_s3 + $0x108] sm:$0xff] }
 0x24d   : > { %v2134_v7 = vmax.f32 %v2080_v25, %v2082_v51  ;;  %v1936_v37 = vadd.f32 %v1851_v41, %v12176_v29  ;;  %v1935_v21 = vadd.f32 %v1692_v31, %v9174_v4  ;;  %v1937_v1 = vadd.f32 %v1853_v27, %v9178_v15  ;;  %v3695_v4 = vld [vmem:[%s12050_s3 + $0x138] sm:$0xff]  ;;  %v3692_v15 = vld [vmem:[%s12050_s3 + $0x120] sm:$0xff]  ;;  %4270 = vmatprep.subr.mxu1 %v3699_v55 }
 0x24e   : > { %v2276_v38 = vcombine.high %v2268_v60, %v2268_v60  ;;  %v2277_v53 = vcombine.high %v2275_v49, %v2275_v49  ;;  %v6819_v54 = vrot.slane %v2268_v60, 9  ;;  %v6821_v30 = vrot.slane %v2275_v49, 9  ;;  %4158 = vmatpush1.msra.mxu0 %v3696_v40  ;;  %4271 = vmatpush1.msra.mxu1 %v3698_v28  ;;  %v3691_v28 = vld [vmem:[%s12050_s3 + $0x118] sm:$0xff] }
 0x24f   : > { %v2083_v25 = vmax.f32 %v2019_v10, 0.0  ;;  %v2020_v41 = vadd.f32 %v9106_v13, %v1934_v57  ;;  %v2022_v63 = vadd.f32 %v9109_v18, %v1936_v37  ;;  %v9463_v42 = vadd.f32 %v9115_v39, %v1935_v21  ;;  %4159 = vmatprep.subr.mxu0 %v3693_v19  ;;  %4272 = vmatprep.subr.mxu1 %v3695_v4  ;;  %v3688_v19 = vld [vmem:[%s12050_s3 + $0x100] sm:$0xff]  ;;  %v12178_v4 = vld [vmem:[#allocation43_spill] sm:$0xff] }
 0x250   : > { %v6820_v35 = vrot.slane %v2276_v38, 9  ;;  %v6822_v62 = vrot.slane %v2277_v53, 9  ;;  %v2748_v5 = vmax.f32 %v2268_v60, %v6819_v54  ;;  %v2750_v43 = vmax.f32 %v2275_v49, %v6821_v30  ;;  %4160 = vmatpush1.msra.mxu0 %v3692_v15  ;;  %4273 = vmatpush1.msra.mxu1 %v3694_v24  ;;  %v1857_v60 = vpop.f32.mrf.mxu1  ;;  %v12177_v54 = vld [vmem:[#allocation42_spill] sm:$0xff] }
 0x251   : > { %v2135_v36 = vmax.f32 %v2081_v2, %v2083_v25  ;;  %v2084_v58 = vmax.f32 %v2020_v41, 0.0  ;;  %v2086_v47 = vmax.f32 %v2022_v63, 0.0  ;;  %v2085_v33 = vmax.f32 %v9463_v42, 0.0  ;;  %v1696_v2 = vpop.f32.mrf.mxu0  ;;  %4161 = vmatprep.subr.mxu0 %v3689_v12  ;;  %v3685_v25 = vld [vmem:[%s12050_s3 + $0xe8] sm:$0xff]  ;;  %4274 = vmatprep.subr.mxu1 %v3691_v28  ;;  %v3682_v42 = vld [vmem:[%s12050_s3 + $0xd0] sm:$0xff] }
 0x252   : > { %v2749_v31 = vmax.f32 %v2276_v38, %v6820_v35  ;;  %v2751_v27 = vmax.f32 %v2277_v53, %v6822_v62  ;;  %v3019_v3 = vrot.slane %v2748_v5, %v9085_v11  ;;  %v3023_v50 = vrot.slane %v2748_v5, %v9088_v8  ;;  %v3687_v5 = vld [vmem:[%s12050_s3 + $0xf8] sm:$0xff]  ;;  %4162 = vmatpush1.msra.mxu0 %v3688_v19 }
 0x253   : > { %v3035_v34 = vrot.slane %v2750_v43, %v9085_v11  ;;  %v3039_v51 = vrot.slane %v2750_v43, %v9088_v8  ;;  %v2278_v45 = vcombine.low %v2134_v7, %v2135_v36  ;;  %v2279_v0 = vcombine.high %v2134_v7, %v2135_v36  ;;  %v3785_v49 = vld [vmem:[#allocation3 + $0x28] sm:$0xff]  ;;  %v3784_v10 = vld [vmem:[#allocation3 + $0x20] sm:$0xff]  ;;  %v1698_v62 = vpop.f32.mrf.mxu0  ;;  %4163 = vmatprep.subr.mxu0 %v3685_v25 }
 0x254   : > { %v3027_v52 = vrot.slane %v2749_v31, %v9085_v11  ;;  %v3031_v57 = vrot.slane %v2749_v31, %v9088_v8  ;;  %v3043_v55 = vrot.slane %v2751_v27, %v9085_v11  ;;  %v3047_v40 = vrot.slane %v2751_v27, %v9088_v8  ;;  %3991 = vmatprep.mubr.f32.mxu0 %v3785_v49  ;;  %v3686_v31 = vld [vmem:[%s12050_s3 + $0xf0] sm:$0xff] }
 0x255   : > { %v2286_v29 = vrot.slane %v2278_v45, %v9122_v44  ;;  %v2293_v37 = vrot.slane %v2279_v0, %v9122_v44  ;;  %v9482_v21 = vmax.f32 %v2084_v58, %v2086_v47  ;;  %v2023_v7 = vadd.f32 %v9119_v32, %v1937_v1  ;;  %4104 = vmatprep.mubr.f32.mxu1 %v3785_v49  ;;  %v3690_v1 = vld [vmem:[%s12050_s3 + $0x110] sm:$0xff]  ;;  %v3684_v47 = vld [vmem:[%s12050_s3 + $0xe0] sm:$0xff]  ;;  %v3683_v49 = vld [vmem:[%s12050_s3 + $0xd8] sm:$0xff]  ;;  %v1702_v19 = vpop.f32.mrf.mxu0 }
 0x256   : > { %v3435_v38 = vsel %vm3400_vm5, %v3027_v52, %v3019_v3  ;;  %v3442_v53 = vsel %vm3400_vm5, %v3031_v57, %v3023_v50  ;;  %v1938_v30 = vadd.f32 %v1696_v2, %v12177_v54  ;;  %v1940_v15 = vadd.f32 %v1857_v60, %v12178_v4  ;;  %3992 = vmatmul.mubr.f32.gmra.mxu0 %v3784_v10  ;;  %v3679_v4 = vld [vmem:[%s12050_s3 + $0xb8] sm:$0xff] }
 0x257   : > { %v3436_v41 = vsel %vm3402_vm6, %v3035_v34, %v3435_v38  ;;  %v3443_v63 = vsel %vm3402_vm6, %v3039_v51, %v3442_v53  ;;  %v2294_v24 = vcombine.high %v2286_v29, %v2286_v29  ;;  %v2295_v35 = vcombine.high %v2293_v37, %v2293_v37  ;;  %4105 = vmatmul.mubr.f32.gmra.mxu1 %v3784_v10  ;;  %v3681_v51 = vld [vmem:[%s12050_s3 + $0xc8] sm:$0xff] }
 0x258   : > { %v3437_v43 = vsel %vm3404_vm7, %v3043_v55, %v3436_v41  ;;  %v3444_v12 = vsel %vm3404_vm7, %v3047_v40, %v3443_v63  ;;  %v6823_v36 = vrot.slane %v2286_v29, 9  ;;  %v6825_v58 = vrot.slane %v2293_v37, 9  ;;  %4275 = vmatpush1.msra.mxu1 %v3690_v1  ;;  %v1859_v40 = vpop.f32.mrf.mxu1  ;;  %4164 = vmatpush1.msra.mxu0 %v3684_v47  ;;  %v3676_v63 = vld [vmem:[%s12050_s3 + $0xa0] sm:$0xff] }
 0x259   : > { %v6824_v27 = vrot.slane %v2294_v24, 9  ;;  %v6826_v3 = vrot.slane %v2295_v35, 9  ;;  %v2087_v50 = vmax.f32 %v2023_v7, 0.0  ;;  %v2024_v34 = vadd.f32 %v9106_v13, %v1938_v30  ;;  %4276 = vmatprep.subr.mxu1 %v3687_v5  ;;  %4165 = vmatprep.subr.mxu0 %v3681_v51 }
 0x25a   : > { %v2752_v45 = vmax.f32 %v2286_v29, %v6823_v36  ;;  %v2754_v0 = vmax.f32 %v2293_v37, %v6825_v58  ;;  %v2026_v2 = vadd.f32 %v9109_v18, %v1940_v15  ;;  %v1939_v60 = vadd.f32 %v1698_v62, %v9182_v16  ;;  %4277 = vmatpush1.msra.mxu1 %v3686_v31  ;;  %v3680_v29 = vld [vmem:[%s12050_s3 + $0xc0] sm:$0xff]  ;;  %v3675_v36 = vld [vmem:[%s12050_s3 + $0x98] sm:$0xff] }
 0x25b   : > { %v2753_v10 = vmax.f32 %v2294_v24, %v6824_v27  ;;  %v2755_v52 = vmax.f32 %v2295_v35, %v6826_v3  ;;  %v2137_v57 = vmax.f32 %v2085_v33, %v2087_v50  ;;  %v2088_v55 = vmax.f32 %v2024_v34, 0.0  ;;  %v3677_v33 = vld [vmem:[%s12050_s3 + $0xa8] sm:$0xff]  ;;  %4278 = vmatprep.subr.mxu1 %v3683_v49  ;;  %4166 = vmatpush1.msra.mxu0 %v3680_v29  ;;  %v3678_v24 = vld [vmem:[%s12050_s3 + $0xb0] sm:$0xff]  ;;  %v1704_v3 = vpop.f32.mrf.mxu0  ;;  %v3672_v50 = vld [vmem:[%s12050_s3 + $0x80] sm:$0xff] }
 0x25c   : > { %v3051_v16 = vrot.slane %v2752_v45, %v9085_v11  ;;  %v3055_v37 = vrot.slane %v2752_v45, %v9088_v8  ;;  %v3067_v7 = vrot.slane %v2754_v0, %v9085_v11  ;;  %v3071_v28 = vrot.slane %v2754_v0, %v9088_v8  ;;  %4279 = vmatpush1.msra.mxu1 %v3682_v42 }
 0x25d   : > { %v3059_v38 = vrot.slane %v2753_v10, %v9085_v11  ;;  %v3063_v53 = vrot.slane %v2753_v10, %v9088_v8  ;;  %v3075_v54 = vrot.slane %v2755_v52, %v9085_v11  ;;  %v3079_v30 = vrot.slane %v2755_v52, %v9088_v8  ;;  %4167 = vmatprep.subr.mxu0 %v3677_v33 }
 0x25e   : > { %v3438_v15 = vsel %vm3406_vm8, %v3051_v16, %v3437_v43  ;;  %v3445_v1 = vsel %vm3406_vm8, %v3055_v37, %v3444_v12  ;;  %v2296_v25 = vcombine.low %v9482_v21, %v2137_v57  ;;  %v2297_v41 = vcombine.high %v9482_v21, %v2137_v57  ;;  %v1863_v12 = vpop.f32.mrf.mxu1  ;;  %v3673_v21 = vld [vmem:[%s12050_s3 + $0x88] sm:$0xff]  ;;  %4280 = vmatprep.subr.mxu1 %v3679_v4  ;;  %v12179_v16 = vld [vmem:[#allocation44_spill] sm:$0xff] }
 0x25f   : > { %v3439_v35 = vsel %vm3408_vm9, %v3059_v38, %v3438_v15  ;;  %v3446_v62 = vsel %vm3408_vm9, %v3063_v53, %v3445_v1  ;;  %v2090_v5 = vmax.f32 %v2026_v2, 0.0  ;;  %v9558_v43 = vadd.f32 %v9115_v39, %v1939_v60  ;;  %4168 = vmatpush1.msra.mxu0 %v3676_v63  ;;  %4281 = vmatpush1.msra.mxu1 %v3678_v24  ;;  %v3674_v2 = vld [vmem:[%s12050_s3 + $0x90] sm:$0xff]  ;;  %v3669_v60 = vld [vmem:[%s12050_s3 + $0x68] sm:$0xff]  ;;  %v3668_v38 = vld [vmem:[%s12050_s3 + $0x60] sm:$0xff] }
 0x260   : > { %v3440_v58 = vsel %vm3410_vm10, %v3067_v7, %v3439_v35  ;;  %v3447_v47 = vsel %vm3410_vm10, %v3071_v28, %v3446_v62  ;;  %v2304_v31 = vrot.slane %v2296_v25, %v9122_v44  ;;  %v2311_v27 = vrot.slane %v2297_v41, %v9122_v44  ;;  %4169 = vmatprep.subr.mxu0 %v3673_v21  ;;  %v12180_v7 = vld [vmem:[#allocation45_spill] sm:$0xff]  ;;  %v1865_v33 = vpop.f32.mrf.mxu1  ;;  %v3664_v62 = vld [vmem:[%s12050_s3 + $0x40] sm:$0xff] }
 0x261   : > { %v3441_v34 = vsel %vm3412_vm11, %v3075_v54, %v3440_v58  ;;  %v3448_v51 = vsel %vm3412_vm11, %v3079_v30, %v3447_v47  ;;  %v9575_v45 = vmax.f32 %v2088_v55, %v2090_v5  ;;  %v2089_v0 = vmax.f32 %v9558_v43, 0.0  ;;  %4282 = vmatprep.subr.mxu1 %v3675_v36  ;;  %v3671_v55 = vld [vmem:[%s12050_s3 + $0x78] sm:$0xff]  ;;  %4170 = vmatpush1.msra.mxu0 %v3672_v50  ;;  %v3666_v5 = vld [vmem:[%s12050_s3 + $0x50] sm:$0xff]  ;;  %v1708_v58 = vpop.f32.mrf.mxu0 }
 0x262   : > { %3539 = vst [vmem:[#allocation3 + $0x50] sm:$0xff] %v3441_v34  ;;  %3540 = vst [vmem:[#allocation3 + $0x58] sm:$0xff] %v3448_v51  ;;  %v2312_v49 = vcombine.high %v2304_v31, %v2304_v31  ;;  %v2313_v10 = vcombine.high %v2311_v27, %v2311_v27  ;;  %v6827_v52 = vrot.slane %v2304_v31, 9  ;;  %v6829_v57 = vrot.slane %v2311_v27, 9  ;;  %4283 = vmatpush1.msra.mxu1 %v3674_v2  ;;  %v3667_v25 = vld [vmem:[%s12050_s3 + $0x58] sm:$0xff]  ;;  %v1869_v47 = vpop.f32.mrf.mxu1 }
 0x263   : > { %v1941_v29 = vadd.f32 %v1859_v40, %v9186_v23  ;;  %v1942_v37 = vadd.f32 %v1702_v19, %v12179_v16  ;;  %v1944_v28 = vadd.f32 %v1863_v12, %v12180_v7  ;;  %v1943_v42 = vadd.f32 %v1704_v3, %v9190_v26  ;;  %4171 = vmatprep.subr.mxu0 %v3669_v60  ;;  %v3670_v23 = vld [vmem:[%s12050_s3 + $0x70] sm:$0xff]  ;;  %v3665_v26 = vld [vmem:[%s12050_s3 + $0x48] sm:$0xff] }
 0x264   : > { %v6828_v53 = vrot.slane %v2312_v49, 9  ;;  %v6830_v54 = vrot.slane %v2313_v10, 9  ;;  %v2756_v30 = vmax.f32 %v2304_v31, %v6827_v52  ;;  %v2758_v4 = vmax.f32 %v2311_v27, %v6829_v57  ;;  %4284 = vmatprep.subr.mxu1 %v3671_v55  ;;  %4172 = vmatpush1.msra.mxu0 %v3668_v38  ;;  %v12181_v55 = vld [vmem:[#allocation46_spill] sm:$0xff]  ;;  %v12182_v16 = vld [vmem:[#allocation47_spill] sm:$0xff] }
 0x265   : > { %v2027_v40 = vadd.f32 %v9119_v32, %v1941_v29  ;;  %v2028_v19 = vadd.f32 %v9106_v13, %v1942_v37  ;;  %v2030_v15 = vadd.f32 %v9109_v18, %v1944_v28  ;;  %v9604_v1 = vadd.f32 %v9115_v39, %v1943_v42  ;;  %4285 = vmatpush1.msra.mxu1 %v3670_v23  ;;  %v1710_v42 = vpop.f32.mrf.mxu0  ;;  %v3661_v38 = vld [vmem:[%s12050_s3 + $0x28] sm:$0xff]  ;;  %v3660_v23 = vld [vmem:[%s12050_s3 + $0x20] sm:$0xff] }
 0x266   : > { %v2757_v41 = vmax.f32 %v2312_v49, %v6828_v53  ;;  %v2759_v63 = vmax.f32 %v2313_v10, %v6830_v54  ;;  %v3083_v24 = vrot.slane %v2756_v30, %v9085_v11  ;;  %v3087_v35 = vrot.slane %v2756_v30, %v9088_v8  ;;  %4173 = vmatprep.subr.mxu0 %v3665_v26  ;;  %v3663_v53 = vld [vmem:[%s12050_s3 + $0x38] sm:$0xff]  ;;  %v3662_v26 = vld [vmem:[%s12050_s3 + $0x30] sm:$0xff] }
 0x267   : > { %v3099_v43 = vrot.slane %v2758_v4, %v9085_v11  ;;  %v3103_v12 = vrot.slane %v2758_v4, %v9088_v8  ;;  %v2091_v21 = vmax.f32 %v2027_v40, 0.0  ;;  %v2092_v36 = vmax.f32 %v2028_v19, 0.0  ;;  %4286 = vmatprep.subr.mxu1 %v3667_v25  ;;  %4174 = vmatpush1.msra.mxu0 %v3664_v62  ;;  %v3657_v25 = vld [vmem:[%s12050_s3 + $0x8] sm:$0xff] }
 0x268   : > { %v3091_v31 = vrot.slane %v2757_v41, %v9085_v11  ;;  %v3095_v27 = vrot.slane %v2757_v41, %v9088_v8  ;;  %v3107_v3 = vrot.slane %v2759_v63, %v9085_v11  ;;  %v3111_v50 = vrot.slane %v2759_v63, %v9088_v8  ;;  %4287 = vmatpush1.msra.mxu1 %v3666_v5  ;;  %v3659_v41 = vld [vmem:[%s12050_s3 + $0x18] sm:$0xff]  ;;  %v12183_v63 = vld [vmem:[#allocation26_spill] sm:$0xff] }
 0x269   : > { %v2139_v34 = vmax.f32 %v2089_v0, %v2091_v21  ;;  %v2094_v51 = vmax.f32 %v2030_v15, 0.0  ;;  %v2093_v2 = vmax.f32 %v9604_v1, 0.0  ;;  %v1945_v60 = vadd.f32 %v1865_v33, %v9196_v17  ;;  %v3560_v49 = vld [vmem:[#allocation3 + $0x58] sm:$0xff]  ;;  %v3559_v10 = vld [vmem:[#allocation3 + $0x50] sm:$0xff]  ;;  %v1871_v33 = vpop.f32.mrf.mxu1  ;;  %4175 = vmatprep.subr.mxu0 %v3661_v38  ;;  %4288 = vmatprep.subr.mxu1 %v3663_v53  ;;  %v3776_v53 = vld [vmem:[%s12050_s3 + $0x3c0] sm:$0xff] }
 0x26a   : > { %v3449_v52 = vsel %vm3400_vm5, %v3091_v31, %v3083_v24  ;;  %v3456_v57 = vsel %vm3400_vm5, %v3095_v27, %v3087_v35  ;;  %v1946_v29 = vadd.f32 %v1708_v58, %v12181_v55  ;;  %v1948_v37 = vadd.f32 %v1869_v47, %v12182_v16  ;;  %3997 = vmatprep.mubr.f32.mxu0 %v3560_v49  ;;  %v3777_v55 = vld [vmem:[%s12050_s3 + $0x3c8] sm:$0xff] }
 0x26b   : > { %v3450_v0 = vsel %vm3402_vm6, %v3099_v43, %v3449_v52  ;;  %v3457_v7 = vsel %vm3402_vm6, %v3103_v12, %v3456_v57  ;;  %v2314_v28 = vcombine.low %v9575_v45, %v2139_v34  ;;  %v2315_v17 = vcombine.high %v9575_v45, %v2139_v34  ;;  %4110 = vmatprep.mubr.f32.mxu1 %v3560_v49  ;;  %v3656_v43 = vld [vmem:[%s12050_s3] sm:$0xff]  ;;  %v3658_v12 = vld [vmem:[%s12050_s3 + $0x10] sm:$0xff] }
 0x26c   : > { %v9640_v54 = vsel %vm3404_vm7, %v3107_v3, %v3450_v0  ;;  %v9643_v30 = vsel %vm3404_vm7, %v3111_v50, %v3457_v7  ;;  %v2140_v4 = vmax.f32 %v2092_v36, %v2094_v51  ;;  %v2031_v45 = vadd.f32 %v9119_v32, %v1945_v60  ;;  %3998 = vmatmul.mubr.f32.gmra.mxu0 %v3559_v10  ;;  %v3780_v50 = vld [vmem:[%s12050_s3 + $0x3e0] sm:$0xff]  ;;  %v9698_v7 = vpop.f32.mrf.mxu0 }
 0x26d   : > { %v2322_v40 = vrot.slane %v2314_v28, %v9122_v44  ;;  %v2329_v19 = vrot.slane %v2315_v17, %v9122_v44  ;;  %v2032_v15 = vadd.f32 %v9106_v13, %v1946_v29  ;;  %v2034_v1 = vadd.f32 %v9109_v18, %v1948_v37  ;;  %4111 = vmatmul.mubr.f32.gmra.mxu1 %v3559_v10  ;;  %v3779_v28 = vld [vmem:[%s12050_s3 + $0x3d8] sm:$0xff] }
 0x26e   : > { %v9664_v24 = vadd.f32 %v9101_v22, %v12183_v63  ;;  %v2095_v35 = vmax.f32 %v2031_v45, 0.0  ;;  %v1947_v62 = vadd.f32 %v1710_v42, %v9200_v14  ;;  %v9668_v5 = vadd.f32 %v1871_v33, %v9204_v46  ;;  %4176 = vmatpush1.msra.mxu0 %v3660_v23  ;;  %4289 = vmatpush1.msra.mxu1 %v3662_v26  ;;  %v3781_v14 = vld [vmem:[%s12050_s3 + $0x3e8] sm:$0xff]  ;;  %v3783_v46 = vld [vmem:[%s12050_s3 + $0x3f8] sm:$0xff] }
 0x26f   : > { %v2330_v21 = vcombine.high %v2322_v40, %v2322_v40  ;;  %v2331_v36 = vcombine.high %v2329_v19, %v2329_v19  ;;  %v6831_v22 = vrot.slane %v2322_v40, 9  ;;  %v6833_v58 = vrot.slane %v2329_v19, 9  ;;  %4177 = vmatprep.subr.mxu0 %v3657_v25  ;;  %4290 = vmatprep.subr.mxu1 %v3659_v41 }
 0x270   : > { %v2141_v47 = vmax.f32 %v2093_v2, %v2095_v35  ;;  %v2096_v31 = vmax.f32 %v2032_v15, 0.0  ;;  %v2098_v27 = vmax.f32 %v2034_v1, 0.0  ;;  %v9683_v3 = vadd.f32 %v9115_v39, %v1947_v62  ;;  %4178 = vmatpush1.msra.mxu0 %v3656_v43  ;;  %4291 = vmatpush1.msra.mxu1 %v3658_v12  ;;  %v3782_v2 = vld [vmem:[%s12050_s3 + $0x3f0] sm:$0xff]  ;;  %v3773_v15 = vld [vmem:[%s12050_s3 + $0x3a8] sm:$0xff]  ;;  %v3775_v1 = vld [vmem:[%s12050_s3 + $0x3b8] sm:$0xff] }
 0x271   : > { %v6832_v34 = vrot.slane %v2330_v21, 9  ;;  %v6834_v51 = vrot.slane %v2331_v36, 9  ;;  %v2760_v60 = vmax.f32 %v2322_v40, %v6831_v22  ;;  %v2762_v49 = vmax.f32 %v2329_v19, %v6833_v58  ;;  %4179 = vmatprep.subr.mxu0 %v3781_v14  ;;  %4292 = vmatprep.subr.mxu1 %v3783_v46  ;;  %v1875_v19 = vpop.f32.mrf.mxu1  ;;  %v3772_v62 = vld [vmem:[%s12050_s3 + $0x3a0] sm:$0xff]  ;;  %v1716_v22 = vpop.f32.mrf.mxu0 }
 0x272   : > { %v2332_v10 = vcombine.low %v2140_v4, %v2141_v47  ;;  %v2333_v52 = vcombine.high %v2140_v4, %v2141_v47  ;;  %v9691_v57 = vmax.f32 %v2096_v31, %v2098_v27  ;;  %4180 = vmatpush2.msra.mxu0 %v3780_v50  ;;  %4293 = vmatpush2.msra.mxu1 %v3782_v2  ;;  %v3778_v4 = vld [vmem:[%s12050_s3 + $0x3d0] sm:$0xff]  ;;  %v3771_v31 = vld [vmem:[%s12050_s3 + $0x398] sm:$0xff] }
 0x273   : > { %v2761_v29 = vmax.f32 %v2330_v21, %v6832_v34  ;;  %v2763_v16 = vmax.f32 %v2331_v36, %v6834_v51  ;;  %v3115_v37 = vrot.slane %v2760_v60, %v9085_v11  ;;  %v3119_v0 = vrot.slane %v2760_v60, %v9088_v8  ;;  %4181 = vmatprep.subr.mxu0 %v3777_v55  ;;  %v1877_v60 = vpop.f32.mrf.mxu1 }
 0x274   : > { %v3131_v17 = vrot.slane %v2762_v49, %v9085_v11  ;;  %v3135_v42 = vrot.slane %v2762_v49, %v9088_v8  ;;  %v2340_v33 = vrot.slane %v2332_v10, %v9122_v44  ;;  %v2347_v38 = vrot.slane %v2333_v52, %v9122_v44  ;;  %4294 = vmatprep.subr.mxu1 %v3779_v28  ;;  %v3768_v49 = vld [vmem:[%s12050_s3 + $0x380] sm:$0xff] }
 0x275   : > { %v3123_v45 = vrot.slane %v2761_v29, %v9085_v11  ;;  %v3127_v23 = vrot.slane %v2761_v29, %v9088_v8  ;;  %v3139_v26 = vrot.slane %v2763_v16, %v9085_v11  ;;  %v3143_v40 = vrot.slane %v2763_v16, %v9088_v8  ;;  %4182 = vmatpush2.msra.mxu0 %v3776_v53  ;;  %v3770_v29 = vld [vmem:[%s12050_s3 + $0x390] sm:$0xff]  ;;  %v3765_v16 = vld [vmem:[%s12050_s3 + $0x368] sm:$0xff] }
 0x276   : > { %v3452_v25 = vsel %vm3406_vm8, %v3115_v37, %v9640_v54  ;;  %v3459_v41 = vsel %vm3406_vm8, %v3119_v0, %v9643_v30  ;;  %v2348_v63 = vcombine.high %v2340_v33, %v2340_v33  ;;  %v2349_v35 = vcombine.high %v2347_v38, %v2347_v38  ;;  %4295 = vmatpush2.msra.mxu1 %v3778_v4  ;;  %v3774_v54 = vld [vmem:[%s12050_s3 + $0x3b0] sm:$0xff]  ;;  %v3769_v30 = vld [vmem:[%s12050_s3 + $0x388] sm:$0xff]  ;;  %v3764_v4 = vld [vmem:[%s12050_s3 + $0x360] sm:$0xff] }
 0x277   : > { %v3453_v43 = vsel %vm3408_vm9, %v3123_v45, %v3452_v25  ;;  %v3460_v12 = vsel %vm3408_vm9, %v3127_v23, %v3459_v41  ;;  %v6835_v21 = vrot.slane %v2340_v33, 9  ;;  %v6837_v36 = vrot.slane %v2347_v38, 9  ;;  %4183 = vmatprep.subr.mxu0 %v3773_v15  ;;  %4296 = vmatprep.subr.mxu1 %v3775_v1  ;;  %v12184_v23 = vld [vmem:[#allocation48_spill] sm:$0xff]  ;;  %v1881_v25 = vpop.f32.mrf.mxu1 }
 0x278   : > { %v3454_v58 = vsel %vm3410_vm10, %v3131_v17, %v3453_v43  ;;  %v3461_v14 = vsel %vm3410_vm10, %v3135_v42, %v3460_v12  ;;  %v6836_v46 = vrot.slane %v2348_v63, 9  ;;  %v6838_v47 = vrot.slane %v2349_v35, 9  ;;  %4184 = vmatpush2.msra.mxu0 %v3772_v62  ;;  %4297 = vmatpush2.msra.mxu1 %v3774_v54  ;;  %v1720_v17 = vpop.f32.mrf.mxu0  ;;  %v3766_v41 = vld [vmem:[%s12050_s3 + $0x370] sm:$0xff]  ;;  %v12186_v43 = vld [vmem:[#allocation50_spill] sm:$0xff] }
 0x279   : > { %v3455_v27 = vsel %vm3412_vm11, %v3139_v26, %v3454_v58  ;;  %v3462_v50 = vsel %vm3412_vm11, %v3143_v40, %v3461_v14  ;;  %v2764_v34 = vmax.f32 %v2340_v33, %v6835_v21  ;;  %v2766_v51 = vmax.f32 %v2347_v38, %v6837_v36  ;;  %4185 = vmatprep.subr.mxu0 %v3769_v30  ;;  %v12185_v40 = vld [vmem:[#allocation49_spill] sm:$0xff] }
 0x27a   : > { %3541 = vst [vmem:[#allocation3 + $0x60] sm:$0xff] %v3455_v27  ;;  %3542 = vst [vmem:[#allocation3 + $0x68] sm:$0xff] %v3462_v50  ;;  %v2765_v2 = vmax.f32 %v2348_v63, %v6836_v46  ;;  %v2767_v10 = vmax.f32 %v2349_v35, %v6838_v47  ;;  %v2097_v52 = vmax.f32 %v9683_v3, 0.0  ;;  %v2035_v55 = vadd.f32 %v9119_v32, %v9668_v5  ;;  %v3767_v5 = vld [vmem:[%s12050_s3 + $0x378] sm:$0xff]  ;;  %v1722_v14 = vpop.f32.mrf.mxu0  ;;  %v3760_v46 = vld [vmem:[%s12050_s3 + $0x340] sm:$0xff] }
 0x27b   : > { %v3147_v37 = vrot.slane %v2764_v34, %v9085_v11  ;;  %v3151_v0 = vrot.slane %v2764_v34, %v9088_v8  ;;  %v3163_v28 = vrot.slane %v2766_v51, %v9085_v11  ;;  %v3167_v3 = vrot.slane %v2766_v51, %v9088_v8  ;;  %4298 = vmatprep.subr.mxu1 %v3771_v31  ;;  %v1883_v34 = vpop.f32.mrf.mxu1 }
 0x27c   : > { %v3155_v42 = vrot.slane %v2765_v2, %v9085_v11  ;;  %v3159_v33 = vrot.slane %v2765_v2, %v9088_v8  ;;  %v3171_v38 = vrot.slane %v2767_v10, %v9085_v11  ;;  %v3175_v53 = vrot.slane %v2767_v10, %v9088_v8  ;;  %4186 = vmatpush2.msra.mxu0 %v3768_v49  ;;  %v3762_v49 = vld [vmem:[%s12050_s3 + $0x350] sm:$0xff] }
 0x27d   : > { %v2099_v45 = vmax.f32 %v2035_v55, 0.0  ;;  %v1950_v26 = vadd.f32 %v9698_v7, %v12184_v23  ;;  %v1952_v15 = vadd.f32 %v1875_v19, %v12185_v40  ;;  %v1951_v1 = vadd.f32 %v1716_v22, %v9208_v59  ;;  %4299 = vmatpush2.msra.mxu1 %v3770_v29  ;;  %4187 = vmatprep.subr.mxu0 %v3765_v16  ;;  %v3761_v59 = vld [vmem:[%s12050_s3 + $0x348] sm:$0xff]  ;;  %v3763_v7 = vld [vmem:[%s12050_s3 + $0x358] sm:$0xff] }
 0x27e   : > { %v3463_v63 = vsel %vm3400_vm5, %v3155_v42, %v3147_v37  ;;  %v3470_v35 = vsel %vm3400_vm5, %v3159_v33, %v3151_v0  ;;  %v1953_v62 = vadd.f32 %v1877_v60, %v9214_v9  ;;  %v1954_v12 = vadd.f32 %v1720_v17, %v12186_v43  ;;  %4300 = vmatprep.subr.mxu1 %v3767_v5  ;;  %v12187_v55 = vld [vmem:[#allocation51_spill] sm:$0xff]  ;;  %v3759_v16 = vld [vmem:[%s12050_s3 + $0x338] sm:$0xff]  ;;  %v3756_v17 = vld [vmem:[%s12050_s3 + $0x320] sm:$0xff] }
 0x27f   : > { %v3464_v19 = vsel %vm3402_vm6, %v3163_v28, %v3463_v63  ;;  %v3471_v21 = vsel %vm3402_vm6, %v3167_v3, %v3470_v35  ;;  %v2143_v36 = vmax.f32 %v2097_v52, %v2099_v45  ;;  %v2036_v22 = vadd.f32 %v9106_v13, %v1950_v26  ;;  %4188 = vmatpush2.msra.mxu0 %v3764_v4  ;;  %v3758_v5 = vld [vmem:[%s12050_s3 + $0x330] sm:$0xff]  ;;  %v3755_v4 = vld [vmem:[%s12050_s3 + $0x318] sm:$0xff]  ;;  %v3749_v35 = vld [vmem:[%s12050_s3 + $0x2e8] sm:$0xff] }
 0x280   : > { %v9792_v9 = vsel %vm3404_vm7, %v3171_v38, %v3464_v19  ;;  %v9795_v54 = vsel %vm3404_vm7, %v3175_v53, %v3471_v21  ;;  %v2038_v30 = vadd.f32 %v9109_v18, %v1952_v15  ;;  %v2037_v58 = vadd.f32 %v9115_v39, %v1951_v1  ;;  %4301 = vmatpush2.msra.mxu1 %v3766_v41  ;;  %v3754_v15 = vld [vmem:[%s12050_s3 + $0x310] sm:$0xff] }
 0x281   : > { %v2350_v47 = vcombine.low %v9691_v57, %v2143_v36  ;;  %v2351_v31 = vcombine.high %v9691_v57, %v2143_v36  ;;  %v2100_v27 = vmax.f32 %v2036_v22, 0.0  ;;  %v2039_v50 = vadd.f32 %v9119_v32, %v1953_v62  ;;  %v3787_v51 = vld [vmem:[#allocation3 + $0x68] sm:$0xff]  ;;  %v3786_v60 = vld [vmem:[#allocation3 + $0x60] sm:$0xff]  ;;  %4189 = vmatprep.subr.mxu0 %v3761_v59  ;;  %4302 = vmatprep.subr.mxu1 %v3763_v7  ;;  %v3751_v7 = vld [vmem:[%s12050_s3 + $0x2f8] sm:$0xff] }
 0x282   : > { %v2102_v2 = vmax.f32 %v2038_v30, 0.0  ;;  %v2101_v10 = vmax.f32 %v2037_v58, 0.0  ;;  %v2040_v52 = vadd.f32 %v9106_v13, %v1954_v12  ;;  %v1956_v29 = vadd.f32 %v1881_v25, %v12187_v55  ;;  %4003 = vmatprep.mubr.f32.mxu0 %v3787_v51  ;;  %4116 = vmatprep.mubr.f32.mxu1 %v3787_v51  ;;  %v3757_v57 = vld [vmem:[%s12050_s3 + $0x328] sm:$0xff]  ;;  %v3748_v30 = vld [vmem:[%s12050_s3 + $0x2e0] sm:$0xff] }
 0x283   : > { %v2358_v37 = vrot.slane %v2350_v47, %v9122_v44  ;;  %v2365_v0 = vrot.slane %v2351_v31, %v9122_v44  ;;  %v2103_v28 = vmax.f32 %v2039_v50, 0.0  ;;  %v1955_v3 = vadd.f32 %v1722_v14, %v9218_v48  ;;  %4004 = vmatmul.mubr.f32.gmra.mxu0 %v3786_v60  ;;  %4117 = vmatmul.mubr.f32.gmra.mxu1 %v3786_v60  ;;  %v3753_v48 = vld [vmem:[%s12050_s3 + $0x308] sm:$0xff]  ;;  %v1726_v31 = vpop.f32.mrf.mxu0 }
 0x284   : > { %v2144_v42 = vmax.f32 %v2100_v27, %v2102_v2  ;;  %v2104_v33 = vmax.f32 %v2040_v52, 0.0  ;;  %v2042_v38 = vadd.f32 %v9109_v18, %v1956_v29  ;;  %v1957_v53 = vadd.f32 %v1883_v34, %v9222_v20  ;;  %4190 = vmatpush2.msra.mxu0 %v3760_v46  ;;  %4303 = vmatpush2.msra.mxu1 %v3762_v49  ;;  %v3752_v20 = vld [vmem:[%s12050_s3 + $0x300] sm:$0xff]  ;;  %v3750_v27 = vld [vmem:[%s12050_s3 + $0x2f0] sm:$0xff]  ;;  %v3745_v49 = vld [vmem:[%s12050_s3 + $0x2c8] sm:$0xff] }
 0x285   : > { %v2366_v45 = vcombine.high %v2358_v37, %v2358_v37  ;;  %v2367_v23 = vcombine.high %v2365_v0, %v2365_v0  ;;  %v6839_v26 = vrot.slane %v2358_v37, 9  ;;  %v6841_v40 = vrot.slane %v2365_v0, 9  ;;  %4191 = vmatprep.subr.mxu0 %v3757_v57  ;;  %4304 = vmatprep.subr.mxu1 %v3759_v16  ;;  %v3747_v2 = vld [vmem:[%s12050_s3 + $0x2d8] sm:$0xff]  ;;  %v3744_v57 = vld [vmem:[%s12050_s3 + $0x2c0] sm:$0xff]  ;;  %v3746_v16 = vld [vmem:[%s12050_s3 + $0x2d0] sm:$0xff] }
 0x286   : > { %v2145_v1 = vmax.f32 %v2101_v10, %v2103_v28  ;;  %v2106_v25 = vmax.f32 %v2042_v38, 0.0  ;;  %v9840_v41 = vadd.f32 %v9115_v39, %v1955_v3  ;;  %v9843_v63 = vadd.f32 %v9119_v32, %v1957_v53  ;;  %4192 = vmatpush2.msra.mxu0 %v3756_v17  ;;  %4305 = vmatpush2.msra.mxu1 %v3758_v5  ;;  %v3741_v17 = vld [vmem:[%s12050_s3 + $0x2a8] sm:$0xff]  ;;  %v1887_v53 = vpop.f32.mrf.mxu1 }
 0x287   : > { %v6840_v62 = vrot.slane %v2366_v45, 9  ;;  %v6842_v43 = vrot.slane %v2367_v23, 9  ;;  %v2768_v12 = vmax.f32 %v2358_v37, %v6839_v26  ;;  %v2770_v59 = vmax.f32 %v2365_v0, %v6841_v40  ;;  %4193 = vmatprep.subr.mxu0 %v3753_v48  ;;  %4306 = vmatprep.subr.mxu1 %v3755_v4  ;;  %v1728_v48 = vpop.f32.mrf.mxu0 }
 0x288   : > { %v2368_v19 = vcombine.low %v2144_v42, %v2145_v1  ;;  %v2369_v21 = vcombine.high %v2144_v42, %v2145_v1  ;;  %v9851_v36 = vmax.f32 %v2104_v33, %v2106_v25  ;;  %v2105_v22 = vmax.f32 %v9840_v41, 0.0  ;;  %4194 = vmatpush2.msra.mxu0 %v3752_v20  ;;  %4307 = vmatpush2.msra.mxu1 %v3754_v15 }
 0x289   : > { %v2769_v58 = vmax.f32 %v2366_v45, %v6840_v62  ;;  %v2771_v14 = vmax.f32 %v2367_v23, %v6842_v43  ;;  %v3179_v46 = vrot.slane %v2768_v12, %v9085_v11  ;;  %v3183_v47 = vrot.slane %v2768_v12, %v9088_v8  ;;  %4195 = vmatprep.subr.mxu0 %v3749_v35  ;;  %v12188_v35 = vld [vmem:[#allocation52_spill] sm:$0xff]  ;;  %v3743_v43 = vld [vmem:[%s12050_s3 + $0x2b8] sm:$0xff] }
 0x28a   : > { %v3195_v50 = vrot.slane %v2770_v59, %v9085_v11  ;;  %v3199_v34 = vrot.slane %v2770_v59, %v9088_v8  ;;  %v2376_v51 = vrot.slane %v2368_v19, %v9122_v44  ;;  %v2383_v60 = vrot.slane %v2369_v21, %v9122_v44  ;;  %4308 = vmatprep.subr.mxu1 %v3751_v7  ;;  %v1889_v21 = vpop.f32.mrf.mxu1 }
 0x28b   : > { %v3187_v10 = vrot.slane %v2769_v58, %v9085_v11  ;;  %v3191_v52 = vrot.slane %v2769_v58, %v9088_v8  ;;  %v3203_v55 = vrot.slane %v2771_v14, %v9085_v11  ;;  %v3207_v29 = vrot.slane %v2771_v14, %v9088_v8  ;;  %4196 = vmatpush2.msra.mxu0 %v3748_v30  ;;  %v3740_v30 = vld [vmem:[%s12050_s3 + $0x2a0] sm:$0xff] }
 0x28c   : > { %v3466_v37 = vsel %vm3406_vm8, %v3179_v46, %v9792_v9  ;;  %v3473_v0 = vsel %vm3406_vm8, %v3183_v47, %v9795_v54  ;;  %v2384_v28 = vcombine.high %v2376_v51, %v2376_v51  ;;  %v2385_v3 = vcombine.high %v2383_v60, %v2383_v60  ;;  %4309 = vmatpush2.msra.mxu1 %v3750_v27 }
 0x28d   : > { %v3467_v5 = vsel %vm3408_vm9, %v3187_v10, %v3466_v37  ;;  %v3474_v42 = vsel %vm3408_vm9, %v3191_v52, %v3473_v0  ;;  %v6843_v33 = vrot.slane %v2376_v51, 9  ;;  %v6845_v38 = vrot.slane %v2383_v60, 9  ;;  %4197 = vmatprep.subr.mxu0 %v3745_v49  ;;  %4310 = vmatprep.subr.mxu1 %v3747_v2  ;;  %v3737_v49 = vld [vmem:[%s12050_s3 + $0x288] sm:$0xff]  ;;  %v3739_v2 = vld [vmem:[%s12050_s3 + $0x298] sm:$0xff]  ;;  %v12190_v52 = vld [vmem:[#allocation56_spill] sm:$0xff]  ;;  %v1893_v0 = vpop.f32.mrf.mxu1 }
 0x28e   : > { %v3468_v9 = vsel %vm3410_vm10, %v3195_v50, %v3467_v5  ;;  %v3475_v54 = vsel %vm3410_vm10, %v3199_v34, %v3474_v42  ;;  %v6844_v4 = vrot.slane %v2384_v28, 9  ;;  %v6846_v45 = vrot.slane %v2385_v3, 9  ;;  %4198 = vmatpush2.msra.mxu0 %v3744_v57  ;;  %4311 = vmatpush2.msra.mxu1 %v3746_v16  ;;  %v12189_v34 = vld [vmem:[#allocation53_spill] sm:$0xff] }
 0x28f   : > { %v9894_v23 = vsel %vm3412_vm11, %v3203_v55, %v3468_v9  ;;  %v9897_v26 = vsel %vm3412_vm11, %v3207_v29, %v3475_v54  ;;  %v2772_v40 = vmax.f32 %v2376_v51, %v6843_v33  ;;  %v2774_v20 = vmax.f32 %v2383_v60, %v6845_v38  ;;  %4199 = vmatprep.subr.mxu0 %v3741_v17  ;;  %v3735_v33 = vld [vmem:[%s12050_s3 + $0x278] sm:$0xff]  ;;  %v3732_v38 = vld [vmem:[%s12050_s3 + $0x260] sm:$0xff] }
 0x290   : > { %3543 = vst [vmem:[#allocation3 + $0x90] sm:$0xff] %v9894_v23  ;;  %3544 = vst [vmem:[#allocation3 + $0x98] sm:$0xff] %v9897_v26  ;;  %v2773_v15 = vmax.f32 %v2384_v28, %v6844_v4  ;;  %v2775_v1 = vmax.f32 %v2385_v3, %v6846_v45  ;;  %v2107_v25 = vmax.f32 %v9843_v63, 0.0  ;;  %v1958_v62 = vadd.f32 %v1726_v31, %v12188_v35  ;;  %v1732_v63 = vpop.f32.mrf.mxu0  ;;  %v3742_v31 = vld [vmem:[%s12050_s3 + $0x2b0] sm:$0xff]  ;;  %v3733_v3 = vld [vmem:[%s12050_s3 + $0x268] sm:$0xff] }
 0x291   : > { %4009 = vmatprep.mubr.f32.mxu0 %v9897_v26  ;;  %4122 = vmatprep.mubr.f32.mxu1 %v9897_v26  ;;  %v3211_v12 = vrot.slane %v2772_v40, %v9085_v11  ;;  %v3215_v59 = vrot.slane %v2772_v40, %v9088_v8  ;;  %v3227_v7 = vrot.slane %v2774_v20, %v9085_v11  ;;  %v3734_v4 = vld [vmem:[%s12050_s3 + $0x270] sm:$0xff]  ;;  %v3729_v45 = vld [vmem:[%s12050_s3 + $0x248] sm:$0xff]  ;;  %v3731_v35 = vld [vmem:[%s12050_s3 + $0x258] sm:$0xff] }
 0x292   : > { %v3231_v19 = vrot.slane %v2774_v20, %v9088_v8  ;;  %4010 = vmatmul.mubr.f32.gmra.mxu0 %v9894_v23  ;;  %v3219_v58 = vrot.slane %v2773_v15, %v9085_v11  ;;  %v3223_v14 = vrot.slane %v2773_v15, %v9088_v8  ;;  %v3235_v46 = vrot.slane %v2775_v1, %v9085_v11  ;;  %v1734_v28 = vpop.f32.mrf.mxu0  ;;  %v12191_v15 = vld [vmem:[#allocation57_spill] sm:$0xff] }
 0x293   : > { %v3239_v47 = vrot.slane %v2775_v1, %v9088_v8  ;;  %4123 = vmatmul.mubr.f32.gmra.mxu1 %v9894_v23  ;;  %v2147_v27 = vmax.f32 %v2105_v22, %v2107_v25  ;;  %v2044_v50 = vadd.f32 %v9106_v13, %v1958_v62  ;;  %v1960_v51 = vadd.f32 %v1887_v53, %v12189_v34  ;;  %v3728_v62 = vld [vmem:[%s12050_s3 + $0x240] sm:$0xff]  ;;  %v1895_v34 = vpop.f32.mrf.mxu1 }
 0x294   : > { %v1959_v60 = vadd.f32 %v1728_v48, %v9237_v56  ;;  %4312 = vmatprep.subr.mxu1 %v3743_v43  ;;  %v3477_v10 = vsel %vm3400_vm5, %v3219_v58, %v3211_v12  ;;  %v3484_v41 = vsel %vm3400_vm5, %v3223_v14, %v3215_v59  ;;  %v1961_v22 = vadd.f32 %v1889_v21, %v9241_v6  ;;  %v3736_v56 = vld [vmem:[%s12050_s3 + $0x280] sm:$0xff]  ;;  %v3738_v6 = vld [vmem:[%s12050_s3 + $0x290] sm:$0xff] }
 0x295   : > { %v1962_v55 = vadd.f32 %v1732_v63, %v12190_v52  ;;  %4200 = vmatpush2.msra.mxu0 %v3740_v30  ;;  %v3478_v29 = vsel %vm3402_vm6, %v3227_v7, %v3477_v10  ;;  %v3485_v57 = vsel %vm3402_vm6, %v3231_v19, %v3484_v41  ;;  %v2386_v16 = vcombine.low %v9851_v36, %v2147_v27  ;;  %v12192_v19 = vld [vmem:[#allocation27_spill] sm:$0xff]  ;;  %v12193_v21 = vld [vmem:[#allocation64_spill] sm:$0xff]  ;;  %v3724_v41 = vld [vmem:[%s12050_s3 + $0x220] sm:$0xff] }
 0x296   : > { %v2387_v37 = vcombine.high %v9851_v36, %v2147_v27  ;;  %4313 = vmatpush2.msra.mxu1 %v3742_v31  ;;  %v9953_v17 = vsel %vm3404_vm7, %v3235_v46, %v3478_v29  ;;  %v9956_v5 = vsel %vm3404_vm7, %v3239_v47, %v3485_v57  ;;  %v2108_v42 = vmax.f32 %v2044_v50, 0.0  ;;  %4201 = vmatprep.subr.mxu0 %v3737_v49  ;;  %v3725_v46 = vld [vmem:[%s12050_s3 + $0x228] sm:$0xff]  ;;  %v3726_v29 = vld [vmem:[%s12050_s3 + $0x230] sm:$0xff] }
 0x297   : > { %v2046_v36 = vadd.f32 %v9109_v18, %v1960_v51  ;;  %4314 = vmatprep.subr.mxu1 %v3739_v2  ;;  %v2394_v53 = vrot.slane %v2386_v16, %v9122_v44  ;;  %v2045_v9 = vadd.f32 %v9115_v39, %v1959_v60  ;;  %v2047_v54 = vadd.f32 %v9119_v32, %v1961_v22  ;;  %v3727_v51 = vld [vmem:[%s12050_s3 + $0x238] sm:$0xff] }
 0x298   : > { %v2401_v48 = vrot.slane %v2387_v37, %v9122_v44  ;;  %4202 = vmatpush2.msra.mxu0 %v3736_v56  ;;  %v9976_v20 = vadd.f32 %v9106_v13, %v1962_v55  ;;  %v1964_v1 = vadd.f32 %v1893_v0, %v12191_v15  ;;  %v1963_v25 = vadd.f32 %v1734_v28, %v9247_v61  ;;  %v3730_v61 = vld [vmem:[%s12050_s3 + $0x250] sm:$0xff]  ;;  %v12194_v0 = vld [vmem:[#allocation15_spill] sm:$0xff] }
 0x299   : > { %v2110_v40 = vmax.f32 %v2046_v36, 0.0  ;;  %4315 = vmatpush2.msra.mxu1 %v3738_v6  ;;  %4203 = vmatprep.subr.mxu0 %v3733_v3  ;;  %v2402_v43 = vcombine.high %v2394_v53, %v2394_v53  ;;  %v6847_v59 = vrot.slane %v2394_v53, 9  ;;  %v9991_v63 = vadd.f32 %v12193_v21, %v12192_v19  ;;  %v3721_v6 = vld [vmem:[%s12050_s3 + $0x208] sm:$0xff]  ;;  %v3723_v3 = vld [vmem:[%s12050_s3 + $0x218] sm:$0xff]  ;;  %v1899_v19 = vpop.f32.mrf.mxu1 }
 0x29a   : > { %v2403_v12 = vcombine.high %v2401_v48, %v2401_v48  ;;  %v6849_v7 = vrot.slane %v2401_v48, 9  ;;  %4316 = vmatprep.subr.mxu1 %v3735_v33  ;;  %4204 = vmatpush2.msra.mxu0 %v3732_v38  ;;  %v2109_v58 = vmax.f32 %v2045_v9, 0.0  ;;  %v2111_v14 = vmax.f32 %v2047_v54, 0.0 }
 0x29b   : > { %v2148_v30 = vmax.f32 %v2108_v42, %v2110_v40  ;;  %4317 = vmatpush2.msra.mxu1 %v3734_v4  ;;  %4205 = vmatprep.subr.mxu0 %v3729_v45  ;;  %v6848_v47 = vrot.slane %v2402_v43, 9  ;;  %v2776_v27 = vmax.f32 %v2394_v53, %v6847_v59  ;;  %v2112_v49 = vmax.f32 %v9976_v20, 0.0  ;;  %v1738_v53 = vpop.f32.mrf.mxu0  ;;  %v3722_v40 = vld [vmem:[%s12050_s3 + $0x210] sm:$0xff]  ;;  %v7056_v20 = vld [vmem:[%s12050_s3 + $0x9e8] sm:$0xff] }
 0x29c   : > { %v6850_v31 = vrot.slane %v2403_v12, 9  ;;  %v2778_v50 = vmax.f32 %v2401_v48, %v6849_v7  ;;  %4318 = vmatprep.subr.mxu1 %v3731_v35  ;;  %4206 = vmatpush2.msra.mxu0 %v3728_v62  ;;  %v2149_v60 = vmax.f32 %v2109_v58, %v2111_v14  ;;  %v2050_v2 = vadd.f32 %v9109_v18, %v1964_v1  ;;  %v3720_v48 = vld [vmem:[%s12050_s3 + $0x200] sm:$0xff] }
 0x29d   : > { %v10002_v10 = vadd.f32 %v9115_v39, %v1963_v25  ;;  %4319 = vmatpush2.msra.mxu1 %v3730_v61  ;;  %v2777_v22 = vmax.f32 %v2402_v43, %v6848_v47  ;;  %v3243_v55 = vrot.slane %v2776_v27, %v9085_v11  ;;  %v3247_v56 = vrot.slane %v2776_v27, %v9088_v8  ;;  %v1740_v21 = vpop.f32.mrf.mxu0  ;;  %v12196_v27 = vld [vmem:[#allocation68_spill] sm:$0xff] }
 0x29e   : > { %v2779_v52 = vmax.f32 %v2403_v12, %v6850_v31  ;;  %4207 = vmatprep.subr.mxu0 %v3725_v46  ;;  %v3259_v57 = vrot.slane %v2778_v50, %v9085_v11  ;;  %v2404_v16 = vcombine.low %v2148_v30, %v2149_v60  ;;  %v2405_v37 = vcombine.high %v2148_v30, %v2149_v60  ;;  %v7058_v30 = vld [vmem:[%s12050_s3 + $0x9f8] sm:$0xff]  ;;  %v12195_v31 = vld [vmem:[#allocation28_spill] sm:$0xff] }
 0x29f   : > { %v1965_v28 = vadd.f32 %v1895_v34, %v12194_v0  ;;  %4320 = vmatprep.subr.mxu1 %v3727_v51  ;;  %v3251_v42 = vrot.slane %v2777_v22, %v9085_v11  ;;  %v3255_v36 = vrot.slane %v2777_v22, %v9088_v8  ;;  %v3263_v33 = vrot.slane %v2778_v50, %v9088_v8 }
 0x2a0   : > { %v3267_v38 = vrot.slane %v2779_v52, %v9085_v11  ;;  %4208 = vmatpush2.msra.mxu0 %v3724_v41  ;;  %v3480_v9 = vsel %vm3406_vm8, %v3243_v55, %v9953_v17  ;;  %v3487_v54 = vsel %vm3406_vm8, %v3247_v56, %v9956_v5  ;;  %v2412_v4 = vrot.slane %v2404_v16, %v9122_v44  ;;  %v1901_v16 = vpop.f32.mrf.mxu1 }
 0x2a1   : > { %v2419_v45 = vrot.slane %v2405_v37, %v9122_v44  ;;  %4321 = vmatpush2.msra.mxu1 %v3726_v29  ;;  %v3271_v15 = vrot.slane %v2779_v52, %v9088_v8  ;;  %v3481_v17 = vsel %vm3408_vm9, %v3251_v42, %v3480_v9  ;;  %v3488_v1 = vsel %vm3408_vm9, %v3255_v36, %v3487_v54  ;;  %v12197_v52 = vld [vmem:[#allocation62_spill] sm:$0xff]  ;;  %v1744_v37 = vpop.f32.mrf.mxu0  ;;  %v12198_v36 = vld [vmem:[#allocation63_spill] sm:$0xff] }
 0x2a2   : > { %v2114_v5 = vmax.f32 %v2050_v2, 0.0  ;;  %4209 = vmatprep.subr.mxu0 %v3721_v6  ;;  %4322 = vmatprep.subr.mxu1 %v3723_v3  ;;  %v3482_v25 = vsel %vm3410_vm10, %v3259_v57, %v3481_v17  ;;  %v3489_v35 = vsel %vm3410_vm10, %v3263_v33, %v3488_v1  ;;  %v2420_v62 = vcombine.high %v2412_v4, %v2412_v4  ;;  %v12199_v54 = vld [vmem:[#allocation66_spill] sm:$0xff]  ;;  %v1905_v17 = vpop.f32.mrf.mxu1 }
 0x2a3   : > { %v2421_v43 = vcombine.high %v2419_v45, %v2419_v45  ;;  %4210 = vmatpush2.msra.mxu0 %v3720_v48  ;;  %v3483_v12 = vsel %vm3412_vm11, %v3267_v38, %v3482_v25  ;;  %v3490_v59 = vsel %vm3412_vm11, %v3271_v15, %v3489_v35  ;;  %v6851_v7 = vrot.slane %v2412_v4, 9  ;;  %4323 = vmatpush2.msra.mxu1 %v3722_v40  ;;  %v1746_v1 = vpop.f32.mrf.mxu0 }
 0x2a4   : > { %v6853_v61 = vrot.slane %v2419_v45, 9  ;;  %4607 = vmatprep.subr.mxu0 %v7056_v20  ;;  %3545 = vst [vmem:[#allocation3 + $0xa0] sm:$0xff] %v3483_v12  ;;  %3546 = vst [vmem:[#allocation3 + $0xa8] sm:$0xff] %v3490_v59  ;;  %v6852_v58 = vrot.slane %v2420_v62, 9  ;;  %v2150_v46 = vmax.f32 %v2112_v49, %v2114_v5  ;;  %v2051_v47 = vadd.f32 %v9119_v32, %v1965_v28 }
 0x2a5   : > { %v6854_v14 = vrot.slane %v2421_v43, 9  ;;  %4015 = vmatprep.mubr.f32.mxu0 %v3490_v59  ;;  %4128 = vmatprep.mubr.f32.mxu1 %v3490_v59  ;;  %v1312_v50 = vadd.f32 %v12196_v27, %v12195_v31  ;;  %v2780_v34 = vmax.f32 %v2412_v4, %v6851_v7  ;;  %v2113_v60 = vmax.f32 %v10002_v10, 0.0  ;;  %v12202_v31 = vld [vmem:[#allocation69_spill] sm:$0xff] }
 0x2a6   : > { %v2782_v51 = vmax.f32 %v2419_v45, %v6853_v61  ;;  %4016 = vmatmul.mubr.f32.gmra.mxu0 %v3483_v12  ;;  %4129 = vmatmul.mubr.f32.gmra.mxu1 %v3483_v12  ;;  %v2781_v2 = vmax.f32 %v2420_v62, %v6852_v58  ;;  %v2115_v22 = vmax.f32 %v2051_v47, 0.0  ;;  %v1966_v55 = vadd.f32 %v1738_v53, %v12197_v52  ;;  %v12200_v61 = vld [vmem:[#allocation67_spill] sm:$0xff]  ;;  %v12201_v47 = vld [vmem:[#allocation29_spill] sm:$0xff] }
 0x2a7   : > { %v2783_v41 = vmax.f32 %v2421_v43, %v6854_v14  ;;  %4720 = vmatprep.subr.mxu1 %v7058_v30  ;;  %v3275_v49 = vrot.slane %v2780_v34, %v9085_v11  ;;  %v3279_v56 = vrot.slane %v2780_v34, %v9088_v8  ;;  %v1968_v33 = vadd.f32 %v1899_v19, %v12198_v36 }
 0x2a8   : > { %v3291_v29 = vrot.slane %v2782_v51, %v9085_v11  ;;  %v3295_v57 = vrot.slane %v2782_v51, %v9088_v8  ;;  %v3283_v10 = vrot.slane %v2781_v2, %v9085_v11  ;;  %v3287_v0 = vrot.slane %v2781_v2, %v9088_v8 }
 0x2a9   : > { %v3299_v28 = vrot.slane %v2783_v41, %v9085_v11  ;;  %v3303_v6 = vrot.slane %v2783_v41, %v9088_v8  ;;  %v2151_v3 = vmax.f32 %v2113_v60, %v2115_v22  ;;  %v2052_v42 = vadd.f32 %v9106_v13, %v1966_v55  ;;  %v1907_v55 = vpop.f32.mrf.mxu1 }
 0x2aa   : > { %v1967_v38 = vadd.f32 %v1740_v21, %v9664_v24  ;;  %v3491_v53 = vsel %vm3400_vm5, %v3283_v10, %v3275_v49  ;;  %v3498_v48 = vsel %vm3400_vm5, %v3287_v0, %v3279_v56  ;;  %v1969_v9 = vadd.f32 %v1901_v16, %v9991_v63 }
 0x2ab   : > { %v1970_v4 = vadd.f32 %v1744_v37, %v12199_v54  ;;  %v3492_v45 = vsel %vm3402_vm6, %v3291_v29, %v3491_v53  ;;  %v3499_v40 = vsel %vm3402_vm6, %v3295_v57, %v3498_v48  ;;  %v2422_v20 = vcombine.low %v2150_v46, %v2151_v3 }
 0x2ac   : > { %v2423_v15 = vcombine.high %v2150_v46, %v2151_v3  ;;  %v3493_v5 = vsel %vm3404_vm7, %v3299_v28, %v3492_v45  ;;  %v3500_v24 = vsel %vm3404_vm7, %v3303_v6, %v3499_v40  ;;  %v2116_v25 = vmax.f32 %v2052_v42, 0.0 }
 0x2ad   : > { %v2054_v35 = vadd.f32 %v9109_v18, %v1968_v33  ;;  %v2430_v62 = vrot.slane %v2422_v20, %v9122_v44  ;;  %v2053_v43 = vadd.f32 %v9115_v39, %v1967_v38  ;;  %v2055_v12 = vadd.f32 %v9119_v32, %v1969_v9 }
 0x2ae   : > { %v2437_v63 = vrot.slane %v2423_v15, %v9122_v44  ;;  %v2056_v7 = vadd.f32 %v9106_v13, %v1970_v4  ;;  %v1972_v19 = vadd.f32 %v1905_v17, %v12200_v61  ;;  %v1971_v21 = vadd.f32 %v1746_v1, %v1312_v50 }
 0x2af   : > { %v2118_v59 = vmax.f32 %v2054_v35, 0.0  ;;  %v2438_v30 = vcombine.high %v2430_v62, %v2430_v62  ;;  %v6855_v14 = vrot.slane %v2430_v62, 9  ;;  %v1473_v27 = vadd.f32 %v12202_v31, %v12201_v47 }
 0x2b0   : > { %v2439_v58 = vcombine.high %v2437_v63, %v2437_v63  ;;  %v6857_v46 = vrot.slane %v2437_v63, 9  ;;  %v2117_v51 = vmax.f32 %v2053_v43, 0.0  ;;  %v2119_v60 = vmax.f32 %v2055_v12, 0.0 }
 0x2b1   : > { %v2152_v34 = vmax.f32 %v2116_v25, %v2118_v59  ;;  %v6856_v2 = vrot.slane %v2438_v30, 9  ;;  %v2784_v22 = vmax.f32 %v2430_v62, %v6855_v14  ;;  %v2120_v13 = vmax.f32 %v2056_v7, 0.0 }
 0x2b2   : > { %v6858_v41 = vrot.slane %v2439_v58, 9  ;;  %v2786_v52 = vmax.f32 %v2437_v63, %v6857_v46  ;;  %v2153_v49 = vmax.f32 %v2117_v51, %v2119_v60  ;;  %v2058_v56 = vadd.f32 %v9109_v18, %v1972_v19 }
 0x2b3   : > { %v2057_v50 = vadd.f32 %v9115_v39, %v1971_v21  ;;  %v2785_v29 = vmax.f32 %v2438_v30, %v6856_v2  ;;  %v3307_v16 = vrot.slane %v2784_v22, %v9085_v11  ;;  %v3311_v37 = vrot.slane %v2784_v22, %v9088_v8 }
 0x2b4   : > { %v2787_v57 = vmax.f32 %v2439_v58, %v6858_v41  ;;  %v3323_v10 = vrot.slane %v2786_v52, %v9085_v11  ;;  %v2440_v0 = vcombine.low %v2152_v34, %v2153_v49  ;;  %v2441_v28 = vcombine.high %v2152_v34, %v2153_v49 }
 0x2b5   : > { %v1973_v6 = vadd.f32 %v1907_v55, %v1473_v27  ;;  %v3315_v3 = vrot.slane %v2785_v29, %v9085_v11  ;;  %v3319_v42 = vrot.slane %v2785_v29, %v9088_v8  ;;  %v3327_v36 = vrot.slane %v2786_v52, %v9088_v8 }
 0x2b6   : > { %v3331_v18 = vrot.slane %v2787_v57, %v9085_v11  ;;  %v3494_v39 = vsel %vm3406_vm8, %v3307_v16, %v3493_v5  ;;  %v3501_v33 = vsel %vm3406_vm8, %v3311_v37, %v3500_v24  ;;  %v2448_v38 = vrot.slane %v2440_v0, %v9122_v44 }
 0x2b7   : > { %v2455_v53 = vrot.slane %v2441_v28, %v9122_v44  ;;  %v3335_v48 = vrot.slane %v2787_v57, %v9088_v8  ;;  %v3495_v9 = vsel %vm3408_vm9, %v3315_v3, %v3494_v39  ;;  %v3502_v54 = vsel %vm3408_vm9, %v3319_v42, %v3501_v33  ;;  %v3552_v28 = vld [vmem:[#allocation3 + $0x8] sm:$0x80] }
 0x2b8   : > { %v2122_v4 = vmax.f32 %v2058_v56, 0.0  ;;  %v3496_v45 = vsel %vm3410_vm10, %v3323_v10, %v3495_v9  ;;  %v3503_v40 = vsel %vm3410_vm10, %v3327_v36, %v3502_v54  ;;  %v2456_v20 = vcombine.high %v2448_v38, %v2448_v38 }
 0x2b9   : > { %v2457_v15 = vcombine.high %v2455_v53, %v2455_v53  ;;  %v10101_v17 = vsel %vm3412_vm11, %v3331_v18, %v3496_v45  ;;  %v10104_v1 = vsel %vm3412_vm11, %v3335_v48, %v3503_v40  ;;  %v6859_v5 = vrot.slane %v2448_v38, 9  ;;  %v7775_v18 = vld [vmem:[#allocation3 + $0x18] sm:$0xff] }
 0x2ba   : > { %v6861_v24 = vrot.slane %v2455_v53, 9  ;;  %3547 = vst [vmem:[#allocation3 + $0xd0] sm:$0xff] %v10101_v17  ;;  %3548 = vst [vmem:[#allocation3 + $0xd8] sm:$0xff] %v10104_v1  ;;  %v6860_v25 = vrot.slane %v2456_v20, 9  ;;  %v2154_v62 = vmax.f32 %v2120_v13, %v2122_v4  ;;  %v2059_v63 = vadd.f32 %v9119_v32, %v1973_v6  ;;  %4021 = vmatprep.mubr.f32.mxu0 %v10104_v1 }
 0x2bb   : > { %v6862_v35 = vrot.slane %v2457_v15, 9  ;;  %4134 = vmatprep.mubr.f32.mxu1 %v10104_v1  ;;  %v2788_v43 = vmax.f32 %v2448_v38, %v6859_v5  ;;  %v2121_v59 = vmax.f32 %v2057_v50, 0.0  ;;  %4022 = vmatmul.mubr.f32.gmra.mxu0 %v10101_v17  ;;  %v3604_v39 = vrot.slane %v7775_v18, 7  ;;  %v3551_v5 = vld [vmem:[#allocation3] sm:$0x80] }
 0x2bc   : > { %v2790_v12 = vmax.f32 %v2455_v53, %v6861_v24  ;;  %4135 = vmatmul.mubr.f32.gmra.mxu1 %v10101_v17  ;;  %v2789_v7 = vmax.f32 %v2456_v20, %v6860_v25  ;;  %v2123_v19 = vmax.f32 %v2059_v63, 0.0  ;;  %v3603_v53 = vrot.slane %v3552_v28, 7  ;;  %v7045_v28 = vld [vmem:[%s12050_s3 + $0x990] sm:$0xff] }
 0x2bd   : > { %v2791_v61 = vmax.f32 %v2457_v15, %v6862_v35  ;;  %v3339_v21 = vrot.slane %v2788_v43, %v9085_v11  ;;  %v3343_v30 = vrot.slane %v2788_v43, %v9088_v8  ;;  %v3556_v35 = vld [vmem:[#allocation3 + $0x28] sm:$0x7f]  ;;  %v7776_v43 = vld [vmem:[#allocation3 + $0x10] sm:$0xff] }
 0x2be   : > { %v3347_v32 = vrot.slane %v2789_v7, %v9085_v11  ;;  %v3351_v58 = vrot.slane %v2789_v7, %v9088_v8  ;;  %v3355_v14 = vrot.slane %v2790_v12, %v9085_v11  ;;  %v3359_v46 = vrot.slane %v2790_v12, %v9088_v8 }
 0x2bf   : > { %v2155_v47 = vmax.f32 %v2121_v59, %v2123_v19  ;;  %v3363_v31 = vrot.slane %v2791_v61, %v9085_v11  ;;  %v3367_v27 = vrot.slane %v2791_v61, %v9088_v8  ;;  %v3601_v12 = vrot.slane %v7776_v43, 7  ;;  %v3555_v19 = vld [vmem:[#allocation3 + $0x20] sm:$0x7f] }
 0x2c0   : > { %v3505_v34 = vsel %vm3400_vm5, %v3347_v32, %v3339_v21  ;;  %v3512_v51 = vsel %vm3400_vm5, %v3351_v58, %v3343_v30  ;;  %v3600_v59 = vrot.slane %v3551_v5, 7  ;;  %v3605_v7 = vsel %vm3599_vm12, %v3603_v53, %v3604_v39  ;;  %v7055_v30 = vld [vmem:[%s12050_s3 + $0x9e0] sm:$0xff]  ;;  %v7057_v32 = vld [vmem:[%s12050_s3 + $0x9f0] sm:$0xff]  ;;  %v3558_v58 = vld [vmem:[#allocation3 + $0x48] sm:$0x80] }
 0x2c1   : > { %v3506_v60 = vsel %vm3402_vm6, %v3355_v14, %v3505_v34  ;;  %v3513_v2 = vsel %vm3402_vm6, %v3359_v46, %v3512_v51  ;;  %v2458_v41 = vcombine.low %v2154_v62, %v2155_v47  ;;  %v2459_v22 = vcombine.high %v2154_v62, %v2155_v47  ;;  %v7052_v46 = vld [vmem:[%s12050_s3 + $0x9c8] sm:$0xff]  ;;  %v7054_v47 = vld [vmem:[%s12050_s3 + $0x9d8] sm:$0xff]  ;;  %v7053_v34 = vld [vmem:[%s12050_s3 + $0x9d0] sm:$0xff] }
 0x2c2   : > { %v3507_v52 = vsel %vm3404_vm7, %v3363_v31, %v3506_v60  ;;  %v3514_v55 = vsel %vm3404_vm7, %v3367_v27, %v3513_v2  ;;  %v3608_v61 = vrot.slane %v3556_v35, 7  ;;  %v3602_v21 = vsel %vm3599_vm12, %v3600_v59, %v3601_v12  ;;  %v7051_v27 = vld [vmem:[%s12050_s3 + $0x9c0] sm:$0xff]  ;;  %v7777_v51 = vld [vmem:[#allocation3 + $0x58] sm:$0xff]  ;;  %v7033_v35 = vld [vmem:[%s12050_s3 + $0x930] sm:$0xff] }
 0x2c3   : > { %v2466_v49 = vrot.slane %v2458_v41, %v9122_v44  ;;  %v2473_v13 = vrot.slane %v2459_v22, %v9122_v44  ;;  %v3606_v31 = vrot.slane %v3555_v19, 7  ;;  %v3614_v60 = vrot.slane %v7777_v51, 7  ;;  %v7048_v41 = vld [vmem:[%s12050_s3 + $0x9a8] sm:$0xff]  ;;  %v7050_v22 = vld [vmem:[%s12050_s3 + $0x9b8] sm:$0xff] }
 0x2c4   : > { %v3609_v14 = vsel %vm3599_vm12, %v3604_v39, %v3608_v61  ;;  %v3613_v2 = vrot.slane %v3558_v58, 7  ;;  %v7039_v39 = vld [vmem:[%s12050_s3 + $0x960] sm:$0xff]  ;;  %v7034_v5 = vld [vmem:[%s12050_s3 + $0x938] sm:$0xff] }
 0x2c5   : > { %v2474_v56 = vcombine.high %v2466_v49, %v2466_v49  ;;  %v2475_v50 = vcombine.high %v2473_v13, %v2473_v13  ;;  %v6863_v29 = vrot.slane %v2466_v49, 9  ;;  %v6865_v57 = vrot.slane %v2473_v13, 9  ;;  %v7030_v59 = vld [vmem:[%s12050_s3 + $0x918] sm:$0xff]  ;;  %v7027_v61 = vld [vmem:[%s12050_s3 + $0x900] sm:$0xff] }
 0x2c7   : > { %v6864_v16 = vrot.slane %v2474_v56, 9  ;;  %v6866_v37 = vrot.slane %v2475_v50, 9  ;;  %v2792_v10 = vmax.f32 %v2466_v49, %v6863_v29  ;;  %v2794_v0 = vmax.f32 %v2473_v13, %v6865_v57  ;;  %v7047_v49 = vld [vmem:[%s12050_s3 + $0x9a0] sm:$0xff]  ;;  %v7049_v13 = vld [vmem:[%s12050_s3 + $0x9b0] sm:$0xff] }
 0x2c8   : > { %v3615_v57 = vsel %vm3599_vm12, %v3613_v2, %v3614_v60  ;;  %v7021_v2 = vld [vmem:[%s12050_s3 + $0x8d0] sm:$0xff] }
 0x2c9   : > { %v2793_v6 = vmax.f32 %v2474_v56, %v6864_v16  ;;  %v2795_v3 = vmax.f32 %v2475_v50, %v6866_v37  ;;  %v3371_v42 = vrot.slane %v2792_v10, %v9085_v11  ;;  %v3375_v36 = vrot.slane %v2792_v10, %v9088_v8  ;;  %v3562_v56 = vld [vmem:[#allocation3 + $0x68] sm:$0x7f]  ;;  %v7778_v50 = vld [vmem:[#allocation3 + $0x50] sm:$0xff]  ;;  %v7046_v37 = vld [vmem:[%s12050_s3 + $0x998] sm:$0xff] }
 0x2ca   : > { %v3387_v48 = vrot.slane %v2794_v0, %v9085_v11  ;;  %v3391_v9 = vrot.slane %v2794_v0, %v9088_v8  ;;  %v3611_v29 = vrot.slane %v7778_v50, 7  ;;  %v7044_v16 = vld [vmem:[%s12050_s3 + $0x988] sm:$0xff]  ;;  %v7043_v0 = vld [vmem:[%s12050_s3 + $0x980] sm:$0xff] }
 0x2cb   : > { %v3379_v33 = vrot.slane %v2793_v6, %v9085_v11  ;;  %v3383_v38 = vrot.slane %v2793_v6, %v9088_v8  ;;  %v3508_v54 = vsel %vm3406_vm8, %v3371_v42, %v3507_v52  ;;  %v3515_v4 = vsel %vm3406_vm8, %v3375_v36, %v3514_v55  ;;  %v3557_v52 = vld [vmem:[#allocation3 + $0x40] sm:$0x80]  ;;  %v7042_v42 = vld [vmem:[%s12050_s3 + $0x978] sm:$0xff]  ;;  %v3561_v36 = vld [vmem:[#allocation3 + $0x60] sm:$0x7f] }
 0x2cc   : > { %v3395_v45 = vrot.slane %v2795_v3, %v9085_v11  ;;  %v3399_v40 = vrot.slane %v2795_v3, %v9088_v8  ;;  %v3607_v55 = vsel %vm3599_vm12, %v3601_v12, %v3606_v31  ;;  %v3610_v10 = vrot.slane %v3557_v52, 7  ;;  %v7040_v3 = vld [vmem:[%s12050_s3 + $0x968] sm:$0xff] }
 0x2cd   : > { %v3509_v20 = vsel %vm3408_vm9, %v3379_v33, %v3508_v54  ;;  %v3516_v15 = vsel %vm3408_vm9, %v3383_v38, %v3515_v4  ;;  %v3618_v6 = vrot.slane %v3562_v56, 7  ;;  %v7041_v33 = vld [vmem:[%s12050_s3 + $0x970] sm:$0xff]  ;;  %v3564_v38 = vld [vmem:[#allocation3 + $0x88] sm:$0x80]  ;;  %v3616_v54 = vrot.slane %v3561_v36, 7  ;;  %v7035_v4 = vld [vmem:[%s12050_s3 + $0x940] sm:$0xff] }
 0x2ce   : > { %v3510_v24 = vsel %vm3410_vm10, %v3387_v48, %v3509_v20  ;;  %v3517_v25 = vsel %vm3410_vm10, %v3391_v9, %v3516_v15  ;;  %v3612_v18 = vsel %vm3599_vm12, %v3610_v10, %v3611_v29  ;;  %v7036_v48 = vld [vmem:[%s12050_s3 + $0x948] sm:$0xff]  ;;  %v7038_v9 = vld [vmem:[%s12050_s3 + $0x958] sm:$0xff]  ;;  %v3623_v20 = vrot.slane %v3564_v38, 7  ;;  %v7017_v56 = vld [vmem:[%s12050_s3 + $0x8b0] sm:$0xff] }
 0x2cf   : > { %v3511_v62 = vsel %vm3412_vm11, %v3395_v45, %v3510_v24  ;;  %v3518_v63 = vsel %vm3412_vm11, %v3399_v40, %v3517_v25  ;;  %v3619_v53 = vsel %vm3599_vm12, %v3614_v60, %v3618_v6  ;;  %v7037_v45 = vld [vmem:[%s12050_s3 + $0x950] sm:$0xff]  ;;  %v3624_v40 = vrot.slane %v9897_v26, 7  ;;  %v7032_v15 = vld [vmem:[%s12050_s3 + $0x928] sm:$0xff]  ;;  %v3563_v24 = vld [vmem:[#allocation3 + $0x80] sm:$0x80] }
 0x2d0   : > { %3549 = vst [vmem:[#allocation3 + $0xe0] sm:$0xff] %v3511_v62  ;;  %3550 = vst [vmem:[#allocation3 + $0xe8] sm:$0xff] %v3518_v63  ;;  %4027 = vmatprep.mubr.f32.mxu0 %v3518_v63  ;;  %4140 = vmatprep.mubr.f32.mxu1 %v3518_v63  ;;  %v3617_v25 = vsel %vm3599_vm12, %v3611_v29, %v3616_v54  ;;  %v7031_v26 = vld [vmem:[%s12050_s3 + $0x920] sm:$0xff]  ;;  %v3621_v63 = vrot.slane %v9894_v23, 7  ;;  %v7028_v12 = vld [vmem:[%s12050_s3 + $0x908] sm:$0xff]  ;;  %v3631_v29 = vrot.slane %v10101_v17, 7 }
 0x2d1   : > { %4028 = vmatmul.mubr.f32.gmra.mxu0 %v3511_v62  ;;  %4141 = vmatmul.mubr.f32.gmra.mxu1 %v3511_v62  ;;  %v3568_v62 = vld [vmem:[#allocation3 + $0xa8] sm:$0x7f]  ;;  %v3625_v43 = vsel %vm3599_vm12, %v3623_v20, %v3624_v40  ;;  %v7029_v23 = vld [vmem:[%s12050_s3 + $0x910] sm:$0xff]  ;;  %v7019_v60 = vld [vmem:[%s12050_s3 + $0x8c0] sm:$0xff] }
 0x2d2   : > { %4211 = vmatprep.mubr.f32.mxu0 %v3605_v7  ;;  %4324 = vmatprep.mubr.f32.mxu1 %v3605_v7  ;;  %v3620_v7 = vrot.slane %v3563_v24, 7  ;;  %v3628_v19 = vrot.slane %v3568_v62, 7  ;;  %v7016_v52 = vld [vmem:[%s12050_s3 + $0x8a8] sm:$0xff]  ;;  %v7013_v17 = vld [vmem:[%s12050_s3 + $0x890] sm:$0xff]  ;;  %v7003_v54 = vld [vmem:[%s12050_s3 + $0x840] sm:$0xff] }
 0x2d3   : > { %v7008_v6 = vld [vmem:[%s12050_s3 + $0x868] sm:$0xff]  ;;  %v6999_v24 = vld [vmem:[%s12050_s3 + $0x820] sm:$0xff] }
 0x2d4   : > { %v3622_v58 = vsel %vm3599_vm12, %v3620_v7, %v3621_v63  ;;  %v3629_v31 = vsel %vm3599_vm12, %v3624_v40, %v3628_v19  ;;  %v7000_v20 = vld [vmem:[%s12050_s3 + $0x828] sm:$0xff]  ;;  %v7122_v7 = vld [vmem:[%s12050_s3 + $0xbf8] sm:$0xff] }
 0x2d5   : > { %4212 = vmatmul.mubr.f32.vlgmr.msra.gmra.mxu0 %v3602_v21  ;;  %4325 = vmatmul.mubr.f32.vlgmr.msra.gmra.mxu1 %v3602_v21  ;;  %v7024_v21 = vld [vmem:[%s12050_s3 + $0x8e8] sm:$0xff] }
 0x2d6   : > { %4217 = vmatprep.mubr.f32.mxu0 %v3609_v14  ;;  %4330 = vmatprep.mubr.f32.mxu1 %v3609_v14  ;;  %v7023_v14 = vld [vmem:[%s12050_s3 + $0x8e0] sm:$0xff]  ;;  %v6996_v62 = vld [vmem:[%s12050_s3 + $0x808] sm:$0xff] }
 0x2d7   : > { %4608 = vmatpush1.msra.mxu0 %v7055_v30  ;;  %4721 = vmatpush1.msra.mxu1 %v7057_v32  ;;  %v7026_v30 = vld [vmem:[%s12050_s3 + $0x8f8] sm:$0xff]  ;;  %v3567_v32 = vld [vmem:[#allocation3 + $0xa0] sm:$0x7f]  ;;  %v3574_v50 = vld [vmem:[#allocation3 + $0xe8] sm:$0x7f] }
 0x2d8   : > { %4609 = vmatprep.subr.mxu0 %v7052_v46  ;;  %4722 = vmatprep.subr.mxu1 %v7054_v47  ;;  %v7025_v46 = vld [vmem:[%s12050_s3 + $0x8f0] sm:$0xff]  ;;  %v3570_v47 = vld [vmem:[#allocation3 + $0xc8] sm:$0x80]  ;;  %v3626_v51 = vrot.slane %v3567_v32, 7 }
 0x2d9   : > { %4610 = vmatpush1.msra.mxu0 %v7051_v27  ;;  %4723 = vmatpush1.msra.mxu1 %v7053_v34  ;;  %v7020_v27 = vld [vmem:[%s12050_s3 + $0x8c8] sm:$0xff]  ;;  %v7022_v34 = vld [vmem:[%s12050_s3 + $0x8d8] sm:$0xff]  ;;  %v7117_v32 = vld [vmem:[%s12050_s3 + $0xbd0] sm:$0xff] }
 0x2da   : > { %4218 = vmatmul.mubr.f32.gmra.mxu0 %v3607_v55  ;;  %4331 = vmatmul.mubr.f32.gmra.mxu1 %v3607_v55  ;;  %v7018_v55 = vld [vmem:[%s12050_s3 + $0x8b8] sm:$0xff]  ;;  %v7116_v19 = vld [vmem:[%s12050_s3 + $0xbc8] sm:$0xff] }
 0x2db   : > { %4611 = vmatprep.subr.mxu0 %v7048_v41  ;;  %4724 = vmatprep.subr.mxu1 %v7050_v22  ;;  %v3634_v41 = vrot.slane %v10104_v1, 7  ;;  %v3633_v22 = vrot.slane %v3570_v47, 7  ;;  %v7015_v1 = vld [vmem:[%s12050_s3 + $0x8a0] sm:$0xff]  ;;  %v7113_v47 = vld [vmem:[%s12050_s3 + $0xbb0] sm:$0xff] }
 0x2dc   : > { %4223 = vmatprep.mubr.f32.mxu0 %v3615_v57  ;;  %4336 = vmatprep.mubr.f32.mxu1 %v3615_v57 }
 0x2dd   : > { %4612 = vmatpush1.msra.mxu0 %v7047_v49  ;;  %4725 = vmatpush1.msra.mxu1 %v7049_v13  ;;  %v3569_v49 = vld [vmem:[#allocation3 + $0xc0] sm:$0x80]  ;;  %v3627_v13 = vsel %vm3599_vm12, %v3621_v63, %v3626_v51  ;;  %v3635_v57 = vsel %vm3599_vm12, %v3633_v22, %v3634_v41  ;;  %v6998_v63 = vld [vmem:[%s12050_s3 + $0x818] sm:$0xff]  ;;  %v7109_v51 = vld [vmem:[%s12050_s3 + $0xb90] sm:$0xff] }
 0x2de   : > { %4613 = vmatprep.subr.mxu0 %v7044_v16  ;;  %4726 = vmatprep.subr.mxu1 %v7046_v37  ;;  %v7012_v16 = vld [vmem:[%s12050_s3 + $0x888] sm:$0xff]  ;;  %v7014_v37 = vld [vmem:[%s12050_s3 + $0x898] sm:$0xff]  ;;  %v3630_v10 = vrot.slane %v3569_v49, 7  ;;  %v7105_v22 = vld [vmem:[%s12050_s3 + $0xb70] sm:$0xff] }
 0x2df   : > { %4614 = vmatpush1.msra.mxu0 %v7043_v0  ;;  %4727 = vmatpush1.msra.mxu1 %v7045_v28  ;;  %v7011_v0 = vld [vmem:[%s12050_s3 + $0x880] sm:$0xff]  ;;  %v3638_v28 = vrot.slane %v3574_v50, 7 }
 0x2e0   : > { %4224 = vmatmul.mubr.f32.gmra.mxu0 %v3612_v18  ;;  %4337 = vmatmul.mubr.f32.gmra.mxu1 %v3612_v18  ;;  %v3632_v36 = vsel %vm3599_vm12, %v3630_v10, %v3631_v29  ;;  %v7007_v18 = vld [vmem:[%s12050_s3 + $0x860] sm:$0xff]  ;;  %v7093_v10 = vld [vmem:[%s12050_s3 + $0xb10] sm:$0xff] }
 0x2e1   : > { %4615 = vmatprep.subr.mxu0 %v7040_v3  ;;  %4728 = vmatprep.subr.mxu1 %v7042_v42  ;;  %v7010_v3 = vld [vmem:[%s12050_s3 + $0x878] sm:$0xff]  ;;  %v3573_v42 = vld [vmem:[#allocation3 + $0xe0] sm:$0x7f]  ;;  %v3639_v38 = vsel %vm3599_vm12, %v3634_v41, %v3638_v28 }
 0x2e2   : > { %4229 = vmatprep.mubr.f32.mxu0 %v3619_v53  ;;  %4342 = vmatprep.mubr.f32.mxu1 %v3619_v53  ;;  %v7004_v53 = vld [vmem:[%s12050_s3 + $0x848] sm:$0xff]  ;;  %v7103_v41 = vld [vmem:[%s12050_s3 + $0xb60] sm:$0xff] }
 0x2e3   : > { %4616 = vmatpush1.msra.mxu0 %v7039_v39  ;;  %4729 = vmatpush1.msra.mxu1 %v7041_v33  ;;  %v7009_v39 = vld [vmem:[%s12050_s3 + $0x870] sm:$0xff]  ;;  %v10313_v33 = vld [vmem:[#allocation3 + $0x28] sm:$0xff]  ;;  %v7099_v49 = vld [vmem:[%s12050_s3 + $0xb40] sm:$0xff] }
 0x2e4   : > { %4617 = vmatprep.subr.mxu0 %v7036_v48  ;;  %4730 = vmatprep.subr.mxu1 %v7038_v9  ;;  %v7006_v48 = vld [vmem:[%s12050_s3 + $0x858] sm:$0xff]  ;;  %v3636_v9 = vrot.slane %v3573_v42, 7  ;;  %v4426_v40 = vrot.slane %v10313_v33, 1  ;;  %v7095_v50 = vld [vmem:[%s12050_s3 + $0xb20] sm:$0xff] }
 0x2e5   : > { %4618 = vmatpush1.msra.mxu0 %v7035_v4  ;;  %4731 = vmatpush1.msra.mxu1 %v7037_v45  ;;  %v7005_v4 = vld [vmem:[%s12050_s3 + $0x850] sm:$0xff]  ;;  %v4374_v45 = vld [vmem:[#allocation3 + $0x18] sm:$0xfe]  ;;  %v7087_v28 = vld [vmem:[%s12050_s3 + $0xae0] sm:$0xff] }
 0x2e6   : > { %4230 = vmatmul.mubr.f32.gmra.mxu0 %v3617_v25  ;;  %4343 = vmatmul.mubr.f32.gmra.mxu1 %v3617_v25  ;;  %v4425_v25 = vrot.slane %v4374_v45, 1  ;;  %v7086_v42 = vld [vmem:[%s12050_s3 + $0xad8] sm:$0xff]  ;;  %v7077_v45 = vld [vmem:[%s12050_s3 + $0xa90] sm:$0xff] }
 0x2e7   : > { %4619 = vmatprep.subr.mxu0 %v7032_v15  ;;  %4732 = vmatprep.subr.mxu1 %v7034_v5  ;;  %v7002_v15 = vld [vmem:[%s12050_s3 + $0x838] sm:$0xff]  ;;  %v3637_v5 = vsel %vm3599_vm12, %v3631_v29, %v3636_v9  ;;  %v7097_v29 = vld [vmem:[%s12050_s3 + $0xb30] sm:$0xff]  ;;  %v7076_v9 = vld [vmem:[%s12050_s3 + $0xa88] sm:$0xff] }
 0x2e8   : > { %4235 = vmatprep.mubr.f32.mxu0 %v3625_v43  ;;  %4348 = vmatprep.mubr.f32.mxu1 %v3625_v43  ;;  %v6995_v43 = vld [vmem:[%s12050_s3 + $0x800] sm:$0xff] }
 0x2e9   : > { %4620 = vmatpush1.msra.mxu0 %v7031_v26  ;;  %4733 = vmatpush1.msra.mxu1 %v7033_v35  ;;  %v7001_v26 = vld [vmem:[%s12050_s3 + $0x830] sm:$0xff]  ;;  %v4427_v35 = vsel %vm4421_vm13, %v4425_v25, %v4426_v40  ;;  %v7068_v25 = vld [vmem:[%s12050_s3 + $0xa48] sm:$0xff] }
 0x2ea   : > { %4621 = vmatprep.subr.mxu0 %v7028_v12  ;;  %4734 = vmatprep.subr.mxu1 %v7030_v59  ;;  %v6997_v12 = vld [vmem:[%s12050_s3 + $0x810] sm:$0xff]  ;;  %v7120_v59 = vld [vmem:[%s12050_s3 + $0xbe8] sm:$0xff] }
 0x2eb   : > { %4622 = vmatpush1.msra.mxu0 %v7027_v61  ;;  %4735 = vmatpush1.msra.mxu1 %v7029_v23  ;;  %v7119_v61 = vld [vmem:[%s12050_s3 + $0xbe0] sm:$0xff]  ;;  %v7121_v23 = vld [vmem:[%s12050_s3 + $0xbf0] sm:$0xff] }
 0x2ec   : > { %4236 = vmatmul.mubr.f32.gmra.mxu0 %v3622_v58  ;;  %4349 = vmatmul.mubr.f32.gmra.mxu1 %v3622_v58  ;;  %v7112_v58 = vld [vmem:[%s12050_s3 + $0xba8] sm:$0xff] }
 0x2ed   : > { %4623 = vmatprep.subr.mxu0 %v7024_v21  ;;  %4736 = vmatprep.subr.mxu1 %v7026_v30  ;;  %v7118_v21 = vld [vmem:[%s12050_s3 + $0xbd8] sm:$0xff]  ;;  %v7115_v30 = vld [vmem:[%s12050_s3 + $0xbc0] sm:$0xff] }
 0x2ee   : > { %4241 = vmatprep.mubr.f32.mxu0 %v3629_v31  ;;  %4354 = vmatprep.mubr.f32.mxu1 %v3629_v31  ;;  %v7108_v31 = vld [vmem:[%s12050_s3 + $0xb88] sm:$0xff] }
 0x2ef   : > { %4624 = vmatpush1.msra.mxu0 %v7023_v14  ;;  %4737 = vmatpush1.msra.mxu1 %v7025_v46  ;;  %v7114_v14 = vld [vmem:[%s12050_s3 + $0xbb8] sm:$0xff]  ;;  %v7111_v46 = vld [vmem:[%s12050_s3 + $0xba0] sm:$0xff] }
 0x2f0   : > { %4625 = vmatprep.subr.mxu0 %v7020_v27  ;;  %4738 = vmatprep.subr.mxu1 %v7022_v34  ;;  %v7110_v27 = vld [vmem:[%s12050_s3 + $0xb98] sm:$0xff]  ;;  %v7107_v34 = vld [vmem:[%s12050_s3 + $0xb80] sm:$0xff] }
 0x2f1   : > { %4626 = vmatpush1.msra.mxu0 %v7019_v60  ;;  %4739 = vmatpush1.msra.mxu1 %v7021_v2  ;;  %v7104_v60 = vld [vmem:[%s12050_s3 + $0xb68] sm:$0xff]  ;;  %v7106_v2 = vld [vmem:[%s12050_s3 + $0xb78] sm:$0xff] }
 0x2f2   : > { %4242 = vmatmul.mubr.f32.gmra.mxu0 %v3627_v13  ;;  %4355 = vmatmul.mubr.f32.gmra.mxu1 %v3627_v13  ;;  %v7101_v13 = vld [vmem:[%s12050_s3 + $0xb50] sm:$0xff] }
 0x2f3   : > { %4627 = vmatprep.subr.mxu0 %v7016_v52  ;;  %4740 = vmatprep.subr.mxu1 %v7018_v55  ;;  %v7100_v52 = vld [vmem:[%s12050_s3 + $0xb48] sm:$0xff]  ;;  %v7102_v55 = vld [vmem:[%s12050_s3 + $0xb58] sm:$0xff] }
 0x2f4   : > { %4247 = vmatprep.mubr.f32.mxu0 %v3635_v57  ;;  %4360 = vmatprep.mubr.f32.mxu1 %v3635_v57  ;;  %v7092_v57 = vld [vmem:[%s12050_s3 + $0xb08] sm:$0xff] }
 0x2f5   : > { %4628 = vmatpush1.msra.mxu0 %v7015_v1  ;;  %4741 = vmatpush1.msra.mxu1 %v7017_v56  ;;  %v7096_v1 = vld [vmem:[%s12050_s3 + $0xb28] sm:$0xff]  ;;  %v7098_v56 = vld [vmem:[%s12050_s3 + $0xb38] sm:$0xff] }
 0x2f6   : > { %4629 = vmatprep.subr.mxu0 %v7012_v16  ;;  %4742 = vmatprep.subr.mxu1 %v7014_v37  ;;  %v7094_v16 = vld [vmem:[%s12050_s3 + $0xb18] sm:$0xff]  ;;  %v7091_v37 = vld [vmem:[%s12050_s3 + $0xb00] sm:$0xff] }
 0x2f7   : > { %4630 = vmatpush1.msra.mxu0 %v7011_v0  ;;  %4743 = vmatpush1.msra.mxu1 %v7013_v17  ;;  %v7088_v0 = vld [vmem:[%s12050_s3 + $0xae8] sm:$0xff]  ;;  %v7090_v17 = vld [vmem:[%s12050_s3 + $0xaf8] sm:$0xff] }
 0x2f8   : > { %4248 = vmatmul.mubr.f32.gmra.mxu0 %v3632_v36  ;;  %4361 = vmatmul.mubr.f32.gmra.mxu1 %v3632_v36  ;;  %v7083_v36 = vld [vmem:[%s12050_s3 + $0xac0] sm:$0xff] }
 0x2f9   : > { %4631 = vmatprep.subr.mxu0 %v7008_v6  ;;  %4744 = vmatprep.subr.mxu1 %v7010_v3  ;;  %v7089_v6 = vld [vmem:[%s12050_s3 + $0xaf0] sm:$0xff]  ;;  %v7084_v3 = vld [vmem:[%s12050_s3 + $0xac8] sm:$0xff] }
 0x2fa   : > { %4253 = vmatprep.mubr.f32.mxu0 %v3639_v38  ;;  %4366 = vmatprep.mubr.f32.mxu1 %v3639_v38  ;;  %v7082_v38 = vld [vmem:[%s12050_s3 + $0xab8] sm:$0xff] }
 0x2fb   : > { %4632 = vmatpush1.msra.mxu0 %v7007_v18  ;;  %4745 = vmatpush1.msra.mxu1 %v7009_v39  ;;  %v7085_v18 = vld [vmem:[%s12050_s3 + $0xad0] sm:$0xff]  ;;  %v7080_v39 = vld [vmem:[%s12050_s3 + $0xaa8] sm:$0xff] }
 0x2fc   : > { %4633 = vmatprep.subr.mxu0 %v7004_v53  ;;  %4746 = vmatprep.subr.mxu1 %v7006_v48  ;;  %v7079_v53 = vld [vmem:[%s12050_s3 + $0xaa0] sm:$0xff]  ;;  %v7081_v48 = vld [vmem:[%s12050_s3 + $0xab0] sm:$0xff] }
 0x2fd   : > { %4634 = vmatpush1.msra.mxu0 %v7003_v54  ;;  %4747 = vmatpush1.msra.mxu1 %v7005_v4  ;;  %v7078_v54 = vld [vmem:[%s12050_s3 + $0xa98] sm:$0xff]  ;;  %v7075_v4 = vld [vmem:[%s12050_s3 + $0xa80] sm:$0xff] }
 0x2fe   : > { %4254 = vmatmul.mubr.f32.gmra.mxu0 %v3637_v5  ;;  %4367 = vmatmul.mubr.f32.gmra.mxu1 %v3637_v5  ;;  %v7071_v5 = vld [vmem:[%s12050_s3 + $0xa60] sm:$0xff] }
 0x2ff   : > { %4635 = vmatprep.subr.mxu0 %v7000_v20  ;;  %4748 = vmatprep.subr.mxu1 %v7002_v15  ;;  %v7072_v20 = vld [vmem:[%s12050_s3 + $0xa68] sm:$0xff]  ;;  %v7074_v15 = vld [vmem:[%s12050_s3 + $0xa78] sm:$0xff] }
 0x300   : > { %4636 = vmatpush1.msra.mxu0 %v6999_v24  ;;  %4671 = vmatprep.mubr.f32.mxu0 %v4427_v35  ;;  %v7073_v24 = vld [vmem:[%s12050_s3 + $0xa70] sm:$0xff] }
 0x301   : > { %4749 = vmatpush1.msra.mxu1 %v7001_v26  ;;  %4784 = vmatprep.mubr.f32.mxu1 %v4427_v35  ;;  %v7070_v26 = vld [vmem:[%s12050_s3 + $0xa58] sm:$0xff]  ;;  %v7067_v35 = vld [vmem:[%s12050_s3 + $0xa40] sm:$0xff] }
 0x302   : > { %4637 = vmatprep.subr.mxu0 %v6996_v62  ;;  %4750 = vmatprep.subr.mxu1 %v6998_v63  ;;  %v7069_v62 = vld [vmem:[%s12050_s3 + $0xa50] sm:$0xff]  ;;  %v4375_v63 = vld [vmem:[#allocation3 + $0x20] sm:$0xff] }
 0x303   : > { %4638 = vmatpush1.msra.mxu0 %v6995_v43  ;;  %4751 = vmatpush1.msra.mxu1 %v6997_v12  ;;  %v7064_v43 = vld [vmem:[%s12050_s3 + $0xa28] sm:$0xff]  ;;  %v7066_v12 = vld [vmem:[%s12050_s3 + $0xa38] sm:$0xff] }
 0x304   : > { %4639 = vmatprep.subr.mxu0 %v7120_v59  ;;  %4752 = vmatprep.subr.mxu1 %v7122_v7  ;;  %v4378_v59 = vld [vmem:[#allocation3 + $0x38] sm:$0x1]  ;;  %v7063_v7 = vld [vmem:[%s12050_s3 + $0xa20] sm:$0xff] }
 0x305   : > { %4640 = vmatpush2.msra.mxu0 %v7119_v61  ;;  %4753 = vmatpush2.msra.mxu1 %v7121_v23  ;;  %v7065_v61 = vld [vmem:[%s12050_s3 + $0xa30] sm:$0xff] }
 0x306   : > { %4641 = vmatprep.subr.mxu0 %v7116_v19  ;;  %4754 = vmatprep.subr.mxu1 %v7118_v21  ;;  %v4373_v23 = vld [vmem:[#allocation3 + $0x10] sm:$0xfe]  ;;  %v7060_v19 = vld [vmem:[%s12050_s3 + $0xa08] sm:$0xff]  ;;  %v7062_v21 = vld [vmem:[%s12050_s3 + $0xa18] sm:$0xff] }
 0x307   : > { %4642 = vmatpush2.msra.mxu0 %v7115_v30  ;;  %4755 = vmatpush2.msra.mxu1 %v7117_v32  ;;  %v4423_v30 = vrot.slane %v4375_v63, 1  ;;  %v7059_v32 = vld [vmem:[%s12050_s3 + $0xa00] sm:$0xff]  ;;  %v4395_v63 = vld [vmem:[#allocation3 + $0xf0] sm:$0x1] }
 0x308   : > { %4643 = vmatprep.subr.mxu0 %v7112_v58  ;;  %4756 = vmatprep.subr.mxu1 %v7114_v14  ;;  %v7061_v58 = vld [vmem:[%s12050_s3 + $0xa10] sm:$0xff]  ;;  %v4430_v14 = vrot.slane %v4378_v59, 1  ;;  %v4458_v59 = vrot.slane %v4395_v63, 1  ;;  %v5296_v63 = vld [vmem:[%s12052_s5 + $0x48] sm:$0xff] }
 0x309   : > { %4644 = vmatpush2.msra.mxu0 %v7111_v46  ;;  %4757 = vmatpush2.msra.mxu1 %v7113_v47  ;;  %v4377_v46 = vld [vmem:[#allocation3 + $0x30] sm:$0x1]  ;;  %v4422_v47 = vrot.slane %v4373_v23, 1  ;;  %v10566_v23 = vpop.f32.mrf.mxu0 }
 0x30a   : > { %4645 = vmatprep.subr.mxu0 %v7108_v31  ;;  %4758 = vmatprep.subr.mxu1 %v7110_v27  ;;  %v4382_v31 = vld [vmem:[#allocation3 + $0x68] sm:$0xff] }
 0x30b   : > { %4646 = vmatpush2.msra.mxu0 %v7107_v34  ;;  %4759 = vmatpush2.msra.mxu1 %v7109_v51  ;;  %v4424_v27 = vsel %vm4421_vm13, %v4422_v47, %v4423_v30  ;;  %v4428_v34 = vrot.slane %v4377_v46, 1  ;;  %v4380_v51 = vld [vmem:[#allocation3 + $0x58] sm:$0xfe] }
 0x30c   : > { %4647 = vmatprep.subr.mxu0 %v7104_v60  ;;  %4760 = vmatprep.subr.mxu1 %v7106_v2  ;;  %v4431_v60 = vsel %vm4421_vm13, %v4426_v40, %v4430_v14  ;;  %v4436_v2 = vrot.slane %v4382_v31, 1  ;;  %v4388_v40 = vld [vmem:[#allocation3 + $0xa8] sm:$0xff] }
 0x30d   : > { %4648 = vmatpush2.msra.mxu0 %v7103_v41  ;;  %4761 = vmatpush2.msra.mxu1 %v7105_v22  ;;  %v4381_v41 = vld [vmem:[#allocation3 + $0x60] sm:$0xff]  ;;  %v4384_v22 = vld [vmem:[#allocation3 + $0x78] sm:$0x1] }
 0x30e   : > { %4649 = vmatprep.subr.mxu0 %v7100_v52  ;;  %4762 = vmatprep.subr.mxu1 %v7102_v55  ;;  %v4435_v52 = vrot.slane %v4380_v51, 1  ;;  %v4379_v55 = vld [vmem:[#allocation3 + $0x50] sm:$0xfe] }
 0x30f   : > { %4650 = vmatpush2.msra.mxu0 %v7099_v49  ;;  %4763 = vmatpush2.msra.mxu1 %v7101_v13  ;;  %v4429_v49 = vsel %vm4421_vm13, %v4423_v30, %v4428_v34  ;;  %v4433_v13 = vrot.slane %v4381_v41, 1  ;;  %v4432_v33 = vrot.slane %v4379_v55, 1 }
 0x310   : > { %4651 = vmatprep.subr.mxu0 %v7096_v1  ;;  %4764 = vmatprep.subr.mxu1 %v7098_v56  ;;  %v4437_v1 = vsel %vm4421_vm13, %v4435_v52, %v4436_v2  ;;  %v4440_v56 = vrot.slane %v4384_v22, 1 }
 0x311   : > { %4652 = vmatpush2.msra.mxu0 %v7095_v50  ;;  %4765 = vmatpush2.msra.mxu1 %v7097_v29  ;;  %v4383_v50 = vld [vmem:[#allocation3 + $0x70] sm:$0x1]  ;;  %v4434_v29 = vsel %vm4421_vm13, %v4432_v33, %v4433_v13 }
 0x312   : > { %4653 = vmatprep.subr.mxu0 %v7092_v57  ;;  %4766 = vmatprep.subr.mxu1 %v7094_v16  ;;  %v4438_v57 = vrot.slane %v4383_v50, 1  ;;  %v4386_v16 = vld [vmem:[#allocation3 + $0x98] sm:$0xfe] }
 0x313   : > { %4654 = vmatpush2.msra.mxu0 %v7091_v37  ;;  %4767 = vmatpush2.msra.mxu1 %v7093_v10  ;;  %v4441_v37 = vsel %vm4421_vm13, %v4436_v2, %v4440_v56  ;;  %v4446_v10 = vrot.slane %v4388_v40, 1  ;;  %v7186_v56 = vld [vmem:[%s12052_s5 + $0x1f8] sm:$0xff]  ;;  %v5317_v40 = vld [vmem:[%s12052_s5 + $0xf0] sm:$0xff] }
 0x314   : > { %4655 = vmatprep.subr.mxu0 %v7088_v0  ;;  %4768 = vmatprep.subr.mxu1 %v7090_v17  ;;  %v4387_v0 = vld [vmem:[#allocation3 + $0xa0] sm:$0xff]  ;;  %v4390_v17 = vld [vmem:[#allocation3 + $0xb8] sm:$0x1] }
 0x315   : > { %4656 = vmatpush2.msra.mxu0 %v7087_v28  ;;  %4769 = vmatpush2.msra.mxu1 %v7089_v6  ;;  %v4445_v28 = vrot.slane %v4386_v16, 1  ;;  %v4385_v6 = vld [vmem:[#allocation3 + $0x90] sm:$0xfe] }
 0x316   : > { %4657 = vmatprep.subr.mxu0 %v7084_v3  ;;  %4770 = vmatprep.subr.mxu1 %v7086_v42  ;;  %v4439_v3 = vsel %vm4421_vm13, %v4433_v13, %v4438_v57  ;;  %v4443_v42 = vrot.slane %v4387_v0, 1  ;;  %v5318_v13 = vld [vmem:[%s12052_s5 + $0xf8] sm:$0xff]  ;;  %v5301_v57 = vld [vmem:[%s12052_s5 + $0x70] sm:$0xff]  ;;  %v5300_v0 = vld [vmem:[%s12052_s5 + $0x68] sm:$0xff] }
 0x317   : > { %4658 = vmatpush2.msra.mxu0 %v7083_v36  ;;  %4771 = vmatpush2.msra.mxu1 %v7085_v18  ;;  %v4447_v36 = vsel %vm4421_vm13, %v4445_v28, %v4446_v10  ;;  %v4450_v18 = vrot.slane %v4390_v17, 1  ;;  %v7185_v16 = vld [vmem:[%s12052_s5 + $0x1f0] sm:$0xff]  ;;  %v7184_v17 = vld [vmem:[%s12052_s5 + $0x1e8] sm:$0xff]  ;;  %v5315_v28 = vld [vmem:[%s12052_s5 + $0xe0] sm:$0xff] }
 0x318   : > { %4659 = vmatprep.subr.mxu0 %v7080_v39  ;;  %4772 = vmatprep.subr.mxu1 %v7082_v38  ;;  %v4389_v39 = vld [vmem:[#allocation3 + $0xb0] sm:$0x1]  ;;  %v4442_v38 = vrot.slane %v4385_v6, 1  ;;  %v7168_v6 = vld [vmem:[%s12052_s5 + $0x168] sm:$0xff] }
 0x319   : > { %4660 = vmatpush2.msra.mxu0 %v7079_v53  ;;  %4773 = vmatpush2.msra.mxu1 %v7081_v48  ;;  %v4394_v53 = vld [vmem:[#allocation3 + $0xe8] sm:$0xff] }
 0x31a   : > { %4661 = vmatprep.subr.mxu0 %v7076_v9  ;;  %4774 = vmatprep.subr.mxu1 %v7078_v54  ;;  %v4444_v48 = vsel %vm4421_vm13, %v4442_v38, %v4443_v42  ;;  %v4448_v9 = vrot.slane %v4389_v39, 1  ;;  %v4392_v54 = vld [vmem:[#allocation3 + $0xd8] sm:$0xfe]  ;;  %v7183_v38 = vld [vmem:[%s12052_s5 + $0x1e0] sm:$0xff] }
 0x31b   : > { %4662 = vmatpush2.msra.mxu0 %v7075_v4  ;;  %4775 = vmatpush2.msra.mxu1 %v7077_v45  ;;  %v4451_v4 = vsel %vm4421_vm13, %v4446_v10, %v4450_v18  ;;  %v4456_v45 = vrot.slane %v4394_v53, 1  ;;  %v7169_v10 = vld [vmem:[%s12052_s5 + $0x170] sm:$0xff]  ;;  %v5314_v53 = vld [vmem:[%s12052_s5 + $0xd8] sm:$0xff] }
 0x31c   : > { %4663 = vmatprep.subr.mxu0 %v7072_v20  ;;  %4776 = vmatprep.subr.mxu1 %v7074_v15  ;;  %v4393_v20 = vld [vmem:[#allocation3 + $0xe0] sm:$0xff]  ;;  %v4396_v15 = vld [vmem:[#allocation3 + $0xf8] sm:$0x1] }
 0x31d   : > { %4664 = vmatpush2.msra.mxu0 %v7071_v5  ;;  %4777 = vmatpush2.msra.mxu1 %v7073_v24  ;;  %v4455_v5 = vrot.slane %v4392_v54, 1  ;;  %v4391_v24 = vld [vmem:[#allocation3 + $0xd0] sm:$0xfe]  ;;  %v7182_v54 = vld [vmem:[%s12052_s5 + $0x1d8] sm:$0xff] }
 0x31e   : > { %4665 = vmatprep.subr.mxu0 %v7068_v25  ;;  %4778 = vmatprep.subr.mxu1 %v7070_v26  ;;  %v4449_v25 = vsel %vm4421_vm13, %v4443_v42, %v4448_v9  ;;  %v4453_v26 = vrot.slane %v4393_v20, 1  ;;  %v5298_v9 = vld [vmem:[%s12052_s5 + $0x58] sm:$0xff]  ;;  %v5297_v20 = vld [vmem:[%s12052_s5 + $0x50] sm:$0xff] }
 0x31f   : > { %4666 = vmatpush2.msra.mxu0 %v7067_v35  ;;  %4779 = vmatpush2.msra.mxu1 %v7069_v62  ;;  %v4457_v35 = vsel %vm4421_vm13, %v4455_v5, %v4456_v45  ;;  %v4460_v62 = vrot.slane %v4396_v15, 1 }
 0x320   : > { %4667 = vmatprep.subr.mxu0 %v7064_v43  ;;  %4780 = vmatprep.subr.mxu1 %v7066_v12  ;;  %v4452_v43 = vrot.slane %v4391_v24, 1 }
 0x321   : > { %4668 = vmatpush2.msra.mxu0 %v7063_v7  ;;  %4781 = vmatpush2.msra.mxu1 %v7065_v61  ;;  %v4461_v7 = vsel %vm4421_vm13, %v4456_v45, %v4460_v62  ;;  %v4459_v61 = vsel %vm4421_vm13, %v4453_v26, %v4458_v59  ;;  %v7166_v45 = vld [vmem:[%s12052_s5 + $0x158] sm:$0xff]  ;;  %v7165_v62 = vld [vmem:[%s12052_s5 + $0x150] sm:$0xff] }
 0x322   : > { %4669 = vmatprep.subr.mxu0 %v7060_v19  ;;  %4782 = vmatprep.subr.mxu1 %v7062_v21  ;;  %v4454_v12 = vsel %vm4421_vm13, %v4452_v43, %v4453_v26  ;;  %v10568_v19 = vpop.f32.mrf.mxu1  ;;  %v10570_v21 = vpop.f32.mrf.mxu0  ;;  %v7181_v26 = vld [vmem:[%s12052_s5 + $0x1d0] sm:$0xff]  ;;  %v7180_v43 = vld [vmem:[%s12052_s5 + $0x1c8] sm:$0xff] }
 0x323   : > { %4670 = vmatpush2.msra.mxu0 %v7059_v32  ;;  %4783 = vmatpush2.msra.mxu1 %v7061_v58 }
 0x324   : > { %4672 = vmatmul.mubr.f32.vlgmr.msra.gmra.mxu0 %v4424_v27  ;;  %4785 = vmatmul.mubr.f32.vlgmr.msra.gmra.mxu1 %v4424_v27  ;;  %v10572_v30 = vpop.f32.mrf.mxu1  ;;  %v10574_v32 = vpop.f32.mrf.mxu0 }
 0x325   : > { %4677 = vmatprep.mubr.f32.mxu0 %v4431_v60  ;;  %4790 = vmatprep.mubr.f32.mxu1 %v4431_v60 }
 0x326   : > { %v10576_v58 = vpop.f32.mrf.mxu1  ;;  %v10578_v14 = vpop.f32.mrf.mxu0  ;;  %7421 = vmatprep.subr.mxu1 %v5318_v13  ;;  %7386 = vmatprep.subr.mxu0 %v7186_v56  ;;  %v5295_v13 = vld [vmem:[%s12052_s5 + $0x40] sm:$0xff] }
 0x328   : > { %4678 = vmatmul.mubr.f32.gmra.mxu0 %v4429_v49  ;;  %4791 = vmatmul.mubr.f32.gmra.mxu1 %v4429_v49  ;;  %v10580_v46 = vpop.f32.mrf.mxu1 }
 0x329   : > { %4683 = vmatprep.mubr.f32.mxu0 %v4437_v1  ;;  %4796 = vmatprep.mubr.f32.mxu1 %v4437_v1  ;;  %v5302_v1 = vld [vmem:[%s12052_s5 + $0x78] sm:$0xff] }
 0x32a   : > { %7422 = vmatpush3.msra.mxu1 %v5302_v1 }
 0x32b   : > { %7423 = vmatprep.subr.mxu1 %v5317_v40 }
 0x32c   : > { %4684 = vmatmul.mubr.f32.gmra.mxu0 %v4434_v29  ;;  %4797 = vmatmul.mubr.f32.gmra.mxu1 %v4434_v29  ;;  %v10582_v47 = vpop.f32.mrf.mxu0  ;;  %v7170_v29 = vld [vmem:[%s12052_s5 + $0x178] sm:$0xff] }
 0x32d   : > { %4689 = vmatprep.mubr.f32.mxu0 %v4441_v37  ;;  %4802 = vmatprep.mubr.f32.mxu1 %v4441_v37  ;;  %v10584_v31 = vpop.f32.mrf.mxu1  ;;  %v5316_v37 = vld [vmem:[%s12052_s5 + $0xe8] sm:$0xff] }
 0x32e   : > { %v10586_v27 = vpop.f32.mrf.mxu0  ;;  %7387 = vmatpush3.msra.mxu0 %v7170_v29  ;;  %7424 = vmatpush3.msra.mxu1 %v5301_v57  ;;  %v7179_v57 = vld [vmem:[%s12052_s5 + $0x1c0] sm:$0xff] }
 0x32f   : > { %v10588_v34 = vpop.f32.mrf.mxu1  ;;  %7388 = vmatprep.subr.mxu0 %v7185_v16  ;;  %7425 = vmatprep.subr.mxu1 %v5316_v37  ;;  %v5310_v16 = vld [vmem:[%s12052_s5 + $0xb8] sm:$0xff]  ;;  %v7163_v37 = vld [vmem:[%s12052_s5 + $0x140] sm:$0xff] }
 0x330   : > { %4690 = vmatmul.mubr.f32.gmra.mxu0 %v4439_v3  ;;  %4803 = vmatmul.mubr.f32.gmra.mxu1 %v4439_v3 }
 0x331   : > { %4695 = vmatprep.mubr.f32.mxu0 %v4447_v36  ;;  %4808 = vmatprep.mubr.f32.mxu1 %v4447_v36  ;;  %v5299_v36 = vld [vmem:[%s12052_s5 + $0x60] sm:$0xff] }
 0x332   : > { %7389 = vmatpush3.msra.mxu0 %v7169_v10  ;;  %7426 = vmatpush3.msra.mxu1 %v5300_v0  ;;  %v5294_v10 = vld [vmem:[%s12052_s5 + $0x38] sm:$0xff] }
 0x333   : > { %7390 = vmatprep.subr.mxu0 %v7184_v17  ;;  %7427 = vmatprep.subr.mxu1 %v5315_v28  ;;  %v7178_v0 = vld [vmem:[%s12052_s5 + $0x1b8] sm:$0xff]  ;;  %v5309_v17 = vld [vmem:[%s12052_s5 + $0xb0] sm:$0xff] }
 0x334   : > { %4696 = vmatmul.mubr.f32.gmra.mxu0 %v4444_v48  ;;  %4809 = vmatmul.mubr.f32.gmra.mxu1 %v4444_v48  ;;  %v7167_v48 = vld [vmem:[%s12052_s5 + $0x160] sm:$0xff]  ;;  %v7162_v28 = vld [vmem:[%s12052_s5 + $0x138] sm:$0xff] }
 0x335   : > { %4701 = vmatprep.mubr.f32.mxu0 %v4451_v4  ;;  %4814 = vmatprep.mubr.f32.mxu1 %v4451_v4  ;;  %v5313_v4 = vld [vmem:[%s12052_s5 + $0xd0] sm:$0xff] }
 0x336   : > { %7391 = vmatpush3.msra.mxu0 %v7168_v6  ;;  %7428 = vmatpush3.msra.mxu1 %v5299_v36  ;;  %v5293_v6 = vld [vmem:[%s12052_s5 + $0x30] sm:$0xff] }
 0x337   : > { %7392 = vmatprep.subr.mxu0 %v7183_v38  ;;  %7429 = vmatprep.subr.mxu1 %v5314_v53  ;;  %v7177_v36 = vld [vmem:[%s12052_s5 + $0x1b0] sm:$0xff] }
 0x338   : > { %4702 = vmatmul.mubr.f32.gmra.mxu0 %v4449_v25  ;;  %4815 = vmatmul.mubr.f32.gmra.mxu1 %v4449_v25 }
 0x339   : > { %4707 = vmatprep.mubr.f32.mxu0 %v4457_v35  ;;  %4820 = vmatprep.mubr.f32.mxu1 %v4457_v35  ;;  %v5312_v35 = vld [vmem:[%s12052_s5 + $0xc8] sm:$0xff] }
 0x33a   : > { %7393 = vmatpush3.msra.mxu0 %v7167_v48  ;;  %7430 = vmatpush3.msra.mxu1 %v5298_v9  ;;  %v5308_v48 = vld [vmem:[%s12052_s5 + $0xa8] sm:$0xff]  ;;  %v7161_v9 = vld [vmem:[%s12052_s5 + $0x130] sm:$0xff] }
 0x33b   : > { %7394 = vmatprep.subr.mxu0 %v7182_v54  ;;  %7431 = vmatprep.subr.mxu1 %v5313_v4  ;;  %v5292_v54 = vld [vmem:[%s12052_s5 + $0x28] sm:$0xff] }
 0x33c   : > { %4708 = vmatmul.mubr.f32.gmra.mxu0 %v4454_v12  ;;  %4821 = vmatmul.mubr.f32.gmra.mxu1 %v4454_v12  ;;  %v5311_v12 = vld [vmem:[%s12052_s5 + $0xc0] sm:$0xff]  ;;  %v7176_v4 = vld [vmem:[%s12052_s5 + $0x1a8] sm:$0xff] }
 0x33d   : > { %4713 = vmatprep.mubr.f32.mxu0 %v4461_v7  ;;  %4826 = vmatprep.mubr.f32.mxu1 %v4461_v7 }
 0x33e   : > { %7395 = vmatpush3.msra.mxu0 %v7166_v45  ;;  %7432 = vmatpush3.msra.mxu1 %v5297_v20  ;;  %v5307_v45 = vld [vmem:[%s12052_s5 + $0xa0] sm:$0xff] }
 0x33f   : > { %7396 = vmatprep.subr.mxu0 %v7181_v26  ;;  %7433 = vmatprep.subr.mxu1 %v5312_v35  ;;  %v7160_v35 = vld [vmem:[%s12052_s5 + $0x128] sm:$0xff] }
 0x340   : > { %4714 = vmatmul.mubr.f32.gmra.mxu0 %v4459_v61  ;;  %4827 = vmatmul.mubr.f32.gmra.mxu1 %v4459_v61  ;;  %v7164_v61 = vld [vmem:[%s12052_s5 + $0x148] sm:$0xff] }
 0x341   : > { %7397 = vmatpush3.msra.mxu0 %v7165_v62  ;;  %7434 = vmatpush3.msra.mxu1 %v5296_v63  ;;  %v5291_v62 = vld [vmem:[%s12052_s5 + $0x20] sm:$0xff] }
 0x342   : > { %7398 = vmatprep.subr.mxu0 %v7180_v43  ;;  %7435 = vmatprep.subr.mxu1 %v5311_v12  ;;  %v7175_v63 = vld [vmem:[%s12052_s5 + $0x1a0] sm:$0xff]  ;;  %v5306_v43 = vld [vmem:[%s12052_s5 + $0x98] sm:$0xff] }
 0x343   : > { %v10590_v51 = vpop.f32.mrf.mxu0  ;;  %v10592_v60 = vpop.f32.mrf.mxu1  ;;  %7399 = vmatpush3.msra.mxu0 %v7164_v61  ;;  %7436 = vmatpush3.msra.mxu1 %v5295_v13  ;;  %v7159_v12 = vld [vmem:[%s12052_s5 + $0x120] sm:$0xff]  ;;  %v5290_v61 = vld [vmem:[%s12052_s5 + $0x18] sm:$0xff] }
 0x344   : > { %7400 = vmatprep.subr.mxu0 %v7179_v57  ;;  %7437 = vmatprep.subr.mxu1 %v5310_v16  ;;  %v7174_v13 = vld [vmem:[%s12052_s5 + $0x198] sm:$0xff]  ;;  %v5305_v57 = vld [vmem:[%s12052_s5 + $0x90] sm:$0xff] }
 0x345   : > { %v10594_v2 = vpop.f32.mrf.mxu0  ;;  %v10596_v41 = vpop.f32.mrf.mxu1  ;;  %7401 = vmatpush3.msra.mxu0 %v7163_v37  ;;  %7438 = vmatpush3.msra.mxu1 %v5294_v10  ;;  %v7158_v10 = vld [vmem:[%s12052_s5 + $0x118] sm:$0xff] }
 0x346   : > { %7402 = vmatprep.subr.mxu0 %v7178_v0  ;;  %7439 = vmatprep.subr.mxu1 %v5309_v17  ;;  %v5289_v0 = vld [vmem:[%s12052_s5 + $0x10] sm:$0xff] }
 0x347   : > { %7403 = vmatpush3.msra.mxu0 %v7162_v28  ;;  %7440 = vmatpush3.msra.mxu1 %v5293_v6  ;;  %v7173_v17 = vld [vmem:[%s12052_s5 + $0x190] sm:$0xff]  ;;  %v5304_v28 = vld [vmem:[%s12052_s5 + $0x88] sm:$0xff] }
 0x348   : > { %7404 = vmatprep.subr.mxu0 %v7177_v36  ;;  %7441 = vmatprep.subr.mxu1 %v5308_v48  ;;  %v7157_v48 = vld [vmem:[%s12052_s5 + $0x110] sm:$0xff] }
 0x349   : > { %7405 = vmatpush3.msra.mxu0 %v7161_v9  ;;  %7442 = vmatpush3.msra.mxu1 %v5292_v54  ;;  %v5288_v9 = vld [vmem:[%s12052_s5 + $0x8] sm:$0xff] }
 0x34a   : > { %7406 = vmatprep.subr.mxu0 %v7176_v4  ;;  %7443 = vmatprep.subr.mxu1 %v5307_v45  ;;  %v7172_v54 = vld [vmem:[%s12052_s5 + $0x188] sm:$0xff]  ;;  %v5303_v4 = vld [vmem:[%s12052_s5 + $0x80] sm:$0xff] }
 0x34b   : > { %7407 = vmatpush3.msra.mxu0 %v7160_v35  ;;  %7444 = vmatpush3.msra.mxu1 %v5291_v62  ;;  %v7156_v45 = vld [vmem:[%s12052_s5 + $0x108] sm:$0xff]  ;;  %v5287_v35 = vld [vmem:[%s12052_s5] sm:$0xff] }
 0x34c   : > { %7408 = vmatprep.subr.mxu0 %v7175_v63  ;;  %7445 = vmatprep.subr.mxu1 %v5306_v43  ;;  %v7171_v62 = vld [vmem:[%s12052_s5 + $0x180] sm:$0xff]  ;;  %v7250_v63 = vld [vmem:[%s12052_s5 + $0x3f8] sm:$0xff] }
 0x34d   : > { %7409 = vmatpush3.msra.mxu0 %v7159_v12  ;;  %7446 = vmatpush3.msra.mxu1 %v5290_v61  ;;  %v7155_v61 = vld [vmem:[%s12052_s5 + $0x100] sm:$0xff] }
 0x34e   : > { %7410 = vmatprep.subr.mxu0 %v7174_v13  ;;  %7447 = vmatprep.subr.mxu1 %v5305_v57  ;;  %v7218_v13 = vld [vmem:[%s12052_s5 + $0x2f8] sm:$0xff] }
 0x34f   : > { %7411 = vmatpush3.msra.mxu0 %v7158_v10  ;;  %7448 = vmatpush3.msra.mxu1 %v5289_v0 }
 0x350   : > { %7412 = vmatprep.subr.mxu0 %v7173_v17  ;;  %7449 = vmatprep.subr.mxu1 %v5304_v28 }
 0x351   : > { %7413 = vmatpush3.msra.mxu0 %v7157_v48  ;;  %7450 = vmatpush3.msra.mxu1 %v5288_v9 }
 0x352   : > { %v10598_v22 = vpop.f32.mrf.mxu0  ;;  %7414 = vmatprep.subr.mxu0 %v7172_v54  ;;  %7451 = vmatprep.subr.mxu1 %v5303_v4 }
 0x353   : > { %v10600_v52 = vpop.f32.mrf.mxu1  ;;  %7415 = vmatpush3.msra.mxu0 %v7156_v45  ;;  %7452 = vmatpush3.msra.mxu1 %v5287_v35 }
 0x354   : > { %v10602_v55 = vpop.f32.mrf.mxu0  ;;  %7416 = vmatprep.subr.mxu0 %v7171_v62  ;;  %7491 = vmatprep.subr.mxu1 %v7250_v63 }
 0x355   : > { %v10604_v49 = vpop.f32.mrf.mxu1  ;;  %7417 = vmatpush3.msra.mxu0 %v7155_v61 }
 0x356   : > { %7456 = vmatprep.subr.mxu0 %v7218_v13 }
 0x366   : > { %v10615_v50 = vpop.f32.mrf.mxu0  ;;  %v10617_v33 = vpop.f32.mrf.mxu1 }
 0x368   : > { %v10649_v3 = vpop.f32.mrf.mxu0  ;;  %v10651_v42 = vpop.f32.mrf.mxu1 }
 0x37b   : > { %v10656_v18 = vpop.f32.mrf.mxu0 }
 0x37c   : > { %v10658_v39 = vpop.f32.mrf.mxu1 }
 0x37d   : > { %v10684_v15 = vpop.f32.mrf.mxu0 }
 0x37e   : > { %12203 = vst [vmem:[#allocation16_spill] sm:$0xff] %v10684_v15  ;;  %v10686_v5 = vpop.f32.mrf.mxu1 }
 0x37f   : > { %12204 = vst [vmem:[#allocation17_spill] sm:$0xff] %v10686_v5 }
 0x391   : > { %v10688_v24 = vpop.f32.mrf.mxu0  ;;  %v10690_v25 = vpop.f32.mrf.mxu1 }
 0x393   : > { %v10710_v59 = vpop.f32.mrf.mxu0  ;;  %v10712_v7 = vpop.f32.mrf.mxu1 }
 0x394   : > { %12205 = vst [vmem:[#allocation18_spill] sm:$0xff] %v10710_v59  ;;  %12206 = vst [vmem:[#allocation19_spill] sm:$0xff] %v10712_v7 }
 0x395   : > { %v10720_v1 = vpop.f32.mrf.mxu0  ;;  %v10722_v56 = vpop.f32.mrf.mxu1 }
 0x397   : > { %v10724_v40 = vpop.f32.mrf.mxu0  ;;  %v10726_v29 = vpop.f32.mrf.mxu1 }
 0x39a   : > { %v10755_v38 = vpop.f32.mrf.mxu0  ;;  %v10757_v53 = vpop.f32.mrf.mxu1 }
 0x39c   : > { %v10774_v20 = vpop.f32.mrf.mxu0  ;;  %v10776_v26 = vpop.f32.mrf.mxu1 }
 0x3a0   : > { %v10802_v16 = vpop.f32.mrf.mxu0  ;;  %v10804_v37 = vpop.f32.mrf.mxu1 }
 0x3a2   : > { %v10818_v6 = vpop.f32.mrf.mxu0  ;;  %v10820_v36 = vpop.f32.mrf.mxu1 }
 0x3a6   : > { %v4231_v43 = vpop.f32.mrf.mxu0  ;;  %v4344_v12 = vpop.f32.mrf.mxu1 }
 0x3a8   : > { %v4233_v57 = vpop.f32.mrf.mxu0  ;;  %v4346_v10 = vpop.f32.mrf.mxu1 }
 0x3ac   : > { %v4237_v0 = vpop.f32.mrf.mxu0  ;;  %v4350_v17 = vpop.f32.mrf.mxu1 }
 0x3ae   : > { %v4239_v28 = vpop.f32.mrf.mxu0  ;;  %v4352_v48 = vpop.f32.mrf.mxu1 }
 0x3b2   : > { %v4243_v9 = vpop.f32.mrf.mxu0  ;;  %v4356_v54 = vpop.f32.mrf.mxu1 }
 0x3b4   : > { %v4245_v4 = vpop.f32.mrf.mxu0  ;;  %v4358_v7 = vpop.f32.mrf.mxu1 }
 0x3b5   : > { %v10853_v45 = vadd.f32 %v4245_v4, %v10649_v3  ;;  %v10856_v35 = vadd.f32 %v4358_v7, %v10651_v42  ;;  %v4865_v3 = vld [vmem:[%s12051_s4] sm:$0xf]  ;;  %v4214_v4 = vadd.f32 %v10720_v1, %v10566_v23  ;;  %v4329_v23 = vadd.f32 %v10726_v29, %v10572_v30 }
 0x3b6   : > { %v10874_v42 = vrot.slane %v4865_v3, %v9085_v11  ;;  %v10877_v7 = vrot.slane %v4865_v3, %v9088_v8  ;;  %v4216_v8 = vadd.f32 %v10724_v40, %v10570_v21  ;;  %v4333_v1 = vadd.f32 %v10757_v53, %v10576_v58 }
 0x3b7   : > { %12207 = vst [vmem:[#allocation20_spill] sm:$0xff] %v10856_v35  ;;  %v4339_v21 = vadd.f32 %v10804_v37, %v10584_v31  ;;  %v4341_v58 = vadd.f32 %v10820_v36, %v10588_v34  ;;  %v10925_v31 = vadd.f32 %v4346_v10, %v10596_v41  ;;  %v10939_v41 = vadd.f32 %v4352_v48, %v10604_v49 }
 0x3b8   : > { %v4249_v59 = vpop.f32.mrf.mxu0  ;;  %v10858_v44 = vpop.f32.mrf.mxu1 }
 0x3b9   : > { %v10950_v49 = vadd.f32 %v4249_v59, %v10656_v18  ;;  %v10957_v18 = vadd.f32 %v10858_v44, %v10658_v39  ;;  %v12213_v44 = vld [vmem:[#allocation16_spill] sm:$0xff] }
 0x3ba   : > { %v10860_v62 = vpop.f32.mrf.mxu0  ;;  %v10862_v63 = vpop.f32.mrf.mxu1 }
 0x3bb   : > { %v10964_v39 = vadd.f32 %v10860_v62, %v12213_v44  ;;  %v12216_v62 = vld [vmem:[#allocation18_spill] sm:$0xff] }
 0x3be   : > { %v4255_v61 = vpop.f32.mrf.mxu0  ;;  %v4368_v13 = vpop.f32.mrf.mxu1 }
 0x3bf   : > { %v10865_v5 = vadd.f32 %v4255_v61, %v10688_v24  ;;  %v10868_v15 = vadd.f32 %v4368_v13, %v10690_v25  ;;  %v4327_v24 = vadd.f32 %v10722_v56, %v10568_v19  ;;  %v12210_v13 = vld [vmem:[#allocation55_spill] sm:$0xff]  ;;  %v4220_v19 = vadd.f32 %v10755_v38, %v10574_v32 }
 0x3c0   : > { %v10883_v61 = vpop.f32.mrf.mxu0  ;;  %v10885_v25 = vpop.f32.mrf.mxu1  ;;  %v12212_v11 = vsub.s32 3, %v12210_v13  ;;  %v4335_v56 = vadd.f32 %v10776_v26, %v10580_v46  ;;  %v4228_v32 = vadd.f32 %v10818_v6, %v10586_v27  ;;  %v10919_v46 = vadd.f32 %v4344_v12, %v10592_v60 }
 0x3c1   : > { %12208 = vst [vmem:[#allocation21_spill] sm:$0xff] %v10865_v5  ;;  %12209 = vst [vmem:[#allocation22_spill] sm:$0xff] %v10868_v15  ;;  %v12211_v15 = vsub.s32 1, %v12210_v13  ;;  %v10933_v60 = vadd.f32 %v4350_v17, %v10600_v52  ;;  %v10947_v52 = vadd.f32 %v4356_v54, %v10617_v33 }
 0x3c2   : > { %v10893_v35 = vrot.slane %v4865_v3, %v12212_v11  ;;  %v4226_v11 = vadd.f32 %v10802_v16, %v10582_v47  ;;  %v10922_v47 = vadd.f32 %v4233_v57, %v10594_v2  ;;  %v10936_v2 = vadd.f32 %v4239_v28, %v10602_v55 }
 0x3c3   : > { %v10889_v5 = vrot.slane %v4865_v3, %v12211_v15  ;;  %v4222_v15 = vadd.f32 %v10774_v20, %v10578_v14  ;;  %v10916_v14 = vadd.f32 %v4231_v43, %v10590_v51  ;;  %v10930_v51 = vadd.f32 %v4237_v0, %v10598_v22 }
 0x3c4   : > { %v10944_v22 = vadd.f32 %v4243_v9, %v10615_v50 }
 0x3e4   : > { %v4673_v40 = vpop.f32.mrf.mxu0  ;;  %v4786_v30 = vpop.f32.mrf.mxu1 }
 0x3e5   : > { %v4833_v29 = vadd.f32 %v4673_v40, %v4214_v4  ;;  %v4835_v38 = vadd.f32 %v4786_v30, %v4327_v24 }
 0x3e6   : > { %v4675_v53 = vpop.f32.mrf.mxu0  ;;  %v4788_v20 = vpop.f32.mrf.mxu1 }
 0x3e7   : > { %v4887_v27 = vadd.f32 %v10874_v42, %v4833_v29  ;;  %v4889_v34 = vadd.f32 %v10877_v7, %v4835_v38  ;;  %v4834_v26 = vadd.f32 %v4675_v53, %v4216_v8  ;;  %v4836_v16 = vadd.f32 %v4788_v20, %v4329_v23 }
 0x3e8   : > { %v4679_v37 = vpop.f32.mrf.mxu0  ;;  %v4792_v6 = vpop.f32.mrf.mxu1 }
 0x3e9   : > { %v4919_v36 = vmax.f32 %v4887_v27, 0.0  ;;  %v4921_v43 = vmax.f32 %v4889_v34, 0.0  ;;  %v4888_v12 = vadd.f32 %v10889_v5, %v4834_v26  ;;  %v4890_v8 = vadd.f32 %v10893_v35, %v4836_v16  ;;  %v12214_v16 = vld [vmem:[#allocation17_spill] sm:$0xff] }
 0x3ea   : > { %v4837_v57 = vadd.f32 %v4679_v37, %v4220_v19  ;;  %v4839_v55 = vadd.f32 %v4792_v6, %v4333_v1  ;;  %v4681_v10 = vpop.f32.mrf.mxu0  ;;  %v4794_v0 = vpop.f32.mrf.mxu1  ;;  %v10968_v37 = vadd.f32 %v10862_v63, %v12214_v16  ;;  %v12215_v6 = vld [vmem:[#allocation65_spill] sm:$0xff]  ;;  %v12217_v63 = vld [vmem:[#allocation19_spill] sm:$0xff] }
 0x3eb   : > { %v4920_v17 = vmax.f32 %v4888_v12, 0.0  ;;  %v4922_v28 = vmax.f32 %v4890_v8, 0.0  ;;  %v4838_v48 = vadd.f32 %v4681_v10, %v4222_v15  ;;  %v4951_v3 = vmax.f32 %v4919_v36, %v4921_v43 }
 0x3ec   : > { %v4891_v4 = vadd.f32 %v10874_v42, %v4837_v57  ;;  %v4893_v24 = vadd.f32 %v10877_v7, %v4839_v55  ;;  %v4840_v50 = vadd.f32 %v4794_v0, %v4335_v56  ;;  %v4685_v9 = vpop.f32.mrf.mxu0  ;;  %v4798_v13 = vpop.f32.mrf.mxu1  ;;  %v10980_v0 = vadd.f32 %v10883_v61, %v12216_v62 }
 0x3ed   : > { %v4952_v33 = vmax.f32 %v4920_v17, %v4922_v28  ;;  %v4892_v54 = vadd.f32 %v10889_v5, %v4838_v48  ;;  %v4841_v23 = vadd.f32 %v4685_v9, %v4226_v11  ;;  %v4843_v19 = vadd.f32 %v4798_v13, %v4339_v21 }
 0x3ee   : > { %v4923_v59 = vmax.f32 %v4891_v4, 0.0  ;;  %v4925_v1 = vmax.f32 %v4893_v24, 0.0  ;;  %v4894_v15 = vadd.f32 %v10893_v35, %v4840_v50  ;;  %v4687_v40 = vpop.f32.mrf.mxu0  ;;  %v4800_v30 = vpop.f32.mrf.mxu1  ;;  %v10984_v17 = vadd.f32 %v10885_v25, %v12217_v63 }
 0x3ef   : > { %v4983_v29 = vcombine.low %v4951_v3, %v4952_v33  ;;  %v4984_v38 = vcombine.high %v4951_v3, %v4952_v33  ;;  %v4924_v56 = vmax.f32 %v4892_v54, 0.0  ;;  %v4895_v53 = vadd.f32 %v10874_v42, %v4841_v23 }
 0x3f0   : > { %v4953_v20 = vmax.f32 %v4923_v59, %v4925_v1  ;;  %v4926_v27 = vmax.f32 %v4894_v15, 0.0  ;;  %v4897_v11 = vadd.f32 %v10877_v7, %v4843_v19  ;;  %v4842_v21 = vadd.f32 %v4687_v40, %v4228_v32  ;;  %v4691_v34 = vpop.f32.mrf.mxu0  ;;  %v4804_v26 = vpop.f32.mrf.mxu1 }
 0x3f1   : > { %v10971_v36 = vrot.slane %v4983_v29, %v12215_v6  ;;  %v4844_v43 = vadd.f32 %v4800_v30, %v4341_v58  ;;  %v10974_v12 = vrot.slane %v4984_v38, %v12215_v6  ;;  %v4845_v57 = vadd.f32 %v4691_v34, %v10916_v14 }
 0x3f2   : > { %v4954_v8 = vmax.f32 %v4924_v56, %v4926_v27  ;;  %v4896_v32 = vadd.f32 %v10889_v5, %v4842_v21  ;;  %v4693_v55 = vpop.f32.mrf.mxu0  ;;  %v4806_v10 = vpop.f32.mrf.mxu1  ;;  %v4927_v28 = vmax.f32 %v4895_v53, 0.0  ;;  %v4929_v58 = vmax.f32 %v4897_v11, 0.0 }
 0x3f3   : > { %v10988_v48 = vcombine.high %v10971_v36, %v10971_v36  ;;  %v4898_v9 = vadd.f32 %v10893_v35, %v4844_v43  ;;  %v4899_v61 = vadd.f32 %v10874_v42, %v4845_v57  ;;  %v4847_v13 = vadd.f32 %v4804_v26, %v10919_v46 }
 0x3f4   : > { %v5001_v3 = vcombine.low %v4953_v20, %v4954_v8  ;;  %v5002_v4 = vcombine.high %v4953_v20, %v4954_v8  ;;  %v4928_v24 = vmax.f32 %v4896_v32, 0.0  ;;  %v4697_v14 = vpop.f32.mrf.mxu0  ;;  %v4810_v50 = vpop.f32.mrf.mxu1  ;;  %v4846_v25 = vadd.f32 %v4693_v55, %v10922_v47 }
 0x3f5   : > { %v10996_v33 = vcombine.high %v10974_v12, %v10974_v12  ;;  %v7123_v54 = vrot.slane %v10971_v36, 9  ;;  %v4848_v23 = vadd.f32 %v4806_v10, %v10925_v31  ;;  %v4849_v19 = vadd.f32 %v4697_v14, %v10930_v51 }
 0x3f6   : > { %v4699_v59 = vpop.f32.mrf.mxu0  ;;  %v4812_v1 = vpop.f32.mrf.mxu1  ;;  %v4930_v15 = vmax.f32 %v4898_v9, 0.0  ;;  %v4931_v40 = vmax.f32 %v4899_v61, 0.0  ;;  %v4901_v30 = vadd.f32 %v10877_v7, %v4847_v13  ;;  %v4900_v46 = vadd.f32 %v10889_v5, %v4846_v25 }
 0x3f7   : > { %v7125_v47 = vrot.slane %v10974_v12, 9  ;;  %v11005_v29 = vrot.slane %v5001_v3, %v12215_v6  ;;  %v11008_v38 = vrot.slane %v5002_v4, %v12215_v6  ;;  %v4955_v56 = vmax.f32 %v4927_v28, %v4929_v58 }
 0x3f8   : > { %v4703_v31 = vpop.f32.mrf.mxu0  ;;  %v4816_v53 = vpop.f32.mrf.mxu1  ;;  %v4956_v51 = vmax.f32 %v4928_v24, %v4930_v15  ;;  %v4933_v20 = vmax.f32 %v4901_v30, 0.0  ;;  %v4932_v27 = vmax.f32 %v4900_v46, 0.0  ;;  %v4902_v11 = vadd.f32 %v10893_v35, %v4848_v23 }
 0x3f9   : > { %v4903_v21 = vadd.f32 %v10874_v42, %v4849_v19  ;;  %v4851_v34 = vadd.f32 %v4810_v50, %v10933_v60  ;;  %v4850_v26 = vadd.f32 %v4699_v59, %v10936_v2  ;;  %v4852_v44 = vadd.f32 %v4812_v1, %v10939_v41 }
 0x3fa   : > { %v4705_v16 = vpop.f32.mrf.mxu0  ;;  %v4818_v43 = vpop.f32.mrf.mxu1  ;;  %v5019_v8 = vcombine.low %v4955_v56, %v4956_v51  ;;  %v5020_v32 = vcombine.high %v4955_v56, %v4956_v51  ;;  %v4957_v57 = vmax.f32 %v4931_v40, %v4933_v20  ;;  %v4934_v55 = vmax.f32 %v4902_v11, 0.0 }
 0x3fb   : > { %v4935_v10 = vmax.f32 %v4903_v21, 0.0  ;;  %v4905_v62 = vadd.f32 %v10877_v7, %v4851_v34  ;;  %v4904_v63 = vadd.f32 %v10889_v5, %v4850_v26  ;;  %v4906_v28 = vadd.f32 %v10893_v35, %v4852_v44 }
 0x3fc   : > { %v4709_v58 = vpop.f32.mrf.mxu0  ;;  %v4822_v3 = vpop.f32.mrf.mxu1  ;;  %v11019_v60 = vrot.slane %v5019_v8, %v12215_v6  ;;  %v11022_v2 = vrot.slane %v5020_v32, %v12215_v6  ;;  %v4958_v41 = vmax.f32 %v4932_v27, %v4934_v55  ;;  %v4853_v4 = vadd.f32 %v4703_v31, %v10944_v22  ;;  %v12218_v31 = vld [vmem:[#allocation20_spill] sm:$0xff] }
 0x3fd   : > { %v4937_v24 = vmax.f32 %v4905_v62, 0.0  ;;  %v4936_v14 = vmax.f32 %v4904_v63, 0.0  ;;  %v4938_v50 = vmax.f32 %v4906_v28, 0.0  ;;  %v4855_v9 = vadd.f32 %v4816_v53, %v10947_v52 }
 0x3fe   : > { %v4711_v61 = vpop.f32.mrf.mxu0  ;;  %v11028_v13 = vcombine.high %v11005_v29, %v11005_v29  ;;  %v11032_v25 = vcombine.high %v11008_v38, %v11008_v38  ;;  %v11036_v23 = vcombine.high %v11019_v60, %v11019_v60  ;;  %v11040_v22 = vcombine.high %v11022_v2, %v11022_v2  ;;  %v4824_v15 = vpop.f32.mrf.mxu1 }
 0x3ff   : > { %v5037_v19 = vcombine.low %v4957_v57, %v4958_v41  ;;  %v5038_v59 = vcombine.high %v4957_v57, %v4958_v41  ;;  %v4959_v52 = vmax.f32 %v4935_v10, %v4937_v24  ;;  %v4960_v1 = vmax.f32 %v4936_v14, %v4938_v50  ;;  %v12219_v50 = vld [vmem:[#allocation21_spill] sm:$0xff] }
 0x400   : > { %v4715_v40 = vpop.f32.mrf.mxu0  ;;  %v4907_v30 = vadd.f32 %v10874_v42, %v4853_v4  ;;  %v4909_v46 = vadd.f32 %v10877_v7, %v4855_v9  ;;  %v4854_v56 = vadd.f32 %v4705_v16, %v10853_v45  ;;  %v4856_v53 = vadd.f32 %v4818_v43, %v12218_v31  ;;  %v4828_v32 = vpop.f32.mrf.mxu1 }
 0x401   : > { %v11047_v51 = vrot.slane %v5037_v19, %v12215_v6  ;;  %v11050_v20 = vrot.slane %v5038_v59, %v12215_v6  ;;  %v5055_v27 = vcombine.low %v4959_v52, %v4960_v1  ;;  %v5056_v11 = vcombine.high %v4959_v52, %v4960_v1  ;;  %v12220_v19 = vld [vmem:[#allocation22_spill] sm:$0xff] }
 0x402   : > { %v4939_v21 = vmax.f32 %v4907_v30, 0.0  ;;  %v4941_v34 = vmax.f32 %v4909_v46, 0.0  ;;  %v4908_v26 = vadd.f32 %v10889_v5, %v4854_v56  ;;  %v4910_v44 = vadd.f32 %v10893_v35, %v4856_v53  ;;  %v4717_v57 = vpop.f32.mrf.mxu0 }
 0x403   : > { %v7131_v8 = vrot.slane %v11019_v60, 9  ;;  %v7133_v45 = vrot.slane %v11022_v2, 9  ;;  %v11058_v16 = vcombine.high %v11047_v51, %v11047_v51  ;;  %v11062_v43 = vcombine.high %v11050_v20, %v11050_v20 }
 0x404   : > { %v5063_v55 = vrot.slane %v5055_v27, %v12215_v6  ;;  %v11066_v10 = vrot.slane %v5056_v11, %v12215_v6  ;;  %v4961_v62 = vmax.f32 %v4939_v21, %v4941_v34  ;;  %v4940_v63 = vmax.f32 %v4908_v26, 0.0 }
 0x405   : > { %v4942_v28 = vmax.f32 %v4910_v44, 0.0  ;;  %v4857_v41 = vadd.f32 %v4709_v58, %v10950_v49  ;;  %v4859_v4 = vadd.f32 %v4822_v3, %v10957_v18  ;;  %v4858_v24 = vadd.f32 %v4711_v61, %v10964_v39 }
 0x406   : > { %v4860_v14 = vadd.f32 %v4824_v15, %v10968_v37  ;;  %v4861_v9 = vadd.f32 %v4715_v40, %v12219_v50  ;;  %v4863_v59 = vadd.f32 %v4828_v32, %v12220_v19  ;;  %v4862_v52 = vadd.f32 %v4717_v57, %v10980_v0  ;;  %v4830_v0 = vpop.f32.mrf.mxu1 }
 0x407   : > { %v4962_v1 = vmax.f32 %v4940_v63, %v4942_v28  ;;  %v4911_v30 = vadd.f32 %v10874_v42, %v4857_v41  ;;  %v4913_v46 = vadd.f32 %v10877_v7, %v4859_v4  ;;  %v4912_v56 = vadd.f32 %v10889_v5, %v4858_v24 }
 0x408   : > { %v4914_v49 = vadd.f32 %v10893_v35, %v4860_v14  ;;  %v4915_v18 = vadd.f32 %v10874_v42, %v4861_v9  ;;  %v4917_v39 = vadd.f32 %v10877_v7, %v4863_v59  ;;  %v4916_v37 = vadd.f32 %v10889_v5, %v4862_v52  ;;  %v12221_v14 = vld [vmem:[#allocation60_spill] sm:$0xff]  ;;  %v12222_v9 = vld [vmem:[#allocation61_spill] sm:$0xff] }
 0x409   : > { %v5073_v58 = vcombine.low %v4961_v62, %v4962_v1  ;;  %v5074_v3 = vcombine.high %v4961_v62, %v4962_v1  ;;  %v4943_v61 = vmax.f32 %v4911_v30, 0.0  ;;  %v4945_v15 = vmax.f32 %v4913_v46, 0.0 }
 0x40a   : > { %v4944_v40 = vmax.f32 %v4912_v56, 0.0  ;;  %v4946_v31 = vmax.f32 %v4914_v49, 0.0  ;;  %v4947_v53 = vmax.f32 %v4915_v18, 0.0  ;;  %v4949_v27 = vmax.f32 %v4917_v39, 0.0 }
 0x40b   : > { %v11083_v11 = vrot.slane %v5073_v58, %v12215_v6  ;;  %v11086_v21 = vrot.slane %v5074_v3, %v12215_v6  ;;  %v4963_v42 = vmax.f32 %v4943_v61, %v4945_v15  ;;  %v4948_v34 = vmax.f32 %v4916_v37, 0.0 }
 0x40c   : > { %v4964_v7 = vmax.f32 %v4944_v40, %v4946_v31  ;;  %v4965_v26 = vmax.f32 %v4947_v53, %v4949_v27  ;;  %v4864_v5 = vadd.f32 %v4830_v0, %v10984_v17  ;;  %v7139_v44 = vrot.slane %v5063_v55, 9 }
 0x40d   : > { %v5255_v32 = vmax.f32 %v10971_v36, %v7123_v54  ;;  %v5263_v57 = vmax.f32 %v11019_v60, %v7131_v8  ;;  %v5071_v62 = vcombine.high %v5063_v55, %v5063_v55  ;;  %v7124_v63 = vrot.slane %v10988_v48, 9 }
 0x40e   : > { %v5091_v28 = vcombine.low %v4963_v42, %v4964_v7  ;;  %v5092_v41 = vcombine.high %v4963_v42, %v4964_v7  ;;  %v4918_v4 = vadd.f32 %v10893_v35, %v4864_v5  ;;  %v5271_v24 = vmax.f32 %v5063_v55, %v7139_v44 }
 0x40f   : > { %v5473_v50 = vrot.slane %v5255_v32, %v12221_v14  ;;  %v5477_v19 = vrot.slane %v5255_v32, %v12222_v9  ;;  %v5481_v17 = vrot.slane %v5263_v57, %v12221_v14  ;;  %v5485_v59 = vrot.slane %v5263_v57, %v12222_v9 }
 0x410   : > { %v5099_v36 = vrot.slane %v5091_v28, %v12215_v6  ;;  %v11101_v54 = vrot.slane %v5092_v41, %v12215_v6  ;;  %v4950_v60 = vmax.f32 %v4918_v4, 0.0  ;;  %v5489_v8 = vrot.slane %v5271_v24, %v12221_v14 }
 0x411   : > { %v5493_v52 = vrot.slane %v5271_v24, %v12222_v9  ;;  %v5505_v35 = vsel %vm3400_vm5, %v5485_v59, %v5477_v19  ;;  %v5502_v55 = vsel %vm3400_vm5, %v5481_v17, %v5473_v50  ;;  %v7132_v1 = vrot.slane %v11036_v23, 9  ;;  %v7249_v24 = vld [vmem:[%s12052_s5 + $0x3f0] sm:$0xff] }
 0x412   : > { %v4966_v30 = vmax.f32 %v4948_v34, %v4950_v60  ;;  %v7147_v46 = vrot.slane %v5099_v36, 9  ;;  %v5503_v56 = vsel %vm3402_vm6, %v5489_v8, %v5502_v55  ;;  %v5107_v49 = vcombine.high %v5099_v36, %v5099_v36  ;;  %v7233_v60 = vld [vmem:[%s12052_s5 + $0x370] sm:$0xff] }
 0x413   : > { %v5506_v18 = vsel %vm3402_vm6, %v5493_v52, %v5505_v35  ;;  %v7140_v39 = vrot.slane %v5071_v62, 9  ;;  %v5256_v37 = vmax.f32 %v10988_v48, %v7124_v63  ;;  %v5264_v58 = vmax.f32 %v11036_v23, %v7132_v1  ;;  %v7248_v1 = vld [vmem:[%s12052_s5 + $0x3e8] sm:$0xff] }
 0x414   : > { %v5109_v3 = vcombine.low %v4965_v26, %v4966_v30  ;;  %v5110_v61 = vcombine.high %v4965_v26, %v4966_v30  ;;  %v5279_v15 = vmax.f32 %v5099_v36, %v7147_v46  ;;  %v7148_v0 = vrot.slane %v5107_v49, 9 }
 0x415   : > { %v5272_v40 = vmax.f32 %v5071_v62, %v7140_v39  ;;  %v5359_v31 = vrot.slane %v5256_v37, %v12221_v14  ;;  %v5363_v53 = vrot.slane %v5256_v37, %v12222_v9  ;;  %v5367_v27 = vrot.slane %v5264_v58, %v12221_v14  ;;  %v7202_v39 = vld [vmem:[%s12052_s5 + $0x278] sm:$0xff] }
 0x416   : > { %v11116_v42 = vrot.slane %v5109_v3, %v12215_v6  ;;  %v11119_v34 = vrot.slane %v5110_v61, %v12215_v6  ;;  %v5497_v48 = vrot.slane %v5279_v15, %v12221_v14  ;;  %v5501_v23 = vrot.slane %v5279_v15, %v12222_v9  ;;  %v7234_v6 = vld [vmem:[%s12052_s5 + $0x378] sm:$0xff] }
 0x417   : > { %v5280_v7 = vmax.f32 %v5107_v49, %v7148_v0  ;;  %v5371_v26 = vrot.slane %v5264_v58, %v12222_v9  ;;  %v5375_v5 = vrot.slane %v5272_v40, %v12221_v14  ;;  %v5379_v44 = vrot.slane %v5272_v40, %v12222_v9  ;;  %v7232_v58 = vld [vmem:[%s12052_s5 + $0x368] sm:$0xff] }
 0x418   : > { %v5507_v32 = vsel %vm3404_vm7, %v5501_v23, %v5506_v18  ;;  %v5504_v57 = vsel %vm3404_vm7, %v5497_v48, %v5503_v56  ;;  %v5072_v62 = vcombine.high %v11066_v10, %v11066_v10  ;;  %v5108_v63 = vcombine.high %v11101_v54, %v11101_v54 }
 0x419   : > { %5574 = vmatprep.mubr.f32.mxu1 %v5507_v32  ;;  %v5383_v28 = vrot.slane %v5280_v7, %v12221_v14  ;;  %v5387_v41 = vrot.slane %v5280_v7, %v12222_v9  ;;  %v5391_v4 = vsel %vm3400_vm5, %v5371_v26, %v5363_v53  ;;  %v7126_v50 = vrot.slane %v10996_v33, 9  ;;  %v7247_v53 = vld [vmem:[%s12052_s5 + $0x3e0] sm:$0xff] }
 0x41a   : > { %5575 = vmatmul.mubr.f32.vlgmr.msra.gmra.mxu1 %v5504_v57  ;;  %v5392_v19 = vsel %vm3402_vm6, %v5379_v44, %v5391_v4  ;;  %v7134_v17 = vrot.slane %v11040_v22, 9  ;;  %v7142_v59 = vrot.slane %v5072_v62, 9  ;;  %v7150_v36 = vrot.slane %v5108_v63, 9  ;;  %v7231_v44 = vld [vmem:[%s12052_s5 + $0x360] sm:$0xff] }
 0x41b   : > { %7492 = vmatpush3.msra.mxu1 %v7234_v6  ;;  %v5393_v8 = vsel %vm3404_vm7, %v5387_v41, %v5392_v19  ;;  %v11149_v52 = vmax.f32 %v10996_v33, %v7126_v50  ;;  %v5388_v35 = vsel %vm3400_vm5, %v5367_v27, %v5359_v31  ;;  %v7141_v55 = vrot.slane %v11066_v10, 9  ;;  %v7201_v31 = vld [vmem:[%s12052_s5 + $0x270] sm:$0xff]  ;;  %v7199_v50 = vld [vmem:[%s12052_s5 + $0x260] sm:$0xff] }
 0x41c   : > { %5460 = vmatprep.mubr.f32.mxu0 %v5393_v8  ;;  %7493 = vmatprep.subr.mxu1 %v7249_v24  ;;  %v5266_v30 = vmax.f32 %v11040_v22, %v7134_v17  ;;  %v11157_v46 = vmax.f32 %v5072_v62, %v7142_v59  ;;  %v11159_v56 = vmax.f32 %v5108_v63, %v7150_v36  ;;  %v7149_v49 = vrot.slane %v11101_v54, 9  ;;  %v7215_v62 = vld [vmem:[%s12052_s5 + $0x2e0] sm:$0xff]  ;;  %v7246_v24 = vld [vmem:[%s12052_s5 + $0x3d8] sm:$0xff] }
 0x41d   : > { %v5772_v33 = vrot.slane %v11149_v52, %v12222_v9  ;;  %v5389_v18 = vsel %vm3402_vm6, %v5375_v5, %v5388_v35  ;;  %7494 = vmatpush3.msra.mxu1 %v7233_v60  ;;  %v11171_v22 = vmax.f32 %v10974_v12, %v7125_v47  ;;  %v11176_v37 = vmax.f32 %v11022_v2, %v7133_v45  ;;  %v7217_v47 = vld [vmem:[%s12052_s5 + $0x2f0] sm:$0xff]  ;;  %v7200_v5 = vld [vmem:[%s12052_s5 + $0x268] sm:$0xff]  ;;  %v7230_v60 = vld [vmem:[%s12052_s5 + $0x358] sm:$0xff] }
 0x41e   : > { %v5780_v3 = vrot.slane %v5266_v30, %v12222_v9  ;;  %v5788_v61 = vrot.slane %v11157_v46, %v12222_v9  ;;  %v5796_v15 = vrot.slane %v11159_v56, %v12222_v9  ;;  %v5390_v12 = vsel %vm3404_vm7, %v5383_v28, %v5389_v18  ;;  %7495 = vmatprep.subr.mxu1 %v7248_v1  ;;  %v7214_v8 = vld [vmem:[%s12052_s5 + $0x2d8] sm:$0xff]  ;;  %v7213_v18 = vld [vmem:[%s12052_s5 + $0x2d0] sm:$0xff] }
 0x41f   : > { %5461 = vmatmul.mubr.f32.vlgmr.msra.gmra.mxu0 %v5390_v12  ;;  %v11191_v2 = vmax.f32 %v11066_v10, %v7141_v55  ;;  %v11194_v45 = vmax.f32 %v11101_v54, %v7149_v49  ;;  %v5624_v0 = vrot.slane %v11171_v22, %v12222_v9  ;;  %v5632_v40 = vrot.slane %v11176_v37, %v12222_v9  ;;  %v7216_v54 = vld [vmem:[%s12052_s5 + $0x2e8] sm:$0xff]  ;;  %v7245_v55 = vld [vmem:[%s12052_s5 + $0x3d0] sm:$0xff]  ;;  %v7198_v1 = vld [vmem:[%s12052_s5 + $0x258] sm:$0xff] }
 0x420   : > { %v5800_v10 = vsel %vm3400_vm5, %v5780_v3, %v5772_v33  ;;  %7457 = vmatpush3.msra.mxu0 %v7202_v39  ;;  %7496 = vmatpush3.msra.mxu1 %v7232_v58  ;;  %v5768_v27 = vrot.slane %v11149_v52, %v12221_v14  ;;  %v5776_v48 = vrot.slane %v5266_v30, %v12221_v14  ;;  %v7128_v32 = vrot.slane %v11028_v13, 9  ;;  %v7229_v33 = vld [vmem:[%s12052_s5 + $0x350] sm:$0xff]  ;;  %v7244_v3 = vld [vmem:[%s12052_s5 + $0x3c8] sm:$0xff] }
 0x421   : > { %v5801_v23 = vsel %vm3402_vm6, %v5788_v61, %v5800_v10  ;;  %7458 = vmatprep.subr.mxu0 %v7217_v47  ;;  %v5640_v7 = vrot.slane %v11191_v2, %v12222_v9  ;;  %v5648_v26 = vrot.slane %v11194_v45, %v12222_v9  ;;  %v5652_v6 = vsel %vm3400_vm5, %v5632_v40, %v5624_v0  ;;  %v7197_v61 = vld [vmem:[%s12052_s5 + $0x250] sm:$0xff]  ;;  %v7228_v47 = vld [vmem:[%s12052_s5 + $0x348] sm:$0xff]  ;;  %v7243_v10 = vld [vmem:[%s12052_s5 + $0x3c0] sm:$0xff] }
 0x422   : > { %v5802_v57 = vsel %vm3404_vm7, %v5796_v15, %v5801_v23  ;;  %7459 = vmatpush3.msra.mxu0 %v7201_v31  ;;  %7497 = vmatprep.subr.mxu1 %v7247_v53  ;;  %v5784_v63 = vrot.slane %v11157_v46, %v12221_v14  ;;  %v7136_v28 = vrot.slane %v11058_v16, 9  ;;  %v7127_v41 = vrot.slane %v11005_v29, 9 }
 0x423   : > { %5869 = vmatprep.mubr.f32.mxu1 %v5802_v57  ;;  %v5653_v4 = vsel %vm3402_vm6, %v5640_v7, %v5652_v6  ;;  %7460 = vmatprep.subr.mxu0 %v7216_v54  ;;  %v5792_v19 = vrot.slane %v11159_v56, %v12221_v14  ;;  %v5089_v17 = vcombine.high %v11083_v11, %v11083_v11  ;;  %v7135_v59 = vrot.slane %v11047_v51, 9  ;;  %v7196_v54 = vld [vmem:[%s12052_s5 + $0x248] sm:$0xff]  ;;  %v7227_v7 = vld [vmem:[%s12052_s5 + $0x340] sm:$0xff]  ;;  %v7242_v57 = vld [vmem:[%s12052_s5 + $0x3b8] sm:$0xff] }
 0x424   : > { %v5654_v36 = vsel %vm3404_vm7, %v5648_v26, %v5653_v4  ;;  %7461 = vmatpush3.msra.mxu0 %v7200_v5  ;;  %7498 = vmatpush3.msra.mxu1 %v7231_v44  ;;  %v5797_v52 = vsel %vm3400_vm5, %v5776_v48, %v5768_v27  ;;  %v5125_v35 = vcombine.high %v11116_v42, %v11116_v42  ;;  %v7143_v12 = vrot.slane %v11083_v11, 9  ;;  %v7211_v26 = vld [vmem:[%s12052_s5 + $0x2c0] sm:$0xff] }
 0x425   : > { %5721 = vmatprep.mubr.f32.mxu0 %v5654_v36  ;;  %7462 = vmatprep.subr.mxu0 %v7215_v62  ;;  %v5798_v30 = vsel %vm3402_vm6, %v5784_v63, %v5797_v52  ;;  %v7144_v46 = vrot.slane %v5089_v17, 9  ;;  %v11264_v56 = vmax.f32 %v11028_v13, %v7128_v32  ;;  %v11267_v49 = vmax.f32 %v11058_v16, %v7136_v28  ;;  %v7195_v6 = vld [vmem:[%s12052_s5 + $0x240] sm:$0xff]  ;;  %v7225_v36 = vld [vmem:[%s12052_s5 + $0x330] sm:$0xff] }
 0x426   : > { %7499 = vmatprep.subr.mxu1 %v7246_v24  ;;  %7463 = vmatpush3.msra.mxu0 %v7199_v50  ;;  %v7152_v39 = vrot.slane %v5125_v35, 9  ;;  %v5620_v58 = vrot.slane %v11171_v22, %v12221_v14  ;;  %v5628_v13 = vrot.slane %v11176_v37, %v12221_v14  ;;  %v5636_v16 = vrot.slane %v11191_v2, %v12221_v14  ;;  %v7212_v2 = vld [vmem:[%s12052_s5 + $0x2c8] sm:$0xff]  ;;  %v7194_v50 = vld [vmem:[%s12052_s5 + $0x238] sm:$0xff] }
 0x427   : > { %7500 = vmatpush3.msra.mxu1 %v7230_v60  ;;  %7464 = vmatprep.subr.mxu0 %v7214_v8  ;;  %v11287_v15 = vmax.f32 %v5089_v17, %v7144_v46  ;;  %v6068_v22 = vrot.slane %v11264_v56, %v12222_v9  ;;  %v6076_v37 = vrot.slane %v11267_v49, %v12222_v9  ;;  %v7151_v53 = vrot.slane %v11116_v42, 9  ;;  %v7209_v60 = vld [vmem:[%s12052_s5 + $0x2b0] sm:$0xff] }
 0x428   : > { %7501 = vmatprep.subr.mxu1 %v7245_v55  ;;  %7465 = vmatpush3.msra.mxu0 %v7198_v1  ;;  %v11301_v0 = vsel %vm3404_vm7, %v5792_v19, %v5798_v30  ;;  %v11303_v40 = vmax.f32 %v5125_v35, %v7152_v39  ;;  %v5644_v31 = vrot.slane %v11194_v45, %v12221_v14  ;;  %v7138_v55 = vrot.slane %v11062_v43, 9  ;;  %v7240_v1 = vld [vmem:[%s12052_s5 + $0x3a8] sm:$0xff]  ;;  %v7193_v30 = vld [vmem:[%s12052_s5 + $0x230] sm:$0xff] }
 0x429   : > { %7502 = vmatpush3.msra.mxu1 %v7229_v33  ;;  %7466 = vmatprep.subr.mxu0 %v7213_v18  ;;  %v6084_v27 = vrot.slane %v11287_v15, %v12222_v9  ;;  %v6096_v48 = vsel %vm3400_vm5, %v6076_v37, %v6068_v22  ;;  %v5649_v23 = vsel %vm3400_vm5, %v5628_v13, %v5620_v58  ;;  %v7129_v33 = vrot.slane %v11008_v38, 9  ;;  %v7224_v18 = vld [vmem:[%s12052_s5 + $0x328] sm:$0xff]  ;;  %v7281_v45 = vld [vmem:[%s12052_s5 + $0x4f0] sm:$0xff] }
 0x42a   : > { %7503 = vmatprep.subr.mxu1 %v7244_v3  ;;  %7467 = vmatpush3.msra.mxu0 %v7197_v61  ;;  %v6092_v5 = vrot.slane %v11303_v40, %v12222_v9  ;;  %v11327_v44 = vsel %vm3402_vm6, %v5636_v16, %v5649_v23  ;;  %v11330_v32 = vmax.f32 %v11005_v29, %v7127_v41  ;;  %v7226_v29 = vld [vmem:[%s12052_s5 + $0x338] sm:$0xff]  ;;  %v7208_v39 = vld [vmem:[%s12052_s5 + $0x2a8] sm:$0xff]  ;;  %v7239_v3 = vld [vmem:[%s12052_s5 + $0x3a0] sm:$0xff] }
 0x42b   : > { %7504 = vmatpush3.msra.mxu1 %v7228_v47  ;;  %7468 = vmatprep.subr.mxu0 %v7212_v2  ;;  %v6097_v62 = vsel %vm3402_vm6, %v6084_v27, %v6096_v48  ;;  %v11340_v63 = vmax.f32 %v11047_v51, %v7135_v59  ;;  %v11343_v28 = vmax.f32 %v11083_v11, %v7143_v12  ;;  %v7210_v41 = vld [vmem:[%s12052_s5 + $0x2b8] sm:$0xff]  ;;  %v7241_v11 = vld [vmem:[%s12052_s5 + $0x3b0] sm:$0xff]  ;;  %v7130_v59 = vrot.slane %v11032_v25, 9  ;;  %v7192_v61 = vld [vmem:[%s12052_s5 + $0x228] sm:$0xff] }
 0x42c   : > { %7505 = vmatprep.subr.mxu1 %v7243_v10  ;;  %7469 = vmatpush3.msra.mxu0 %v7196_v54  ;;  %v11352_v4 = vsel %vm3404_vm7, %v6092_v5, %v6097_v62  ;;  %v11355_v24 = vmax.f32 %v11116_v42, %v7151_v53  ;;  %v5920_v51 = vrot.slane %v11330_v32, %v12222_v9  ;;  %v7223_v47 = vld [vmem:[%s12052_s5 + $0x320] sm:$0xff]  ;;  %v7137_v54 = vrot.slane %v11050_v20, 9  ;;  %v7238_v27 = vld [vmem:[%s12052_s5 + $0x398] sm:$0xff] }
 0x42d   : > { %7506 = vmatpush3.msra.mxu1 %v7227_v7  ;;  %7470 = vmatprep.subr.mxu0 %v7211_v26  ;;  %v5928_v19 = vrot.slane %v11340_v63, %v12222_v9  ;;  %v5936_v42 = vrot.slane %v11343_v28, %v12222_v9  ;;  %v6064_v17 = vrot.slane %v11264_v56, %v12221_v14  ;;  %v7207_v2 = vld [vmem:[%s12052_s5 + $0x2a0] sm:$0xff]  ;;  %v7222_v26 = vld [vmem:[%s12052_s5 + $0x318] sm:$0xff]  ;;  %v7145_v62 = vrot.slane %v11086_v21, 9 }
 0x42e   : > { %7507 = vmatprep.subr.mxu1 %v7242_v57  ;;  %7471 = vmatpush3.msra.mxu0 %v7195_v6  ;;  %v5944_v8 = vrot.slane %v11355_v24, %v12222_v9  ;;  %v6072_v52 = vrot.slane %v11267_v49, %v12221_v14  ;;  %v6080_v35 = vrot.slane %v11287_v15, %v12221_v14  ;;  %v7191_v48 = vld [vmem:[%s12052_s5 + $0x220] sm:$0xff]  ;;  %v7206_v5 = vld [vmem:[%s12052_s5 + $0x298] sm:$0xff] }
 0x42f   : > { %7508 = vmatpush3.msra.mxu1 %v7226_v29  ;;  %7472 = vmatprep.subr.mxu0 %v7210_v41  ;;  %v5948_v46 = vsel %vm3400_vm5, %v5928_v19, %v5920_v51  ;;  %v6088_v56 = vrot.slane %v11303_v40, %v12221_v14  ;;  %v5090_v49 = vcombine.high %v11086_v21, %v11086_v21  ;;  %v7190_v29 = vld [vmem:[%s12052_s5 + $0x218] sm:$0xff]  ;;  %v7205_v19 = vld [vmem:[%s12052_s5 + $0x290] sm:$0xff] }
 0x430   : > { %7509 = vmatprep.subr.mxu1 %v7241_v11  ;;  %7473 = vmatpush3.msra.mxu0 %v7194_v50  ;;  %v5949_v58 = vsel %vm3402_vm6, %v5936_v42, %v5948_v46  ;;  %v6093_v13 = vsel %vm3400_vm5, %v6072_v52, %v6064_v17  ;;  %v5126_v16 = vcombine.high %v11119_v34, %v11119_v34  ;;  %v7153_v11 = vrot.slane %v11119_v34, 9  ;;  %v7221_v50 = vld [vmem:[%s12052_s5 + $0x310] sm:$0xff] }
 0x431   : > { %7510 = vmatpush3.msra.mxu1 %v7225_v36  ;;  %7474 = vmatprep.subr.mxu0 %v7209_v60  ;;  %v11414_v15 = vsel %vm3404_vm7, %v5944_v8, %v5949_v58  ;;  %v6094_v22 = vsel %vm3402_vm6, %v6080_v35, %v6093_v13  ;;  %v7146_v37 = vrot.slane %v5090_v49, 9  ;;  %v11418_v12 = vmax.f32 %v11032_v25, %v7130_v59  ;;  %v7236_v59 = vld [vmem:[%s12052_s5 + $0x388] sm:$0xff]  ;;  %v7189_v36 = vld [vmem:[%s12052_s5 + $0x210] sm:$0xff]  ;;  %v7314_v13 = vld [vmem:[%s12052_s5 + $0x5f8] sm:$0xff] }
 0x432   : > { %7511 = vmatprep.subr.mxu1 %v7240_v1  ;;  %7475 = vmatpush3.msra.mxu0 %v7193_v30  ;;  %v11427_v40 = vsel %vm3404_vm7, %v6088_v56, %v6094_v22  ;;  %v7154_v53 = vrot.slane %v5126_v16, 9  ;;  %v11430_v10 = vmax.f32 %v11062_v43, %v7138_v55  ;;  %v5916_v25 = vrot.slane %v11330_v32, %v12221_v14  ;;  %v7220_v35 = vld [vmem:[%s12052_s5 + $0x308] sm:$0xff]  ;;  %v7187_v22 = vld [vmem:[%s12052_s5 + $0x200] sm:$0xff] }
 0x433   : > { %7512 = vmatpush3.msra.mxu1 %v7224_v18  ;;  %7476 = vmatprep.subr.mxu0 %v7208_v39  ;;  %v11441_v23 = vmax.f32 %v5090_v49, %v7146_v37  ;;  %v6364_v43 = vrot.slane %v11418_v12, %v12222_v9  ;;  %v5924_v7 = vrot.slane %v11340_v63, %v12221_v14  ;;  %v7237_v63 = vld [vmem:[%s12052_s5 + $0x390] sm:$0xff]  ;;  %v7204_v55 = vld [vmem:[%s12052_s5 + $0x288] sm:$0xff]  ;;  %v7298_v37 = vld [vmem:[%s12052_s5 + $0x578] sm:$0xff] }
 0x434   : > { %7513 = vmatprep.subr.mxu1 %v7239_v3  ;;  %7477 = vmatpush3.msra.mxu0 %v7192_v61  ;;  %v11453_v32 = vmax.f32 %v5126_v16, %v7154_v53  ;;  %v6372_v57 = vrot.slane %v11430_v10, %v12222_v9  ;;  %v5932_v6 = vrot.slane %v11343_v28, %v12221_v14  ;;  %v7188_v56 = vld [vmem:[%s12052_s5 + $0x208] sm:$0xff] }
 0x435   : > { %7514 = vmatpush3.msra.mxu1 %v7223_v47  ;;  %7478 = vmatprep.subr.mxu0 %v7207_v2  ;;  %v6380_v41 = vrot.slane %v11441_v23, %v12222_v9  ;;  %v5940_v51 = vrot.slane %v11355_v24, %v12221_v14  ;;  %v5945_v28 = vsel %vm3400_vm5, %v5924_v7, %v5916_v25  ;;  %v7282_v25 = vld [vmem:[%s12052_s5 + $0x4f8] sm:$0xff] }
 0x436   : > { %7515 = vmatprep.subr.mxu1 %v7238_v27  ;;  %7479 = vmatpush3.msra.mxu0 %v7191_v48  ;;  %v6388_v42 = vrot.slane %v11453_v32, %v12222_v9  ;;  %v6392_v17 = vsel %vm3400_vm5, %v6372_v57, %v6364_v43  ;;  %v5946_v24 = vsel %vm3402_vm6, %v5932_v6, %v5945_v28  ;;  %v7266_v43 = vld [vmem:[%s12052_s5 + $0x478] sm:$0xff]  ;;  %v7280_v57 = vld [vmem:[%s12052_s5 + $0x4e8] sm:$0xff]  ;;  %v7311_v6 = vld [vmem:[%s12052_s5 + $0x5e0] sm:$0xff] }
 0x437   : > { %7516 = vmatpush3.msra.mxu1 %v7222_v26  ;;  %7480 = vmatprep.subr.mxu0 %v7206_v5  ;;  %v6393_v60 = vsel %vm3402_vm6, %v6380_v41, %v6392_v17  ;;  %v11490_v8 = vsel %vm3404_vm7, %v5940_v51, %v5946_v24  ;;  %v5261_v52 = vmax.f32 %v11008_v38, %v7129_v33  ;;  %v7235_v38 = vld [vmem:[%s12052_s5 + $0x380] sm:$0xff]  ;;  %v7297_v5 = vld [vmem:[%s12052_s5 + $0x570] sm:$0xff]  ;;  %v7294_v51 = vld [vmem:[%s12052_s5 + $0x558] sm:$0xff] }
 0x438   : > { %7517 = vmatprep.subr.mxu1 %v7237_v63  ;;  %7481 = vmatpush3.msra.mxu0 %v7190_v29  ;;  %v11500_v1 = vsel %vm3404_vm7, %v6388_v42, %v6393_v60  ;;  %v5269_v30 = vmax.f32 %v11050_v20, %v7137_v54  ;;  %v5277_v46 = vmax.f32 %v11086_v21, %v7145_v62  ;;  %v7219_v20 = vld [vmem:[%s12052_s5 + $0x300] sm:$0xff]  ;;  %v7313_v54 = vld [vmem:[%s12052_s5 + $0x5f0] sm:$0xff]  ;;  %v7264_v62 = vld [vmem:[%s12052_s5 + $0x468] sm:$0xff] }
 0x439   : > { %7518 = vmatpush3.msra.mxu1 %v7221_v50  ;;  %7482 = vmatprep.subr.mxu0 %v7205_v19  ;;  %v5285_v49 = vmax.f32 %v11119_v34, %v7153_v11  ;;  %v6216_v33 = vrot.slane %v5261_v52, %v12222_v9  ;;  %v6360_v18 = vrot.slane %v11418_v12, %v12221_v14  ;;  %v7203_v21 = vld [vmem:[%s12052_s5 + $0x280] sm:$0xff]  ;;  %v7310_v29 = vld [vmem:[%s12052_s5 + $0x5d8] sm:$0xff]  ;;  %v7309_v11 = vld [vmem:[%s12052_s5 + $0x5d0] sm:$0xff] }
 0x43a   : > { %7519 = vmatprep.subr.mxu1 %v7236_v59  ;;  %7483 = vmatpush3.msra.mxu0 %v7189_v36  ;;  %v6224_v39 = vrot.slane %v5269_v30, %v12222_v9  ;;  %v6232_v58 = vrot.slane %v5277_v46, %v12222_v9  ;;  %v6368_v34 = vrot.slane %v11430_v10, %v12221_v14  ;;  %v7279_v63 = vld [vmem:[%s12052_s5 + $0x4e0] sm:$0xff]  ;;  %v7278_v28 = vld [vmem:[%s12052_s5 + $0x4d8] sm:$0xff]  ;;  %v7293_v19 = vld [vmem:[%s12052_s5 + $0x550] sm:$0xff] }
 0x43b   : > { %7520 = vmatpush3.msra.mxu1 %v7220_v35  ;;  %7484 = vmatprep.subr.mxu0 %v7204_v55  ;;  %v6240_v16 = vrot.slane %v5285_v49, %v12222_v9  ;;  %v6376_v3 = vrot.slane %v11441_v23, %v12221_v14  ;;  %v6384_v61 = vrot.slane %v11453_v32, %v12221_v14  ;;  %v7296_v32 = vld [vmem:[%s12052_s5 + $0x568] sm:$0xff]  ;;  %v7263_v41 = vld [vmem:[%s12052_s5 + $0x460] sm:$0xff]  ;;  %v7262_v50 = vld [vmem:[%s12052_s5 + $0x458] sm:$0xff] }
 0x43c   : > { %7521 = vmatprep.subr.mxu1 %v7235_v38  ;;  %7485 = vmatpush3.msra.mxu0 %v7188_v56  ;;  %v6244_v12 = vsel %vm3400_vm5, %v6224_v39, %v6216_v33  ;;  %v6389_v9 = vsel %vm3400_vm5, %v6368_v34, %v6360_v18  ;;  %v6212_v47 = vrot.slane %v5261_v52, %v12221_v14  ;;  %v7277_v42 = vld [vmem:[%s12052_s5 + $0x4d0] sm:$0xff]  ;;  %v7308_v17 = vld [vmem:[%s12052_s5 + $0x5c8] sm:$0xff]  ;;  %v7307_v60 = vld [vmem:[%s12052_s5 + $0x5c0] sm:$0xff] }
 0x43d   : > { %7522 = vmatpush3.msra.mxu1 %v7219_v20  ;;  %7486 = vmatprep.subr.mxu0 %v7203_v21  ;;  %v6245_v2 = vsel %vm3402_vm6, %v6232_v58, %v6244_v12  ;;  %v6390_v53 = vsel %vm3402_vm6, %v6376_v3, %v6389_v9  ;;  %v6220_v10 = vrot.slane %v5269_v30, %v12221_v14  ;;  %v7261_v24 = vld [vmem:[%s12052_s5 + $0x450] sm:$0xff]  ;;  %v7292_v59 = vld [vmem:[%s12052_s5 + $0x548] sm:$0xff]  ;;  %v7291_v35 = vld [vmem:[%s12052_s5 + $0x540] sm:$0xff] }
 0x43e   : > { %5870 = vmatmul.mubr.f32.vlgmr.msra.gmra.mxu1 %v11301_v0  ;;  %7561 = vmatprep.subr.mxu1 %v7314_v13  ;;  %v11552_v27 = vsel %vm3404_vm7, %v6240_v16, %v6245_v2  ;;  %v11555_v48 = vsel %vm3404_vm7, %v6384_v61, %v6390_v53  ;;  %v6228_v23 = vrot.slane %v5277_v46, %v12221_v14  ;;  %v7276_v36 = vld [vmem:[%s12052_s5 + $0x4c8] sm:$0xff]  ;;  %v7275_v55 = vld [vmem:[%s12052_s5 + $0x4c0] sm:$0xff]  ;;  %v7306_v30 = vld [vmem:[%s12052_s5 + $0x5b8] sm:$0xff] }
 0x43f   : > { %7487 = vmatpush3.msra.mxu0 %v7187_v22  ;;  %7562 = vmatpush3.msra.mxu1 %v7298_v37  ;;  %v5651_v0 = vsel %vm3404_vm7, %v5644_v31, %v11327_v44  ;;  %v6236_v7 = vrot.slane %v5285_v49, %v12221_v14  ;;  %v6241_v26 = vsel %vm3400_vm5, %v6220_v10, %v6212_v47  ;;  %v7312_v14 = vld [vmem:[%s12052_s5 + $0x5e8] sm:$0xff]  ;;  %v7265_v44 = vld [vmem:[%s12052_s5 + $0x470] sm:$0xff]  ;;  %v7259_v46 = vld [vmem:[%s12052_s5 + $0x440] sm:$0xff] }
 0x440   : > { %6165 = vmatprep.mubr.f32.mxu1 %v11352_v4  ;;  %5722 = vmatmul.mubr.f32.vlgmr.msra.gmra.mxu0 %v5651_v0  ;;  %v6242_v31 = vsel %vm3402_vm6, %v6228_v23, %v6241_v26  ;;  %v7260_v52 = vld [vmem:[%s12052_s5 + $0x448] sm:$0xff]  ;;  %v7290_v38 = vld [vmem:[%s12052_s5 + $0x538] sm:$0xff]  ;;  %v7305_v49 = vld [vmem:[%s12052_s5 + $0x5b0] sm:$0xff] }
 0x441   : > { %7526 = vmatprep.subr.mxu0 %v7282_v25  ;;  %7563 = vmatprep.subr.mxu1 %v7313_v54  ;;  %v11583_v4 = vsel %vm3404_vm7, %v6236_v7, %v6242_v31  ;;  %v7274_v56 = vld [vmem:[%s12052_s5 + $0x4b8] sm:$0xff]  ;;  %v7289_v18 = vld [vmem:[%s12052_s5 + $0x530] sm:$0xff]  ;;  %v7304_v21 = vld [vmem:[%s12052_s5 + $0x5a8] sm:$0xff] }
 0x442   : > { %7527 = vmatpush3.msra.mxu0 %v7266_v43  ;;  %6017 = vmatprep.mubr.f32.mxu0 %v11414_v15  ;;  %v7295_v15 = vld [vmem:[%s12052_s5 + $0x560] sm:$0xff]  ;;  %v7258_v33 = vld [vmem:[%s12052_s5 + $0x438] sm:$0xff]  ;;  %v7273_v20 = vld [vmem:[%s12052_s5 + $0x4b0] sm:$0xff] }
 0x443   : > { %7564 = vmatpush3.msra.mxu1 %v7297_v5  ;;  %7528 = vmatprep.subr.mxu0 %v7281_v45  ;;  %v7257_v39 = vld [vmem:[%s12052_s5 + $0x430] sm:$0xff]  ;;  %v7288_v58 = vld [vmem:[%s12052_s5 + $0x528] sm:$0xff]  ;;  %v7303_v13 = vld [vmem:[%s12052_s5 + $0x5a0] sm:$0xff] }
 0x444   : > { %7565 = vmatprep.subr.mxu1 %v7312_v14  ;;  %7529 = vmatpush3.msra.mxu0 %v7265_v44  ;;  %v7272_v34 = vld [vmem:[%s12052_s5 + $0x4a8] sm:$0xff]  ;;  %v7287_v3 = vld [vmem:[%s12052_s5 + $0x520] sm:$0xff]  ;;  %v7302_v22 = vld [vmem:[%s12052_s5 + $0x598] sm:$0xff] }
 0x445   : > { %7566 = vmatpush3.msra.mxu1 %v7296_v32  ;;  %7530 = vmatprep.subr.mxu0 %v7280_v57  ;;  %v7256_v16 = vld [vmem:[%s12052_s5 + $0x428] sm:$0xff]  ;;  %v7271_v61 = vld [vmem:[%s12052_s5 + $0x4a0] sm:$0xff]  ;;  %v7286_v12 = vld [vmem:[%s12052_s5 + $0x518] sm:$0xff] }
 0x446   : > { %7567 = vmatprep.subr.mxu1 %v7311_v6  ;;  %7531 = vmatpush3.msra.mxu0 %v7264_v62  ;;  %v7255_v37 = vld [vmem:[%s12052_s5 + $0x420] sm:$0xff]  ;;  %v7270_v9 = vld [vmem:[%s12052_s5 + $0x498] sm:$0xff]  ;;  %v7301_v47 = vld [vmem:[%s12052_s5 + $0x590] sm:$0xff] }
 0x447   : > { %7568 = vmatpush3.msra.mxu1 %v7295_v15  ;;  %7532 = vmatprep.subr.mxu0 %v7279_v63  ;;  %v7254_v2 = vld [vmem:[%s12052_s5 + $0x418] sm:$0xff]  ;;  %v7285_v53 = vld [vmem:[%s12052_s5 + $0x510] sm:$0xff]  ;;  %v7300_v25 = vld [vmem:[%s12052_s5 + $0x588] sm:$0xff] }
 0x448   : > { %7569 = vmatprep.subr.mxu1 %v7310_v29  ;;  %7533 = vmatpush3.msra.mxu0 %v7263_v41  ;;  %v7269_v10 = vld [vmem:[%s12052_s5 + $0x490] sm:$0xff]  ;;  %v7284_v23 = vld [vmem:[%s12052_s5 + $0x508] sm:$0xff]  ;;  %v7299_v43 = vld [vmem:[%s12052_s5 + $0x580] sm:$0xff] }
 0x449   : > { %7570 = vmatpush3.msra.mxu1 %v7294_v51  ;;  %7534 = vmatprep.subr.mxu0 %v7278_v28  ;;  %v7253_v54 = vld [vmem:[%s12052_s5 + $0x410] sm:$0xff]  ;;  %v7268_v0 = vld [vmem:[%s12052_s5 + $0x488] sm:$0xff]  ;;  %v7283_v26 = vld [vmem:[%s12052_s5 + $0x500] sm:$0xff] }
 0x44a   : > { %7571 = vmatprep.subr.mxu1 %v7309_v11  ;;  %7535 = vmatpush3.msra.mxu0 %v7262_v50  ;;  %v7252_v7 = vld [vmem:[%s12052_s5 + $0x408] sm:$0xff]  ;;  %v7267_v5 = vld [vmem:[%s12052_s5 + $0x480] sm:$0xff]  ;;  %v7378_v45 = vld [vmem:[%s12052_s5 + $0x7f8] sm:$0xff] }
 0x44b   : > { %7572 = vmatpush3.msra.mxu1 %v7293_v19  ;;  %7536 = vmatprep.subr.mxu0 %v7277_v42  ;;  %v7251_v31 = vld [vmem:[%s12052_s5 + $0x400] sm:$0xff]  ;;  %v7362_v14 = vld [vmem:[%s12052_s5 + $0x778] sm:$0xff]  ;;  %v7377_v32 = vld [vmem:[%s12052_s5 + $0x7f0] sm:$0xff] }
 0x44c   : > { %7573 = vmatprep.subr.mxu1 %v7308_v17  ;;  %7537 = vmatpush3.msra.mxu0 %v7261_v24  ;;  %v7346_v44 = vld [vmem:[%s12052_s5 + $0x6f8] sm:$0xff]  ;;  %v7345_v6 = vld [vmem:[%s12052_s5 + $0x6f0] sm:$0xff]  ;;  %v7376_v62 = vld [vmem:[%s12052_s5 + $0x7e8] sm:$0xff] }
 0x44d   : > { %7574 = vmatpush3.msra.mxu1 %v7292_v59  ;;  %7538 = vmatprep.subr.mxu0 %v7276_v36  ;;  %v7330_v57 = vld [vmem:[%s12052_s5 + $0x678] sm:$0xff]  ;;  %v7344_v15 = vld [vmem:[%s12052_s5 + $0x6e8] sm:$0xff]  ;;  %v7375_v63 = vld [vmem:[%s12052_s5 + $0x7e0] sm:$0xff] }
 0x44e   : > { %7575 = vmatprep.subr.mxu1 %v7307_v60  ;;  %7539 = vmatpush3.msra.mxu0 %v7260_v52  ;;  %v7328_v29 = vld [vmem:[%s12052_s5 + $0x668] sm:$0xff]  ;;  %v7343_v41 = vld [vmem:[%s12052_s5 + $0x6e0] sm:$0xff]  ;;  %v7374_v51 = vld [vmem:[%s12052_s5 + $0x7d8] sm:$0xff] }
 0x44f   : > { %7576 = vmatpush3.msra.mxu1 %v7291_v35  ;;  %7540 = vmatprep.subr.mxu0 %v7275_v55  ;;  %v7327_v28 = vld [vmem:[%s12052_s5 + $0x660] sm:$0xff]  ;;  %v7358_v11 = vld [vmem:[%s12052_s5 + $0x758] sm:$0xff]  ;;  %v7373_v19 = vld [vmem:[%s12052_s5 + $0x7d0] sm:$0xff] }
 0x450   : > { %7577 = vmatprep.subr.mxu1 %v7306_v30  ;;  %7541 = vmatpush3.msra.mxu0 %v7259_v46  ;;  %v7342_v50 = vld [vmem:[%s12052_s5 + $0x6d8] sm:$0xff]  ;;  %v7357_v17 = vld [vmem:[%s12052_s5 + $0x750] sm:$0xff]  ;;  %v7372_v59 = vld [vmem:[%s12052_s5 + $0x7c8] sm:$0xff] }
 0x451   : > { %7578 = vmatpush3.msra.mxu1 %v7290_v38  ;;  %7542 = vmatprep.subr.mxu0 %v7274_v56  ;;  %v7326_v42 = vld [vmem:[%s12052_s5 + $0x658] sm:$0xff]  ;;  %v7341_v24 = vld [vmem:[%s12052_s5 + $0x6d0] sm:$0xff]  ;;  %v7356_v60 = vld [vmem:[%s12052_s5 + $0x748] sm:$0xff] }
 0x452   : > { %7579 = vmatprep.subr.mxu1 %v7305_v49  ;;  %7543 = vmatpush3.msra.mxu0 %v7258_v33  ;;  %v7325_v36 = vld [vmem:[%s12052_s5 + $0x650] sm:$0xff]  ;;  %v7340_v52 = vld [vmem:[%s12052_s5 + $0x6c8] sm:$0xff]  ;;  %v7371_v35 = vld [vmem:[%s12052_s5 + $0x7c0] sm:$0xff] }
 0x453   : > { %7580 = vmatpush3.msra.mxu1 %v7289_v18  ;;  %7544 = vmatprep.subr.mxu0 %v7273_v20  ;;  %v7324_v55 = vld [vmem:[%s12052_s5 + $0x648] sm:$0xff]  ;;  %v7355_v30 = vld [vmem:[%s12052_s5 + $0x740] sm:$0xff]  ;;  %v7370_v38 = vld [vmem:[%s12052_s5 + $0x7b8] sm:$0xff] }
 0x454   : > { %7581 = vmatprep.subr.mxu1 %v7304_v21  ;;  %7545 = vmatpush3.msra.mxu0 %v7257_v39  ;;  %v7339_v46 = vld [vmem:[%s12052_s5 + $0x6c0] sm:$0xff]  ;;  %v7354_v49 = vld [vmem:[%s12052_s5 + $0x738] sm:$0xff]  ;;  %v7369_v18 = vld [vmem:[%s12052_s5 + $0x7b0] sm:$0xff] }
 0x455   : > { %7582 = vmatpush3.msra.mxu1 %v7288_v58  ;;  %7546 = vmatprep.subr.mxu0 %v7272_v34  ;;  %v7323_v56 = vld [vmem:[%s12052_s5 + $0x640] sm:$0xff]  ;;  %v7338_v33 = vld [vmem:[%s12052_s5 + $0x6b8] sm:$0xff]  ;;  %v7353_v21 = vld [vmem:[%s12052_s5 + $0x730] sm:$0xff] }
 0x456   : > { %7583 = vmatprep.subr.mxu1 %v7303_v13  ;;  %7547 = vmatpush3.msra.mxu0 %v7256_v16  ;;  %v7322_v20 = vld [vmem:[%s12052_s5 + $0x638] sm:$0xff]  ;;  %v7337_v39 = vld [vmem:[%s12052_s5 + $0x6b0] sm:$0xff]  ;;  %v7368_v58 = vld [vmem:[%s12052_s5 + $0x7a8] sm:$0xff] }
 0x457   : > { %7584 = vmatpush3.msra.mxu1 %v7287_v3  ;;  %7548 = vmatprep.subr.mxu0 %v7271_v61  ;;  %v7321_v34 = vld [vmem:[%s12052_s5 + $0x630] sm:$0xff]  ;;  %v7352_v13 = vld [vmem:[%s12052_s5 + $0x728] sm:$0xff]  ;;  %v7367_v3 = vld [vmem:[%s12052_s5 + $0x7a0] sm:$0xff] }
 0x458   : > { %7585 = vmatprep.subr.mxu1 %v7302_v22  ;;  %7549 = vmatpush3.msra.mxu0 %v7255_v37  ;;  %v7336_v16 = vld [vmem:[%s12052_s5 + $0x6a8] sm:$0xff]  ;;  %v7351_v22 = vld [vmem:[%s12052_s5 + $0x720] sm:$0xff] }
 0x459   : > { %7586 = vmatpush3.msra.mxu1 %v7286_v12  ;;  %7550 = vmatprep.subr.mxu0 %v7270_v9  ;;  %v7320_v61 = vld [vmem:[%s12052_s5 + $0x628] sm:$0xff]  ;;  %v7335_v37 = vld [vmem:[%s12052_s5 + $0x6a0] sm:$0xff]  ;;  %v7366_v12 = vld [vmem:[%s12052_s5 + $0x798] sm:$0xff] }
 0x45a   : > { %7587 = vmatprep.subr.mxu1 %v7301_v47  ;;  %7551 = vmatpush3.msra.mxu0 %v7254_v2  ;;  %v7319_v9 = vld [vmem:[%s12052_s5 + $0x620] sm:$0xff]  ;;  %v7350_v47 = vld [vmem:[%s12052_s5 + $0x718] sm:$0xff] }
 0x45b   : > { %7588 = vmatpush3.msra.mxu1 %v7285_v53  ;;  %7552 = vmatprep.subr.mxu0 %v7269_v10  ;;  %v7334_v2 = vld [vmem:[%s12052_s5 + $0x698] sm:$0xff]  ;;  %v7365_v53 = vld [vmem:[%s12052_s5 + $0x790] sm:$0xff] }
 0x45c   : > { %7589 = vmatprep.subr.mxu1 %v7300_v25  ;;  %7553 = vmatpush3.msra.mxu0 %v7253_v54  ;;  %v7318_v10 = vld [vmem:[%s12052_s5 + $0x618] sm:$0xff]  ;;  %v7349_v25 = vld [vmem:[%s12052_s5 + $0x710] sm:$0xff] }
 0x45d   : > { %7590 = vmatpush3.msra.mxu1 %v7284_v23  ;;  %7554 = vmatprep.subr.mxu0 %v7268_v0  ;;  %v7333_v54 = vld [vmem:[%s12052_s5 + $0x690] sm:$0xff]  ;;  %v7364_v23 = vld [vmem:[%s12052_s5 + $0x788] sm:$0xff] }
 0x45e   : > { %7591 = vmatprep.subr.mxu1 %v7299_v43  ;;  %7555 = vmatpush3.msra.mxu0 %v7252_v7  ;;  %v7317_v0 = vld [vmem:[%s12052_s5 + $0x610] sm:$0xff]  ;;  %v7348_v43 = vld [vmem:[%s12052_s5 + $0x708] sm:$0xff] }
 0x45f   : > { %7592 = vmatpush3.msra.mxu1 %v7283_v26  ;;  %7556 = vmatprep.subr.mxu0 %v7267_v5  ;;  %v7332_v7 = vld [vmem:[%s12052_s5 + $0x688] sm:$0xff]  ;;  %v7363_v26 = vld [vmem:[%s12052_s5 + $0x780] sm:$0xff] }
 0x460   : > { %6166 = vmatmul.mubr.f32.vlgmr.msra.gmra.mxu1 %v11427_v40  ;;  %7631 = vmatprep.subr.mxu1 %v7378_v45  ;;  %v7361_v40 = vld [vmem:[%s12052_s5 + $0x770] sm:$0xff]  ;;  %v7316_v5 = vld [vmem:[%s12052_s5 + $0x608] sm:$0xff]  ;;  %v7347_v45 = vld [vmem:[%s12052_s5 + $0x700] sm:$0xff] }
 0x461   : > { %7557 = vmatpush3.msra.mxu0 %v7251_v31  ;;  %7632 = vmatpush3.msra.mxu1 %v7362_v14  ;;  %v7331_v31 = vld [vmem:[%s12052_s5 + $0x680] sm:$0xff] }
 0x462   : > { %6461 = vmatprep.mubr.f32.mxu1 %v11500_v1  ;;  %6018 = vmatmul.mubr.f32.vlgmr.msra.gmra.mxu0 %v11490_v8  ;;  %v7329_v1 = vld [vmem:[%s12052_s5 + $0x670] sm:$0xff]  ;;  %v7360_v8 = vld [vmem:[%s12052_s5 + $0x768] sm:$0xff]  ;;  %v7315_v14 = vld [vmem:[%s12052_s5 + $0x600] sm:$0xff] }
 0x463   : > { %7596 = vmatprep.subr.mxu0 %v7346_v44  ;;  %7633 = vmatprep.subr.mxu1 %v7377_v32  ;;  %v12223_v44 = vmov 0.0   ;;  %v6488_v32 = vld [vmem:[%s12054_s7 + $0x58] sm:$0xff] }
 0x464   : > { %7597 = vmatpush3.msra.mxu0 %v7330_v57  ;;  %6313 = vmatprep.mubr.f32.mxu0 %v11552_v27  ;;  %v7359_v27 = vld [vmem:[%s12052_s5 + $0x760] sm:$0xff]  ;;  %v6487_v57 = vld [vmem:[%s12054_s7 + $0x50] sm:$0xff] }
 0x465   : > { %7634 = vmatpush3.msra.mxu1 %v7361_v40  ;;  %7598 = vmatprep.subr.mxu0 %v7345_v6  ;;  %v6484_v40 = vld [vmem:[%s12054_s7 + $0x38] sm:$0xff]  ;;  %v6483_v6 = vld [vmem:[%s12054_s7 + $0x30] sm:$0xff] }
 0x466   : > { %7635 = vmatprep.subr.mxu1 %v7376_v62  ;;  %7599 = vmatpush3.msra.mxu0 %v7329_v1  ;;  %v6482_v62 = vld [vmem:[%s12054_s7 + $0x28] sm:$0xff]  ;;  %v6481_v1 = vld [vmem:[%s12054_s7 + $0x20] sm:$0xff] }
 0x467   : > { %7636 = vmatpush3.msra.mxu1 %v7360_v8  ;;  %7600 = vmatprep.subr.mxu0 %v7344_v15  ;;  %v6480_v8 = vld [vmem:[%s12054_s7 + $0x18] sm:$0xff]  ;;  %v6479_v15 = vld [vmem:[%s12054_s7 + $0x10] sm:$0xff] }
 0x468   : > { %7637 = vmatprep.subr.mxu1 %v7375_v63  ;;  %7601 = vmatpush3.msra.mxu0 %v7328_v29  ;;  %v6478_v63 = vld [vmem:[%s12054_s7 + $0x8] sm:$0xff]  ;;  %v6477_v29 = vld [vmem:[%s12054_s7] sm:$0xff] }
 0x469   : > { %7638 = vmatpush3.msra.mxu1 %v7359_v27  ;;  %7602 = vmatprep.subr.mxu0 %v7343_v41 }
 0x46a   : > { %7639 = vmatprep.subr.mxu1 %v7374_v51  ;;  %7603 = vmatpush3.msra.mxu0 %v7327_v28 }
 0x46b   : > { %7640 = vmatpush3.msra.mxu1 %v7358_v11  ;;  %7604 = vmatprep.subr.mxu0 %v7342_v50 }
 0x46c   : > { %7641 = vmatprep.subr.mxu1 %v7373_v19  ;;  %7605 = vmatpush3.msra.mxu0 %v7326_v42 }
 0x46d   : > { %7642 = vmatpush3.msra.mxu1 %v7357_v17  ;;  %7606 = vmatprep.subr.mxu0 %v7341_v24 }
 0x46e   : > { %7643 = vmatprep.subr.mxu1 %v7372_v59  ;;  %7607 = vmatpush3.msra.mxu0 %v7325_v36 }
 0x46f   : > { %7644 = vmatpush3.msra.mxu1 %v7356_v60  ;;  %7608 = vmatprep.subr.mxu0 %v7340_v52 }
 0x470   : > { %7645 = vmatprep.subr.mxu1 %v7371_v35  ;;  %7609 = vmatpush3.msra.mxu0 %v7324_v55 }
 0x471   : > { %7646 = vmatpush3.msra.mxu1 %v7355_v30  ;;  %7610 = vmatprep.subr.mxu0 %v7339_v46 }
 0x472   : > { %7647 = vmatprep.subr.mxu1 %v7370_v38  ;;  %7611 = vmatpush3.msra.mxu0 %v7323_v56 }
 0x473   : > { %7648 = vmatpush3.msra.mxu1 %v7354_v49  ;;  %7612 = vmatprep.subr.mxu0 %v7338_v33 }
 0x474   : > { %7649 = vmatprep.subr.mxu1 %v7369_v18  ;;  %7613 = vmatpush3.msra.mxu0 %v7322_v20 }
 0x475   : > { %7650 = vmatpush3.msra.mxu1 %v7353_v21  ;;  %7614 = vmatprep.subr.mxu0 %v7337_v39 }
 0x476   : > { %7651 = vmatprep.subr.mxu1 %v7368_v58  ;;  %7615 = vmatpush3.msra.mxu0 %v7321_v34 }
 0x477   : > { %7652 = vmatpush3.msra.mxu1 %v7352_v13  ;;  %7616 = vmatprep.subr.mxu0 %v7336_v16 }
 0x478   : > { %7653 = vmatprep.subr.mxu1 %v7367_v3  ;;  %7617 = vmatpush3.msra.mxu0 %v7320_v61  ;;  %v7379_v3 = vld [vmem:[%s12053_s6] ss:$0 sm:$0xff] }
 0x479   : > { %7654 = vmatpush3.msra.mxu1 %v7351_v22  ;;  %7618 = vmatprep.subr.mxu0 %v7335_v37 }
 0x47a   : > { %7655 = vmatprep.subr.mxu1 %v7366_v12  ;;  %7619 = vmatpush3.msra.mxu0 %v7319_v9  ;;  %v7380_v12 = vld [vmem:[%s12055_s8] ss:$0 sm:$0xff] }
 0x47b   : > { %7656 = vmatpush3.msra.mxu1 %v7350_v47  ;;  %7620 = vmatprep.subr.mxu0 %v7334_v2 }
 0x47c   : > { %7657 = vmatprep.subr.mxu1 %v7365_v53  ;;  %7621 = vmatpush3.msra.mxu0 %v7318_v10 }
 0x47d   : > { %7658 = vmatpush3.msra.mxu1 %v7349_v25  ;;  %7622 = vmatprep.subr.mxu0 %v7333_v54 }
 0x47e   : > { %7659 = vmatprep.subr.mxu1 %v7364_v23  ;;  %7623 = vmatpush3.msra.mxu0 %v7317_v0 }
 0x47f   : > { %7660 = vmatpush3.msra.mxu1 %v7348_v43  ;;  %7624 = vmatprep.subr.mxu0 %v7332_v7 }
 0x480   : > { %7661 = vmatprep.subr.mxu1 %v7363_v26  ;;  %7625 = vmatpush3.msra.mxu0 %v7316_v5 }
 0x481   : > { %7662 = vmatpush3.msra.mxu1 %v7347_v45  ;;  %7626 = vmatprep.subr.mxu0 %v7331_v31 }
 0x482   : > { %6462 = vmatmul.mubr.f32.vlgmr.msra.gmra.mxu1 %v11555_v48  ;;  %7627 = vmatpush3.msra.mxu0 %v7315_v14  ;;  %v6486_v48 = vld [vmem:[%s12054_s7 + $0x48] sm:$0xff] }
 0x483   : > { %6314 = vmatmul.mubr.f32.vlgmr.msra.gmra.mxu0 %v11583_v4  ;;  %7679 = vmatprep.subr.mxu0 %v12223_v44  ;;  %v6485_v4 = vld [vmem:[%s12054_s7 + $0x40] sm:$0xff] }
 0x484   : > { %7680 = vmatpush3.msra.mxu0 %v6488_v32  ;;  %7703 = vmatprep.mubr.msk.f32.mxu0 %vm7913_vm14, %v12223_v44 }
 0x485   : > { %7681 = vmatprep.subr.mxu0 %v12223_v44 }
 0x486   : > { %7682 = vmatpush3.msra.mxu0 %v6487_v57 }
 0x487   : > { %7683 = vmatprep.subr.mxu0 %v12223_v44 }
 0x488   : > { %7684 = vmatpush3.msra.mxu0 %v6486_v48 }
 0x489   : > { %7685 = vmatprep.subr.mxu0 %v12223_v44 }
 0x48a   : > { %7686 = vmatpush3.msra.mxu0 %v6485_v4 }
 0x48b   : > { %7687 = vmatprep.subr.mxu0 %v12223_v44 }
 0x48c   : > { %7688 = vmatpush3.msra.mxu0 %v6484_v40 }
 0x48d   : > { %7689 = vmatprep.subr.mxu0 %v12223_v44 }
 0x48e   : > { %7690 = vmatpush3.msra.mxu0 %v6483_v6 }
 0x48f   : > { %7691 = vmatprep.subr.mxu0 %v12223_v44 }
 0x490   : > { %7692 = vmatpush3.msra.mxu0 %v6482_v62 }
 0x491   : > { %7693 = vmatprep.subr.mxu0 %v12223_v44 }
 0x492   : > { %7694 = vmatpush3.msra.mxu0 %v6481_v1 }
 0x493   : > { %7695 = vmatprep.subr.mxu0 %v12223_v44 }
 0x494   : > { %7696 = vmatpush3.msra.mxu0 %v6480_v8 }
 0x495   : > { %7697 = vmatprep.subr.mxu0 %v12223_v44 }
 0x496   : > { %7698 = vmatpush3.msra.mxu0 %v6479_v15 }
 0x497   : > { %7699 = vmatprep.subr.mxu0 %v12223_v44 }
 0x498   : > { %7700 = vmatpush3.msra.mxu0 %v6478_v63 }
 0x499   : > { %7701 = vmatprep.subr.mxu0 %v12223_v44 }
 0x49a   : > { %7702 = vmatpush3.msra.mxu0 %v6477_v29 }
 0x4da   : > { %v7453_v51 = vpop.f32.mrf.mxu1 }
 0x4dc   : > { %v7454_v11 = vpop.f32.mrf.mxu1 }
 0x4dd   : > { %v7455_v24 = vadd.f32 %v7454_v11, %v7453_v51 }
 0x4df   : > { %v7418_v27 = vpop.f32.mrf.mxu0 }
 0x4e1   : > { %v7419_v41 = vpop.f32.mrf.mxu0 }
 0x4e2   : > { %v7420_v19 = vadd.f32 %v7419_v41, %v7418_v27 }
 0x4e4   : > { %v5577_v36 = vadd.f32 %v7455_v24, %v7420_v19 }
 0x4fe   : > { %v7523_v42 = vpop.f32.mrf.mxu1 }
 0x500   : > { %v7488_v28 = vpop.f32.mrf.mxu0  ;;  %v7524_v60 = vpop.f32.mrf.mxu1 }
 0x501   : > { %v7525_v30 = vadd.f32 %v7524_v60, %v7523_v42 }
 0x502   : > { %v7489_v50 = vpop.f32.mrf.mxu0 }
 0x503   : > { %v7490_v59 = vadd.f32 %v7489_v50, %v7488_v28 }
 0x505   : > { %v5727_v35 = vadd.f32 %v7490_v59, %v5577_v36 }
 0x507   : > { %v5875_v56 = vadd.f32 %v7525_v30, %v5727_v35 }
 0x520   : > { %v7593_v55 = vpop.f32.mrf.mxu1 }
 0x522   : > { %v7558_v17 = vpop.f32.mrf.mxu0  ;;  %v7594_v38 = vpop.f32.mrf.mxu1 }
 0x523   : > { %v7595_v20 = vadd.f32 %v7594_v38, %v7593_v55 }
 0x524   : > { %v7559_v52 = vpop.f32.mrf.mxu0 }
 0x525   : > { %v7560_v46 = vadd.f32 %v7559_v52, %v7558_v17 }
 0x527   : > { %v6023_v49 = vadd.f32 %v7560_v46, %v5875_v56 }
 0x529   : > { %v6171_v58 = vadd.f32 %v7595_v20, %v6023_v49 }
 0x542   : > { %v7663_v33 = vpop.f32.mrf.mxu1 }
 0x543   : > { %v7628_v18 = vpop.f32.mrf.mxu0 }
 0x544   : > { %v7664_v21 = vpop.f32.mrf.mxu1 }
 0x545   : > { %v7629_v39 = vpop.f32.mrf.mxu0  ;;  %v7665_v13 = vadd.f32 %v7664_v21, %v7663_v33 }
 0x546   : > { %v7630_v34 = vadd.f32 %v7629_v39, %v7628_v18 }
 0x548   : > { %v6319_v16 = vadd.f32 %v7630_v34, %v6171_v58 }
 0x54a   : > { %v6467_v61 = vadd.f32 %v7665_v13, %v6319_v16 }
 0x54c   : > { %v6475_v22 = vadd.f32 %v7379_v3, %v6467_v61 }
 0x54e   : > { %v6476_v37 = vmax.f32 %v6475_v22, 0.0 }
 0x550   : > { %7704 = vmatmul.mubr.msk.f32.vlgmr.msra.gmra.mxu0 %vm589_vm3, %v6476_v37 }
 0x610   : > { %v6565_v9 = vpop.f32.mrf.mxu0 }
 0x611   : > { %v6566_v47 = vadd.f32 %v7380_v12, %v6565_v9 }
 0x612   : > { %v7705_v2 = vpop.f32.mrf.mxu0 }
 0x613   : > { %6570 = vst.msk [vmem:[%s366_s15] sm:$0xf] %vm6569_vm15, %v6566_v47 }
 0x614   : > { %7846 = shalt.err (!%p7843_p0)
}
 0x615   : > { %s7847_s1 = scalar_lea.hbm %s12010_s23, 64  ;;  %s7851_s24 = scalar_lea.hbm %s12056_s9, 128 }
 0x616   : > { %p7848_p5 = scmp.ne.s32.totalorder %s12010_s23, %s7847_s1  ;;  %p7852_p4 = scmp.lt.s32.totalorder %s12010_s23, %s12056_s9 }
 0x617   : > { %p7853_p6 = scmp.lt.s32.totalorder %s7851_s24, %s7847_s1 }
 0x618   : > { %p7849_p9 = pnand %p7848_p5, %p12224_p11 }
 0x619   : > { %p7854_p8 = por %p7853_p6, %p7852_p4 }
 0x61a   : > { %p7850_p1 = pneg %p7849_p9 }
 0x61c   : > { %p7855_p3 = pnand %p7854_p8, %p7850_p1 }
 0x61e   : > { %7858 = shalt.err (!%p7855_p3)
}
 0x61f   : > { %7715 = dma.vmem_to_hbm [thread:$0]  (%p12224_p11), %s6586_s17, 64, %s12010_s23, %s6572_s25  }
 0x620 PF: > { %s12225_s15 = sld [smem:[#allocation13_spill]]  ;;  %s6597_s27 = sand.u32 1, %s7889_s30  }
 0x621   : > { %p12227_p12 = scmp.ge.s32.totalorder %s7901_s12, 2  ;;  %s6598_s19 = scalar_lea.sflag [#allocation6], %s6597_s27 }
 0x626   : > { %p12226_p7 = scmp.ne.s32.totalorder %s12225_s15, 0 }
 0x628   : > { %p7726_p10 = pnand %p12227_p12, %p12226_p7 }
 0x62a   : > { %p7727_p2 = pneg %p7726_p10 }
 0x62c   : > { %7884 = dma.done.wait (%p7727_p2), %s6598_s19, 64  }
 0x62d   : > { %7886 = vsyncadd (%p7727_p2), %s6598_s19, 4294967232  ;;  %s12228_s12 = sld [smem:[#allocation14_spill]]  ;;  %s12229_s30 = smov %s7893_s10 }
 0x62e   : > { %s12230_s10 = smov %s7897_s11  ;;  %s12231_s11 = smov %s8036_s29 }
 0x633   : > { %p23_p13 = scmp.ge.s32.totalorder %s12228_s12, 4  }
 0x635   :  { %25 = sbr.rel (!%p23_p13) target bundleno = 8 (0x8), region = 126 }
 0x63a   :  { %6603 = vsyncpa [#allocation5], 1 }
 0x63b   :  { %6605 = vsyncpa [#allocation5 + $0x1], 1 }
 0x63c   :  { %6606 = vsyncpa [#allocation8], 1 }
 0x63d   :  { %6607 = vsyncpa [#allocation6], 1 }
 0x63e   :  { %6609 = vsyncpa [#allocation6 + $0x1], 1 }

</bundles_post_ra>
